<compile_context>
chip_gen: v5e
topology: v5e:2x2
jax: 0.10.0
libtpu: 0.0.40
codegen_flags: <defaults>
</compile_context>

<pallas_src>
import jax
import jax.numpy as jnp
from jax import lax
from jax.experimental import pallas as pl
from jax.experimental.pallas import tpu as pltpu


# ----------------------------------------------------------------------------
# Kernel 1: ConvTranspose2d(kernel=2, stride=2) as one matmul per image.
#   y[n, 2i+ky, 2j+kx, co] = sum_ci x[n,i,j,ci] * w[ci,co,ky,kx] + b[co]
# The kernel produces all 4 (ky,kx) offsets packed on the lane dim; the
# spatial interleave (pure layout, zero FLOPs) stays in XLA glue.
# ----------------------------------------------------------------------------
def _deconv2x2_kernel(x_ref, w_ref, b_ref, o_ref):
    # x_ref: (1, H, W, Cin)  w_ref: (Cin, 4*Cout)  b_ref: (1, 4*Cout)
    # o_ref: (1, H, W, 4*Cout) with last dim ordered (ky, kx, co)
    h, w, cin = x_ref.shape[1], x_ref.shape[2], x_ref.shape[3]
    c4 = o_ref.shape[3]
    xflat = x_ref[0].reshape(h * w, cin)
    y = jnp.dot(xflat, w_ref[...], preferred_element_type=jnp.float32)
    y = y + b_ref[0]
    o_ref[0] = y.reshape(h, w, c4).astype(o_ref.dtype)


def deconv2x2_stride2(x, w_up, b_up):
    """x: (N,H,W,Cin) NHWC;  w_up: (Cin,Cout,2,2) (PyTorch ConvTranspose2d layout)."""
    n, h, w, cin = x.shape
    cout = w_up.shape[1]
    # (Cin,Cout,2,2) -> (Cin,2,2,Cout) -> (Cin, 4*Cout); columns ordered (ky,kx,co)
    wmat = jnp.transpose(w_up, (0, 2, 3, 1)).reshape(cin, 4 * cout)
    btile = jnp.tile(b_up, 4)[None, :]  # (1, 4*Cout), same (ky,kx,co) order

    out = pl.pallas_call(
        _deconv2x2_kernel,
        out_shape=jax.ShapeDtypeStruct((n, h, w, 4 * cout), jnp.float32),
        grid=(n,),
        in_specs=[
            pl.BlockSpec((1, h, w, cin), lambda i: (i, 0, 0, 0)),
            pl.BlockSpec((cin, 4 * cout), lambda i: (0, 0)),
            pl.BlockSpec((1, 4 * cout), lambda i: (0, 0)),
        ],
        out_specs=pl.BlockSpec((1, h, w, 4 * cout), lambda i: (i, 0, 0, 0)),
        compiler_params=pltpu.CompilerParams(dimension_semantics=("parallel",)),
    )(x, wmat, btile)

    # scatter the (ky,kx) offsets into the 2x upsampled grid (pure layout glue)
    out = out.reshape(n, h, w, 2, 2, cout)
    out = jnp.transpose(out, (0, 1, 3, 2, 4, 5)).reshape(n, 2 * h, 2 * w, cout)
    return out


# ----------------------------------------------------------------------------
# Kernel 2: fully fused ConvBlock:
#   concat([skip, up], C) -> 3x { Conv3x3(pad=1) -> BN(scale/shift) -> ReLU }
# One pallas_call per image.  Intermediate activations stay in VMEM scratch
# (padded buffers).  Each conv = one im2col matmul of depth 9*Cin on the MXU.
# ----------------------------------------------------------------------------
def _fused_convblock_kernel(skip_ref, up_ref,
                            w0_ref, w1_ref, w2_ref,
                            s0_ref, s1_ref, s2_ref,
                            o_ref,
                            xpad_ref, ypad_ref):
    # skip_ref/up_ref: (1, H, W, C)
    # w0_ref: (9*2C, C)   w1_ref/w2_ref: (9*C, C)      rows ordered (ky, kx, ci)
    # s*_ref: (2, C)      row 0 = BN scale, row 1 = BN shift (conv bias folded)
    # o_ref : (1, H, W, C)
    # xpad_ref: VMEM (H+2, W+2, 2C) f32   padded concat input for layer 0
    # ypad_ref: VMEM (H+2, W+2, C)  f32   padded intermediate for layers 1 & 2
    h, w, c = o_ref.shape[1], o_ref.shape[2], o_ref.shape[3]

    def conv_bn_relu(src_ref, w_ref, s_ref):
        cin = src_ref.shape[2]
        # Build the im2col slab ONCE: 9 shifted windows concatenated on the
        # lane dim -> (H, W, 9*Cin) -> single (H*W, 9*Cin) reshape.
        cols = [src_ref[ky:ky + h, kx:kx + w, :]
                for ky in range(3) for kx in range(3)]
        patch = jnp.concatenate(cols, axis=-1).reshape(h * w, 9 * cin)
        # Single fat matmul (contraction depth 9*Cin) on the MXU.
        y = jnp.dot(patch, w_ref[...], preferred_element_type=jnp.float32)
        y = y * s_ref[0] + s_ref[1]     # BatchNorm (inference) + folded conv bias
        y = jnp.maximum(y, 0.0)         # ReLU
        return y.reshape(h, w, c)

    # --- concat + zero padding, entirely in VMEM (no jnp.pad HBM pass) ---
    xpad_ref[...] = jnp.zeros_like(xpad_ref)
    xpad_ref[1:h + 1, 1:w + 1, :] = jnp.concatenate(
        [skip_ref[0].astype(jnp.float32), up_ref[0].astype(jnp.float32)], axis=-1)

    # layer 0 (input channels = 2C)
    y0 = conv_bn_relu(xpad_ref, w0_ref, s0_ref)
    ypad_ref[...] = jnp.zeros_like(ypad_ref)
    ypad_ref[1:h + 1, 1:w + 1, :] = y0

    # layer 1 (borders of ypad stay zero)
    y1 = conv_bn_relu(ypad_ref, w1_ref, s1_ref)
    ypad_ref[1:h + 1, 1:w + 1, :] = y1

    # layer 2 -> HBM output (only HBM write of the whole ConvBlock)
    y2 = conv_bn_relu(ypad_ref, w2_ref, s2_ref)
    o_ref[0] = y2.astype(o_ref.dtype)


def _fold_bn(conv_b, gamma, beta, rmean, rvar, eps=1e-5):
    """Fold conv bias + inference BatchNorm into per-channel scale/shift."""
    scale = gamma / jnp.sqrt(rvar + eps)
    shift = beta + (conv_b - rmean) * scale
    return jnp.stack([scale, shift], axis=0)  # (2, C)


def fused_convblock(skip, up, params):
    """skip/up: (N, H, W, C) NHWC.  Runs the full 3-layer ConvBlock fused."""
    n, hs, ws, c = skip.shape
    assert up.shape == (n, hs, ws, c), (up.shape, skip.shape)
    c2 = 2 * c

    wmats, ss = [], []
    for i in range(3):
        cw, cb, g, beta, rm, rv = params[f"conv{i}"]
        cin = cw.shape[1]
        # (Cout,Cin,3,3) -> (ky,kx,Cin,Cout) -> (9*Cin, Cout); matches im2col order
        wmats.append(jnp.transpose(cw, (2, 3, 1, 0)).reshape(9 * cin, c))
        ss.append(_fold_bn(cb, g, beta, rm, rv))

    return pl.pallas_call(
        _fused_convblock_kernel,
        out_shape=jax.ShapeDtypeStruct((n, hs, ws, c), jnp.float32),
        grid=(n,),
        in_specs=[
            pl.BlockSpec((1, hs, ws, c), lambda i: (i, 0, 0, 0)),   # skip
            pl.BlockSpec((1, hs, ws, c), lambda i: (i, 0, 0, 0)),   # up
            pl.BlockSpec((9 * c2, c), lambda i: (0, 0)),            # w0
            pl.BlockSpec((9 * c, c), lambda i: (0, 0)),             # w1
            pl.BlockSpec((9 * c, c), lambda i: (0, 0)),             # w2
            pl.BlockSpec((2, c), lambda i: (0, 0)),                 # scale/shift 0
            pl.BlockSpec((2, c), lambda i: (0, 0)),                 # scale/shift 1
            pl.BlockSpec((2, c), lambda i: (0, 0)),                 # scale/shift 2
        ],
        out_specs=pl.BlockSpec((1, hs, ws, c), lambda i: (i, 0, 0, 0)),
        scratch_shapes=[
            pltpu.VMEM((hs + 2, ws + 2, c2), jnp.float32),
            pltpu.VMEM((hs + 2, ws + 2, c), jnp.float32),
        ],
        compiler_params=pltpu.CompilerParams(dimension_semantics=("parallel",)),
    )(skip, up, wmats[0], wmats[1], wmats[2], ss[0], ss[1], ss[2])


# ----------------------------------------------------------------------------
# UpBlock forward (NCHW in / NCHW out, matching the PyTorch module interface).
# ----------------------------------------------------------------------------
def upblock_forward(x_nchw, skip_nchw, params):
    x = jnp.transpose(x_nchw, (0, 2, 3, 1))        # NCHW -> NHWC
    skip = jnp.transpose(skip_nchw, (0, 2, 3, 1))

    up = deconv2x2_stride2(x, params["up_w"], params["up_b"])
    if up.shape[1:3] != skip.shape[1:3]:
        # bilinear, align_corners=False (half-pixel centers == jax.image default)
        up = jax.image.resize(
            up, (up.shape[0], skip.shape[1], skip.shape[2], up.shape[3]),
            method="bilinear")

    out = fused_convblock(skip, up, params)        # concat + 3x(conv+bn+relu)
    return jnp.transpose(out, (0, 3, 1, 2))        # NHWC -> NCHW


# ----------------------------------------------------------------------------
# Pure-JAX reference (for correctness check).
# ----------------------------------------------------------------------------
def ref_forward(x_nchw, skip_nchw, params):
    x = jnp.transpose(x_nchw, (0, 2, 3, 1))
    skip = jnp.transpose(skip_nchw, (0, 2, 3, 1))
    n, h, w, _ = x.shape
    w_up, b_up = params["up_w"], params["up_b"]
    cout = w_up.shape[1]
    y = jnp.einsum("nijc,cdkl->nikjld", x, w_up)
    y = y.reshape(n, 2 * h, 2 * w, cout) + b_up
    if y.shape[1:3] != skip.shape[1:3]:
        y = jax.image.resize(y, (n, skip.shape[1], skip.shape[2], cout),
                             method="bilinear")
    hh = jnp.concatenate([skip, y], axis=-1)
    for i in range(3):
        cw, cb, g, beta, rm, rv = params[f"conv{i}"]
        whwio = jnp.transpose(cw, (2, 3, 1, 0))
        hh = lax.conv_general_dilated(
            hh, whwio, (1, 1), "SAME",
            dimension_numbers=("NHWC", "HWIO", "NHWC"),
            precision=lax.Precision.HIGHEST) + cb
        hh = (hh - rm) / jnp.sqrt(rv + 1e-5) * g + beta
        hh = jnp.maximum(hh, 0.0)
    return jnp.transpose(hh, (0, 3, 1, 2))


if __name__ == "__main__":
    key = jax.random.PRNGKey(0)
    N, CIN, COUT = 2, 8, 4          # UNet convention: in_channels = 2 * out_channels
    H, W = 8, 8                     # low-res input; skip is (2H, 2W)

    ks = list(jax.random.split(key, 32))
    x = jax.random.normal(ks[0], (N, CIN, H, W), jnp.float32)
    skip = jax.random.normal(ks[1], (N, COUT, 2 * H, 2 * W), jnp.float32)

    params = {
        "up_w": 0.25 * jax.random.normal(ks[2], (CIN, COUT, 2, 2), jnp.float32),
        "up_b": 0.10 * jax.random.normal(ks[3], (COUT,), jnp.float32),
    }
    conv_cins = [CIN, COUT, COUT]   # ConvBlock(in_channels=CIN, out_channels=COUT)
    kidx = 4
    for i, ci in enumerate(conv_cins):
        cw = 0.2 * jax.random.normal(ks[kidx], (COUT, ci, 3, 3), jnp.float32); kidx += 1
        cb = 0.05 * jax.random.normal(ks[kidx], (COUT,), jnp.float32); kidx += 1
        g = 1.0 + 0.1 * jax.random.normal(ks[kidx], (COUT,), jnp.float32); kidx += 1
        beta = 0.05 * jax.random.normal(ks[kidx], (COUT,), jnp.float32); kidx += 1
        rm = 0.1 * jax.random.normal(ks[kidx], (COUT,), jnp.float32); kidx += 1
        rv = 0.5 + jax.random.uniform(ks[kidx], (COUT,), jnp.float32); kidx += 1
        params[f"conv{i}"] = (cw, cb, g, beta, rm, rv)

    out = jax.jit(upblock_forward)(x, skip, params)
    out = jax.block_until_ready(out)
    assert out.shape == (N, COUT, 2 * H, 2 * W), out.shape

    ref = jax.block_until_ready(ref_forward(x, skip, params))
    if not jnp.allclose(out, ref, atol=2e-2, rtol=2e-2):
        raise AssertionError(
            f"mismatch vs reference: max abs err {float(jnp.max(jnp.abs(out - ref)))}")

    print("KERNEL_OK")
</pallas_src>

<mosaic_0001>
module attributes {stable_mosaic.version = 11 : i64} {
  func.func @_deconv2x2_kernel(%arg0: i32, %arg1: memref<1x8x8x8xf32, #tpu.memory_space<vmem>>, %arg2: memref<8x16xf32, #tpu.memory_space<vmem>>, %arg3: memref<1x16xf32, #tpu.memory_space<vmem>>, %arg4: memref<1x8x8x16xf32, #tpu.memory_space<vmem>>) attributes {dimension_semantics = [#tpu.dimension_semantics<parallel>], iteration_bounds = array<i64: 2>, scalar_prefetch = 0 : i64, scratch_operands = 0 : i64, tpu.core_type = #tpu.core_type<tc>, window_params = [{transform_indices = @transform_0, window_bounds = array<i64: 1, 8, 8, 8>}, {pipeline_mode = #tpu.pipeline_mode<synchronous>, transform_indices = @transform_1, window_bounds = array<i64: 8, 16>}, {pipeline_mode = #tpu.pipeline_mode<synchronous>, transform_indices = @transform_2, window_bounds = array<i64: 1, 16>}, {transform_indices = @transform_3, window_bounds = array<i64: 1, 8, 8, 16>}]} {
    %c0 = arith.constant 0 : index
    %c0_0 = arith.constant 0 : index
    %c0_1 = arith.constant 0 : index
    %c0_2 = arith.constant 0 : index
    %0 = vector.load %arg1[%c0, %c0_0, %c0_1, %c0_2] : memref<1x8x8x8xf32, #tpu.memory_space<vmem>>, vector<1x8x8x8xf32>
    %1 = vector.shape_cast %0 : vector<1x8x8x8xf32> to vector<8x8x8xf32>
    %2 = vector.shape_cast %1 : vector<8x8x8xf32> to vector<64x8xf32>
    %c0_3 = arith.constant 0 : index
    %c0_4 = arith.constant 0 : index
    %3 = vector.load %arg2[%c0_3, %c0_4] : memref<8x16xf32, #tpu.memory_space<vmem>>, vector<8x16xf32>
    %cst = arith.constant dense<0.000000e+00> : vector<64x16xf32>
    %4 = tpu.matmul %2, %3, %cst {dimension_numbers = #tpu.dot_dimension_numbers<[1], [0], [0], [1], [0, 0, 1, 1], [], []>} : vector<64x8xf32>, vector<8x16xf32>, vector<64x16xf32> -> vector<64x16xf32>
    %c0_5 = arith.constant 0 : index
    %c0_6 = arith.constant 0 : index
    %5 = vector.load %arg3[%c0_5, %c0_6] : memref<1x16xf32, #tpu.memory_space<vmem>>, vector<1x16xf32>
    %6 = vector.shape_cast %5 : vector<1x16xf32> to vector<16xf32>
    %7 = vector.shape_cast %6 : vector<16xf32> to vector<1x16xf32>
    %8 = vector.broadcast %7 : vector<1x16xf32> to vector<64x16xf32>
    %9 = arith.addf %4, %8 : vector<64x16xf32>
    %10 = vector.shape_cast %9 : vector<64x16xf32> to vector<8x8x16xf32>
    %c0_7 = arith.constant 0 : index
    %c0_8 = arith.constant 0 : index
    %c0_9 = arith.constant 0 : index
    %c0_10 = arith.constant 0 : index
    %11 = vector.load %arg4[%c0_7, %c0_8, %c0_9, %c0_10] : memref<1x8x8x16xf32, #tpu.memory_space<vmem>>, vector<1x8x8x16xf32>
    %12 = vector.shape_cast %11 : vector<1x8x8x16xf32> to vector<8x8x16xf32>
    %13 = vector.shape_cast %10 : vector<8x8x16xf32> to vector<1x8x8x16xf32>
    tpu.vector_store %arg4[%c0_7, %c0_8, %c0_9, %c0_10], %13 {strides = array<i32>} : memref<1x8x8x16xf32, #tpu.memory_space<vmem>>, vector<1x8x8x16xf32>,
    return
  }
  func.func @transform_0(%arg0: i32) -> (i32, i32, i32, i32) {
    %c0_i32 = arith.constant 0 : i32
    %c0_i32_0 = arith.constant 0 : i32
    %c0_i32_1 = arith.constant 0 : i32
    %c0_i32_2 = arith.constant 0 : i32
    return %arg0, %c0_i32, %c0_i32_0, %c0_i32_1 : i32, i32, i32, i32
  }
  func.func @transform_1(%arg0: i32) -> (i32, i32) {
    %c0_i32 = arith.constant 0 : i32
    %c0_i32_0 = arith.constant 0 : i32
    %c0_i32_1 = arith.constant 0 : i32
    return %c0_i32, %c0_i32_0 : i32, i32
  }
  func.func @transform_2(%arg0: i32) -> (i32, i32) {
    %c0_i32 = arith.constant 0 : i32
    %c0_i32_0 = arith.constant 0 : i32
    %c0_i32_1 = arith.constant 0 : i32
    return %c0_i32, %c0_i32_0 : i32, i32
  }
  func.func @transform_3(%arg0: i32) -> (i32, i32, i32, i32) {
    %c0_i32 = arith.constant 0 : i32
    %c0_i32_0 = arith.constant 0 : i32
    %c0_i32_1 = arith.constant 0 : i32
    %c0_i32_2 = arith.constant 0 : i32
    return %arg0, %c0_i32, %c0_i32_0, %c0_i32_1 : i32, i32, i32, i32
  }
}

module attributes {stable_mosaic.version = 11 : i64} {
  func.func @_fused_convblock_kernel(%arg0: i32, %arg1: memref<1x16x16x4xf32, #tpu.memory_space<vmem>>, %arg2: memref<1x16x16x4xf32, #tpu.memory_space<vmem>>, %arg3: memref<72x4xf32, #tpu.memory_space<vmem>>, %arg4: memref<36x4xf32, #tpu.memory_space<vmem>>, %arg5: memref<36x4xf32, #tpu.memory_space<vmem>>, %arg6: memref<2x4xf32, #tpu.memory_space<vmem>>, %arg7: memref<2x4xf32, #tpu.memory_space<vmem>>, %arg8: memref<2x4xf32, #tpu.memory_space<vmem>>, %arg9: memref<1x16x16x4xf32, #tpu.memory_space<vmem>>, %arg10: memref<18x18x8xf32, #tpu.memory_space<vmem>>, %arg11: memref<18x18x4xf32, #tpu.memory_space<vmem>>) attributes {dimension_semantics = [#tpu.dimension_semantics<parallel>], iteration_bounds = array<i64: 2>, scalar_prefetch = 0 : i64, scratch_operands = 2 : i64, tpu.core_type = #tpu.core_type<tc>, window_params = [{transform_indices = @transform_0, window_bounds = array<i64: 1, 16, 16, 4>}, {transform_indices = @transform_1, window_bounds = array<i64: 1, 16, 16, 4>}, {pipeline_mode = #tpu.pipeline_mode<synchronous>, transform_indices = @transform_2, window_bounds = array<i64: 72, 4>}, {pipeline_mode = #tpu.pipeline_mode<synchronous>, transform_indices = @transform_3, window_bounds = array<i64: 36, 4>}, {pipeline_mode = #tpu.pipeline_mode<synchronous>, transform_indices = @transform_4, window_bounds = array<i64: 36, 4>}, {pipeline_mode = #tpu.pipeline_mode<synchronous>, transform_indices = @transform_5, window_bounds = array<i64: 2, 4>}, {pipeline_mode = #tpu.pipeline_mode<synchronous>, transform_indices = @transform_6, window_bounds = array<i64: 2, 4>}, {pipeline_mode = #tpu.pipeline_mode<synchronous>, transform_indices = @transform_7, window_bounds = array<i64: 2, 4>}, {transform_indices = @transform_8, window_bounds = array<i64: 1, 16, 16, 4>}]} {
    %cst = arith.constant 0.000000e+00 : f32
    %0 = vector.broadcast %cst : f32 to vector<18x18x8xf32>
    %c0 = arith.constant 0 : index
    %c0_0 = arith.constant 0 : index
    %c0_1 = arith.constant 0 : index
    %1 = vector.load %arg10[%c0, %c0_0, %c0_1] : memref<18x18x8xf32, #tpu.memory_space<vmem>>, vector<18x18x8xf32>
    tpu.vector_store %arg10[%c0, %c0_0, %c0_1], %0 {strides = array<i32>} : memref<18x18x8xf32, #tpu.memory_space<vmem>>, vector<18x18x8xf32>,
    %c0_2 = arith.constant 0 : index
    %c0_3 = arith.constant 0 : index
    %c0_4 = arith.constant 0 : index
    %c0_5 = arith.constant 0 : index
    %2 = vector.load %arg1[%c0_2, %c0_3, %c0_4, %c0_5] : memref<1x16x16x4xf32, #tpu.memory_space<vmem>>, vector<1x16x16x4xf32>
    %3 = vector.shape_cast %2 : vector<1x16x16x4xf32> to vector<16x16x4xf32>
    %c0_6 = arith.constant 0 : index
    %c0_7 = arith.constant 0 : index
    %c0_8 = arith.constant 0 : index
    %c0_9 = arith.constant 0 : index
    %4 = vector.load %arg2[%c0_6, %c0_7, %c0_8, %c0_9] : memref<1x16x16x4xf32, #tpu.memory_space<vmem>>, vector<1x16x16x4xf32>
    %5 = vector.shape_cast %4 : vector<1x16x16x4xf32> to vector<16x16x4xf32>
    %6 = tpu.concatenate %3, %5 in 2 : vector<16x16x4xf32>, vector<16x16x4xf32> -> vector<16x16x8xf32>
    %c1 = arith.constant 1 : index
    %c1_10 = arith.constant 1 : index
    %c0_11 = arith.constant 0 : index
    %7 = vector.load %arg10[%c1, %c1_10, %c0_11] : memref<18x18x8xf32, #tpu.memory_space<vmem>>, vector<16x16x8xf32>
    tpu.vector_store %arg10[%c1, %c1_10, %c0_11], %6 {strides = array<i32>} : memref<18x18x8xf32, #tpu.memory_space<vmem>>, vector<16x16x8xf32>,
    %c0_12 = arith.constant 0 : index
    %c0_13 = arith.constant 0 : index
    %c0_14 = arith.constant 0 : index
    %8 = vector.load %arg10[%c0_12, %c0_13, %c0_14] : memref<18x18x8xf32, #tpu.memory_space<vmem>>, vector<16x16x8xf32>
    %c0_15 = arith.constant 0 : index
    %c1_16 = arith.constant 1 : index
    %c0_17 = arith.constant 0 : index
    %9 = vector.load %arg10[%c0_15, %c1_16, %c0_17] : memref<18x18x8xf32, #tpu.memory_space<vmem>>, vector<16x16x8xf32>
    %c0_18 = arith.constant 0 : index
    %c2 = arith.constant 2 : index
    %c0_19 = arith.constant 0 : index
    %10 = vector.load %arg10[%c0_18, %c2, %c0_19] : memref<18x18x8xf32, #tpu.memory_space<vmem>>, vector<16x16x8xf32>
    %c1_20 = arith.constant 1 : index
    %c0_21 = arith.constant 0 : index
    %c0_22 = arith.constant 0 : index
    %11 = vector.load %arg10[%c1_20, %c0_21, %c0_22] : memref<18x18x8xf32, #tpu.memory_space<vmem>>, vector<16x16x8xf32>
    %c1_23 = arith.constant 1 : index
    %c1_24 = arith.constant 1 : index
    %c0_25 = arith.constant 0 : index
    %12 = vector.load %arg10[%c1_23, %c1_24, %c0_25] : memref<18x18x8xf32, #tpu.memory_space<vmem>>, vector<16x16x8xf32>
    %c1_26 = arith.constant 1 : index
    %c2_27 = arith.constant 2 : index
    %c0_28 = arith.constant 0 : index
    %13 = vector.load %arg10[%c1_26, %c2_27, %c0_28] : memref<18x18x8xf32, #tpu.memory_space<vmem>>, vector<16x16x8xf32>
    %c2_29 = arith.constant 2 : index
    %c0_30 = arith.constant 0 : index
    %c0_31 = arith.constant 0 : index
    %14 = vector.load %arg10[%c2_29, %c0_30, %c0_31] : memref<18x18x8xf32, #tpu.memory_space<vmem>>, vector<16x16x8xf32>
    %c2_32 = arith.constant 2 : index
    %c1_33 = arith.constant 1 : index
    %c0_34 = arith.constant 0 : index
    %15 = vector.load %arg10[%c2_32, %c1_33, %c0_34] : memref<18x18x8xf32, #tpu.memory_space<vmem>>, vector<16x16x8xf32>
    %c2_35 = arith.constant 2 : index
    %c2_36 = arith.constant 2 : index
    %c0_37 = arith.constant 0 : index
    %16 = vector.load %arg10[%c2_35, %c2_36, %c0_37] : memref<18x18x8xf32, #tpu.memory_space<vmem>>, vector<16x16x8xf32>
    %17 = tpu.concatenate %8, %9, %10, %11, %12, %13, %14, %15, %16 in 2 : vector<16x16x8xf32>, vector<16x16x8xf32>, vector<16x16x8xf32>, vector<16x16x8xf32>, vector<16x16x8xf32>, vector<16x16x8xf32>, vector<16x16x8xf32>, vector<16x16x8xf32>, vector<16x16x8xf32> -> vector<16x16x72xf32>
    %18 = vector.shape_cast %17 : vector<16x16x72xf32> to vector<256x72xf32>
    %c0_38 = arith.constant 0 : index
    %c0_39 = arith.constant 0 : index
    %19 = vector.load %arg3[%c0_38, %c0_39] : memref<72x4xf32, #tpu.memory_space<vmem>>, vector<72x4xf32>
    %cst_40 = arith.constant dense<0.000000e+00> : vector<256x4xf32>
    %20 = tpu.matmul %18, %19, %cst_40 {dimension_numbers = #tpu.dot_dimension_numbers<[1], [0], [0], [1], [0, 0, 1, 1], [], []>} : vector<256x72xf32>, vector<72x4xf32>, vector<256x4xf32> -> vector<256x4xf32>
    %c0_41 = arith.constant 0 : index
    %c0_42 = arith.constant 0 : index
    %21 = vector.load %arg6[%c0_41, %c0_42] : memref<2x4xf32, #tpu.memory_space<vmem>>, vector<1x4xf32>
    %22 = vector.shape_cast %21 : vector<1x4xf32> to vector<4xf32>
    %23 = vector.shape_cast %22 : vector<4xf32> to vector<1x4xf32>
    %24 = vector.broadcast %23 : vector<1x4xf32> to vector<256x4xf32>
    %25 = arith.mulf %20, %24 : vector<256x4xf32>
    %c1_43 = arith.constant 1 : index
    %c0_44 = arith.constant 0 : index
    %26 = vector.load %arg6[%c1_43, %c0_44] : memref<2x4xf32, #tpu.memory_space<vmem>>, vector<1x4xf32>
    %27 = vector.shape_cast %26 : vector<1x4xf32> to vector<4xf32>
    %28 = vector.shape_cast %27 : vector<4xf32> to vector<1x4xf32>
    %29 = vector.broadcast %28 : vector<1x4xf32> to vector<256x4xf32>
    %30 = arith.addf %25, %29 : vector<256x4xf32>
    %cst_45 = arith.constant 0.000000e+00 : f32
    %31 = vector.broadcast %cst_45 : f32 to vector<256x4xf32>
    %32 = arith.maximumf %30, %31 : vector<256x4xf32>
    %33 = vector.shape_cast %32 : vector<256x4xf32> to vector<16x16x4xf32>
    %cst_46 = arith.constant 0.000000e+00 : f32
    %34 = vector.broadcast %cst_46 : f32 to vector<18x18x4xf32>
    %c0_47 = arith.constant 0 : index
    %c0_48 = arith.constant 0 : index
    %c0_49 = arith.constant 0 : index
    %35 = vector.load %arg11[%c0_47, %c0_48, %c0_49] : memref<18x18x4xf32, #tpu.memory_space<vmem>>, vector<18x18x4xf32>
    tpu.vector_store %arg11[%c0_47, %c0_48, %c0_49], %34 {strides = array<i32>} : memref<18x18x4xf32, #tpu.memory_space<vmem>>, vector<18x18x4xf32>,
    %c1_50 = arith.constant 1 : index
    %c1_51 = arith.constant 1 : index
    %c0_52 = arith.constant 0 : index
    %36 = vector.load %arg11[%c1_50, %c1_51, %c0_52] : memref<18x18x4xf32, #tpu.memory_space<vmem>>, vector<16x16x4xf32>
    tpu.vector_store %arg11[%c1_50, %c1_51, %c0_52], %33 {strides = array<i32>} : memref<18x18x4xf32, #tpu.memory_space<vmem>>, vector<16x16x4xf32>,
    %c0_53 = arith.constant 0 : index
    %c0_54 = arith.constant 0 : index
    %c0_55 = arith.constant 0 : index
    %37 = vector.load %arg11[%c0_53, %c0_54, %c0_55] : memref<18x18x4xf32, #tpu.memory_space<vmem>>, vector<16x16x4xf32>
    %c0_56 = arith.constant 0 : index
    %c1_57 = arith.constant 1 : index
    %c0_58 = arith.constant 0 : index
    %38 = vector.load %arg11[%c0_56, %c1_57, %c0_58] : memref<18x18x4xf32, #tpu.memory_space<vmem>>, vector<16x16x4xf32>
    %c0_59 = arith.constant 0 : index
    %c2_60 = arith.constant 2 : index
    %c0_61 = arith.constant 0 : index
    %39 = vector.load %arg11[%c0_59, %c2_60, %c0_61] : memref<18x18x4xf32, #tpu.memory_space<vmem>>, vector<16x16x4xf32>
    %c1_62 = arith.constant 1 : index
    %c0_63 = arith.constant 0 : index
    %c0_64 = arith.constant 0 : index
    %40 = vector.load %arg11[%c1_62, %c0_63, %c0_64] : memref<18x18x4xf32, #tpu.memory_space<vmem>>, vector<16x16x4xf32>
    %c1_65 = arith.constant 1 : index
    %c1_66 = arith.constant 1 : index
    %c0_67 = arith.constant 0 : index
    %41 = vector.load %arg11[%c1_65, %c1_66, %c0_67] : memref<18x18x4xf32, #tpu.memory_space<vmem>>, vector<16x16x4xf32>
    %c1_68 = arith.constant 1 : index
    %c2_69 = arith.constant 2 : index
    %c0_70 = arith.constant 0 : index
    %42 = vector.load %arg11[%c1_68, %c2_69, %c0_70] : memref<18x18x4xf32, #tpu.memory_space<vmem>>, vector<16x16x4xf32>
    %c2_71 = arith.constant 2 : index
    %c0_72 = arith.constant 0 : index
    %c0_73 = arith.constant 0 : index
    %43 = vector.load %arg11[%c2_71, %c0_72, %c0_73] : memref<18x18x4xf32, #tpu.memory_space<vmem>>, vector<16x16x4xf32>
    %c2_74 = arith.constant 2 : index
    %c1_75 = arith.constant 1 : index
    %c0_76 = arith.constant 0 : index
    %44 = vector.load %arg11[%c2_74, %c1_75, %c0_76] : memref<18x18x4xf32, #tpu.memory_space<vmem>>, vector<16x16x4xf32>
    %c2_77 = arith.constant 2 : index
    %c2_78 = arith.constant 2 : index
    %c0_79 = arith.constant 0 : index
    %45 = vector.load %arg11[%c2_77, %c2_78, %c0_79] : memref<18x18x4xf32, #tpu.memory_space<vmem>>, vector<16x16x4xf32>
    %46 = tpu.concatenate %37, %38, %39, %40, %41, %42, %43, %44, %45 in 2 : vector<16x16x4xf32>, vector<16x16x4xf32>, vector<16x16x4xf32>, vector<16x16x4xf32>, vector<16x16x4xf32>, vector<16x16x4xf32>, vector<16x16x4xf32>, vector<16x16x4xf32>, vector<16x16x4xf32> -> vector<16x16x36xf32>
    %47 = vector.shape_cast %46 : vector<16x16x36xf32> to vector<256x36xf32>
    %c0_80 = arith.constant 0 : index
    %c0_81 = arith.constant 0 : index
    %48 = vector.load %arg4[%c0_80, %c0_81] : memref<36x4xf32, #tpu.memory_space<vmem>>, vector<36x4xf32>
    %cst_82 = arith.constant dense<0.000000e+00> : vector<256x4xf32>
    %49 = tpu.matmul %47, %48, %cst_82 {dimension_numbers = #tpu.dot_dimension_numbers<[1], [0], [0], [1], [0, 0, 1, 1], [], []>} : vector<256x36xf32>, vector<36x4xf32>, vector<256x4xf32> -> vector<256x4xf32>
    %c0_83 = arith.constant 0 : index
    %c0_84 = arith.constant 0 : index
    %50 = vector.load %arg7[%c0_83, %c0_84] : memref<2x4xf32, #tpu.memory_space<vmem>>, vector<1x4xf32>
    %51 = vector.shape_cast %50 : vector<1x4xf32> to vector<4xf32>
    %52 = vector.shape_cast %51 : vector<4xf32> to vector<1x4xf32>
    %53 = vector.broadcast %52 : vector<1x4xf32> to vector<256x4xf32>
    %54 = arith.mulf %49, %53 : vector<256x4xf32>
    %c1_85 = arith.constant 1 : index
    %c0_86 = arith.constant 0 : index
    %55 = vector.load %arg7[%c1_85, %c0_86] : memref<2x4xf32, #tpu.memory_space<vmem>>, vector<1x4xf32>
    %56 = vector.shape_cast %55 : vector<1x4xf32> to vector<4xf32>
    %57 = vector.shape_cast %56 : vector<4xf32> to vector<1x4xf32>
    %58 = vector.broadcast %57 : vector<1x4xf32> to vector<256x4xf32>
    %59 = arith.addf %54, %58 : vector<256x4xf32>
    %cst_87 = arith.constant 0.000000e+00 : f32
    %60 = vector.broadcast %cst_87 : f32 to vector<256x4xf32>
    %61 = arith.maximumf %59, %60 : vector<256x4xf32>
    %62 = vector.shape_cast %61 : vector<256x4xf32> to vector<16x16x4xf32>
    %c1_88 = arith.constant 1 : index
    %c1_89 = arith.constant 1 : index
    %c0_90 = arith.constant 0 : index
    %63 = vector.load %arg11[%c1_88, %c1_89, %c0_90] : memref<18x18x4xf32, #tpu.memory_space<vmem>>, vector<16x16x4xf32>
    tpu.vector_store %arg11[%c1_88, %c1_89, %c0_90], %62 {strides = array<i32>} : memref<18x18x4xf32, #tpu.memory_space<vmem>>, vector<16x16x4xf32>,
    %c0_91 = arith.constant 0 : index
    %c0_92 = arith.constant 0 : index
    %c0_93 = arith.constant 0 : index
    %64 = vector.load %arg11[%c0_91, %c0_92, %c0_93] : memref<18x18x4xf32, #tpu.memory_space<vmem>>, vector<16x16x4xf32>
    %c0_94 = arith.constant 0 : index
    %c1_95 = arith.constant 1 : index
    %c0_96 = arith.constant 0 : index
    %65 = vector.load %arg11[%c0_94, %c1_95, %c0_96] : memref<18x18x4xf32, #tpu.memory_space<vmem>>, vector<16x16x4xf32>
    %c0_97 = arith.constant 0 : index
    %c2_98 = arith.constant 2 : index
    %c0_99 = arith.constant 0 : index
    %66 = vector.load %arg11[%c0_97, %c2_98, %c0_99] : memref<18x18x4xf32, #tpu.memory_space<vmem>>, vector<16x16x4xf32>
    %c1_100 = arith.constant 1 : index
    %c0_101 = arith.constant 0 : index
    %c0_102 = arith.constant 0 : index
    %67 = vector.load %arg11[%c1_100, %c0_101, %c0_102] : memref<18x18x4xf32, #tpu.memory_space<vmem>>, vector<16x16x4xf32>
    %c1_103 = arith.constant 1 : index
    %c1_104 = arith.constant 1 : index
    %c0_105 = arith.constant 0 : index
    %68 = vector.load %arg11[%c1_103, %c1_104, %c0_105] : memref<18x18x4xf32, #tpu.memory_space<vmem>>, vector<16x16x4xf32>
    %c1_106 = arith.constant 1 : index
    %c2_107 = arith.constant 2 : index
    %c0_108 = arith.constant 0 : index
    %69 = vector.load %arg11[%c1_106, %c2_107, %c0_108] : memref<18x18x4xf32, #tpu.memory_space<vmem>>, vector<16x16x4xf32>
    %c2_109 = arith.constant 2 : index
    %c0_110 = arith.constant 0 : index
    %c0_111 = arith.constant 0 : index
    %70 = vector.load %arg11[%c2_109, %c0_110, %c0_111] : memref<18x18x4xf32, #tpu.memory_space<vmem>>, vector<16x16x4xf32>
    %c2_112 = arith.constant 2 : index
    %c1_113 = arith.constant 1 : index
    %c0_114 = arith.constant 0 : index
    %71 = vector.load %arg11[%c2_112, %c1_113, %c0_114] : memref<18x18x4xf32, #tpu.memory_space<vmem>>, vector<16x16x4xf32>
    %c2_115 = arith.constant 2 : index
    %c2_116 = arith.constant 2 : index
    %c0_117 = arith.constant 0 : index
    %72 = vector.load %arg11[%c2_115, %c2_116, %c0_117] : memref<18x18x4xf32, #tpu.memory_space<vmem>>, vector<16x16x4xf32>
    %73 = tpu.concatenate %64, %65, %66, %67, %68, %69, %70, %71, %72 in 2 : vector<16x16x4xf32>, vector<16x16x4xf32>, vector<16x16x4xf32>, vector<16x16x4xf32>, vector<16x16x4xf32>, vector<16x16x4xf32>, vector<16x16x4xf32>, vector<16x16x4xf32>, vector<16x16x4xf32> -> vector<16x16x36xf32>
    %74 = vector.shape_cast %73 : vector<16x16x36xf32> to vector<256x36xf32>
    %c0_118 = arith.constant 0 : index
    %c0_119 = arith.constant 0 : index
    %75 = vector.load %arg5[%c0_118, %c0_119] : memref<36x4xf32, #tpu.memory_space<vmem>>, vector<36x4xf32>
    %cst_120 = arith.constant dense<0.000000e+00> : vector<256x4xf32>
    %76 = tpu.matmul %74, %75, %cst_120 {dimension_numbers = #tpu.dot_dimension_numbers<[1], [0], [0], [1], [0, 0, 1, 1], [], []>} : vector<256x36xf32>, vector<36x4xf32>, vector<256x4xf32> -> vector<256x4xf32>
    %c0_121 = arith.constant 0 : index
    %c0_122 = arith.constant 0 : index
    %77 = vector.load %arg8[%c0_121, %c0_122] : memref<2x4xf32, #tpu.memory_space<vmem>>, vector<1x4xf32>
    %78 = vector.shape_cast %77 : vector<1x4xf32> to vector<4xf32>
    %79 = vector.shape_cast %78 : vector<4xf32> to vector<1x4xf32>
    %80 = vector.broadcast %79 : vector<1x4xf32> to vector<256x4xf32>
    %81 = arith.mulf %76, %80 : vector<256x4xf32>
    %c1_123 = arith.constant 1 : index
    %c0_124 = arith.constant 0 : index
    %82 = vector.load %arg8[%c1_123, %c0_124] : memref<2x4xf32, #tpu.memory_space<vmem>>, vector<1x4xf32>
    %83 = vector.shape_cast %82 : vector<1x4xf32> to vector<4xf32>
    %84 = vector.shape_cast %83 : vector<4xf32> to vector<1x4xf32>
    %85 = vector.broadcast %84 : vector<1x4xf32> to vector<256x4xf32>
    %86 = arith.addf %81, %85 : vector<256x4xf32>
    %cst_125 = arith.constant 0.000000e+00 : f32
    %87 = vector.broadcast %cst_125 : f32 to vector<256x4xf32>
    %88 = arith.maximumf %86, %87 : vector<256x4xf32>
    %89 = vector.shape_cast %88 : vector<256x4xf32> to vector<16x16x4xf32>
    %c0_126 = arith.constant 0 : index
    %c0_127 = arith.constant 0 : index
    %c0_128 = arith.constant 0 : index
    %c0_129 = arith.constant 0 : index
    %90 = vector.load %arg9[%c0_126, %c0_127, %c0_128, %c0_129] : memref<1x16x16x4xf32, #tpu.memory_space<vmem>>, vector<1x16x16x4xf32>
    %91 = vector.shape_cast %90 : vector<1x16x16x4xf32> to vector<16x16x4xf32>
    %92 = vector.shape_cast %89 : vector<16x16x4xf32> to vector<1x16x16x4xf32>
    tpu.vector_store %arg9[%c0_126, %c0_127, %c0_128, %c0_129], %92 {strides = array<i32>} : memref<1x16x16x4xf32, #tpu.memory_space<vmem>>, vector<1x16x16x4xf32>,
    return
  }
  func.func @transform_0(%arg0: i32) -> (i32, i32, i32, i32) {
    %c0_i32 = arith.constant 0 : i32
    %c0_i32_0 = arith.constant 0 : i32
    %c0_i32_1 = arith.constant 0 : i32
    %c0_i32_2 = arith.constant 0 : i32
    return %arg0, %c0_i32, %c0_i32_0, %c0_i32_1 : i32, i32, i32, i32
  }
  func.func @transform_1(%arg0: i32) -> (i32, i32, i32, i32) {
    %c0_i32 = arith.constant 0 : i32
    %c0_i32_0 = arith.constant 0 : i32
    %c0_i32_1 = arith.constant 0 : i32
    %c0_i32_2 = arith.constant 0 : i32
    return %arg0, %c0_i32, %c0_i32_0, %c0_i32_1 : i32, i32, i32, i32
  }
  func.func @transform_2(%arg0: i32) -> (i32, i32) {
    %c0_i32 = arith.constant 0 : i32
    %c0_i32_0 = arith.constant 0 : i32
    %c0_i32_1 = arith.constant 0 : i32
    return %c0_i32, %c0_i32_0 : i32, i32
  }
  func.func @transform_3(%arg0: i32) -> (i32, i32) {
    %c0_i32 = arith.constant 0 : i32
    %c0_i32_0 = arith.constant 0 : i32
    %c0_i32_1 = arith.constant 0 : i32
    return %c0_i32, %c0_i32_0 : i32, i32
  }
  func.func @transform_4(%arg0: i32) -> (i32, i32) {
    %c0_i32 = arith.constant 0 : i32
    %c0_i32_0 = arith.constant 0 : i32
    %c0_i32_1 = arith.constant 0 : i32
    return %c0_i32, %c0_i32_0 : i32, i32
  }
  func.func @transform_5(%arg0: i32) -> (i32, i32) {
    %c0_i32 = arith.constant 0 : i32
    %c0_i32_0 = arith.constant 0 : i32
    %c0_i32_1 = arith.constant 0 : i32
    return %c0_i32, %c0_i32_0 : i32, i32
  }
  func.func @transform_6(%arg0: i32) -> (i32, i32) {
    %c0_i32 = arith.constant 0 : i32
    %c0_i32_0 = arith.constant 0 : i32
    %c0_i32_1 = arith.constant 0 : i32
    return %c0_i32, %c0_i32_0 : i32, i32
  }
  func.func @transform_7(%arg0: i32) -> (i32, i32) {
    %c0_i32 = arith.constant 0 : i32
    %c0_i32_0 = arith.constant 0 : i32
    %c0_i32_1 = arith.constant 0 : i32
    return %c0_i32, %c0_i32_0 : i32, i32
  }
  func.func @transform_8(%arg0: i32) -> (i32, i32, i32, i32) {
    %c0_i32 = arith.constant 0 : i32
    %c0_i32_0 = arith.constant 0 : i32
    %c0_i32_1 = arith.constant 0 : i32
    %c0_i32_2 = arith.constant 0 : i32
    return %arg0, %c0_i32, %c0_i32_0, %c0_i32_1 : i32, i32, i32, i32
  }
}

</mosaic_0001>

<bundles_post_ra>
// kernel: tile.8
= control target key start
LH: loop header
LB: loop body
LE: loop exit
PB: predicated region body
PF: predicated region fallthrough
CT: control target
= control target key end

     0   :  { %s22_s0 = inlined_call_operand.vmem [shape: f32[4], index: 0, kind: input, shape index: {}]   ;;  %s23_s1 = inlined_call_operand.vmem [shape: f32[4,4], index: 1, kind: output, shape index: {}]  }
   0x1   :  { %v4_v0 = vld [vmem:[%s22_s0] ss:$0 sm:$0xff] }
   0x2   :  { %5 = vst [vmem:[%s23_s1] sm:$0xf] %v4_v0 }

// kernel: tile.9
= control target key start
LH: loop header
LB: loop body
LE: loop exit
PB: predicated region body
PF: predicated region fallthrough
CT: control target
= control target key end

     0   :  { %s37_s8 = smov 4   ;;  %s38_s9 = smov 8   ;;  %vm7_vm0 = vcmask 31744   ;;  %vm13_vm1 = vcmask 130144   ;;  %vm19_vm2 = vcmask 97344   ;;  %vm25_vm3 = vcmask 64544   ;;  %s55_s0 = inlined_call_operand.vmem [shape: f32[4,4], index: 0, kind: input, shape index: {}]   ;;  %s56_s1 = inlined_call_operand.vmem [shape: f32[1,16], index: 1, kind: output, shape index: {}]  }
   0x1   :  { %v4_v0 = vld [vmem:[%s55_s0] sm:$0xf]  ;;  %s36_s0 = smov 12  }
   0x2   :  { %5 = vst [vmem:[#allocation1] sm:$0xf] %v4_v0 }
   0x9   :  { %v10_v1 = vld [vmem:[#allocation1 + $0x3] sm:$0x1]   ;;  %v22_v2 = vld [vmem:[#allocation1 + $0x1] sm:$0x1]   ;;  %v16_v3 = vld [vmem:[#allocation1 + $0x2] sm:$0x1]  }
   0xa   :  { %11 = vrot.lane.b32.xlu0 %v10_v1, %s36_s0  ;;  %23 = vrot.lane.b32.xlu1 %v22_v2, %s37_s8  ;;  %v6_v4 = vld [vmem:[#allocation1] sm:$0x1]  }
   0xb   :  { %8 = vst.msk [vmem:[#allocation0] sm:$0x1] %vm7_vm0, %v6_v4  }
  0x12   :  { %17 = vrot.lane.b32.xlu0 %v16_v3, %s38_s9 }
  0x7c   :  { %v12_v5 = vpop.permute.xlu0 %11   ;;  %v24_v6 = vpop.permute.xlu1 %23  }
  0x7d   :  { %14 = vst.msk [vmem:[#allocation0] sm:$0x1] %vm13_vm1, %v12_v5  }
  0x84   :  { %v18_v7 = vpop.permute.xlu0 %17  }
  0x85   :  { %20 = vst.msk [vmem:[#allocation0] sm:$0x1] %vm19_vm2, %v18_v7  }
  0x86   :  { %26 = vst.msk [vmem:[#allocation0] sm:$0x1] %vm25_vm3, %v24_v6  }
  0x8d   :  { %v29_v8 = vld [vmem:[#allocation0] sm:$0x1] }
  0x8e   :  { %32 = vst [vmem:[%s56_s1] sm:$0x1] %v29_v8 }

// kernel: upblock_forward.2
= control target key start
LH: loop header
LB: loop body
LE: loop exit
PB: predicated region body
PF: predicated region fallthrough
CT: control target
= control target key end

     0   :  { %s375_s12 = smov 0   ;;  %s414_s0 = inlined_call_operand.vmem [shape: f32[2,8,8,8], index: 0, kind: input, shape index: {}]   ;;  %s415_s1 = inlined_call_operand.vmem [shape: f32[8,16], index: 1, kind: input, shape index: {}]   ;;  %s416_s2 = inlined_call_operand.vmem [shape: f32[1,16], index: 2, kind: input, shape index: {}]   ;;  %s417_s3 = inlined_call_operand.vmem [shape: f32[2,8,8,16], index: 3, kind: output, shape index: {}]  }
   0x1 LB: > { %s314_s13 = sadd.s32 4294967295, %s353_s12   ;;  %p318_p0 = scmp.ge.s32.totalorder %s353_s12, 1  ;;  %s353_s12 = sphi %s375_s12, %s13_s12  }
   0x2   : > { %p137_p1 = scmp.lt.s32.totalorder %s353_s12, 3 }
   0x4   : > { %p138_p2 = pnand %p318_p0, %p137_p1 }
   0x5   : > { %p161_p3 = scmp.lt.s32.totalorder (!%p138_p2), %s314_s13, 1 }
   0x6   : > { %141 = sbr.rel (%p138_p2) target bundleno = 159 (0x9f), region = 32 }
   0xb   : > { %v179_v0 = vld [vmem:[%s415_s1] sm:$0xff]  ;;  %s419_s13 = smov (!%p161_p3, %s314_s13), 1  ;;  %vm184_vm0 = vcmask 64512   ;;  %vm250_vm1 = vcmask 130048  }
   0xc   : > { %336 = vmatpush.msra.mxu2 %v179_v0  ;;  %337 = vmatpush.msra.mxu3 %v179_v0  ;;  %s333_s16 = sshll.u32 %s419_s13, 6  ;;  %v346_v9 = vld [vmem:[%s416_s2] ss:$0 sm:$0xff] }
   0xd   : > { %224 = vmatpush.msra.mxu0 %v179_v0  ;;  %335 = vmatpush.msra.mxu1 %v179_v0  ;;  %s165_s19 = scalar_lea.vmem %s414_s0, %s333_s16  ;;  %s170_s24 = scalar_lea.vmem %s417_s3, %s333_s16 }
   0xe   : > { %v175_v1 = vld [vmem:[%s165_s19 + $0x20] sm:$0xff]  ;;  %v177_v2 = vld [vmem:[%s165_s19 + $0x30] sm:$0xff]  ;;  %v176_v5 = vld [vmem:[%s165_s19 + $0x28] sm:$0xff] }
   0xf   : > { %v171_v3 = vld [vmem:[%s165_s19] sm:$0xff]  ;;  %327 = vmatmul.msk.f32.vlgmr.msra.gmra.mxu2 %vm184_vm0, %v175_v1  ;;  %329 = vmatmul.msk.f32.vlgmr.msra.gmra.mxu3 %vm184_vm0, %v177_v2  ;;  %v173_v4 = vld [vmem:[%s165_s19 + $0x10] sm:$0xff]  ;;  %v178_v6 = vld [vmem:[%s165_s19 + $0x38] sm:$0xff] }
  0x10   : > { %323 = vmatmul.msk.f32.vlgmr.msra.gmra.mxu0 %vm184_vm0, %v171_v3  ;;  %325 = vmatmul.msk.f32.vlgmr.msra.gmra.mxu1 %vm184_vm0, %v173_v4  ;;  %v172_v7 = vld [vmem:[%s165_s19 + $0x8] sm:$0xff]  ;;  %v174_v8 = vld [vmem:[%s165_s19 + $0x18] sm:$0xff] }
  0x17   : > { %328 = vmatmul.msk.f32.gmra.mxu2 %vm184_vm0, %v176_v5  ;;  %330 = vmatmul.msk.f32.gmra.mxu3 %vm184_vm0, %v178_v6 }
  0x18   : > { %324 = vmatmul.msk.f32.gmra.mxu0 %vm184_vm0, %v172_v7  ;;  %326 = vmatmul.msk.f32.gmra.mxu1 %vm184_vm0, %v174_v8 }
  0x8d   : > { %v226_v10 = vpop.f32.mrf.mxu0  ;;  %v232_v11 = vpop.f32.mrf.mxu1 }
  0x8e   : > { %v227_v12 = vadd.f32 %v346_v9, %v226_v10  ;;  %v233_v13 = vadd.f32 %v346_v9, %v232_v11 }
  0x90   : > { %251 = vst.msk [vmem:[%s170_s24] sm:$0xff] %vm250_vm1, %v227_v12 }
  0x91   : > { %253 = vst.msk [vmem:[%s170_s24 + $0x10] sm:$0xff] %vm250_vm1, %v233_v13 }
  0x92   : > { %v238_v14 = vpop.f32.mrf.mxu2  ;;  %v244_v15 = vpop.f32.mrf.mxu3 }
  0x93   : > { %v239_v16 = vadd.f32 %v346_v9, %v238_v14  ;;  %v245_v17 = vadd.f32 %v346_v9, %v244_v15 }
  0x95   : > { %255 = vst.msk [vmem:[%s170_s24 + $0x20] sm:$0xff] %vm250_vm1, %v239_v16  ;;  %v229_v18 = vpop.f32.mrf.mxu0  ;;  %v235_v19 = vpop.f32.mrf.mxu1 }
  0x96   : > { %257 = vst.msk [vmem:[%s170_s24 + $0x30] sm:$0xff] %vm250_vm1, %v245_v17  ;;  %v230_v20 = vadd.f32 %v346_v9, %v229_v18  ;;  %v236_v21 = vadd.f32 %v346_v9, %v235_v19 }
  0x98   : > { %252 = vst.msk [vmem:[%s170_s24 + $0x8] sm:$0xff] %vm250_vm1, %v230_v20 }
  0x99   : > { %254 = vst.msk [vmem:[%s170_s24 + $0x18] sm:$0xff] %vm250_vm1, %v236_v21 }
  0x9a   : > { %v241_v22 = vpop.f32.mrf.mxu2  ;;  %v247_v23 = vpop.f32.mrf.mxu3 }
  0x9b   : > { %v242_v24 = vadd.f32 %v346_v9, %v241_v22  ;;  %v248_v25 = vadd.f32 %v346_v9, %v247_v23 }
  0x9d   : > { %256 = vst.msk [vmem:[%s170_s24 + $0x28] sm:$0xff] %vm250_vm1, %v242_v24 }
  0x9e   : > { %258 = vst.msk [vmem:[%s170_s24 + $0x38] sm:$0xff] %vm250_vm1, %v248_v25 }
  0x9f PF: > { %s13_s12 = sadd.s32 1, %s353_s12  }
  0xa0   : > { %p10_p4 = scmp.ge.s32.totalorder %s13_s12, 4  }
  0xa2   :  { %12 = sbr.rel (!%p10_p4) target bundleno = 1 (0x1), region = 62 }

// kernel: upblock_forward.3
= control target key start
LH: loop header
LB: loop body
LE: loop exit
PB: predicated region body
PF: predicated region fallthrough
CT: control target
= control target key end

     0   :  { %s6829_s27 = smov 0   ;;  %s12157_s0 = inlined_call_operand.vmem [shape: f32[2,16,16,4], index: 0, kind: input, shape index: {}]   ;;  %s12158_s1 = inlined_call_operand.vmem [shape: f32[2,16,16,4], index: 1, kind: input, shape index: {}]   ;;  %s12159_s2 = inlined_call_operand.vmem [shape: f32[72,4], index: 2, kind: input, shape index: {}]   ;;  %s12160_s3 = inlined_call_operand.vmem [shape: f32[36,4], index: 3, kind: input, shape index: {}]   ;;  %s12161_s4 = inlined_call_operand.vmem [shape: f32[36,4], index: 4, kind: input, shape index: {}]   ;;  %s12162_s5 = inlined_call_operand.vmem [shape: f32[2,4], index: 5, kind: input, shape index: {}]   ;;  %s12163_s6 = inlined_call_operand.vmem [shape: f32[2,4], index: 6, kind: input, shape index: {}]   ;;  %s12164_s7 = inlined_call_operand.vmem [shape: f32[2,4], index: 7, kind: input, shape index: {}]   ;;  %s12165_s8 = inlined_call_operand.vmem [shape: f32[2,16,16,4], index: 8, kind: output, shape index: {}]  }
   0x1 LB: > { %s6530_s28 = sadd.s32 4294967295, %s6769_s27   ;;  %p6534_p0 = scmp.ge.s32.totalorder %s6769_s27, 1  ;;  %s6769_s27 = sphi %s6829_s27, %s18_s27  }
   0x2   : > { %p272_p1 = scmp.lt.s32.totalorder %s6769_s27, 3 }
   0x4   : > { %p273_p2 = pnand %p6534_p0, %p272_p1 }
   0x6   : > { %276 = sbr.rel (%p273_p2) target bundleno = 3006 (0xbbe), region = 52 }
   0xb   : > { %p311_p3 = scmp.lt.s32.totalorder %s6530_s28, 1  ;;  %s6771_s11 = smov 4   ;;  %vm326_vm0 = vcmask 64512   ;;  %v12166_v21 = vmov 0.0   ;;  %vm574_vm1 = vcmask 31744   ;;  %vm329_vm2 = vcmask 58368  }
   0xc   : > { %337 = vst.msk [vmem:[#allocation2 + $0x48] sm:$0xff] %vm326_vm0, %v12166_v21  ;;  %s6773_s15 = smov 8   ;;  %s6774_s16 = smov 16   ;;  %vm1985_vm3 = vcmask 130048   ;;  %vm2051_vm4 = vcmask 261120   ;;  %vm2018_vm5 = vcmask 195584  }
   0xd   : > { %s13169_s28 = smov (!%p311_p3, %s6530_s28), 1  ;;  %338 = vst.msk [vmem:[#allocation2 + $0x50] sm:$0xff] %vm326_vm0, %v12166_v21  ;;  %s6775_s17 = smov 24   ;;  %vm2084_vm6 = vcmask 326656   ;;  %vm2150_vm7 = vcmask 457728   ;;  %vm2117_vm8 = vcmask 392192  }
   0xe   : > { %s6837_s29 = sshll.u32 %s13169_s28, 8  ;;  %327 = vst.msk [vmem:[#allocation2] sm:$0xff] %vm326_vm0, %v12166_v21  ;;  %s6776_s18 = smov 32   ;;  %vm2225_vm9 = vcmask 588800   ;;  %vm2183_vm10 = vcmask 523264   ;;  %vm2537_vm11 = vcmask 25600  }
   0xf   : > { %s6843_s10 = scalar_lea.vmem %s12158_s1, %s6837_s29  ;;  %328 = vst.msk [vmem:[#allocation2 + $0x8] sm:$0xff] %vm326_vm0, %v12166_v21  ;;  %s6991_s14 = scalar_lea.vmem %s12157_s0, %s6837_s29  ;;  %vm4297_vm12 = vcmask 1043456   ;;  %vm4000_vm13 = vcmask 97280   ;;  %vm4065_vm14 = vcmask 162816   ;;  %vm4130_vm15 = vcmask 228352  }
  0x10   : > { %v416_v0 = vld [vmem:[%s6843_s10 + $0x10] sm:$0xff]  ;;  %v414_v1 = vld [vmem:[%s6843_s10] sm:$0xff]  ;;  %v417_v3 = vld [vmem:[%s6843_s10 + $0x18] sm:$0xff]  ;;  %331 = vst.msk [vmem:[#allocation2 + $0x18] sm:$0xff] %vm326_vm0, %v12166_v21  ;;  %s6777_s19 = smov 40   ;;  %s6778_s20 = smov 48  }
  0x11   : > { %482 = vrot.lane.b32.xlu1 %v416_v0, %s6771_s11  ;;  %478 = vrot.lane.b32.xlu0 %v414_v1, %s6771_s11  ;;  %v418_v2 = vld [vmem:[%s6843_s10 + $0x20] sm:$0xff]  ;;  %v415_v4 = vld [vmem:[%s6843_s10 + $0x8] sm:$0xff]  ;;  %332 = vst.msk [vmem:[#allocation2 + $0x20] sm:$0xff] %vm326_vm0, %v12166_v21  ;;  %s6779_s21 = smov 56   ;;  %s6780_s22 = smov 64  }
  0x12   : > { %486 = vrot.lane.b32.xlu2 %v418_v2, %s6771_s11  ;;  %v419_v5 = vld [vmem:[%s6843_s10 + $0x28] sm:$0xff]  ;;  %v421_v6 = vld [vmem:[%s6843_s10 + $0x38] sm:$0xff]  ;;  %v420_v7 = vld [vmem:[%s6843_s10 + $0x30] sm:$0xff]  ;;  %334 = vst.msk [vmem:[#allocation2 + $0x30] sm:$0xff] %vm326_vm0, %v12166_v21  ;;  %s6782_s12 = smov 20   ;;  %s6783_s13 = smov 28  }
  0x13   : > { %v422_v8 = vld [vmem:[%s6843_s10 + $0x40] sm:$0xff]  ;;  %v424_v9 = vld [vmem:[%s6843_s10 + $0x50] sm:$0xff]  ;;  %v423_v10 = vld [vmem:[%s6843_s10 + $0x48] sm:$0xff]  ;;  %335 = vst.msk [vmem:[#allocation2 + $0x38] sm:$0xff] %vm326_vm0, %v12166_v21 }
  0x14   : > { %v425_v11 = vld [vmem:[%s6843_s10 + $0x58] sm:$0xff]  ;;  %v427_v12 = vld [vmem:[%s6843_s10 + $0x68] sm:$0xff]  ;;  %v426_v13 = vld [vmem:[%s6843_s10 + $0x60] sm:$0xff]  ;;  %340 = vst.msk [vmem:[#allocation2 + $0x60] sm:$0xff] %vm326_vm0, %v12166_v21 }
  0x15   : > { %v428_v14 = vld [vmem:[%s6843_s10 + $0x70] sm:$0xff]  ;;  %v430_v15 = vld [vmem:[%s6843_s10 + $0x80] sm:$0xff]  ;;  %v429_v16 = vld [vmem:[%s6843_s10 + $0x78] sm:$0xff]  ;;  %341 = vst.msk [vmem:[#allocation2 + $0x68] sm:$0xff] %vm326_vm0, %v12166_v21 }
  0x16   : > { %v431_v17 = vld [vmem:[%s6843_s10 + $0x88] sm:$0xff]  ;;  %v433_v18 = vld [vmem:[%s6843_s10 + $0x98] sm:$0xff]  ;;  %v432_v19 = vld [vmem:[%s6843_s10 + $0x90] sm:$0xff]  ;;  %343 = vst.msk [vmem:[#allocation2 + $0x78] sm:$0xff] %vm326_vm0, %v12166_v21 }
  0x17   : > { %v434_v20 = vld [vmem:[%s6843_s10 + $0xa0] sm:$0xff]  ;;  %v436_v22 = vld [vmem:[%s6843_s10 + $0xb0] sm:$0xff]  ;;  %v435_v23 = vld [vmem:[%s6843_s10 + $0xa8] sm:$0xff]  ;;  %344 = vst.msk [vmem:[#allocation2 + $0x80] sm:$0xff] %vm326_vm0, %v12166_v21 }
  0x18   : > { %v437_v24 = vld [vmem:[%s6843_s10 + $0xb8] sm:$0xff]  ;;  %v439_v25 = vld [vmem:[%s6843_s10 + $0xc8] sm:$0xff]  ;;  %v438_v26 = vld [vmem:[%s6843_s10 + $0xc0] sm:$0xff]  ;;  %346 = vst.msk [vmem:[#allocation2 + $0x90] sm:$0xff] %vm326_vm0, %v12166_v21 }
  0x19   : > { %484 = vrot.lane.b32.xlu1 %v417_v3, %s6771_s11  ;;  %480 = vrot.lane.b32.xlu0 %v415_v4, %s6771_s11  ;;  %347 = vst.msk [vmem:[#allocation2 + $0x98] sm:$0xff] %vm326_vm0, %v12166_v21  ;;  %v440_v27 = vld [vmem:[%s6843_s10 + $0xd0] sm:$0xff]  ;;  %v441_v28 = vld [vmem:[%s6843_s10 + $0xd8] sm:$0xff]  ;;  %v672_v37 = vld [vmem:[#allocation2 + $0x1] sm:$0xff] }
  0x1a   : > { %488 = vrot.lane.b32.xlu2 %v419_v5, %s6771_s11  ;;  %349 = vst.msk [vmem:[#allocation2 + $0xa8] sm:$0xff] %vm326_vm0, %v12166_v21  ;;  %v442_v29 = vld [vmem:[%s6843_s10 + $0xe0] sm:$0xff]  ;;  %v443_v30 = vld [vmem:[%s6843_s10 + $0xe8] sm:$0xff]  ;;  %v444_v31 = vld [vmem:[%s6843_s10 + $0xf0] sm:$0xff] }
  0x1b   : > { %350 = vst.msk [vmem:[#allocation2 + $0xb0] sm:$0xff] %vm326_vm0, %v12166_v21  ;;  %v386_v32 = vld [vmem:[%s6991_s14 + $0x20] sm:$0xff]  ;;  %v445_v33 = vld [vmem:[%s6843_s10 + $0xf8] sm:$0xff]  ;;  %v384_v41 = vld [vmem:[%s6991_s14 + $0x10] sm:$0xff]  ;;  %s6781_s10 = smov 12  }
  0x1c   : > { %352 = vst.msk [vmem:[#allocation2 + $0xc0] sm:$0xff] %vm326_vm0, %v12166_v21  ;;  %v382_v42 = vld [vmem:[%s6991_s14] sm:$0xff]  ;;  %v387_v53 = vld [vmem:[%s6991_s14 + $0x28] sm:$0xff]  ;;  %v385_v54 = vld [vmem:[%s6991_s14 + $0x18] sm:$0xff] }
  0x1d   : > { %353 = vst.msk [vmem:[#allocation2 + $0xc8] sm:$0xff] %vm326_vm0, %v12166_v21  ;;  %v383_v56 = vld [vmem:[%s6991_s14 + $0x8] sm:$0xff]  ;;  %v390_v60 = vld [vmem:[%s6991_s14 + $0x40] sm:$0xff]  ;;  %v389_v63 = vld [vmem:[%s6991_s14 + $0x38] sm:$0xff] }
  0x1e   : > { %355 = vst.msk [vmem:[#allocation2 + $0xd8] sm:$0xff] %vm326_vm0, %v12166_v21  ;;  %v388_v1 = vld [vmem:[%s6991_s14 + $0x30] sm:$0xff]  ;;  %v393_v3 = vld [vmem:[%s6991_s14 + $0x58] sm:$0xff] }
  0x1f   : > { %356 = vst.msk [vmem:[#allocation2 + $0xe0] sm:$0xff] %vm326_vm0, %v12166_v21  ;;  %v392_v5 = vld [vmem:[%s6991_s14 + $0x50] sm:$0xff] }
  0x20   : > { %358 = vst.msk [vmem:[#allocation2 + $0xf0] sm:$0xff] %vm326_vm0, %v12166_v21 }
  0x21   : > { %492 = vrot.lane.b32.xlu1 %v421_v6, %s6771_s11  ;;  %490 = vrot.lane.b32.xlu0 %v420_v7, %s6771_s11  ;;  %359 = vst.msk [vmem:[#allocation2 + $0xf8] sm:$0xff] %vm326_vm0, %v12166_v21  ;;  %v391_v7 = vld [vmem:[%s6991_s14 + $0x48] sm:$0xff] }
  0x22   : > { %494 = vrot.lane.b32.xlu2 %v422_v8, %s6771_s11  ;;  %361 = vst.msk [vmem:[#allocation2 + $0x108] sm:$0xff] %vm326_vm0, %v12166_v21 }
  0x23   : > { %362 = vst.msk [vmem:[#allocation2 + $0x110] sm:$0xff] %vm326_vm0, %v12166_v21 }
  0x24   : > { %364 = vst.msk [vmem:[#allocation2 + $0x120] sm:$0xff] %vm326_vm0, %v12166_v21 }
  0x25   : > { %365 = vst.msk [vmem:[#allocation2 + $0x128] sm:$0xff] %vm326_vm0, %v12166_v21 }
  0x26   : > { %367 = vst.msk [vmem:[#allocation2 + $0x138] sm:$0xff] %vm326_vm0, %v12166_v21 }
  0x27   : > { %368 = vst.msk [vmem:[#allocation2 + $0x140] sm:$0xff] %vm326_vm0, %v12166_v21 }
  0x28   : > { %370 = vst.msk [vmem:[#allocation2 + $0x150] sm:$0xff] %vm326_vm0, %v12166_v21 }
  0x29   : > { %498 = vrot.lane.b32.xlu1 %v424_v9, %s6771_s11  ;;  %496 = vrot.lane.b32.xlu0 %v423_v10, %s6771_s11  ;;  %371 = vst.msk [vmem:[#allocation2 + $0x158] sm:$0xff] %vm326_vm0, %v12166_v21  ;;  %v396_v9 = vld [vmem:[%s6991_s14 + $0x70] sm:$0xff] }
  0x2a   : > { %500 = vrot.lane.b32.xlu2 %v425_v11, %s6771_s11  ;;  %373 = vst.msk [vmem:[#allocation2 + $0x168] sm:$0xff] %vm326_vm0, %v12166_v21 }
  0x2b   : > { %374 = vst.msk [vmem:[#allocation2 + $0x170] sm:$0xff] %vm326_vm0, %v12166_v21 }
  0x2c   : > { %376 = vst.msk [vmem:[#allocation2 + $0x180] sm:$0xff] %vm326_vm0, %v12166_v21 }
  0x2d   : > { %377 = vst.msk [vmem:[#allocation2 + $0x188] sm:$0xff] %vm326_vm0, %v12166_v21 }
  0x2e   : > { %379 = vst.msk [vmem:[#allocation2 + $0x198] sm:$0xff] %vm326_vm0, %v12166_v21 }
  0x2f   : > { %380 = vst.msk [vmem:[#allocation2 + $0x1a0] sm:$0xff] %vm326_vm0, %v12166_v21 }
  0x30   : > { %2535 = vst.msk [vmem:[#allocation3] sm:$0xff] %vm574_vm1, %v12166_v21 }
  0x31   : > { %504 = vrot.lane.b32.xlu1 %v427_v12, %s6771_s11  ;;  %502 = vrot.lane.b32.xlu0 %v426_v13, %s6771_s11  ;;  %2536 = vst.msk [vmem:[#allocation3 + $0x8] sm:$0xff] %vm574_vm1, %v12166_v21  ;;  %v395_v12 = vld [vmem:[%s6991_s14 + $0x68] sm:$0xff] }
  0x32   : > { %506 = vrot.lane.b32.xlu2 %v428_v14, %s6771_s11  ;;  %2539 = vst.msk [vmem:[#allocation3 + $0x18] sm:$0xff] %vm574_vm1, %v12166_v21 }
  0x33   : > { %2540 = vst.msk [vmem:[#allocation3 + $0x20] sm:$0xff] %vm574_vm1, %v12166_v21 }
  0x34   : > { %2542 = vst.msk [vmem:[#allocation3 + $0x30] sm:$0xff] %vm574_vm1, %v12166_v21 }
  0x35   : > { %2543 = vst.msk [vmem:[#allocation3 + $0x38] sm:$0xff] %vm574_vm1, %v12166_v21 }
  0x36   : > { %2545 = vst.msk [vmem:[#allocation3 + $0x48] sm:$0xff] %vm574_vm1, %v12166_v21 }
  0x37   : > { %2546 = vst.msk [vmem:[#allocation3 + $0x50] sm:$0xff] %vm574_vm1, %v12166_v21 }
  0x38   : > { %2548 = vst.msk [vmem:[#allocation3 + $0x60] sm:$0xff] %vm574_vm1, %v12166_v21 }
  0x39   : > { %510 = vrot.lane.b32.xlu1 %v430_v15, %s6771_s11  ;;  %508 = vrot.lane.b32.xlu0 %v429_v16, %s6771_s11  ;;  %2549 = vst.msk [vmem:[#allocation3 + $0x68] sm:$0xff] %vm574_vm1, %v12166_v21  ;;  %v394_v15 = vld [vmem:[%s6991_s14 + $0x60] sm:$0xff] }
  0x3a   : > { %512 = vrot.lane.b32.xlu2 %v431_v17, %s6771_s11  ;;  %2551 = vst.msk [vmem:[#allocation3 + $0x78] sm:$0xff] %vm574_vm1, %v12166_v21 }
  0x3b   : > { %2552 = vst.msk [vmem:[#allocation3 + $0x80] sm:$0xff] %vm574_vm1, %v12166_v21 }
  0x3c   : > { %2554 = vst.msk [vmem:[#allocation3 + $0x90] sm:$0xff] %vm574_vm1, %v12166_v21 }
  0x3d   : > { %2555 = vst.msk [vmem:[#allocation3 + $0x98] sm:$0xff] %vm574_vm1, %v12166_v21 }
  0x3e   : > { %2557 = vst.msk [vmem:[#allocation3 + $0xa8] sm:$0xff] %vm574_vm1, %v12166_v21 }
  0x3f   : > { %2558 = vst.msk [vmem:[#allocation3 + $0xb0] sm:$0xff] %vm574_vm1, %v12166_v21 }
  0x40   : > { %2560 = vst.msk [vmem:[#allocation3 + $0xc0] sm:$0xff] %vm574_vm1, %v12166_v21 }
  0x41   : > { %516 = vrot.lane.b32.xlu1 %v433_v18, %s6771_s11  ;;  %514 = vrot.lane.b32.xlu0 %v432_v19, %s6771_s11  ;;  %2561 = vst.msk [vmem:[#allocation3 + $0xc8] sm:$0xff] %vm574_vm1, %v12166_v21  ;;  %v399_v18 = vld [vmem:[%s6991_s14 + $0x88] sm:$0xff] }
  0x42   : > { %518 = vrot.lane.b32.xlu2 %v434_v20, %s6771_s11  ;;  %2563 = vst.msk [vmem:[#allocation3 + $0xd8] sm:$0xff] %vm574_vm1, %v12166_v21 }
  0x43   : > { %2564 = vst.msk [vmem:[#allocation3 + $0xe0] sm:$0xff] %vm574_vm1, %v12166_v21 }
  0x44   : > { %2566 = vst.msk [vmem:[#allocation3 + $0xf0] sm:$0xff] %vm574_vm1, %v12166_v21 }
  0x45   : > { %2567 = vst.msk [vmem:[#allocation3 + $0xf8] sm:$0xff] %vm574_vm1, %v12166_v21 }
  0x46   : > { %2569 = vst.msk [vmem:[#allocation3 + $0x108] sm:$0xff] %vm574_vm1, %v12166_v21 }
  0x47   : > { %2570 = vst.msk [vmem:[#allocation3 + $0x110] sm:$0xff] %vm574_vm1, %v12166_v21 }
  0x48   : > { %2572 = vst.msk [vmem:[#allocation3 + $0x120] sm:$0xff] %vm574_vm1, %v12166_v21 }
  0x49   : > { %522 = vrot.lane.b32.xlu1 %v436_v22, %s6771_s11  ;;  %520 = vrot.lane.b32.xlu0 %v435_v23, %s6771_s11  ;;  %2573 = vst.msk [vmem:[#allocation3 + $0x128] sm:$0xff] %vm574_vm1, %v12166_v21  ;;  %v402_v22 = vld [vmem:[%s6991_s14 + $0xa0] sm:$0xff] }
  0x4a   : > { %524 = vrot.lane.b32.xlu2 %v437_v24, %s6771_s11  ;;  %2575 = vst.msk [vmem:[#allocation3 + $0x138] sm:$0xff] %vm574_vm1, %v12166_v21 }
  0x4b   : > { %2576 = vst.msk [vmem:[#allocation3 + $0x140] sm:$0xff] %vm574_vm1, %v12166_v21 }
  0x4c   : > { %2578 = vst.msk [vmem:[#allocation3 + $0x150] sm:$0xff] %vm574_vm1, %v12166_v21 }
  0x4d   : > { %2579 = vst.msk [vmem:[#allocation3 + $0x158] sm:$0xff] %vm574_vm1, %v12166_v21 }
  0x4e   : > { %2581 = vst.msk [vmem:[#allocation3 + $0x168] sm:$0xff] %vm574_vm1, %v12166_v21 }
  0x4f   : > { %2582 = vst.msk [vmem:[#allocation3 + $0x170] sm:$0xff] %vm574_vm1, %v12166_v21 }
  0x50   : > { %2584 = vst.msk [vmem:[#allocation3 + $0x180] sm:$0xff] %vm574_vm1, %v12166_v21 }
  0x51   : > { %528 = vrot.lane.b32.xlu1 %v439_v25, %s6771_s11  ;;  %526 = vrot.lane.b32.xlu0 %v438_v26, %s6771_s11  ;;  %2585 = vst.msk [vmem:[#allocation3 + $0x188] sm:$0xff] %vm574_vm1, %v12166_v21 }
  0x52   : > { %530 = vrot.lane.b32.xlu2 %v440_v27, %s6771_s11  ;;  %2587 = vst.msk [vmem:[#allocation3 + $0x198] sm:$0xff] %vm574_vm1, %v12166_v21  ;;  %v398_v27 = vld [vmem:[%s6991_s14 + $0x80] sm:$0xff] }
  0x53   : > { %2588 = vst.msk [vmem:[#allocation3 + $0x1a0] sm:$0xff] %vm574_vm1, %v12166_v21 }
  0x54   : > { %330 = vst.msk [vmem:[#allocation2 + $0x10] sm:$0x3] %vm329_vm2, %v12166_v21 }
  0x55   : > { %333 = vst.msk [vmem:[#allocation2 + $0x28] sm:$0x3] %vm329_vm2, %v12166_v21 }
  0x56   : > { %336 = vst.msk [vmem:[#allocation2 + $0x40] sm:$0x3] %vm329_vm2, %v12166_v21 }
  0x57   : > { %339 = vst.msk [vmem:[#allocation2 + $0x58] sm:$0x3] %vm329_vm2, %v12166_v21 }
  0x58   : > { %342 = vst.msk [vmem:[#allocation2 + $0x70] sm:$0x3] %vm329_vm2, %v12166_v21 }
  0x59   : > { %532 = vrot.lane.b32.xlu0 %v441_v28, %s6771_s11  ;;  %534 = vrot.lane.b32.xlu1 %v442_v29, %s6771_s11  ;;  %345 = vst.msk [vmem:[#allocation2 + $0x88] sm:$0x3] %vm329_vm2, %v12166_v21  ;;  %v397_v28 = vld [vmem:[%s6991_s14 + $0x78] sm:$0xff] }
  0x5a   : > { %536 = vrot.lane.b32.xlu2 %v443_v30, %s6771_s11  ;;  %348 = vst.msk [vmem:[#allocation2 + $0xa0] sm:$0x3] %vm329_vm2, %v12166_v21  ;;  %v405_v30 = vld [vmem:[%s6991_s14 + $0xb8] sm:$0xff] }
  0x5b   : > { %v673_v51 = vld [vmem:[#allocation2 + $0x9] sm:$0xff]  ;;  %351 = vst.msk [vmem:[#allocation2 + $0xb8] sm:$0x3] %vm329_vm2, %v12166_v21 }
  0x5c   : > { %354 = vst.msk [vmem:[#allocation2 + $0xd0] sm:$0x3] %vm329_vm2, %v12166_v21 }
  0x5d   : > { %357 = vst.msk [vmem:[#allocation2 + $0xe8] sm:$0x3] %vm329_vm2, %v12166_v21 }
  0x5e   : > { %360 = vst.msk [vmem:[#allocation2 + $0x100] sm:$0x3] %vm329_vm2, %v12166_v21 }
  0x5f   : > { %363 = vst.msk [vmem:[#allocation2 + $0x118] sm:$0x3] %vm329_vm2, %v12166_v21 }
  0x60   : > { %366 = vst.msk [vmem:[#allocation2 + $0x130] sm:$0x3] %vm329_vm2, %v12166_v21 }
  0x61   : > { %538 = vrot.lane.b32.xlu0 %v444_v31, %s6771_s11  ;;  %540 = vrot.lane.b32.xlu1 %v445_v33, %s6771_s11  ;;  %369 = vst.msk [vmem:[#allocation2 + $0x148] sm:$0x3] %vm329_vm2, %v12166_v21 }
  0x62   : > { %961 = vrot.lane.b32.xlu2 %v672_v37, %s6773_s15  ;;  %372 = vst.msk [vmem:[#allocation2 + $0x160] sm:$0x3] %vm329_vm2, %v12166_v21 }
  0x63   : > { %375 = vst.msk [vmem:[#allocation2 + $0x178] sm:$0x3] %vm329_vm2, %v12166_v21 }
  0x64   : > { %378 = vst.msk [vmem:[#allocation2 + $0x190] sm:$0x3] %vm329_vm2, %v12166_v21 }
  0x65   : > { %381 = vst.msk [vmem:[#allocation2 + $0x1a8] sm:$0x3] %vm329_vm2, %v12166_v21  ;;  %vm4200_vm2 = vcmask 293888  }
  0x69   : > { %963 = vrot.lane.b32.xlu0 %v673_v51, %s6773_s15 }
  0x6c   : > { %v487_v34 = vpop.permute.xlu2 %486 }
  0x6d   : > { %v579_v35 = vsel %vm574_vm1, %v386_v32, %v487_v34 }
  0x6e   : > { %612 = vst.msk [vmem:[#allocation2 + $0x49] sm:$0xff] %vm326_vm0, %v579_v35 }
  0x74   : > { %v489_v36 = vpop.permute.xlu2 %488 }
  0x75   : > { %v580_v59 = vsel %vm574_vm1, %v387_v53, %v489_v36  ;;  %v404_v53 = vld [vmem:[%s6991_s14 + $0xb0] sm:$0xff] }
  0x76   : > { %613 = vst.msk [vmem:[#allocation2 + $0x51] sm:$0xff] %vm326_vm0, %v580_v59 }
  0x7c   : > { %v495_v40 = vpop.permute.xlu2 %494 }
  0x7d   : > { %v583_v2 = vsel %vm574_vm1, %v390_v60, %v495_v40  ;;  %v7144_v19 = vld [vmem:[#allocation2 + $0x51] sm:$0xff] }
  0x7e   : > { %616 = vst.msk [vmem:[#allocation2 + $0x79] sm:$0xff] %vm326_vm0, %v583_v2  ;;  %v401_v40 = vld [vmem:[%s6991_s14 + $0x98] sm:$0xff]  ;;  %v407_v2 = vld [vmem:[%s6991_s14 + $0xc8] sm:$0xff] }
  0x83   : > { %v483_v38 = vpop.permute.xlu1 %482  ;;  %v479_v39 = vpop.permute.xlu0 %478 }
  0x84   : > { %v577_v43 = vsel %vm574_vm1, %v384_v41, %v483_v38  ;;  %v575_v44 = vsel %vm574_vm1, %v382_v42, %v479_v39  ;;  %v501_v47 = vpop.permute.xlu2 %500  ;;  %v7179_v39 = vld [vmem:[#allocation2 + $0x49] sm:$0xff] }
  0x85   : > { %610 = vst.msk [vmem:[#allocation2 + $0x31] sm:$0xff] %vm326_vm0, %v577_v43  ;;  %v586_v8 = vsel %vm574_vm1, %v393_v3, %v501_v47  ;;  %v7170_v33 = vld [vmem:[#allocation2 + $0x79] sm:$0xff]  ;;  %v400_v41 = vld [vmem:[%s6991_s14 + $0x90] sm:$0xff] }
  0x86   : > { %608 = vst.msk [vmem:[#allocation2 + $0x19] sm:$0xff] %vm326_vm0, %v575_v44  ;;  %v408_v42 = vld [vmem:[%s6991_s14 + $0xd0] sm:$0xff]  ;;  %v406_v3 = vld [vmem:[%s6991_s14 + $0xc0] sm:$0xff] }
  0x87   : > { %619 = vst.msk [vmem:[#allocation2 + $0x99] sm:$0xff] %vm326_vm0, %v586_v8 }
  0x8b   : > { %v485_v45 = vpop.permute.xlu1 %484  ;;  %v481_v46 = vpop.permute.xlu0 %480 }
  0x8c   : > { %v507_v52 = vpop.permute.xlu2 %506  ;;  %v7104_v55 = vld [vmem:[#allocation2 + $0x31] sm:$0xff]  ;;  %v578_v62 = vsel %vm574_vm1, %v385_v54, %v485_v45  ;;  %v576_v0 = vsel %vm574_vm1, %v383_v56, %v481_v46  ;;  %v403_v54 = vld [vmem:[%s6991_s14 + $0xa8] sm:$0xff] }
  0x8d   : > { %v7083_v48 = vld [vmem:[#allocation2 + $0x19] sm:$0xff]  ;;  %969 = vrot.lane.b32.xlu0 %v7104_v55, %s6773_s15  ;;  %611 = vst.msk [vmem:[#allocation2 + $0x39] sm:$0xff] %vm326_vm0, %v578_v62  ;;  %v589_v17 = vsel %vm574_vm1, %v396_v9, %v507_v52  ;;  %v411_v56 = vld [vmem:[%s6991_s14 + $0xe8] sm:$0xff] }
  0x8e   : > { %965 = vrot.lane.b32.xlu1 %v7083_v48, %s6773_s15  ;;  %609 = vst.msk [vmem:[#allocation2 + $0x21] sm:$0xff] %vm326_vm0, %v576_v0  ;;  %v7192_v45 = vld [vmem:[#allocation2 + $0x99] sm:$0xff] }
  0x8f   : > { %622 = vst.msk [vmem:[#allocation2 + $0xc1] sm:$0xff] %vm326_vm0, %v589_v17 }
  0x93   : > { %v493_v49 = vpop.permute.xlu1 %492  ;;  %v491_v50 = vpop.permute.xlu0 %490 }
  0x94   : > { %v513_v61 = vpop.permute.xlu2 %512  ;;  %v582_v4 = vsel %vm574_vm1, %v389_v63, %v493_v49  ;;  %v581_v6 = vsel %vm574_vm1, %v388_v1, %v491_v50  ;;  %v7151_v23 = vld [vmem:[#allocation2 + $0x39] sm:$0xff] }
  0x95   : > { %615 = vst.msk [vmem:[#allocation2 + $0x69] sm:$0xff] %vm326_vm0, %v582_v4  ;;  %975 = vrot.lane.b32.xlu0 %v7144_v19, %s6773_s15  ;;  %v7155_v25 = vld [vmem:[#allocation2 + $0x21] sm:$0xff]  ;;  %v592_v26 = vsel %vm574_vm1, %v399_v18, %v513_v61 }
  0x96   : > { %614 = vst.msk [vmem:[#allocation2 + $0x61] sm:$0xff] %vm326_vm0, %v581_v6  ;;  %971 = vrot.lane.b32.xlu1 %v7151_v23, %s6773_s15  ;;  %967 = vrot.lane.b32.xlu2 %v7155_v25, %s6773_s15  ;;  %v7213_v59 = vld [vmem:[#allocation2 + $0xc1] sm:$0xff] }
  0x97   : > { %625 = vst.msk [vmem:[#allocation2 + $0xe1] sm:$0xff] %vm326_vm0, %v592_v26 }
  0x9b   : > { %v499_v57 = vpop.permute.xlu1 %498  ;;  %v497_v58 = vpop.permute.xlu0 %496 }
  0x9c   : > { %v585_v10 = vsel %vm574_vm1, %v392_v5, %v499_v57  ;;  %v584_v14 = vsel %vm574_vm1, %v391_v7, %v497_v58  ;;  %v519_v16 = vpop.permute.xlu2 %518  ;;  %v7200_v52 = vld [vmem:[#allocation2 + $0x69] sm:$0xff] }
  0x9d   : > { %618 = vst.msk [vmem:[#allocation2 + $0x91] sm:$0xff] %vm326_vm0, %v585_v10  ;;  %v595_v29 = vsel %vm574_vm1, %v402_v22, %v519_v16  ;;  %v7175_v37 = vld [vmem:[#allocation2 + $0x61] sm:$0xff]  ;;  %981 = vrot.lane.b32.xlu0 %v7170_v33, %s6773_s15 }
  0x9e   : > { %617 = vst.msk [vmem:[#allocation2 + $0x81] sm:$0xff] %vm326_vm0, %v584_v14  ;;  %977 = vrot.lane.b32.xlu1 %v7175_v37, %s6773_s15  ;;  %973 = vrot.lane.b32.xlu2 %v7179_v39, %s6773_s15  ;;  %v7233_v6 = vld [vmem:[#allocation2 + $0xe1] sm:$0xff] }
  0x9f   : > { %628 = vst.msk [vmem:[#allocation2 + $0x109] sm:$0xff] %vm326_vm0, %v595_v29  ;;  %v7419_v21 = vld [vmem:[#allocation2 + $0xe2] sm:$0xff] }
  0xa3   : > { %v505_v11 = vpop.permute.xlu1 %504  ;;  %v503_v13 = vpop.permute.xlu0 %502 }
  0xa4   : > { %v588_v20 = vsel %vm574_vm1, %v395_v12, %v505_v11  ;;  %v587_v24 = vsel %vm574_vm1, %v394_v15, %v503_v13  ;;  %v525_v36 = vpop.permute.xlu2 %524  ;;  %v7221_v1 = vld [vmem:[#allocation2 + $0x91] sm:$0xff]  ;;  %v410_v12 = vld [vmem:[%s6991_s14 + $0xe0] sm:$0xff] }
  0xa5   : > { %621 = vst.msk [vmem:[#allocation2 + $0xb1] sm:$0xff] %vm326_vm0, %v588_v20  ;;  %v598_v38 = vsel %vm574_vm1, %v405_v30, %v525_v36  ;;  %v7196_v50 = vld [vmem:[#allocation2 + $0x81] sm:$0xff]  ;;  %987 = vrot.lane.b32.xlu0 %v7192_v45, %s6773_s15  ;;  %v409_v11 = vld [vmem:[%s6991_s14 + $0xd8] sm:$0xff] }
  0xa6   : > { %620 = vst.msk [vmem:[#allocation2 + $0xa9] sm:$0xff] %vm326_vm0, %v587_v24  ;;  %983 = vrot.lane.b32.xlu1 %v7196_v50, %s6773_s15  ;;  %979 = vrot.lane.b32.xlu2 %v7200_v52, %s6773_s15  ;;  %v7251_v15 = vld [vmem:[#allocation2 + $0x109] sm:$0xff] }
  0xa7   : > { %631 = vst.msk [vmem:[#allocation2 + $0x129] sm:$0xff] %vm326_vm0, %v598_v38 }
  0xab   : > { %v511_v31 = vpop.permute.xlu1 %510  ;;  %v509_v32 = vpop.permute.xlu0 %508 }
  0xac   : > { %v591_v34 = vsel %vm574_vm1, %v398_v27, %v511_v31  ;;  %v590_v35 = vsel %vm574_vm1, %v397_v28, %v509_v32  ;;  %v531_v49 = vpop.permute.xlu2 %530  ;;  %v7240_v10 = vld [vmem:[#allocation2 + $0xb1] sm:$0xff] }
  0xad   : > { %624 = vst.msk [vmem:[#allocation2 + $0xd9] sm:$0xff] %vm326_vm0, %v591_v34  ;;  %v601_v51 = vsel %vm574_vm1, %v408_v42, %v531_v49  ;;  %v7217_v63 = vld [vmem:[#allocation2 + $0xa9] sm:$0xff]  ;;  %993 = vrot.lane.b32.xlu0 %v7213_v59, %s6773_s15 }
  0xae   : > { %623 = vst.msk [vmem:[#allocation2 + $0xc9] sm:$0xff] %vm326_vm0, %v590_v35  ;;  %989 = vrot.lane.b32.xlu1 %v7217_v63, %s6773_s15  ;;  %985 = vrot.lane.b32.xlu2 %v7221_v1, %s6773_s15  ;;  %v7267_v22 = vld [vmem:[#allocation2 + $0x129] sm:$0xff] }
  0xaf   : > { %634 = vst.msk [vmem:[#allocation2 + $0x151] sm:$0xff] %vm326_vm0, %v601_v51  ;;  %v412_v31 = vld [vmem:[%s6991_s14 + $0xf0] sm:$0xff]  ;;  %v704_v42 = vld [vmem:[#allocation2 + $0x2] sm:$0xff] }
  0xb0   : > { %v7322_v49 = vld [vmem:[#allocation2 + $0x22] sm:$0xff] }
  0xb3   : > { %v517_v43 = vpop.permute.xlu1 %516  ;;  %v515_v44 = vpop.permute.xlu0 %514 }
  0xb4   : > { %v594_v46 = vsel %vm574_vm1, %v401_v40, %v517_v43  ;;  %v593_v47 = vsel %vm574_vm1, %v400_v41, %v515_v44  ;;  %v537_v62 = vpop.permute.xlu2 %536  ;;  %v7258_v20 = vld [vmem:[#allocation2 + $0xd9] sm:$0xff] }
  0xb5   : > { %627 = vst.msk [vmem:[#allocation2 + $0xf9] sm:$0xff] %vm326_vm0, %v594_v46  ;;  %v604_v0 = vsel %vm574_vm1, %v411_v56, %v537_v62  ;;  %v7237_v9 = vld [vmem:[#allocation2 + $0xc9] sm:$0xff]  ;;  %999 = vrot.lane.b32.xlu0 %v7233_v6, %s6773_s15  ;;  %v413_v40 = vld [vmem:[%s6991_s14 + $0xf8] sm:$0xff] }
  0xb6   : > { %626 = vst.msk [vmem:[#allocation2 + $0xf1] sm:$0xff] %vm326_vm0, %v593_v47  ;;  %995 = vrot.lane.b32.xlu1 %v7237_v9, %s6773_s15  ;;  %991 = vrot.lane.b32.xlu2 %v7240_v10, %s6773_s15  ;;  %v7279_v27 = vld [vmem:[#allocation2 + $0x151] sm:$0xff]  ;;  %v7311_v44 = vld [vmem:[#allocation2 + $0x1a] sm:$0xff] }
  0xb7   : > { %637 = vst.msk [vmem:[#allocation2 + $0x171] sm:$0xff] %vm326_vm0, %v604_v0  ;;  %v705_v46 = vld [vmem:[#allocation2 + $0xa] sm:$0xff]  ;;  %v7318_v47 = vld [vmem:[#allocation2 + $0x3a] sm:$0xff]  ;;  %v7335_v56 = vld [vmem:[#allocation2 + $0x32] sm:$0xff] }
  0xb8   : > { %v7351_v62 = vld [vmem:[#allocation2 + $0x52] sm:$0xff] }
  0xbb   : > { %v523_v57 = vpop.permute.xlu1 %522  ;;  %v521_v58 = vpop.permute.xlu0 %520 }
  0xbc   : > { %v597_v60 = vsel %vm574_vm1, %v404_v53, %v523_v57  ;;  %v596_v61 = vsel %vm574_vm1, %v403_v54, %v521_v58  ;;  %v7271_v26 = vld [vmem:[#allocation2 + $0xf9] sm:$0xff]  ;;  %v7327_v51 = vpop.permute.xlu2 %961  ;;  %v7329_v53 = vld [vmem:[#allocation2 + $0x62] sm:$0xff]  ;;  %v7333_v54 = vld [vmem:[#allocation2 + $0x4a] sm:$0xff] }
  0xbd   : > { %630 = vst.msk [vmem:[#allocation2 + $0x121] sm:$0xff] %vm326_vm0, %v597_v60  ;;  %v7255_v18 = vld [vmem:[#allocation2 + $0xf1] sm:$0xff]  ;;  %1005 = vrot.lane.b32.xlu0 %v7251_v15, %s6773_s15  ;;  %v7343_v58 = vld [vmem:[#allocation2 + $0x82] sm:$0xff] }
  0xbe   : > { %629 = vst.msk [vmem:[#allocation2 + $0x111] sm:$0xff] %vm326_vm0, %v596_v61  ;;  %1001 = vrot.lane.b32.xlu1 %v7255_v18, %s6773_s15  ;;  %997 = vrot.lane.b32.xlu2 %v7258_v20, %s6773_s15  ;;  %v7294_v34 = vld [vmem:[#allocation2 + $0x171] sm:$0xff] }
  0xbf   : > { %12225 = vst [vmem:[#allocation4_spill] sm:$0xff] %v7327_v51  ;;  %v7347_v60 = vld [vmem:[#allocation2 + $0x6a] sm:$0xff] }
  0xc3   : > { %v529_v4 = vpop.permute.xlu1 %528  ;;  %v527_v5 = vpop.permute.xlu0 %526 }
  0xc4   : > { %v600_v7 = vsel %vm574_vm1, %v407_v2, %v529_v4  ;;  %v599_v8 = vsel %vm574_vm1, %v406_v3, %v527_v5  ;;  %v7283_v29 = vld [vmem:[#allocation2 + $0x121] sm:$0xff]  ;;  %v7359_v2 = vld [vmem:[#allocation2 + $0xaa] sm:$0xff]  ;;  %v7363_v3 = vld [vmem:[#allocation2 + $0x92] sm:$0xff] }
  0xc5   : > { %633 = vst.msk [vmem:[#allocation2 + $0x141] sm:$0xff] %vm326_vm0, %v600_v7  ;;  %v7269_v24 = vld [vmem:[#allocation2 + $0x111] sm:$0xff]  ;;  %1011 = vrot.lane.b32.xlu0 %v7267_v22, %s6773_s15  ;;  %v7367_v5 = vld [vmem:[#allocation2 + $0x7a] sm:$0xff] }
  0xc6   : > { %632 = vst.msk [vmem:[#allocation2 + $0x139] sm:$0xff] %vm326_vm0, %v599_v8  ;;  %1007 = vrot.lane.b32.xlu1 %v7269_v24, %s6773_s15  ;;  %1003 = vrot.lane.b32.xlu2 %v7271_v26, %s6773_s15 }
  0xcb   : > { %v533_v13 = vpop.permute.xlu0 %532  ;;  %v535_v14 = vpop.permute.xlu1 %534 }
  0xcc   : > { %v602_v16 = vsel %vm574_vm1, %v409_v11, %v533_v13  ;;  %v603_v17 = vsel %vm574_vm1, %v410_v12, %v535_v14  ;;  %v7298_v36 = vld [vmem:[#allocation2 + $0x141] sm:$0xff]  ;;  %v7377_v11 = vld [vmem:[#allocation2 + $0xca] sm:$0xff]  ;;  %v7381_v12 = vld [vmem:[#allocation2 + $0xb2] sm:$0xff] }
  0xcd   : > { %635 = vst.msk [vmem:[#allocation2 + $0x159] sm:$0xff] %vm326_vm0, %v602_v16  ;;  %v7281_v28 = vld [vmem:[#allocation2 + $0x139] sm:$0xff]  ;;  %1017 = vrot.lane.b32.xlu0 %v7279_v27, %s6773_s15 }
  0xce   : > { %636 = vst.msk [vmem:[#allocation2 + $0x169] sm:$0xff] %vm326_vm0, %v603_v17  ;;  %1013 = vrot.lane.b32.xlu1 %v7281_v28, %s6773_s15  ;;  %1009 = vrot.lane.b32.xlu2 %v7283_v29, %s6773_s15  ;;  %v7383_v13 = vld [vmem:[#allocation2 + $0x9a] sm:$0xff] }
  0xd3   : > { %v539_v30 = vpop.permute.xlu0 %538  ;;  %v541_v38 = vpop.permute.xlu1 %540 }
  0xd4   : > { %v605_v32 = vsel %vm574_vm1, %v412_v31, %v539_v30  ;;  %v7296_v35 = vld [vmem:[#allocation2 + $0x159] sm:$0xff]  ;;  %v606_v41 = vsel %vm574_vm1, %v413_v40, %v541_v38 }
  0xd5   : > { %638 = vst.msk [vmem:[#allocation2 + $0x181] sm:$0xff] %vm326_vm0, %v605_v32  ;;  %1023 = vrot.lane.b32.xlu0 %v7294_v34, %s6773_s15  ;;  %v7309_v43 = vld [vmem:[#allocation2 + $0x169] sm:$0xff]  ;;  %v7395_v30 = vld [vmem:[#allocation2 + $0xf2] sm:$0xff]  ;;  %v7399_v31 = vld [vmem:[#allocation2 + $0xda] sm:$0xff] }
  0xd6   : > { %1019 = vrot.lane.b32.xlu1 %v7296_v35, %s6773_s15  ;;  %1015 = vrot.lane.b32.xlu2 %v7298_v36, %s6773_s15  ;;  %639 = vst.msk [vmem:[#allocation2 + $0x189] sm:$0xff] %vm326_vm0, %v606_v41  ;;  %v7401_v32 = vld [vmem:[#allocation2 + $0xc2] sm:$0xff] }
  0xdb   : > { %v7349_v61 = vpop.permute.xlu0 %963 }
  0xdc   : > { %12227 = vst [vmem:[#allocation6_spill] sm:$0xff] %v7349_v61  ;;  %v7470_v61 = vld [vmem:[#allocation2 + $0x152] sm:$0xff] }
  0xdd   : > { %1093 = vrot.lane.b32.xlu0 %v7311_v44, %s6774_s16 }
  0xde   : > { %1089 = vrot.lane.b32.xlu1 %v704_v42, %s6774_s16  ;;  %1021 = vrot.lane.b32.xlu2 %v7309_v43, %s6773_s15  ;;  %v7413_v42 = vld [vmem:[#allocation2 + $0x112] sm:$0xff] }
  0xe5   : > { %1099 = vrot.lane.b32.xlu0 %v7318_v47, %s6774_s16 }
  0xe6   : > { %1095 = vrot.lane.b32.xlu1 %v7322_v49, %s6774_s16  ;;  %1091 = vrot.lane.b32.xlu2 %v705_v46, %s6774_s16  ;;  %v7417_v46 = vld [vmem:[#allocation2 + $0xfa] sm:$0xff] }
  0xed   : > { %1105 = vrot.lane.b32.xlu0 %v7329_v53, %s6774_s16 }
  0xee   : > { %1101 = vrot.lane.b32.xlu1 %v7333_v54, %s6774_s16  ;;  %1097 = vrot.lane.b32.xlu2 %v7335_v56, %s6774_s16 }
  0xf0   : > { %v7341_v57 = vpop.permute.xlu2 %967 }
  0xf1   : > { %12226 = vst [vmem:[#allocation5_spill] sm:$0xff] %v7341_v57  ;;  %v642_v57 = vld [vmem:[#allocation2 + $0x18] sm:$0xff] }
  0xf5   : > { %1111 = vrot.lane.b32.xlu0 %v7343_v58, %s6774_s16 }
  0xf6   : > { %1107 = vrot.lane.b32.xlu1 %v7347_v60, %s6774_s16  ;;  %1103 = vrot.lane.b32.xlu2 %v7351_v62, %s6774_s16 }
  0xf8   : > { %v7357_v0 = vpop.permute.xlu2 %973 }
  0xf9   : > { %12228 = vst [vmem:[#allocation7_spill] sm:$0xff] %v7357_v0  ;;  %v7449_v0 = vld [vmem:[#allocation2 + $0x15a] sm:$0xff] }
  0xfa   : > { %12244 = vst [vmem:[#allocation23_spill] sm:$0xff] %v7449_v0 }
  0xfd   : > { %1117 = vrot.lane.b32.xlu0 %v7359_v2, %s6774_s16 }
  0xfe   : > { %1113 = vrot.lane.b32.xlu1 %v7363_v3, %s6774_s16  ;;  %1109 = vrot.lane.b32.xlu2 %v7367_v5, %s6774_s16 }
  0xff   : > { %v7365_v4 = vpop.permute.xlu0 %969 }
 0x100   : > { %12229 = vst [vmem:[#allocation8_spill] sm:$0xff] %v7365_v4  ;;  %v7371_v7 = vpop.permute.xlu1 %965  ;;  %v7375_v8 = vpop.permute.xlu2 %979  ;;  %v7455_v4 = vld [vmem:[#allocation2 + $0x12a] sm:$0xff] }
 0x101   : > { %12230 = vst [vmem:[#allocation9_spill] sm:$0xff] %v7371_v7  ;;  %v7468_v7 = vld [vmem:[#allocation2 + $0x16a] sm:$0xff] }
 0x102   : > { %12231 = vst [vmem:[#allocation10_spill] sm:$0xff] %v7375_v8  ;;  %v7431_v8 = vld [vmem:[#allocation2 + $0x13a] sm:$0xff] }
 0x103   : > { %12249 = vst [vmem:[#allocation28_spill] sm:$0xff] %v7468_v7 }
 0x105   : > { %1123 = vrot.lane.b32.xlu0 %v7377_v11, %s6774_s16 }
 0x106   : > { %1119 = vrot.lane.b32.xlu1 %v7381_v12, %s6774_s16  ;;  %1115 = vrot.lane.b32.xlu2 %v7383_v13, %s6774_s16 }
 0x107   : > { %v7389_v14 = vpop.permute.xlu0 %975 }
 0x108   : > { %12232 = vst [vmem:[#allocation11_spill] sm:$0xff] %v7389_v14  ;;  %v7391_v16 = vpop.permute.xlu1 %971  ;;  %v7393_v17 = vpop.permute.xlu2 %985  ;;  %v7437_v14 = vld [vmem:[#allocation2 + $0x10a] sm:$0xff] }
 0x109   : > { %12233 = vst [vmem:[#allocation12_spill] sm:$0xff] %v7391_v16  ;;  %v7453_v16 = vld [vmem:[#allocation2 + $0x142] sm:$0xff] }
 0x10a   : > { %12234 = vst [vmem:[#allocation13_spill] sm:$0xff] %v7393_v17 }
 0x10b   : > { %12245 = vst [vmem:[#allocation24_spill] sm:$0xff] %v7453_v16 }
 0x10d   : > { %1129 = vrot.lane.b32.xlu0 %v7395_v30, %s6774_s16 }
 0x10e   : > { %1125 = vrot.lane.b32.xlu1 %v7399_v31, %s6774_s16  ;;  %1121 = vrot.lane.b32.xlu2 %v7401_v32, %s6774_s16 }
 0x10f   : > { %v7407_v38 = vpop.permute.xlu0 %981 }
 0x110   : > { %12235 = vst [vmem:[#allocation14_spill] sm:$0xff] %v7407_v38  ;;  %v7409_v40 = vpop.permute.xlu1 %977  ;;  %v7411_v41 = vpop.permute.xlu2 %991 }
 0x111   : > { %12236 = vst [vmem:[#allocation15_spill] sm:$0xff] %v7409_v40  ;;  %v7435_v40 = vld [vmem:[#allocation2 + $0x122] sm:$0xff] }
 0x112   : > { %12237 = vst [vmem:[#allocation16_spill] sm:$0xff] %v7411_v41 }
 0x115   : > { %1135 = vrot.lane.b32.xlu0 %v7413_v42, %s6774_s16 }
 0x116   : > { %1131 = vrot.lane.b32.xlu1 %v7417_v46, %s6774_s16  ;;  %1127 = vrot.lane.b32.xlu2 %v7419_v21, %s6774_s16 }
 0x117   : > { %v7425_v17 = vpop.permute.xlu0 %987 }
 0x118   : > { %12238 = vst [vmem:[#allocation17_spill] sm:$0xff] %v7425_v17  ;;  %v7427_v38 = vpop.permute.xlu1 %983  ;;  %v7429_v41 = vpop.permute.xlu2 %997 }
 0x119   : > { %12239 = vst [vmem:[#allocation18_spill] sm:$0xff] %v7427_v38 }
 0x11a   : > { %12240 = vst [vmem:[#allocation19_spill] sm:$0xff] %v7429_v41 }
 0x11d   : > { %1141 = vrot.lane.b32.xlu0 %v7431_v8, %s6774_s16 }
 0x11e   : > { %1137 = vrot.lane.b32.xlu1 %v7435_v40, %s6774_s16  ;;  %1133 = vrot.lane.b32.xlu2 %v7437_v14, %s6774_s16 }
 0x11f   : > { %v7443_v17 = vpop.permute.xlu0 %993 }
 0x120   : > { %12241 = vst [vmem:[#allocation20_spill] sm:$0xff] %v7443_v17  ;;  %v7445_v38 = vpop.permute.xlu1 %989  ;;  %v7447_v41 = vpop.permute.xlu2 %1003 }
 0x121   : > { %12242 = vst [vmem:[#allocation21_spill] sm:$0xff] %v7445_v38 }
 0x122   : > { %12243 = vst [vmem:[#allocation22_spill] sm:$0xff] %v7447_v41 }
 0x125   : > { %1147 = vrot.lane.b32.xlu0 %v7449_v0, %s6774_s16  ;;  %v646_v0 = vld [vmem:[#allocation2 + $0x48] sm:$0xff] }
 0x126   : > { %1143 = vrot.lane.b32.xlu1 %v7453_v16, %s6774_s16  ;;  %1139 = vrot.lane.b32.xlu2 %v7455_v4, %s6774_s16  ;;  %v643_v16 = vld [vmem:[#allocation2 + $0x20] sm:$0xff] }
 0x127   : > { %v7461_v17 = vpop.permute.xlu0 %999 }
 0x128   : > { %12246 = vst [vmem:[#allocation25_spill] sm:$0xff] %v7461_v17  ;;  %v7463_v38 = vpop.permute.xlu1 %995  ;;  %v7465_v41 = vpop.permute.xlu2 %1009 }
 0x129   : > { %12247 = vst [vmem:[#allocation26_spill] sm:$0xff] %v7463_v38 }
 0x12a   : > { %12248 = vst [vmem:[#allocation27_spill] sm:$0xff] %v7465_v41  ;;  %v7482_v41 = vld [vmem:[#allocation2 + $0x38] sm:$0xff] }
 0x12b   : > { %12253 = vst [vmem:[#allocation32_spill] sm:$0xff] %v7482_v41 }
 0x12d   : > { %1217 = vrot.lane.b32.xlu0 %v642_v57, %s6775_s17  ;;  %v7486_v57 = vld [vmem:[#allocation2 + $0x172] sm:$0xff] }
 0x12e   : > { %1149 = vrot.lane.b32.xlu1 %v7468_v7, %s6774_s16  ;;  %1145 = vrot.lane.b32.xlu2 %v7470_v61, %s6774_s16  ;;  %12254 = vst [vmem:[#allocation33_spill] sm:$0xff] %v7486_v57 }
 0x12f   : > { %v7476_v51 = vpop.permute.xlu0 %1005 }
 0x130   : > { %12250 = vst [vmem:[#allocation29_spill] sm:$0xff] %v7476_v51  ;;  %v7478_v17 = vpop.permute.xlu1 %1001  ;;  %v7480_v38 = vpop.permute.xlu2 %1015 }
 0x131   : > { %12251 = vst [vmem:[#allocation30_spill] sm:$0xff] %v7478_v17 }
 0x132   : > { %12252 = vst [vmem:[#allocation31_spill] sm:$0xff] %v7480_v38  ;;  %v7497_v38 = vld [vmem:[#allocation2 + $0x60] sm:$0xff] }
 0x133   : > { %12258 = vst [vmem:[#allocation37_spill] sm:$0xff] %v7497_v38 }
 0x135   : > { %1223 = vrot.lane.b32.xlu0 %v7482_v41, %s6775_s17  ;;  %v7501_v41 = vld [vmem:[#allocation2 + $0x30] sm:$0xff] }
 0x136   : > { %1219 = vrot.lane.b32.xlu1 %v643_v16, %s6775_s17  ;;  %1151 = vrot.lane.b32.xlu2 %v7486_v57, %s6774_s16  ;;  %12259 = vst [vmem:[#allocation38_spill] sm:$0xff] %v7501_v41  ;;  %v649_v57 = vld [vmem:[#allocation2 + $0x68] sm:$0xff] }
 0x137   : > { %v7491_v7 = vpop.permute.xlu0 %1011 }
 0x138   : > { %12255 = vst [vmem:[#allocation34_spill] sm:$0xff] %v7491_v7  ;;  %v7493_v51 = vpop.permute.xlu1 %1007  ;;  %v7495_v17 = vpop.permute.xlu2 %1021 }
 0x139   : > { %12256 = vst [vmem:[#allocation35_spill] sm:$0xff] %v7493_v51 }
 0x13a   : > { %12257 = vst [vmem:[#allocation36_spill] sm:$0xff] %v7495_v17  ;;  %v7512_v17 = vld [vmem:[#allocation2 + $0x80] sm:$0xff] }
 0x13b   : > { %12263 = vst [vmem:[#allocation42_spill] sm:$0xff] %v7512_v17 }
 0x13d   : > { %1229 = vrot.lane.b32.xlu0 %v7497_v38, %s6775_s17  ;;  %v7516_v38 = vld [vmem:[#allocation2 + $0x50] sm:$0xff] }
 0x13e   : > { %1225 = vrot.lane.b32.xlu1 %v646_v0, %s6775_s17  ;;  %1221 = vrot.lane.b32.xlu2 %v7501_v41, %s6775_s17  ;;  %12264 = vst [vmem:[#allocation43_spill] sm:$0xff] %v7516_v38  ;;  %v652_v41 = vld [vmem:[#allocation2 + $0x90] sm:$0xff] }
 0x13f   : > { %v7506_v16 = vpop.permute.xlu0 %1017 }
 0x140   : > { %12260 = vst [vmem:[#allocation39_spill] sm:$0xff] %v7506_v16  ;;  %v7508_v7 = vpop.permute.xlu1 %1013  ;;  %v7510_v51 = vpop.permute.xlu2 %1091 }
 0x141   : > { %12261 = vst [vmem:[#allocation40_spill] sm:$0xff] %v7508_v7 }
 0x142   : > { %12262 = vst [vmem:[#allocation41_spill] sm:$0xff] %v7510_v51  ;;  %v7527_v51 = vld [vmem:[#allocation2 + $0xa8] sm:$0xff] }
 0x143   : > { %12268 = vst [vmem:[#allocation47_spill] sm:$0xff] %v7527_v51 }
 0x145   : > { %1235 = vrot.lane.b32.xlu0 %v7512_v17, %s6775_s17  ;;  %v7531_v17 = vld [vmem:[#allocation2 + $0x78] sm:$0xff] }
 0x146   : > { %1231 = vrot.lane.b32.xlu1 %v649_v57, %s6775_s17  ;;  %1227 = vrot.lane.b32.xlu2 %v7516_v38, %s6775_s17  ;;  %12269 = vst [vmem:[#allocation48_spill] sm:$0xff] %v7531_v17  ;;  %v655_v38 = vld [vmem:[#allocation2 + $0xb0] sm:$0xff] }
 0x147   : > { %v7521_v0 = vpop.permute.xlu0 %1023 }
 0x148   : > { %12265 = vst [vmem:[#allocation44_spill] sm:$0xff] %v7521_v0  ;;  %v7523_v16 = vpop.permute.xlu1 %1019  ;;  %v7525_v7 = vpop.permute.xlu2 %1097 }
 0x149   : > { %12266 = vst [vmem:[#allocation45_spill] sm:$0xff] %v7523_v16 }
 0x14a   : > { %12267 = vst [vmem:[#allocation46_spill] sm:$0xff] %v7525_v7  ;;  %v7542_v7 = vld [vmem:[#allocation2 + $0xc8] sm:$0xff] }
 0x14b   : > { %12273 = vst [vmem:[#allocation52_spill] sm:$0xff] %v7542_v7 }
 0x14d   : > { %1241 = vrot.lane.b32.xlu0 %v7527_v51, %s6775_s17  ;;  %v7546_v51 = vld [vmem:[#allocation2 + $0x98] sm:$0xff] }
 0x14e   : > { %1237 = vrot.lane.b32.xlu1 %v652_v41, %s6775_s17  ;;  %1233 = vrot.lane.b32.xlu2 %v7531_v17, %s6775_s17  ;;  %12274 = vst [vmem:[#allocation53_spill] sm:$0xff] %v7546_v51  ;;  %v7559_v17 = vld [vmem:[#allocation2 + $0xd8] sm:$0xff] }
 0x14f   : > { %v7536_v57 = vpop.permute.xlu0 %1093  ;;  %12279 = vst [vmem:[#allocation58_spill] sm:$0xff] %v7559_v17 }
 0x150   : > { %12270 = vst [vmem:[#allocation49_spill] sm:$0xff] %v7536_v57  ;;  %v7538_v0 = vpop.permute.xlu1 %1089  ;;  %v7540_v16 = vpop.permute.xlu2 %1103 }
 0x151   : > { %12271 = vst [vmem:[#allocation50_spill] sm:$0xff] %v7538_v0 }
 0x152   : > { %12272 = vst [vmem:[#allocation51_spill] sm:$0xff] %v7540_v16  ;;  %v7557_v16 = vld [vmem:[#allocation2 + $0xf0] sm:$0xff] }
 0x153   : > { %12278 = vst [vmem:[#allocation57_spill] sm:$0xff] %v7557_v16 }
 0x155   : > { %1247 = vrot.lane.b32.xlu0 %v7542_v7, %s6775_s17  ;;  %v7563_v7 = vld [vmem:[#allocation2 + $0xc0] sm:$0xff] }
 0x156   : > { %1243 = vrot.lane.b32.xlu1 %v655_v38, %s6775_s17  ;;  %1239 = vrot.lane.b32.xlu2 %v7546_v51, %s6775_s17  ;;  %12280 = vst [vmem:[#allocation59_spill] sm:$0xff] %v7563_v7  ;;  %v7577_v51 = vld [vmem:[#allocation2 + $0xf8] sm:$0xff] }
 0x157   : > { %v7551_v41 = vpop.permute.xlu0 %1099  ;;  %12285 = vst [vmem:[#allocation64_spill] sm:$0xff] %v7577_v51 }
 0x158   : > { %12275 = vst [vmem:[#allocation54_spill] sm:$0xff] %v7551_v41  ;;  %v7553_v57 = vpop.permute.xlu1 %1095  ;;  %v7555_v0 = vpop.permute.xlu2 %1109 }
 0x159   : > { %12276 = vst [vmem:[#allocation55_spill] sm:$0xff] %v7553_v57  ;;  %v7575_v57 = vld [vmem:[#allocation2 + $0x110] sm:$0xff] }
 0x15a   : > { %12277 = vst [vmem:[#allocation56_spill] sm:$0xff] %v7555_v0 }
 0x15b   : > { %12284 = vst [vmem:[#allocation63_spill] sm:$0xff] %v7575_v57 }
 0x15d   : > { %1253 = vrot.lane.b32.xlu0 %v7557_v16, %s6775_s17  ;;  %v7581_v16 = vld [vmem:[#allocation2 + $0xe0] sm:$0xff] }
 0x15e   : > { %1249 = vrot.lane.b32.xlu1 %v7559_v17, %s6775_s17  ;;  %1245 = vrot.lane.b32.xlu2 %v7563_v7, %s6775_s17  ;;  %12286 = vst [vmem:[#allocation65_spill] sm:$0xff] %v7581_v16  ;;  %v7593_v17 = vld [vmem:[#allocation2 + $0x138] sm:$0xff]  ;;  %v7595_v7 = vld [vmem:[#allocation2 + $0x120] sm:$0xff] }
 0x15f   : > { %v7569_v38 = vpop.permute.xlu0 %1105  ;;  %12290 = vst [vmem:[#allocation69_spill] sm:$0xff] %v7593_v17 }
 0x160   : > { %12281 = vst [vmem:[#allocation60_spill] sm:$0xff] %v7569_v38  ;;  %v7571_v41 = vpop.permute.xlu1 %1101  ;;  %v7573_v0 = vpop.permute.xlu2 %1115 }
 0x161   : > { %12282 = vst [vmem:[#allocation61_spill] sm:$0xff] %v7571_v41 }
 0x162   : > { %12283 = vst [vmem:[#allocation62_spill] sm:$0xff] %v7573_v0 }
 0x163   : > { %12291 = vst [vmem:[#allocation70_spill] sm:$0xff] %v7595_v7 }
 0x165   : > { %1259 = vrot.lane.b32.xlu0 %v7575_v57, %s6775_s17  ;;  %v7599_v57 = vld [vmem:[#allocation2 + $0x108] sm:$0xff] }
 0x166   : > { %1255 = vrot.lane.b32.xlu1 %v7577_v51, %s6775_s17  ;;  %1251 = vrot.lane.b32.xlu2 %v7581_v16, %s6775_s17  ;;  %12292 = vst [vmem:[#allocation71_spill] sm:$0xff] %v7599_v57  ;;  %v7611_v51 = vld [vmem:[#allocation2 + $0x158] sm:$0xff]  ;;  %v7613_v16 = vld [vmem:[#allocation2 + $0x140] sm:$0xff] }
 0x167   : > { %v7587_v38 = vpop.permute.xlu0 %1111  ;;  %12296 = vst [vmem:[#allocation75_spill] sm:$0xff] %v7611_v51 }
 0x168   : > { %12287 = vst [vmem:[#allocation66_spill] sm:$0xff] %v7587_v38  ;;  %v7589_v41 = vpop.permute.xlu1 %1107  ;;  %v7591_v0 = vpop.permute.xlu2 %1121 }
 0x169   : > { %12288 = vst [vmem:[#allocation67_spill] sm:$0xff] %v7589_v41 }
 0x16a   : > { %12289 = vst [vmem:[#allocation68_spill] sm:$0xff] %v7591_v0 }
 0x16b   : > { %12297 = vst [vmem:[#allocation76_spill] sm:$0xff] %v7613_v16 }
 0x16d   : > { %1265 = vrot.lane.b32.xlu0 %v7593_v17, %s6775_s17  ;;  %v7617_v17 = vld [vmem:[#allocation2 + $0x128] sm:$0xff] }
 0x16e   : > { %1261 = vrot.lane.b32.xlu1 %v7595_v7, %s6775_s17  ;;  %1257 = vrot.lane.b32.xlu2 %v7599_v57, %s6775_s17  ;;  %v7629_v7 = vld [vmem:[#allocation2 + $0x180] sm:$0xff]  ;;  %v7631_v57 = vld [vmem:[#allocation2 + $0x168] sm:$0xff] }
 0x16f   : > { %v7605_v38 = vpop.permute.xlu0 %1117  ;;  %12301 = vst [vmem:[#allocation80_spill] sm:$0xff] %v7629_v7 }
 0x170   : > { %12293 = vst [vmem:[#allocation72_spill] sm:$0xff] %v7605_v38  ;;  %v7607_v41 = vpop.permute.xlu1 %1113  ;;  %v7609_v0 = vpop.permute.xlu2 %1127 }
 0x171   : > { %12294 = vst [vmem:[#allocation73_spill] sm:$0xff] %v7607_v41 }
 0x172   : > { %12295 = vst [vmem:[#allocation74_spill] sm:$0xff] %v7609_v0 }
 0x173   : > { %12302 = vst [vmem:[#allocation81_spill] sm:$0xff] %v7631_v57 }
 0x175   : > { %1271 = vrot.lane.b32.xlu0 %v7611_v51, %s6775_s17  ;;  %v7635_v51 = vld [vmem:[#allocation2 + $0x150] sm:$0xff] }
 0x176   : > { %1267 = vrot.lane.b32.xlu1 %v7613_v16, %s6775_s17  ;;  %1263 = vrot.lane.b32.xlu2 %v7617_v17, %s6775_s17  ;;  %v7649_v16 = vld [vmem:[#allocation2 + $0x188] sm:$0xff] }
 0x177   : > { %v7623_v38 = vpop.permute.xlu0 %1123  ;;  %12306 = vst [vmem:[#allocation85_spill] sm:$0xff] %v7649_v16 }
 0x178   : > { %12298 = vst [vmem:[#allocation77_spill] sm:$0xff] %v7623_v38  ;;  %v7625_v41 = vpop.permute.xlu1 %1119  ;;  %v7627_v0 = vpop.permute.xlu2 %1133 }
 0x179   : > { %12299 = vst [vmem:[#allocation78_spill] sm:$0xff] %v7625_v41 }
 0x17a   : > { %12300 = vst [vmem:[#allocation79_spill] sm:$0xff] %v7627_v0 }
 0x17d   : > { %1277 = vrot.lane.b32.xlu0 %v7629_v7, %s6775_s17  ;;  %v7651_v7 = vld [vmem:[#allocation2 + $0x170] sm:$0xff] }
 0x17e   : > { %1273 = vrot.lane.b32.xlu1 %v7631_v57, %s6775_s17  ;;  %1269 = vrot.lane.b32.xlu2 %v7635_v51, %s6775_s17 }
 0x17f   : > { %v7641_v38 = vpop.permute.xlu0 %1129 }
 0x180   : > { %12303 = vst [vmem:[#allocation82_spill] sm:$0xff] %v7641_v38  ;;  %v7643_v41 = vpop.permute.xlu1 %1125  ;;  %v7645_v0 = vpop.permute.xlu2 %1139 }
 0x181   : > { %12304 = vst [vmem:[#allocation83_spill] sm:$0xff] %v7643_v41 }
 0x182   : > { %12305 = vst [vmem:[#allocation84_spill] sm:$0xff] %v7645_v0 }
 0x185   : > { %1347 = vrot.lane.b32.xlu0 %v7155_v25, %s6776_s18 }
 0x186   : > { %1279 = vrot.lane.b32.xlu1 %v7649_v16, %s6775_s17  ;;  %1275 = vrot.lane.b32.xlu2 %v7651_v7, %s6775_s17 }
 0x187   : > { %v7657_v57 = vpop.permute.xlu0 %1135 }
 0x188   : > { %12307 = vst [vmem:[#allocation86_spill] sm:$0xff] %v7657_v57  ;;  %v7659_v38 = vpop.permute.xlu1 %1131  ;;  %v7661_v41 = vpop.permute.xlu2 %1145  ;;  %v7771_v57 = vld [vmem:[#allocation2 + $0x189] sm:$0xff] }
 0x189   : > { %12308 = vst [vmem:[#allocation87_spill] sm:$0xff] %v7659_v38 }
 0x18a   : > { %12309 = vst [vmem:[#allocation88_spill] sm:$0xff] %v7661_v41  ;;  %v876_v41 = vld [vmem:[#allocation2 + $0xb1] sm:$0xff] }
 0x18d   : > { %1353 = vrot.lane.b32.xlu0 %v7179_v39, %s6776_s18 }
 0x18e   : > { %1349 = vrot.lane.b32.xlu1 %v7104_v55, %s6776_s18  ;;  %1345 = vrot.lane.b32.xlu2 %v7083_v48, %s6776_s18 }
 0x18f   : > { %v7669_v25 = vpop.permute.xlu0 %1141 }
 0x190   : > { %12310 = vst [vmem:[#allocation89_spill] sm:$0xff] %v7669_v25  ;;  %v7671_v0 = vpop.permute.xlu1 %1137  ;;  %v7673_v16 = vpop.permute.xlu2 %1151  ;;  %v910_v25 = vld [vmem:[#allocation2 + $0xca] sm:$0xff] }
 0x191   : > { %12311 = vst [vmem:[#allocation90_spill] sm:$0xff] %v7673_v16  ;;  %v12369_v16 = vld [vmem:[#allocation59_spill] sm:$0xff] }
 0x195   : > { %1359 = vrot.lane.b32.xlu0 %v7200_v52, %s6776_s18 }
 0x196   : > { %1355 = vrot.lane.b32.xlu1 %v7144_v19, %s6776_s18  ;;  %1351 = vrot.lane.b32.xlu2 %v7151_v23, %s6776_s18 }
 0x197   : > { %v7681_v39 = vpop.permute.xlu0 %1147 }
 0x198   : > { %12312 = vst [vmem:[#allocation91_spill] sm:$0xff] %v7681_v39  ;;  %v7683_v55 = vpop.permute.xlu1 %1143  ;;  %v7685_v48 = vpop.permute.xlu2 %1221 }
 0x199   : > { %12313 = vst [vmem:[#allocation92_spill] sm:$0xff] %v7683_v55  ;;  %v887_v55 = vld [vmem:[#allocation2 + $0x139] sm:$0xff] }
 0x19d   : > { %1365 = vrot.lane.b32.xlu0 %v7221_v1, %s6776_s18 }
 0x19e   : > { %1361 = vrot.lane.b32.xlu1 %v7170_v33, %s6776_s18  ;;  %1357 = vrot.lane.b32.xlu2 %v7175_v37, %s6776_s18 }
 0x19f   : > { %v7693_v52 = vpop.permute.xlu0 %1217 }
 0x1a0   : > { %v7695_v19 = vpop.permute.xlu1 %1149  ;;  %v7697_v23 = vpop.permute.xlu2 %1227 }
 0x1a1   : > { %12314 = vst [vmem:[#allocation93_spill] sm:$0xff] %v7695_v19  ;;  %v12374_v19 = vld [vmem:[#allocation71_spill] sm:$0xff] }
 0x1a5   : > { %1371 = vrot.lane.b32.xlu0 %v7240_v10, %s6776_s18 }
 0x1a6   : > { %1367 = vrot.lane.b32.xlu1 %v7192_v45, %s6776_s18  ;;  %1363 = vrot.lane.b32.xlu2 %v7196_v50, %s6776_s18 }
 0x1a7   : > { %v7705_v1 = vpop.permute.xlu0 %1223 }
 0x1a8   : > { %v7707_v33 = vpop.permute.xlu1 %1219  ;;  %v7709_v37 = vpop.permute.xlu2 %1233 }
 0x1ad   : > { %1377 = vrot.lane.b32.xlu0 %v7258_v20, %s6776_s18 }
 0x1ae   : > { %1373 = vrot.lane.b32.xlu1 %v7213_v59, %s6776_s18  ;;  %1369 = vrot.lane.b32.xlu2 %v7217_v63, %s6776_s18 }
 0x1af   : > { %v7717_v10 = vpop.permute.xlu0 %1229 }
 0x1b0   : > { %v7719_v45 = vpop.permute.xlu1 %1225  ;;  %v7721_v50 = vpop.permute.xlu2 %1239 }
 0x1b1   : > { %12315 = vst [vmem:[#allocation94_spill] sm:$0xff] %v7721_v50  ;;  %v880_v50 = vld [vmem:[#allocation2 + $0xe1] sm:$0xff] }
 0x1b5   : > { %1383 = vrot.lane.b32.xlu0 %v7271_v26, %s6776_s18 }
 0x1b6   : > { %1379 = vrot.lane.b32.xlu1 %v7233_v6, %s6776_s18  ;;  %1375 = vrot.lane.b32.xlu2 %v7237_v9, %s6776_s18 }
 0x1b7   : > { %v7729_v20 = vpop.permute.xlu0 %1235 }
 0x1b8   : > { %v7731_v59 = vpop.permute.xlu1 %1231  ;;  %v7733_v63 = vpop.permute.xlu2 %1245 }
 0x1b9   : > { %12316 = vst [vmem:[#allocation95_spill] sm:$0xff] %v7733_v63  ;;  %v12372_v63 = vld [vmem:[#allocation52_spill] sm:$0xff] }
 0x1bd   : > { %1389 = vrot.lane.b32.xlu0 %v7283_v29, %s6776_s18 }
 0x1be   : > { %1385 = vrot.lane.b32.xlu1 %v7251_v15, %s6776_s18  ;;  %1381 = vrot.lane.b32.xlu2 %v7255_v18, %s6776_s18 }
 0x1bf   : > { %v7741_v26 = vpop.permute.xlu0 %1241 }
 0x1c0   : > { %12317 = vst [vmem:[#allocation96_spill] sm:$0xff] %v7741_v26  ;;  %v7743_v6 = vpop.permute.xlu1 %1237  ;;  %v7745_v9 = vpop.permute.xlu2 %1251  ;;  %v873_v26 = vld [vmem:[#allocation2 + $0x91] sm:$0xff] }
 0x1c1   : > { %12318 = vst [vmem:[#allocation97_spill] sm:$0xff] %v7743_v6  ;;  %v914_v6 = vld [vmem:[#allocation2 + $0xfa] sm:$0xff] }
 0x1c2   : > { %12319 = vst [vmem:[#allocation98_spill] sm:$0xff] %v7745_v9 }
 0x1c5   : > { %1395 = vrot.lane.b32.xlu0 %v7298_v36, %s6776_s18 }
 0x1c6   : > { %1391 = vrot.lane.b32.xlu1 %v7267_v22, %s6776_s18  ;;  %1387 = vrot.lane.b32.xlu2 %v7269_v24, %s6776_s18 }
 0x1c7   : > { %v7753_v29 = vpop.permute.xlu0 %1247 }
 0x1c8   : > { %12320 = vst [vmem:[#allocation99_spill] sm:$0xff] %v7753_v29  ;;  %v7755_v15 = vpop.permute.xlu1 %1243  ;;  %v7757_v18 = vpop.permute.xlu2 %1257  ;;  %v12366_v29 = vld [vmem:[#allocation42_spill] sm:$0xff] }
 0x1c9   : > { %12321 = vst [vmem:[#allocation100_spill] sm:$0xff] %v7755_v15 }
 0x1ca   : > { %12322 = vst [vmem:[#allocation101_spill] sm:$0xff] %v7757_v18  ;;  %v12347_v18 = vld [vmem:[#allocation23_spill] sm:$0xff] }
 0x1cd   : > { %1401 = vrot.lane.b32.xlu0 %v7309_v43, %s6776_s18 }
 0x1ce   : > { %1397 = vrot.lane.b32.xlu1 %v7279_v27, %s6776_s18  ;;  %1393 = vrot.lane.b32.xlu2 %v7281_v28, %s6776_s18 }
 0x1cf   : > { %v7765_v36 = vpop.permute.xlu0 %1253 }
 0x1d0   : > { %12323 = vst [vmem:[#allocation102_spill] sm:$0xff] %v7765_v36  ;;  %v7767_v22 = vpop.permute.xlu1 %1249  ;;  %v7769_v24 = vpop.permute.xlu2 %1263  ;;  %v12356_v36 = vld [vmem:[#allocation43_spill] sm:$0xff] }
 0x1d1   : > { %12324 = vst [vmem:[#allocation103_spill] sm:$0xff] %v7767_v22 }
 0x1d2   : > { %12325 = vst [vmem:[#allocation104_spill] sm:$0xff] %v7769_v24  ;;  %v7787_v24 = vld [vmem:[#allocation2 + $0x181] sm:$0xff] }
 0x1d5   : > { %1407 = vrot.lane.b32.xlu0 %v7771_v57, %s6776_s18 }
 0x1d6   : > { %1403 = vrot.lane.b32.xlu1 %v7294_v34, %s6776_s18  ;;  %1399 = vrot.lane.b32.xlu2 %v7296_v35, %s6776_s18 }
 0x1d7   : > { %v7779_v27 = vpop.permute.xlu0 %1259 }
 0x1d8   : > { %12326 = vst [vmem:[#allocation105_spill] sm:$0xff] %v7779_v27  ;;  %v7781_v28 = vpop.permute.xlu1 %1255  ;;  %v7783_v43 = vpop.permute.xlu2 %1269 }
 0x1d9   : > { %12327 = vst [vmem:[#allocation106_spill] sm:$0xff] %v7781_v28 }
 0x1da   : > { %12328 = vst [vmem:[#allocation107_spill] sm:$0xff] %v7783_v43  ;;  %v907_v43 = vld [vmem:[#allocation2 + $0xaa] sm:$0xff] }
 0x1dd   : > { %1477 = vrot.lane.b32.xlu0 %v7335_v56, %s6777_s19 }
 0x1de   : > { %1473 = vrot.lane.b32.xlu1 %v7311_v44, %s6777_s19  ;;  %1405 = vrot.lane.b32.xlu2 %v7787_v24, %s6776_s18 }
 0x1df   : > { %v7793_v34 = vpop.permute.xlu0 %1265 }
 0x1e0   : > { %v7795_v35 = vpop.permute.xlu1 %1261  ;;  %v7797_v27 = vpop.permute.xlu2 %1275 }
 0x1e1   : > { %12329 = vst [vmem:[#allocation108_spill] sm:$0xff] %v7795_v35  ;;  %v12346_v35 = vld [vmem:[#allocation33_spill] sm:$0xff] }
 0x1e2   : > { %12330 = vst [vmem:[#allocation109_spill] sm:$0xff] %v7797_v27  ;;  %v12378_v27 = vld [vmem:[#allocation63_spill] sm:$0xff] }
 0x1e5   : > { %1483 = vrot.lane.b32.xlu0 %v7351_v62, %s6777_s19 }
 0x1e6   : > { %1479 = vrot.lane.b32.xlu1 %v7318_v47, %s6777_s19  ;;  %1475 = vrot.lane.b32.xlu2 %v7322_v49, %s6777_s19 }
 0x1e7   : > { %v7805_v56 = vpop.permute.xlu0 %1271 }
 0x1e8   : > { %12331 = vst [vmem:[#allocation110_spill] sm:$0xff] %v7805_v56  ;;  %v7807_v44 = vpop.permute.xlu1 %1267  ;;  %v7809_v38 = vpop.permute.xlu2 %1345  ;;  %v882_v56 = vld [vmem:[#allocation2 + $0xf9] sm:$0xff] }
 0x1e9   : > { %12332 = vst [vmem:[#allocation111_spill] sm:$0xff] %v7807_v44 }
 0x1ed   : > { %1489 = vrot.lane.b32.xlu0 %v7367_v5, %s6777_s19 }
 0x1ee   : > { %1485 = vrot.lane.b32.xlu1 %v7329_v53, %s6777_s19  ;;  %1481 = vrot.lane.b32.xlu2 %v7333_v54, %s6777_s19 }
 0x1ef   : > { %v7817_v62 = vpop.permute.xlu0 %1277 }
 0x1f0   : > { %12333 = vst [vmem:[#allocation112_spill] sm:$0xff] %v7817_v62  ;;  %v7819_v47 = vpop.permute.xlu1 %1273  ;;  %v7821_v49 = vpop.permute.xlu2 %1351  ;;  %v844_v62 = vld [vmem:[#allocation2 + $0xb0] sm:$0xff] }
 0x1f1   : > { %12334 = vst [vmem:[#allocation113_spill] sm:$0xff] %v7819_v47  ;;  %v875_v47 = vld [vmem:[#allocation2 + $0xa9] sm:$0xff] }
 0x1f5   : > { %1495 = vrot.lane.b32.xlu0 %v7383_v13, %s6777_s19 }
 0x1f6   : > { %1491 = vrot.lane.b32.xlu1 %v7343_v58, %s6777_s19  ;;  %1487 = vrot.lane.b32.xlu2 %v7347_v60, %s6777_s19 }
 0x1f7   : > { %v7829_v5 = vpop.permute.xlu0 %1347 }
 0x1f8   : > { %v7831_v53 = vpop.permute.xlu1 %1279  ;;  %v7833_v54 = vpop.permute.xlu2 %1357 }
 0x1f9   : > { %12335 = vst [vmem:[#allocation114_spill] sm:$0xff] %v7831_v53  ;;  %v12365_v53 = vld [vmem:[#allocation53_spill] sm:$0xff] }
 0x1fd   : > { %1501 = vrot.lane.b32.xlu0 %v7401_v32, %s6777_s19 }
 0x1fe   : > { %1497 = vrot.lane.b32.xlu1 %v7359_v2, %s6777_s19  ;;  %1493 = vrot.lane.b32.xlu2 %v7363_v3, %s6777_s19 }
 0x1ff   : > { %v7841_v13 = vpop.permute.xlu0 %1353 }
 0x200   : > { %v7843_v58 = vpop.permute.xlu1 %1349  ;;  %v7845_v60 = vpop.permute.xlu2 %1363 }
 0x201   : > { %12336 = vst [vmem:[#allocation115_spill] sm:$0xff] %v7845_v60  ;;  %v640_v60 = vld [vmem:[#allocation2] sm:$0xff] }
 0x205   : > { %1507 = vrot.lane.b32.xlu0 %v7419_v21, %s6777_s19 }
 0x206   : > { %1503 = vrot.lane.b32.xlu1 %v7377_v11, %s6777_s19  ;;  %1499 = vrot.lane.b32.xlu2 %v7381_v12, %s6777_s19 }
 0x207   : > { %v7853_v32 = vpop.permute.xlu0 %1359 }
 0x208   : > { %v7855_v2 = vpop.permute.xlu1 %1355  ;;  %v7857_v3 = vpop.permute.xlu2 %1369 }
 0x209   : > { %12337 = vst [vmem:[#allocation116_spill] sm:$0xff] %v7857_v3  ;;  %v866_v3 = vld [vmem:[#allocation2 + $0x39] sm:$0xff] }
 0x20d   : > { %1513 = vrot.lane.b32.xlu0 %v7437_v14, %s6777_s19 }
 0x20e   : > { %1509 = vrot.lane.b32.xlu1 %v7395_v30, %s6777_s19  ;;  %1505 = vrot.lane.b32.xlu2 %v7399_v31, %s6777_s19 }
 0x20f   : > { %v7865_v21 = vpop.permute.xlu0 %1365 }
 0x210   : > { %12338 = vst [vmem:[#allocation117_spill] sm:$0xff] %v7865_v21  ;;  %v7867_v11 = vpop.permute.xlu1 %1361  ;;  %v7869_v12 = vpop.permute.xlu2 %1375  ;;  %v904_v21 = vld [vmem:[#allocation2 + $0x82] sm:$0xff] }
 0x211   : > { %12339 = vst [vmem:[#allocation118_spill] sm:$0xff] %v7869_v12 }
 0x215   : > { %1519 = vrot.lane.b32.xlu0 %v7455_v4, %s6777_s19 }
 0x216   : > { %1515 = vrot.lane.b32.xlu1 %v7413_v42, %s6777_s19  ;;  %1511 = vrot.lane.b32.xlu2 %v7417_v46, %s6777_s19 }
 0x217   : > { %v7877_v14 = vpop.permute.xlu0 %1371 }
 0x218   : > { %12340 = vst [vmem:[#allocation119_spill] sm:$0xff] %v7877_v14  ;;  %v7879_v30 = vpop.permute.xlu1 %1367  ;;  %v7881_v31 = vpop.permute.xlu2 %1381 }
 0x219   : > { %12341 = vst [vmem:[#allocation120_spill] sm:$0xff] %v7879_v30  ;;  %v884_v30 = vld [vmem:[#allocation2 + $0x111] sm:$0xff] }
 0x21a   : > { %12342 = vst [vmem:[#allocation121_spill] sm:$0xff] %v7881_v31  ;;  %v12351_v31 = vld [vmem:[#allocation38_spill] sm:$0xff] }
 0x21d   : > { %1525 = vrot.lane.b32.xlu0 %v7470_v61, %s6777_s19  ;;  %v12348_v61 = vld [vmem:[#allocation24_spill] sm:$0xff] }
 0x21e   : > { %1521 = vrot.lane.b32.xlu1 %v7431_v8, %s6777_s19  ;;  %1517 = vrot.lane.b32.xlu2 %v7435_v40, %s6777_s19 }
 0x21f   : > { %v7889_v4 = vpop.permute.xlu0 %1377 }
 0x220   : > { %12343 = vst [vmem:[#allocation122_spill] sm:$0xff] %v7889_v4  ;;  %v7891_v42 = vpop.permute.xlu1 %1373  ;;  %v7893_v46 = vpop.permute.xlu2 %1387  ;;  %v835_v4 = vld [vmem:[#allocation2 + $0x48] sm:$0xff] }
 0x221   : > { %12344 = vst [vmem:[#allocation123_spill] sm:$0xff] %v7891_v42  ;;  %v12370_v42 = vld [vmem:[#allocation47_spill] sm:$0xff] }
 0x222   : > { %12345 = vst [vmem:[#allocation124_spill] sm:$0xff] %v7893_v46  ;;  %v7909_v46 = vld [vmem:[#allocation2 + $0x182] sm:$0xff] }
 0x225   : > { %1531 = vrot.lane.b32.xlu0 %v12346_v35, %s6777_s19 }
 0x226   : > { %1527 = vrot.lane.b32.xlu1 %v12347_v18, %s6777_s19  ;;  %1523 = vrot.lane.b32.xlu2 %v12348_v61, %s6777_s19  ;;  %v12352_v18 = vld [vmem:[#allocation28_spill] sm:$0xff] }
 0x227   : > { %v7901_v28 = vpop.permute.xlu0 %1383 }
 0x228   : > { %12349 = vst [vmem:[#allocation33_spill] sm:$0xff] %v7901_v28  ;;  %v7903_v8 = vpop.permute.xlu1 %1379  ;;  %v7905_v40 = vpop.permute.xlu2 %1393 }
 0x229   : > { %12350 = vst [vmem:[#allocation23_spill] sm:$0xff] %v7903_v8  ;;  %v7923_v8 = vld [vmem:[#allocation2 + $0x18a] sm:$0xff] }
 0x22d   : > { %1601 = vrot.lane.b32.xlu0 %v12351_v31, %s6778_s20  ;;  %v12357_v31 = vld [vmem:[#allocation32_spill] sm:$0xff] }
 0x22e   : > { %1533 = vrot.lane.b32.xlu1 %v7909_v46, %s6777_s19  ;;  %1529 = vrot.lane.b32.xlu2 %v12352_v18, %s6777_s19 }
 0x22f   : > { %v7915_v35 = vpop.permute.xlu0 %1389 }
 0x230   : > { %12353 = vst [vmem:[#allocation24_spill] sm:$0xff] %v7915_v35  ;;  %v7917_v61 = vpop.permute.xlu1 %1385  ;;  %v7919_v28 = vpop.permute.xlu2 %1399 }
 0x231   : > { %12354 = vst [vmem:[#allocation38_spill] sm:$0xff] %v7917_v61  ;;  %v12361_v61 = vld [vmem:[#allocation48_spill] sm:$0xff] }
 0x232   : > { %12355 = vst [vmem:[#allocation28_spill] sm:$0xff] %v7919_v28  ;;  %v877_v28 = vld [vmem:[#allocation2 + $0xc1] sm:$0xff] }
 0x235   : > { %1607 = vrot.lane.b32.xlu0 %v12356_v36, %s6778_s20  ;;  %v12362_v36 = vld [vmem:[#allocation37_spill] sm:$0xff] }
 0x236   : > { %1603 = vrot.lane.b32.xlu1 %v12357_v31, %s6778_s20  ;;  %1535 = vrot.lane.b32.xlu2 %v7923_v8, %s6777_s19 }
 0x237   : > { %v7929_v9 = vpop.permute.xlu0 %1395 }
 0x238   : > { %12358 = vst [vmem:[#allocation43_spill] sm:$0xff] %v7929_v9  ;;  %v7931_v18 = vpop.permute.xlu1 %1391  ;;  %v7933_v35 = vpop.permute.xlu2 %1405  ;;  %v921_v9 = vld [vmem:[#allocation2 + $0x152] sm:$0xff] }
 0x239   : > { %12359 = vst [vmem:[#allocation32_spill] sm:$0xff] %v7931_v18  ;;  %v838_v18 = vld [vmem:[#allocation2 + $0x68] sm:$0xff] }
 0x23a   : > { %12360 = vst [vmem:[#allocation125_spill] sm:$0xff] %v7933_v35  ;;  %v841_v35 = vld [vmem:[#allocation2 + $0x90] sm:$0xff] }
 0x23d   : > { %1613 = vrot.lane.b32.xlu0 %v12361_v61, %s6778_s20 }
 0x23e   : > { %1609 = vrot.lane.b32.xlu1 %v12362_v36, %s6778_s20  ;;  %1605 = vrot.lane.b32.xlu2 %v835_v4, %s6778_s20 }
 0x23f   : > { %v7940_v22 = vpop.permute.xlu0 %1401 }
 0x240   : > { %12363 = vst [vmem:[#allocation48_spill] sm:$0xff] %v7940_v22  ;;  %v7942_v31 = vpop.permute.xlu1 %1397  ;;  %v7944_v12 = vpop.permute.xlu2 %1475 }
 0x241   : > { %12364 = vst [vmem:[#allocation37_spill] sm:$0xff] %v7942_v31  ;;  %v888_v31 = vld [vmem:[#allocation2 + $0x141] sm:$0xff] }
 0x245   : > { %1619 = vrot.lane.b32.xlu0 %v12365_v53, %s6778_s20 }
 0x246   : > { %1615 = vrot.lane.b32.xlu1 %v12366_v29, %s6778_s20  ;;  %1611 = vrot.lane.b32.xlu2 %v838_v18, %s6778_s20 }
 0x247   : > { %v7951_v61 = vpop.permute.xlu0 %1407 }
 0x248   : > { %12367 = vst [vmem:[#allocation53_spill] sm:$0xff] %v7951_v61  ;;  %v7953_v36 = vpop.permute.xlu1 %1403  ;;  %v7955_v4 = vpop.permute.xlu2 %1481  ;;  %v12371_v61 = vld [vmem:[#allocation65_spill] sm:$0xff] }
 0x249   : > { %12368 = vst [vmem:[#allocation42_spill] sm:$0xff] %v7953_v36  ;;  %v12375_v36 = vld [vmem:[#allocation57_spill] sm:$0xff] }
 0x24d   : > { %1625 = vrot.lane.b32.xlu0 %v12369_v16, %s6778_s20 }
 0x24e   : > { %1621 = vrot.lane.b32.xlu1 %v12370_v42, %s6778_s20  ;;  %1617 = vrot.lane.b32.xlu2 %v841_v35, %s6778_s20 }
 0x24f   : > { %v7962_v53 = vpop.permute.xlu0 %1477 }
 0x250   : > { %v7964_v29 = vpop.permute.xlu1 %1473  ;;  %v7966_v18 = vpop.permute.xlu2 %1487 }
 0x255   : > { %1631 = vrot.lane.b32.xlu0 %v12371_v61, %s6778_s20  ;;  %v12376_v61 = vld [vmem:[#allocation58_spill] sm:$0xff] }
 0x256   : > { %1627 = vrot.lane.b32.xlu1 %v12372_v63, %s6778_s20  ;;  %1623 = vrot.lane.b32.xlu2 %v844_v62, %s6778_s20 }
 0x257   : > { %v7973_v16 = vpop.permute.xlu0 %1483 }
 0x258   : > { %v7975_v42 = vpop.permute.xlu1 %1479  ;;  %v7977_v35 = vpop.permute.xlu2 %1493 }
 0x259   : > { %12373 = vst [vmem:[#allocation59_spill] sm:$0xff] %v7977_v35  ;;  %v890_v35 = vld [vmem:[#allocation2 + $0x159] sm:$0xff] }
 0x25d   : > { %1637 = vrot.lane.b32.xlu0 %v12374_v19, %s6778_s20  ;;  %v12379_v19 = vld [vmem:[#allocation64_spill] sm:$0xff] }
 0x25e   : > { %1633 = vrot.lane.b32.xlu1 %v12375_v36, %s6778_s20  ;;  %1629 = vrot.lane.b32.xlu2 %v12376_v61, %s6778_s20 }
 0x25f   : > { %v7985_v14 = vpop.permute.xlu0 %1489 }
 0x260   : > { %v7987_v63 = vpop.permute.xlu1 %1485  ;;  %v7989_v62 = vpop.permute.xlu2 %1499 }
 0x261   : > { %12377 = vst [vmem:[#allocation47_spill] sm:$0xff] %v7989_v62  ;;  %v12383_v62 = vld [vmem:[#allocation69_spill] sm:$0xff] }
 0x265   : > { %1643 = vrot.lane.b32.xlu0 %v7617_v17, %s6778_s20  ;;  %v12384_v17 = vld [vmem:[#allocation70_spill] sm:$0xff] }
 0x266   : > { %1639 = vrot.lane.b32.xlu1 %v12378_v27, %s6778_s20  ;;  %1635 = vrot.lane.b32.xlu2 %v12379_v19, %s6778_s20 }
 0x267   : > { %v7997_v15 = vpop.permute.xlu0 %1495 }
 0x268   : > { %12380 = vst [vmem:[#allocation65_spill] sm:$0xff] %v7997_v15  ;;  %v7999_v36 = vpop.permute.xlu1 %1491  ;;  %v8001_v61 = vpop.permute.xlu2 %1505  ;;  %v881_v15 = vld [vmem:[#allocation2 + $0xf1] sm:$0xff] }
 0x269   : > { %12381 = vst [vmem:[#allocation52_spill] sm:$0xff] %v7999_v36  ;;  %v918_v36 = vld [vmem:[#allocation2 + $0x12a] sm:$0xff] }
 0x26a   : > { %12382 = vst [vmem:[#allocation71_spill] sm:$0xff] %v8001_v61  ;;  %v12388_v61 = vld [vmem:[#allocation75_spill] sm:$0xff] }
 0x26d   : > { %1649 = vrot.lane.b32.xlu0 %v7635_v51, %s6778_s20  ;;  %v12389_v51 = vld [vmem:[#allocation76_spill] sm:$0xff] }
 0x26e   : > { %1645 = vrot.lane.b32.xlu1 %v12383_v62, %s6778_s20  ;;  %1641 = vrot.lane.b32.xlu2 %v12384_v17, %s6778_s20 }
 0x26f   : > { %v8009_v39 = vpop.permute.xlu0 %1501 }
 0x270   : > { %12385 = vst [vmem:[#allocation57_spill] sm:$0xff] %v8009_v39  ;;  %v8011_v27 = vpop.permute.xlu1 %1497  ;;  %v8013_v19 = vpop.permute.xlu2 %1511  ;;  %v863_v39 = vld [vmem:[#allocation2 + $0x198] sm:$0xff] }
 0x271   : > { %12386 = vst [vmem:[#allocation58_spill] sm:$0xff] %v8011_v27 }
 0x272   : > { %12387 = vst [vmem:[#allocation63_spill] sm:$0xff] %v8013_v19  ;;  %v12393_v19 = vld [vmem:[#allocation80_spill] sm:$0xff] }
 0x275   : > { %1655 = vrot.lane.b32.xlu0 %v7651_v7, %s6778_s20  ;;  %v12394_v7 = vld [vmem:[#allocation81_spill] sm:$0xff] }
 0x276   : > { %1651 = vrot.lane.b32.xlu1 %v12388_v61, %s6778_s20  ;;  %1647 = vrot.lane.b32.xlu2 %v12389_v51, %s6778_s20 }
 0x277   : > { %v8021_v22 = vpop.permute.xlu0 %1507 }
 0x278   : > { %12390 = vst [vmem:[#allocation64_spill] sm:$0xff] %v8021_v22  ;;  %v8023_v62 = vpop.permute.xlu1 %1503  ;;  %v8025_v17 = vpop.permute.xlu2 %1517  ;;  %v864_v22 = vld [vmem:[#allocation2 + $0x1a0] sm:$0xff] }
 0x279   : > { %12391 = vst [vmem:[#allocation69_spill] sm:$0xff] %v8023_v62  ;;  %v865_v62 = vld [vmem:[#allocation2 + $0x31] sm:$0xff] }
 0x27a   : > { %12392 = vst [vmem:[#allocation70_spill] sm:$0xff] %v8025_v17 }
 0x27d   : > { %1661 = vrot.lane.b32.xlu0 %v863_v39, %s6778_s20  ;;  %v12398_v39 = vld [vmem:[#allocation85_spill] sm:$0xff] }
 0x27e   : > { %1657 = vrot.lane.b32.xlu1 %v12393_v19, %s6778_s20  ;;  %1653 = vrot.lane.b32.xlu2 %v12394_v7, %s6778_s20 }
 0x27f   : > { %v8032_v27 = vpop.permute.xlu0 %1513 }
 0x280   : > { %12395 = vst [vmem:[#allocation75_spill] sm:$0xff] %v8032_v27  ;;  %v8034_v61 = vpop.permute.xlu1 %1509  ;;  %v8036_v51 = vpop.permute.xlu2 %1523  ;;  %v869_v27 = vld [vmem:[#allocation2 + $0x61] sm:$0xff] }
 0x281   : > { %12396 = vst [vmem:[#allocation76_spill] sm:$0xff] %v8034_v61  ;;  %v867_v61 = vld [vmem:[#allocation2 + $0x49] sm:$0xff] }
 0x282   : > { %12397 = vst [vmem:[#allocation80_spill] sm:$0xff] %v8036_v51  ;;  %v920_v51 = vld [vmem:[#allocation2 + $0x142] sm:$0xff] }
 0x285   : > { %1731 = vrot.lane.b32.xlu0 %v866_v3, %s6779_s21 }
 0x286   : > { %1663 = vrot.lane.b32.xlu1 %v864_v22, %s6778_s20  ;;  %1659 = vrot.lane.b32.xlu2 %v12398_v39, %s6778_s20 }
 0x287   : > { %v8042_v19 = vpop.permute.xlu0 %1519 }
 0x288   : > { %12399 = vst [vmem:[#allocation81_spill] sm:$0xff] %v8042_v19  ;;  %v8044_v17 = vpop.permute.xlu1 %1515  ;;  %v8046_v7 = vpop.permute.xlu2 %1529  ;;  %v872_v19 = vld [vmem:[#allocation2 + $0x81] sm:$0xff] }
 0x289   : > { %12400 = vst [vmem:[#allocation85_spill] sm:$0xff] %v8044_v17  ;;  %v870_v17 = vld [vmem:[#allocation2 + $0x69] sm:$0xff] }
 0x28a   : > { %12401 = vst [vmem:[#allocation126_spill] sm:$0xff] %v8046_v7  ;;  %v868_v7 = vld [vmem:[#allocation2 + $0x51] sm:$0xff] }
 0x28d   : > { %1737 = vrot.lane.b32.xlu0 %v869_v27, %s6779_s21 }
 0x28e   : > { %1733 = vrot.lane.b32.xlu1 %v867_v61, %s6779_s21  ;;  %1729 = vrot.lane.b32.xlu2 %v865_v62, %s6779_s21 }
 0x28f   : > { %v8051_v3 = vpop.permute.xlu0 %1525 }
 0x290   : > { %12402 = vst [vmem:[#allocation127_spill] sm:$0xff] %v8051_v3  ;;  %v8053_v22 = vpop.permute.xlu1 %1521  ;;  %v8055_v39 = vpop.permute.xlu2 %1535  ;;  %v885_v3 = vld [vmem:[#allocation2 + $0x121] sm:$0xff] }
 0x291   : > { %12403 = vst [vmem:[#allocation128_spill] sm:$0xff] %v8055_v39  ;;  %v871_v39 = vld [vmem:[#allocation2 + $0x79] sm:$0xff] }
 0x295   : > { %1743 = vrot.lane.b32.xlu0 %v872_v19, %s6779_s21 }
 0x296   : > { %1739 = vrot.lane.b32.xlu1 %v870_v17, %s6779_s21  ;;  %1735 = vrot.lane.b32.xlu2 %v868_v7, %s6779_s21 }
 0x297   : > { %v8060_v27 = vpop.permute.xlu0 %1531 }
 0x298   : > { %12404 = vst [vmem:[#allocation129_spill] sm:$0xff] %v8060_v27  ;;  %v8062_v61 = vpop.permute.xlu1 %1527  ;;  %v8064_v62 = vpop.permute.xlu2 %1605  ;;  %v878_v27 = vld [vmem:[#allocation2 + $0xc9] sm:$0xff] }
 0x299   : > { %12405 = vst [vmem:[#allocation130_spill] sm:$0xff] %v8062_v61  ;;  %v874_v61 = vld [vmem:[#allocation2 + $0x99] sm:$0xff] }
 0x29d   : > { %1749 = vrot.lane.b32.xlu0 %v875_v47, %s6779_s21 }
 0x29e   : > { %1745 = vrot.lane.b32.xlu1 %v873_v26, %s6779_s21  ;;  %1741 = vrot.lane.b32.xlu2 %v871_v39, %s6779_s21 }
 0x29f   : > { %v8069_v19 = vpop.permute.xlu0 %1601 }
 0x2a0   : > { %v8071_v17 = vpop.permute.xlu1 %1533  ;;  %v8073_v7 = vpop.permute.xlu2 %1611 }
 0x2a1   : > { %12406 = vst [vmem:[#allocation131_spill] sm:$0xff] %v8071_v17  ;;  %v879_v17 = vld [vmem:[#allocation2 + $0xd9] sm:$0xff] }
 0x2a5   : > { %1755 = vrot.lane.b32.xlu0 %v878_v27, %s6779_s21 }
 0x2a6   : > { %1751 = vrot.lane.b32.xlu1 %v876_v41, %s6779_s21  ;;  %1747 = vrot.lane.b32.xlu2 %v874_v61, %s6779_s21 }
 0x2a7   : > { %v8078_v47 = vpop.permute.xlu0 %1607 }
 0x2a8   : > { %v8080_v26 = vpop.permute.xlu1 %1603  ;;  %v8082_v39 = vpop.permute.xlu2 %1617 }
 0x2ad   : > { %1761 = vrot.lane.b32.xlu0 %v881_v15, %s6779_s21 }
 0x2ae   : > { %1757 = vrot.lane.b32.xlu1 %v879_v17, %s6779_s21  ;;  %1753 = vrot.lane.b32.xlu2 %v877_v28, %s6779_s21 }
 0x2af   : > { %v8087_v27 = vpop.permute.xlu0 %1613 }
 0x2b0   : > { %v8089_v41 = vpop.permute.xlu1 %1609  ;;  %v8091_v61 = vpop.permute.xlu2 %1623 }
 0x2b1   : > { %12407 = vst [vmem:[#allocation132_spill] sm:$0xff] %v8091_v61  ;;  %v883_v61 = vld [vmem:[#allocation2 + $0x109] sm:$0xff] }
 0x2b5   : > { %1767 = vrot.lane.b32.xlu0 %v884_v30, %s6779_s21 }
 0x2b6   : > { %1763 = vrot.lane.b32.xlu1 %v882_v56, %s6779_s21  ;;  %1759 = vrot.lane.b32.xlu2 %v880_v50, %s6779_s21 }
 0x2b7   : > { %v8096_v15 = vpop.permute.xlu0 %1619 }
 0x2b8   : > { %12408 = vst [vmem:[#allocation133_spill] sm:$0xff] %v8096_v15  ;;  %v8098_v17 = vpop.permute.xlu1 %1615  ;;  %v8100_v28 = vpop.permute.xlu2 %1629  ;;  %v915_v15 = vld [vmem:[#allocation2 + $0x10a] sm:$0xff] }
 0x2b9   : > { %12409 = vst [vmem:[#allocation134_spill] sm:$0xff] %v8100_v28  ;;  %v886_v28 = vld [vmem:[#allocation2 + $0x129] sm:$0xff] }
 0x2bd   : > { %1773 = vrot.lane.b32.xlu0 %v887_v55, %s6779_s21 }
 0x2be   : > { %1769 = vrot.lane.b32.xlu1 %v885_v3, %s6779_s21  ;;  %1765 = vrot.lane.b32.xlu2 %v883_v61, %s6779_s21 }
 0x2bf   : > { %v8105_v30 = vpop.permute.xlu0 %1625 }
 0x2c0   : > { %12410 = vst [vmem:[#allocation135_spill] sm:$0xff] %v8105_v30  ;;  %v8107_v56 = vpop.permute.xlu1 %1621  ;;  %v8109_v50 = vpop.permute.xlu2 %1635  ;;  %v891_v30 = vld [vmem:[#allocation2 + $0x169] sm:$0xff] }
 0x2c1   : > { %12411 = vst [vmem:[#allocation136_spill] sm:$0xff] %v8107_v56  ;;  %v906_v56 = vld [vmem:[#allocation2 + $0x9a] sm:$0xff] }
 0x2c2   : > { %12412 = vst [vmem:[#allocation137_spill] sm:$0xff] %v8109_v50  ;;  %v889_v50 = vld [vmem:[#allocation2 + $0x151] sm:$0xff] }
 0x2c5   : > { %1779 = vrot.lane.b32.xlu0 %v890_v35, %s6779_s21 }
 0x2c6   : > { %1775 = vrot.lane.b32.xlu1 %v888_v31, %s6779_s21  ;;  %1771 = vrot.lane.b32.xlu2 %v886_v28, %s6779_s21 }
 0x2c7   : > { %v8114_v55 = vpop.permute.xlu0 %1631 }
 0x2c8   : > { %12413 = vst [vmem:[#allocation138_spill] sm:$0xff] %v8114_v55  ;;  %v8116_v3 = vpop.permute.xlu1 %1627  ;;  %v8118_v61 = vpop.permute.xlu2 %1641  ;;  %v896_v55 = vld [vmem:[#allocation2 + $0x1a1] sm:$0xff] }
 0x2c9   : > { %12414 = vst [vmem:[#allocation139_spill] sm:$0xff] %v8116_v3  ;;  %v892_v3 = vld [vmem:[#allocation2 + $0x171] sm:$0xff] }
 0x2ca   : > { %12415 = vst [vmem:[#allocation140_spill] sm:$0xff] %v8118_v61  ;;  %v895_v61 = vld [vmem:[#allocation2 + $0x199] sm:$0xff] }
 0x2cd   : > { %1785 = vrot.lane.b32.xlu0 %v7787_v24, %s6779_s21 }
 0x2ce   : > { %1781 = vrot.lane.b32.xlu1 %v891_v30, %s6779_s21  ;;  %1777 = vrot.lane.b32.xlu2 %v889_v50, %s6779_s21 }
 0x2cf   : > { %v8124_v35 = vpop.permute.xlu0 %1637 }
 0x2d0   : > { %12416 = vst [vmem:[#allocation141_spill] sm:$0xff] %v8124_v35  ;;  %v8126_v31 = vpop.permute.xlu1 %1633  ;;  %v8128_v28 = vpop.permute.xlu2 %1647  ;;  %v899_v35 = vld [vmem:[#allocation2 + $0x4a] sm:$0xff] }
 0x2d1   : > { %12417 = vst [vmem:[#allocation142_spill] sm:$0xff] %v8126_v31  ;;  %v898_v31 = vld [vmem:[#allocation2 + $0x3a] sm:$0xff] }
 0x2d2   : > { %12418 = vst [vmem:[#allocation143_spill] sm:$0xff] %v8128_v28  ;;  %v897_v28 = vld [vmem:[#allocation2 + $0x32] sm:$0xff] }
 0x2d5   : > { %1791 = vrot.lane.b32.xlu0 %v896_v55, %s6779_s21 }
 0x2d6   : > { %1787 = vrot.lane.b32.xlu1 %v7771_v57, %s6779_s21  ;;  %1783 = vrot.lane.b32.xlu2 %v892_v3, %s6779_s21 }
 0x2d7   : > { %v8134_v24 = vpop.permute.xlu0 %1643 }
 0x2d8   : > { %12419 = vst [vmem:[#allocation144_spill] sm:$0xff] %v8134_v24  ;;  %v8136_v30 = vpop.permute.xlu1 %1639  ;;  %v8138_v50 = vpop.permute.xlu2 %1653  ;;  %v902_v24 = vld [vmem:[#allocation2 + $0x6a] sm:$0xff] }
 0x2d9   : > { %12420 = vst [vmem:[#allocation145_spill] sm:$0xff] %v8136_v30  ;;  %v900_v30 = vld [vmem:[#allocation2 + $0x52] sm:$0xff] }
 0x2da   : > { %12421 = vst [vmem:[#allocation146_spill] sm:$0xff] %v8138_v50  ;;  %v905_v50 = vld [vmem:[#allocation2 + $0x92] sm:$0xff] }
 0x2dd   : > { %1861 = vrot.lane.b32.xlu0 %v899_v35, %s6780_s22 }
 0x2de   : > { %1857 = vrot.lane.b32.xlu1 %v897_v28, %s6780_s22  ;;  %1789 = vrot.lane.b32.xlu2 %v895_v61, %s6779_s21 }
 0x2df   : > { %v8143_v55 = vpop.permute.xlu0 %1649 }
 0x2e0   : > { %v8145_v57 = vpop.permute.xlu1 %1645  ;;  %v8147_v3 = vpop.permute.xlu2 %1659 }
 0x2e1   : > { %12422 = vst [vmem:[#allocation147_spill] sm:$0xff] %v8145_v57  ;;  %v903_v57 = vld [vmem:[#allocation2 + $0x7a] sm:$0xff] }
 0x2e2   : > { %12423 = vst [vmem:[#allocation148_spill] sm:$0xff] %v8147_v3  ;;  %v901_v3 = vld [vmem:[#allocation2 + $0x62] sm:$0xff] }
 0x2e5   : > { %1867 = vrot.lane.b32.xlu0 %v902_v24, %s6780_s22 }
 0x2e6   : > { %1863 = vrot.lane.b32.xlu1 %v900_v30, %s6780_s22  ;;  %1859 = vrot.lane.b32.xlu2 %v898_v31, %s6780_s22 }
 0x2e7   : > { %v8152_v35 = vpop.permute.xlu0 %1655 }
 0x2e8   : > { %12424 = vst [vmem:[#allocation149_spill] sm:$0xff] %v8152_v35  ;;  %v8154_v28 = vpop.permute.xlu1 %1651  ;;  %v8156_v61 = vpop.permute.xlu2 %1729  ;;  %v908_v35 = vld [vmem:[#allocation2 + $0xb2] sm:$0xff] }
 0x2e9   : > { %12425 = vst [vmem:[#allocation150_spill] sm:$0xff] %v8154_v28  ;;  %v917_v28 = vld [vmem:[#allocation2 + $0x122] sm:$0xff] }
 0x2ed   : > { %1873 = vrot.lane.b32.xlu0 %v905_v50, %s6780_s22 }
 0x2ee   : > { %1869 = vrot.lane.b32.xlu1 %v903_v57, %s6780_s22  ;;  %1865 = vrot.lane.b32.xlu2 %v901_v3, %s6780_s22 }
 0x2ef   : > { %v8161_v24 = vpop.permute.xlu0 %1661 }
 0x2f0   : > { %12426 = vst [vmem:[#allocation151_spill] sm:$0xff] %v8161_v24  ;;  %v8163_v30 = vpop.permute.xlu1 %1657  ;;  %v8165_v31 = vpop.permute.xlu2 %1735  ;;  %v911_v24 = vld [vmem:[#allocation2 + $0xda] sm:$0xff] }
 0x2f1   : > { %12427 = vst [vmem:[#allocation152_spill] sm:$0xff] %v8163_v30  ;;  %v909_v30 = vld [vmem:[#allocation2 + $0xc2] sm:$0xff] }
 0x2f5   : > { %1879 = vrot.lane.b32.xlu0 %v908_v35, %s6780_s22 }
 0x2f6   : > { %1875 = vrot.lane.b32.xlu1 %v906_v56, %s6780_s22  ;;  %1871 = vrot.lane.b32.xlu2 %v904_v21, %s6780_s22 }
 0x2f7   : > { %v8170_v50 = vpop.permute.xlu0 %1731 }
 0x2f8   : > { %v8172_v57 = vpop.permute.xlu1 %1663  ;;  %v8174_v3 = vpop.permute.xlu2 %1741 }
 0x2f9   : > { %12428 = vst [vmem:[#allocation153_spill] sm:$0xff] %v8172_v57  ;;  %v912_v57 = vld [vmem:[#allocation2 + $0xe2] sm:$0xff] }
 0x2fd   : > { %1885 = vrot.lane.b32.xlu0 %v911_v24, %s6780_s22 }
 0x2fe   : > { %1881 = vrot.lane.b32.xlu1 %v909_v30, %s6780_s22  ;;  %1877 = vrot.lane.b32.xlu2 %v907_v43, %s6780_s22 }
 0x2ff   : > { %v8179_v35 = vpop.permute.xlu0 %1737 }
 0x300   : > { %v8181_v56 = vpop.permute.xlu1 %1733  ;;  %v8183_v21 = vpop.permute.xlu2 %1747 }
 0x301   : > { %12429 = vst [vmem:[#allocation154_spill] sm:$0xff] %v8183_v21  ;;  %v913_v21 = vld [vmem:[#allocation2 + $0xf2] sm:$0xff] }
 0x305   : > { %1891 = vrot.lane.b32.xlu0 %v914_v6, %s6780_s22 }
 0x306   : > { %1887 = vrot.lane.b32.xlu1 %v912_v57, %s6780_s22  ;;  %1883 = vrot.lane.b32.xlu2 %v910_v25, %s6780_s22 }
 0x307   : > { %v8188_v24 = vpop.permute.xlu0 %1743 }
 0x308   : > { %v8190_v30 = vpop.permute.xlu1 %1739  ;;  %v8192_v43 = vpop.permute.xlu2 %1753 }
 0x309   : > { %12430 = vst [vmem:[#allocation155_spill] sm:$0xff] %v8192_v43  ;;  %v916_v43 = vld [vmem:[#allocation2 + $0x112] sm:$0xff] }
 0x30d   : > { %1897 = vrot.lane.b32.xlu0 %v917_v28, %s6780_s22 }
 0x30e   : > { %1893 = vrot.lane.b32.xlu1 %v915_v15, %s6780_s22  ;;  %1889 = vrot.lane.b32.xlu2 %v913_v21, %s6780_s22 }
 0x30f   : > { %v8197_v6 = vpop.permute.xlu0 %1749 }
 0x310   : > { %12431 = vst [vmem:[#allocation156_spill] sm:$0xff] %v8197_v6  ;;  %v8199_v57 = vpop.permute.xlu1 %1745  ;;  %v8201_v25 = vpop.permute.xlu2 %1759  ;;  %v923_v6 = vld [vmem:[#allocation2 + $0x16a] sm:$0xff] }
 0x311   : > { %12432 = vst [vmem:[#allocation157_spill] sm:$0xff] %v8201_v25  ;;  %v919_v25 = vld [vmem:[#allocation2 + $0x13a] sm:$0xff] }
 0x315   : > { %1903 = vrot.lane.b32.xlu0 %v920_v51, %s6780_s22 }
 0x316   : > { %1899 = vrot.lane.b32.xlu1 %v918_v36, %s6780_s22  ;;  %1895 = vrot.lane.b32.xlu2 %v916_v43, %s6780_s22 }
 0x317   : > { %v8206_v28 = vpop.permute.xlu0 %1755 }
 0x318   : > { %12433 = vst [vmem:[#allocation158_spill] sm:$0xff] %v8206_v28  ;;  %v8208_v15 = vpop.permute.xlu1 %1751  ;;  %v8210_v21 = vpop.permute.xlu2 %1765  ;;  %v2224_v28 = vld [vmem:[%s12159_s2 + $0x40] sm:$0xff] }
 0x319   : > { %12434 = vst [vmem:[#allocation159_spill] sm:$0xff] %v8208_v15  ;;  %2329 = vmatpush.msra.mxu0 %v2224_v28  ;;  %6644 = vmatpush.msra.mxu3 %v2224_v28 }
 0x31a   : > { %12435 = vst [vmem:[#allocation160_spill] sm:$0xff] %v8210_v21  ;;  %v922_v21 = vld [vmem:[#allocation2 + $0x15a] sm:$0xff] }
 0x31d   : > { %1909 = vrot.lane.b32.xlu0 %v923_v6, %s6780_s22  ;;  %v2223_v6 = vld [vmem:[%s12159_s2 + $0x38] sm:$0xff] }
 0x31e   : > { %1905 = vrot.lane.b32.xlu1 %v921_v9, %s6780_s22  ;;  %1901 = vrot.lane.b32.xlu2 %v919_v25, %s6780_s22  ;;  %v2222_v9 = vld [vmem:[%s12159_s2 + $0x30] sm:$0xff] }
 0x31f   : > { %v8215_v51 = vpop.permute.xlu0 %1761  ;;  %2330 = vmatpush.msra.mxu0 %v2223_v6  ;;  %6645 = vmatpush.msra.mxu3 %v2223_v6  ;;  %v924_v25 = vld [vmem:[#allocation2 + $0x172] sm:$0xff] }
 0x320   : > { %12436 = vst [vmem:[#allocation161_spill] sm:$0xff] %v8215_v51  ;;  %v8217_v36 = vpop.permute.xlu1 %1757  ;;  %v8219_v43 = vpop.permute.xlu2 %1771 }
 0x321   : > { %12437 = vst [vmem:[#allocation162_spill] sm:$0xff] %v8217_v36  ;;  %2331 = vmatpush.msra.mxu0 %v2222_v9  ;;  %6646 = vmatpush.msra.mxu3 %v2222_v9  ;;  %v2219_v36 = vld [vmem:[%s12159_s2 + $0x18] sm:$0xff]  ;;  %v2217_v9 = vld [vmem:[%s12159_s2 + $0x8] sm:$0xff] }
 0x322   : > { %12438 = vst [vmem:[#allocation163_spill] sm:$0xff] %v8219_v43  ;;  %v2221_v43 = vld [vmem:[%s12159_s2 + $0x28] sm:$0xff] }
 0x323   : > { %2332 = vmatpush.msra.mxu0 %v2221_v43  ;;  %6647 = vmatpush.msra.mxu3 %v2221_v43 }
 0x325   : > { %1915 = vrot.lane.b32.xlu0 %v7923_v8, %s6780_s22  ;;  %v2220_v8 = vld [vmem:[%s12159_s2 + $0x20] sm:$0xff] }
 0x326   : > { %1911 = vrot.lane.b32.xlu1 %v924_v25, %s6780_s22  ;;  %1907 = vrot.lane.b32.xlu2 %v922_v21, %s6780_s22  ;;  %v927_v25 = vld [vmem:[#allocation2 + $0x19a] sm:$0xff]  ;;  %v2218_v21 = vld [vmem:[%s12159_s2 + $0x10] sm:$0xff] }
 0x327   : > { %v8237_v28 = vpop.permute.xlu0 %1767  ;;  %2333 = vmatpush.msra.mxu0 %v2220_v8  ;;  %6648 = vmatpush.msra.mxu3 %v2220_v8  ;;  %v2216_v8 = vld [vmem:[%s12159_s2] sm:$0xff] }
 0x328   : > { %12439 = vst [vmem:[#allocation164_spill] sm:$0xff] %v8237_v28  ;;  %v8239_v51 = vpop.permute.xlu1 %1763  ;;  %v8241_v6 = vpop.permute.xlu2 %1777 }
 0x329   : > { %12440 = vst [vmem:[#allocation165_spill] sm:$0xff] %v8239_v51  ;;  %2334 = vmatpush.msra.mxu0 %v2219_v36  ;;  %6649 = vmatpush.msra.mxu3 %v2219_v36  ;;  %v928_v36 = vld [vmem:[#allocation2 + $0x1a2] sm:$0xff] }
 0x32b   : > { %2335 = vmatpush.msra.mxu0 %v2218_v21  ;;  %6650 = vmatpush.msra.mxu3 %v2218_v21 }
 0x32d   : > { %2336 = vmatpush.msra.mxu0 %v2217_v9  ;;  %6651 = vmatpush.msra.mxu3 %v2217_v9 }
 0x32e   : > { %1917 = vrot.lane.b32.xlu1 %v927_v25, %s6780_s22  ;;  %1913 = vrot.lane.b32.xlu2 %v7909_v46, %s6780_s22 }
 0x32f   : > { %v8258_v43 = vpop.permute.xlu0 %1773  ;;  %2337 = vmatpush.msra.mxu0 %v2216_v8  ;;  %6652 = vmatpush.msra.mxu3 %v2216_v8  ;;  %v12449_v8 = vld [vmem:[#allocation4_spill] sm:$0xff] }
 0x330   : > { %12441 = vst [vmem:[#allocation166_spill] sm:$0xff] %v8258_v43  ;;  %v8260_v28 = vpop.permute.xlu1 %1769  ;;  %v8265_v51 = vpop.permute.xlu2 %1783  ;;  %v1953_v44 = vsel %vm326_vm0, %v640_v60, %v12449_v8 }
 0x331   : > { %12442 = vst [vmem:[#allocation167_spill] sm:$0xff] %v8260_v28 }
 0x332   : > { %12443 = vst [vmem:[#allocation168_spill] sm:$0xff] %v8265_v51 }
 0x336   : > { %1919 = vrot.lane.b32.xlu2 %v928_v36, %s6780_s22  ;;  %v12450_v36 = vld [vmem:[#allocation50_spill] sm:$0xff] }
 0x337   : > { %v8268_v25 = vpop.permute.xlu0 %1779 }
 0x338   : > { %v8270_v46 = vpop.permute.xlu1 %1775  ;;  %v8272_v21 = vpop.permute.xlu2 %1789 }
 0x339   : > { %12444 = vst [vmem:[#allocation169_spill] sm:$0xff] %v8270_v46  ;;  %v1986_v46 = vsel %vm1985_vm3, %v1953_v44, %v12450_v36 }
 0x33a   : > { %12445 = vst [vmem:[#allocation170_spill] sm:$0xff] %v8272_v21  ;;  %v2019_v21 = vsel %vm2018_vm5, %v1986_v46, %v7693_v52  ;;  %v12451_v46 = vld [vmem:[#allocation6_spill] sm:$0xff] }
 0x33f   : > { %v8274_v43 = vpop.permute.xlu0 %1785 }
 0x340   : > { %12446 = vst [vmem:[#allocation171_spill] sm:$0xff] %v8274_v43  ;;  %v8276_v28 = vpop.permute.xlu1 %1781  ;;  %v1860_v15 = vpop.permute.xlu2 %1859  ;;  %v2052_v43 = vsel %vm2051_vm4, %v2019_v21, %v7809_v38 }
 0x347   : > { %v8278_v9 = vpop.permute.xlu0 %1791 }
 0x348   : > { %12447 = vst [vmem:[#allocation172_spill] sm:$0xff] %v8278_v9  ;;  %v8280_v51 = vpop.permute.xlu1 %1787  ;;  %v2085_v9 = vsel %vm2084_vm6, %v2052_v43, %v7964_v29  ;;  %v1866_v36 = vpop.permute.xlu2 %1865  ;;  %v12452_v29 = vld [vmem:[#allocation41_spill] sm:$0xff] }
 0x349   : > { %12448 = vst [vmem:[#allocation173_spill] sm:$0xff] %v8280_v51  ;;  %v641_v51 = vld [vmem:[#allocation2 + $0x8] sm:$0xff]  ;;  %v2118_v60 = vsel %vm2117_vm8, %v2085_v9, %v8069_v19 }
 0x34a   : > { %v2151_v44 = vsel %vm2150_vm7, %v2118_v60, %v8156_v61  ;;  %v1954_v21 = vsel %vm326_vm0, %v641_v51, %v12451_v46  ;;  %v6690_v46 = vld [vmem:[#allocation2 + $0x18] sm:$0xff] }
 0x34b   : > { %v1987_v43 = vsel %vm1985_vm3, %v1954_v21, %v12452_v29  ;;  %v12453_v21 = vld [vmem:[#allocation9_spill] sm:$0xff] }
 0x34c   : > { %v2020_v19 = vsel %vm2018_vm5, %v1987_v43, %v7707_v33  ;;  %v1955_v33 = vsel %vm326_vm0, %v6690_v46, %v12453_v21 }
 0x34d   : > { %v2053_v9 = vsel %vm2051_vm4, %v2020_v19, %v7829_v5  ;;  %v12454_v5 = vld [vmem:[#allocation49_spill] sm:$0xff] }
 0x34e   : > { %v2086_v61 = vsel %vm2084_vm6, %v2053_v9, %v7944_v12  ;;  %v1988_v12 = vsel %vm1985_vm3, %v1955_v33, %v12454_v5 }
 0x34f   : > { %v1862_v8 = vpop.permute.xlu0 %1861  ;;  %v2119_v60 = vsel %vm2117_vm8, %v2086_v61, %v8080_v26  ;;  %v2021_v26 = vsel %vm2018_vm5, %v1988_v12, %v7685_v48 }
 0x350   : > { %v1858_v52 = vpop.permute.xlu1 %1857  ;;  %v2152_v51 = vsel %vm2150_vm7, %v2119_v60, %v8170_v50  ;;  %v8315_v29 = vpop.permute.xlu2 %1871  ;;  %v2054_v50 = vsel %vm2051_vm4, %v2021_v26, %v7843_v58  ;;  %v6691_v60 = vld [vmem:[#allocation2 + $0x20] sm:$0xff]  ;;  %v12456_v58 = vld [vmem:[#allocation55_spill] sm:$0xff]  ;;  %v6692_v26 = vld [vmem:[#allocation2 + $0x30] sm:$0xff] }
 0x351   : > { %v2184_v38 = vsel %vm2183_vm10, %v2151_v44, %v1858_v52 }
 0x352   : > { %6541 = vmatmul.msk.f32.vlgmr.msra.gmra.mxu0 %vm2225_vm9, %v2184_v38  ;;  %v2185_v38 = vsel %vm2183_vm10, %v2152_v51, %v1860_v15  ;;  %v2087_v15 = vsel %vm2084_vm6, %v2054_v50, %v7962_v53  ;;  %v12455_v51 = vld [vmem:[#allocation5_spill] sm:$0xff] }
 0x353   : > { %v2120_v43 = vsel %vm2117_vm8, %v2087_v15, %v8064_v62 }
 0x354   : > { %v2153_v19 = vsel %vm2150_vm7, %v2120_v43, %v8181_v56 }
 0x355   : > { %v2186_v61 = vsel %vm2183_vm10, %v2153_v19, %v1862_v8 }
 0x357   : > { %v1868_v44 = vpop.permute.xlu0 %1867 }
 0x358   : > { %v1864_v52 = vpop.permute.xlu1 %1863  ;;  %v8340_v46 = vpop.permute.xlu2 %1877 }
 0x35a   : > { %6542 = vmatmul.msk.f32.gmra.mxu0 %vm2225_vm9, %v2185_v38  ;;  %v1956_v38 = vsel %vm326_vm0, %v6691_v60, %v12455_v51  ;;  %v6693_v51 = vld [vmem:[#allocation2 + $0x38] sm:$0xff] }
 0x35b   : > { %v1989_v53 = vsel %vm1985_vm3, %v1956_v38, %v12456_v58  ;;  %v12459_v38 = vld [vmem:[#allocation12_spill] sm:$0xff] }
 0x35c   : > { %v2022_v62 = vsel %vm2018_vm5, %v1989_v53, %v7705_v1  ;;  %v12457_v1 = vld [vmem:[#allocation8_spill] sm:$0xff]  ;;  %v1958_v58 = vsel %vm326_vm0, %v6693_v51, %v12459_v38 }
 0x35d   : > { %v2055_v56 = vsel %vm2051_vm4, %v2022_v62, %v7821_v49  ;;  %v1957_v50 = vsel %vm326_vm0, %v6692_v26, %v12457_v1  ;;  %v12458_v49 = vld [vmem:[#allocation46_spill] sm:$0xff] }
 0x35e   : > { %v2088_v8 = vsel %vm2084_vm6, %v2055_v56, %v7975_v42  ;;  %v1990_v15 = vsel %vm1985_vm3, %v1957_v50, %v12458_v49 }
 0x35f   : > { %v8333_v48 = vpop.permute.xlu0 %1873  ;;  %v2121_v21 = vsel %vm2117_vm8, %v2088_v8, %v8078_v47  ;;  %v2023_v42 = vsel %vm2018_vm5, %v1990_v15, %v7719_v45 }
 0x360   : > { %v1870_v9 = vpop.permute.xlu1 %1869  ;;  %v2154_v33 = vsel %vm2150_vm7, %v2121_v21, %v8165_v31  ;;  %v2056_v31 = vsel %vm2051_vm4, %v2023_v42, %v7841_v13  ;;  %v8366_v43 = vpop.permute.xlu2 %1883  ;;  %v12460_v13 = vld [vmem:[#allocation54_spill] sm:$0xff] }
 0x361   : > { %v2187_v12 = vsel %vm2183_vm10, %v2154_v33, %v1864_v52  ;;  %v2089_v52 = vsel %vm2084_vm6, %v2056_v31, %v7955_v4  ;;  %v1991_v4 = vsel %vm1985_vm3, %v1958_v58, %v12460_v13  ;;  %v6694_v33 = vld [vmem:[#allocation2 + $0x48] sm:$0xff]  ;;  %v6695_v31 = vld [vmem:[#allocation2 + $0x50] sm:$0xff]  ;;  %v6696_v58 = vld [vmem:[#allocation2 + $0x60] sm:$0xff] }
 0x362   : > { %6543 = vmatmul.msk.f32.gmra.mxu0 %vm2225_vm9, %v2186_v61  ;;  %v2122_v19 = vsel %vm2117_vm8, %v2089_v52, %v8089_v41  ;;  %v2024_v53 = vsel %vm2018_vm5, %v1991_v4, %v7697_v23  ;;  %v12465_v13 = vld [vmem:[#allocation15_spill] sm:$0xff]  ;;  %v6697_v4 = vld [vmem:[#allocation2 + $0x120] sm:$0xff] }
 0x363   : > { %v2155_v61 = vsel %vm2150_vm7, %v2122_v19, %v8179_v35  ;;  %v2057_v41 = vsel %vm2051_vm4, %v2024_v53, %v7855_v2 }
 0x364   : > { %v2188_v45 = vsel %vm2183_vm10, %v2155_v61, %v1866_v36  ;;  %v2090_v35 = vsel %vm2084_vm6, %v2057_v41, %v7973_v16  ;;  %v12462_v16 = vld [vmem:[#allocation61_spill] sm:$0xff] }
 0x365   : > { %v2123_v36 = vsel %vm2117_vm8, %v2090_v35, %v8073_v7 }
 0x366   : > { %v2156_v56 = vsel %vm2150_vm7, %v2123_v36, %v8190_v30 }
 0x367   : > { %v8360_v47 = vpop.permute.xlu0 %1879  ;;  %v2189_v23 = vsel %vm2183_vm10, %v2156_v56, %v1868_v44 }
 0x368   : > { %v8350_v5 = vpop.permute.xlu1 %1875  ;;  %v8392_v8 = vpop.permute.xlu2 %1889 }
 0x36a   : > { %6544 = vmatmul.msk.f32.gmra.mxu0 %vm2225_vm9, %v2187_v12  ;;  %v12461_v12 = vld [vmem:[#allocation7_spill] sm:$0xff] }
 0x36b   : > { %v1959_v2 = vsel %vm326_vm0, %v6694_v33, %v12461_v12 }
 0x36c   : > { %v1992_v26 = vsel %vm1985_vm3, %v1959_v2, %v12462_v16  ;;  %v6698_v16 = vld [vmem:[#allocation2 + $0x68] sm:$0xff] }
 0x36d   : > { %v2025_v7 = vsel %vm2018_vm5, %v1992_v26, %v7717_v10  ;;  %v12463_v10 = vld [vmem:[#allocation11_spill] sm:$0xff] }
 0x36e   : > { %v2058_v30 = vsel %vm2051_vm4, %v2025_v7, %v7833_v54  ;;  %v1960_v52 = vsel %vm326_vm0, %v6695_v31, %v12463_v10  ;;  %v12469_v7 = vld [vmem:[#allocation34_spill] sm:$0xff]  ;;  %v12473_v31 = vld [vmem:[#allocation115_spill] sm:$0xff] }
 0x36f   : > { %v8386_v62 = vpop.permute.xlu0 %1885  ;;  %v2091_v1 = vsel %vm2084_vm6, %v2058_v30, %v7987_v63  ;;  %v12464_v63 = vld [vmem:[#allocation51_spill] sm:$0xff]  ;;  %v12471_v30 = vld [vmem:[#allocation84_spill] sm:$0xff] }
 0x370   : > { %v8372_v60 = vpop.permute.xlu1 %1881  ;;  %v2124_v44 = vsel %vm2117_vm8, %v2091_v1, %v8087_v27  ;;  %v8419_v54 = vpop.permute.xlu2 %1895  ;;  %v1993_v27 = vsel %vm1985_vm3, %v1960_v52, %v12464_v63  ;;  %v12474_v52 = vld [vmem:[#allocation43_spill] sm:$0xff] }
 0x371   : > { %v2157_v50 = vsel %vm2150_vm7, %v2124_v44, %v8174_v3  ;;  %v2026_v3 = vsel %vm2018_vm5, %v1993_v27, %v7731_v59  ;;  %v1961_v59 = vsel %vm326_vm0, %v6696_v58, %v12465_v13  ;;  %v12472_v44 = vld [vmem:[#allocation111_spill] sm:$0xff]  ;;  %v12475_v27 = vld [vmem:[#allocation52_spill] sm:$0xff]  ;;  %v12479_v13 = vld [vmem:[#allocation154_spill] sm:$0xff] }
 0x372   : > { %6545 = vmatmul.msk.f32.gmra.mxu0 %vm2225_vm9, %v2188_v45  ;;  %v2190_v42 = vsel %vm2183_vm10, %v2157_v50, %v1870_v9  ;;  %v2059_v19 = vsel %vm2051_vm4, %v2026_v3, %v7853_v32  ;;  %v12466_v32 = vld [vmem:[#allocation27_spill] sm:$0xff] }
 0x373   : > { %v2092_v9 = vsel %vm2084_vm6, %v2059_v19, %v7966_v18  ;;  %v1977_v53 = vsel %vm326_vm0, %v6697_v4, %v12466_v32  ;;  %v12476_v19 = vld [vmem:[#allocation80_spill] sm:$0xff] }
 0x374   : > { %v2125_v61 = vsel %vm2117_vm8, %v2092_v9, %v8098_v17  ;;  %v12467_v17 = vld [vmem:[#allocation60_spill] sm:$0xff]  ;;  %v2010_v41 = vsel %vm1985_vm3, %v1977_v53, %v7671_v0 }
 0x375   : > { %v2158_v45 = vsel %vm2150_vm7, %v2125_v61, %v8188_v24  ;;  %v1994_v24 = vsel %vm1985_vm3, %v1961_v59, %v12467_v17  ;;  %v2043_v35 = vsel %vm2018_vm5, %v2010_v41, %v7793_v34  ;;  %v6700_v17 = vld [vmem:[#allocation2 + $0x78] sm:$0xff] }
 0x376   : > { %v2191_v38 = vsel %vm2183_vm10, %v2158_v45, %v8315_v29  ;;  %v2027_v29 = vsel %vm2018_vm5, %v1994_v24, %v7709_v37  ;;  %v12477_v45 = vld [vmem:[#allocation133_spill] sm:$0xff]  ;;  %v12480_v24 = vld [vmem:[#allocation14_spill] sm:$0xff] }
 0x377   : > { %v8412_v49 = vpop.permute.xlu0 %1891  ;;  %v2060_v56 = vsel %vm2051_vm4, %v2027_v29, %v7867_v11  ;;  %v1963_v41 = vsel %vm326_vm0, %v6700_v17, %v12480_v24  ;;  %v6701_v29 = vld [vmem:[#allocation2 + $0x138] sm:$0xff]  ;;  %v12502_v24 = vld [vmem:[#allocation130_spill] sm:$0xff] }
 0x378   : > { %v8394_v21 = vpop.permute.xlu1 %1887  ;;  %v8453_v36 = vpop.permute.xlu2 %1901  ;;  %v2093_v33 = vsel %vm2084_vm6, %v2060_v56, %v7985_v14 }
 0x379   : > { %v2126_v37 = vsel %vm2117_vm8, %v2093_v33, %v8082_v39  ;;  %v6699_v39 = vld [vmem:[#allocation2 + $0x128] sm:$0xff] }
 0x37a   : > { %6546 = vmatmul.msk.f32.gmra.mxu0 %vm2225_vm9, %v2189_v23  ;;  %v2076_v23 = vsel %vm2051_vm4, %v2043_v35, %v7905_v40  ;;  %v2159_v12 = vsel %vm2150_vm7, %v2126_v37, %v8199_v57  ;;  %v12470_v57 = vld [vmem:[#allocation67_spill] sm:$0xff]  ;;  %v12481_v35 = vld [vmem:[#allocation40_spill] sm:$0xff]  ;;  %v12483_v33 = vld [vmem:[#allocation89_spill] sm:$0xff] }
 0x37b   : > { %v2109_v0 = vsel %vm2084_vm6, %v2076_v23, %v8053_v22  ;;  %v2192_v40 = vsel %vm2183_vm10, %v2159_v12, %v8333_v48  ;;  %v12468_v22 = vld [vmem:[#allocation10_spill] sm:$0xff]  ;;  %v1979_v56 = vsel %vm326_vm0, %v6701_v29, %v12481_v35  ;;  %v12482_v23 = vld [vmem:[#allocation56_spill] sm:$0xff] }
 0x37c   : > { %v2142_v34 = vsel %vm2117_vm8, %v2109_v0, %v8143_v55  ;;  %v1962_v26 = vsel %vm326_vm0, %v6698_v16, %v12468_v22  ;;  %v1978_v55 = vsel %vm326_vm0, %v6699_v39, %v12469_v7  ;;  %v12484_v0 = vld [vmem:[#allocation97_spill] sm:$0xff]  ;;  %v12488_v16 = vld [vmem:[#allocation59_spill] sm:$0xff]  ;;  %v12503_v35 = vld [vmem:[#allocation132_spill] sm:$0xff] }
 0x37d   : > { %v2175_v11 = vsel %vm2150_vm7, %v2142_v34, %v8241_v6  ;;  %v1995_v6 = vsel %vm1985_vm3, %v1962_v26, %v12470_v57  ;;  %v2011_v48 = vsel %vm1985_vm3, %v1978_v55, %v12471_v30  ;;  %v12485_v34 = vld [vmem:[#allocation107_spill] sm:$0xff]  ;;  %v12490_v55 = vld [vmem:[#allocation136_spill] sm:$0xff] }
 0x37e   : > { %v2028_v1 = vsel %vm2018_vm5, %v1995_v6, %v7729_v20  ;;  %v2044_v50 = vsel %vm2018_vm5, %v2011_v48, %v12472_v44  ;;  %v12489_v26 = vld [vmem:[#allocation127_spill] sm:$0xff]  ;;  %v12491_v6 = vld [vmem:[#allocation146_spill] sm:$0xff]  ;;  %v12492_v48 = vld [vmem:[#allocation156_spill] sm:$0xff] }
 0x37f   : > { %v8442_v18 = vpop.permute.xlu0 %1897  ;;  %v2061_v10 = vsel %vm2051_vm4, %v2028_v1, %v12473_v31  ;;  %v2077_v63 = vsel %vm2051_vm4, %v2044_v50, %v12474_v52  ;;  %v12493_v52 = vld [vmem:[#allocation18_spill] sm:$0xff] }
 0x380   : > { %v8414_v15 = vpop.permute.xlu1 %1893  ;;  %v2094_v3 = vsel %vm2084_vm6, %v2061_v10, %v12475_v27  ;;  %v2110_v9 = vsel %vm2084_vm6, %v2077_v63, %v12476_v19  ;;  %v1908_v61 = vpop.permute.xlu2 %1907  ;;  %v6702_v10 = vld [vmem:[#allocation2 + $0x80] sm:$0xff] }
 0x381   : > { %v2127_v20 = vsel %vm2117_vm8, %v2094_v3, %v12477_v45  ;;  %v1964_v63 = vsel %vm326_vm0, %v6702_v10, %v12493_v52  ;;  %v6703_v27 = vld [vmem:[#allocation2 + $0x140] sm:$0xff]  ;;  %v12494_v3 = vld [vmem:[#allocation31_spill] sm:$0xff]  ;;  %v12497_v45 = vld [vmem:[#allocation94_spill] sm:$0xff] }
 0x382   : > { %6547 = vmatmul.msk.f32.gmra.mxu0 %vm2225_vm9, %v2190_v42  ;;  %v2160_v59 = vsel %vm2150_vm7, %v2127_v20, %v12479_v13  ;;  %v1980_v19 = vsel %vm326_vm0, %v6703_v27, %v12494_v3  ;;  %v12499_v13 = vld [vmem:[#allocation120_spill] sm:$0xff]  ;;  %v12516_v52 = vld [vmem:[#allocation126_spill] sm:$0xff]  ;;  %v12517_v3 = vld [vmem:[#allocation135_spill] sm:$0xff] }
 0x383   : > { %v2193_v32 = vsel %vm2183_vm10, %v2160_v59, %v8350_v5  ;;  %v2012_v5 = vsel %vm1985_vm3, %v1979_v56, %v12483_v33  ;;  %v12505_v33 = vld [vmem:[#allocation159_spill] sm:$0xff] }
 0x384   : > { %v2045_v12 = vsel %vm2018_vm5, %v2012_v5, %v12485_v34 }
 0x387   : > { %v8488_v42 = vpop.permute.xlu0 %1903 }
 0x388   : > { %v8434_v51 = vpop.permute.xlu1 %1899  ;;  %v1914_v27 = vpop.permute.xlu2 %1913 }
 0x38a   : > { %6548 = vmatmul.msk.f32.gmra.mxu0 %vm2225_vm9, %v2191_v38  ;;  %v12478_v38 = vld [vmem:[#allocation150_spill] sm:$0xff] }
 0x38b   : > { %v2143_v58 = vsel %vm2117_vm8, %v2110_v9, %v12478_v38  ;;  %v12495_v9 = vld [vmem:[#allocation66_spill] sm:$0xff] }
 0x38c   : > { %v2176_v4 = vsel %vm2150_vm7, %v2143_v58, %v8268_v25  ;;  %v1996_v25 = vsel %vm1985_vm3, %v1963_v41, %v12482_v23  ;;  %v12498_v38 = vld [vmem:[#allocation110_spill] sm:$0xff]  ;;  %v12504_v23 = vld [vmem:[#allocation149_spill] sm:$0xff] }
 0x38d   : > { %v2209_v53 = vsel %vm2183_vm10, %v2176_v4, %v1908_v61  ;;  %v2029_v37 = vsel %vm2018_vm5, %v1996_v25, %v12484_v0  ;;  %v12496_v61 = vld [vmem:[#allocation92_spill] sm:$0xff] }
 0x38e   : > { %v12500_v4 = vld [vmem:[#allocation28_spill] sm:$0xff] }
 0x38f   : > { %v1910_v7 = vpop.permute.xlu0 %1909  ;;  %v12506_v0 = vld [vmem:[#allocation168_spill] sm:$0xff] }
 0x390   : > { %v1906_v2 = vpop.permute.xlu1 %1905 }
 0x391   : > { %v2208_v14 = vsel %vm2183_vm10, %v2175_v11, %v1906_v2  ;;  %v12486_v11 = vld [vmem:[#allocation117_spill] sm:$0xff] }
 0x392   : > { %6549 = vmatmul.msk.f32.gmra.mxu0 %vm2225_vm9, %v2192_v40  ;;  %6565 = vmatmul.msk.f32.vlgmr.msra.gmra.mxu3 %vm2225_vm9, %v2208_v14  ;;  %v2062_v2 = vsel %vm2051_vm4, %v2029_v37, %v12486_v11  ;;  %v12487_v40 = vld [vmem:[#allocation37_spill] sm:$0xff]  ;;  %v6704_v11 = vld [vmem:[#allocation2 + $0x90] sm:$0xff] }
 0x393   : > { %v2078_v14 = vsel %vm2051_vm4, %v2045_v12, %v12487_v40  ;;  %v2095_v22 = vsel %vm2084_vm6, %v2062_v2, %v12488_v16  ;;  %v12507_v2 = vld [vmem:[#allocation13_spill] sm:$0xff]  ;;  %v12508_v16 = vld [vmem:[#allocation39_spill] sm:$0xff] }
 0x394   : > { %v2111_v39 = vsel %vm2084_vm6, %v2078_v14, %v12489_v26  ;;  %v2128_v57 = vsel %vm2117_vm8, %v2095_v22, %v12490_v55  ;;  %v1965_v40 = vsel %vm326_vm0, %v6704_v11, %v12507_v2  ;;  %v6705_v14 = vld [vmem:[#allocation2 + $0x150] sm:$0xff]  ;;  %v12509_v26 = vld [vmem:[#allocation73_spill] sm:$0xff]  ;;  %v12511_v55 = vld [vmem:[#allocation96_spill] sm:$0xff] }
 0x395   : > { %v2144_v30 = vsel %vm2117_vm8, %v2111_v39, %v12491_v6  ;;  %v2161_v1 = vsel %vm2150_vm7, %v2128_v57, %v12492_v48  ;;  %v1981_v22 = vsel %vm326_vm0, %v6705_v14, %v12508_v16  ;;  %v1998_v39 = vsel %vm1985_vm3, %v1965_v40, %v12509_v26  ;;  %v12512_v6 = vld [vmem:[#allocation113_spill] sm:$0xff]  ;;  %v12513_v48 = vld [vmem:[#allocation116_spill] sm:$0xff]  ;;  %v12531_v14 = vld [vmem:[#allocation139_spill] sm:$0xff] }
 0x396   : > { %v2177_v44 = vsel %vm2150_vm7, %v2144_v30, %v8276_v28  ;;  %v2194_v50 = vsel %vm2183_vm10, %v2161_v1, %v8340_v46  ;;  %v1997_v28 = vsel %vm1985_vm3, %v1964_v63, %v12495_v9  ;;  %v2013_v46 = vsel %vm1985_vm3, %v1980_v19, %v12496_v61  ;;  %v12518_v9 = vld [vmem:[#allocation152_spill] sm:$0xff]  ;;  %v12519_v61 = vld [vmem:[#allocation155_spill] sm:$0xff]  ;;  %v12530_v11 = vld [vmem:[#allocation129_spill] sm:$0xff] }
 0x397   : > { %v2210_v31 = vsel %vm2183_vm10, %v2177_v44, %v1910_v7  ;;  %v2030_v20 = vsel %vm2018_vm5, %v1997_v28, %v12497_v45  ;;  %v2046_v58 = vsel %vm2018_vm5, %v2013_v46, %v12498_v38  ;;  %v12510_v7 = vld [vmem:[#allocation88_spill] sm:$0xff]  ;;  %v2031_v57 = vsel %vm2018_vm5, %v1998_v39, %v12511_v55  ;;  %v12520_v45 = vld [vmem:[#allocation171_spill] sm:$0xff]  ;;  %v1916_v40 = vpop.permute.xlu0 %1915  ;;  %v12533_v39 = vld [vmem:[#allocation158_spill] sm:$0xff] }
 0x398   : > { %v2063_v59 = vsel %vm2051_vm4, %v2030_v20, %v12499_v13  ;;  %v1912_v29 = vpop.permute.xlu1 %1911  ;;  %v2064_v1 = vsel %vm2051_vm4, %v2031_v57, %v12513_v48  ;;  %v12514_v44 = vld [vmem:[#allocation48_spill] sm:$0xff]  ;;  %v6706_v13 = vld [vmem:[#allocation2 + $0x98] sm:$0xff]  ;;  %v12535_v48 = vld [vmem:[#allocation21_spill] sm:$0xff] }
 0x39a   : > { %6550 = vmatmul.msk.f32.gmra.mxu0 %vm2225_vm9, %v2193_v32  ;;  %6566 = vmatmul.msk.f32.gmra.mxu3 %vm2225_vm9, %v2209_v53  ;;  %v2079_v32 = vsel %vm2051_vm4, %v2046_v58, %v12500_v4  ;;  %v12501_v53 = vld [vmem:[#allocation65_spill] sm:$0xff] }
 0x39b   : > { %v2096_v17 = vsel %vm2084_vm6, %v2063_v59, %v12501_v53  ;;  %v2112_v41 = vsel %vm2084_vm6, %v2079_v32, %v12502_v24  ;;  %v12521_v59 = vld [vmem:[#allocation17_spill] sm:$0xff]  ;;  %v6707_v32 = vld [vmem:[#allocation2 + $0x158] sm:$0xff]  ;;  %v12523_v24 = vld [vmem:[#allocation62_spill] sm:$0xff] }
 0x39c   : > { %v2129_v56 = vsel %vm2117_vm8, %v2096_v17, %v12503_v35  ;;  %v2145_v25 = vsel %vm2117_vm8, %v2112_v41, %v12504_v23  ;;  %v1966_v4 = vsel %vm326_vm0, %v6706_v13, %v12521_v59  ;;  %v12522_v53 = vld [vmem:[#allocation45_spill] sm:$0xff]  ;;  %v12525_v35 = vld [vmem:[#allocation100_spill] sm:$0xff]  ;;  %v12545_v13 = vld [vmem:[#allocation131_spill] sm:$0xff] }
 0x39d   : > { %v2162_v5 = vsel %vm2150_vm7, %v2129_v56, %v12505_v33  ;;  %v2178_v37 = vsel %vm2150_vm7, %v2145_v25, %v12506_v0  ;;  %v1982_v17 = vsel %vm326_vm0, %v6707_v32, %v12522_v53  ;;  %v1999_v41 = vsel %vm1985_vm3, %v1966_v4, %v12523_v24  ;;  %v12526_v23 = vld [vmem:[#allocation109_spill] sm:$0xff]  ;;  %v12527_v33 = vld [vmem:[#allocation119_spill] sm:$0xff]  ;;  %v12528_v0 = vld [vmem:[#allocation42_spill] sm:$0xff] }
 0x39e   : > { %v2195_v34 = vsel %vm2183_vm10, %v2162_v5, %v8360_v47  ;;  %v2211_v12 = vsel %vm2183_vm10, %v2178_v37, %v1912_v29  ;;  %v2014_v47 = vsel %vm1985_vm3, %v1981_v22, %v12510_v7  ;;  %v12524_v29 = vld [vmem:[#allocation91_spill] sm:$0xff]  ;;  %v2032_v56 = vsel %vm2018_vm5, %v1999_v41, %v12525_v35  ;;  %v12532_v22 = vld [vmem:[#allocation148_spill] sm:$0xff]  ;;  %v12546_v53 = vld [vmem:[#allocation134_spill] sm:$0xff] }
 0x39f   : > { %v2047_v30 = vsel %vm2018_vm5, %v2014_v47, %v12512_v6  ;;  %v2065_v5 = vsel %vm2051_vm4, %v2032_v56, %v12527_v33  ;;  %v12534_v47 = vld [vmem:[#allocation173_spill] sm:$0xff]  ;;  %v2655_v32 = vld [vmem:[#allocation3 + $0x1] sm:$0xff] }
 0x3a0   : > { %v1918_v4 = vpop.permute.xlu1 %1917  ;;  %v12547_v24 = vld [vmem:[#allocation151_spill] sm:$0xff]  ;;  %2944 = vrot.lane.b32.xlu0 %v2655_v32, %s6771_s11  ;;  %v12549_v35 = vld [vmem:[#allocation170_spill] sm:$0xff] }
 0x3a1   : > { %v6710_v33 = vld [vmem:[#allocation2 + $0xb0] sm:$0xff]  ;;  %v12568_v32 = vld [vmem:[#allocation71_spill] sm:$0xff] }
 0x3a2   : > { %6551 = vmatmul.msk.f32.gmra.mxu0 %vm2225_vm9, %v2194_v50  ;;  %6567 = vmatmul.msk.f32.gmra.mxu3 %vm2225_vm9, %v2210_v31  ;;  %v2080_v50 = vsel %vm2051_vm4, %v2047_v30, %v12514_v44  ;;  %v12515_v31 = vld [vmem:[#allocation58_spill] sm:$0xff]  ;;  %v6708_v30 = vld [vmem:[#allocation2 + $0xa8] sm:$0xff] }
 0x3a3   : > { %v2097_v10 = vsel %vm2084_vm6, %v2064_v1, %v12515_v31  ;;  %v2113_v63 = vsel %vm2084_vm6, %v2080_v50, %v12516_v52  ;;  %v1967_v1 = vsel %vm326_vm0, %v6708_v30, %v12535_v48  ;;  %v6709_v44 = vld [vmem:[#allocation2 + $0x168] sm:$0xff]  ;;  %v12536_v50 = vld [vmem:[#allocation36_spill] sm:$0xff] }
 0x3a4   : > { %v2130_v19 = vsel %vm2117_vm8, %v2097_v10, %v12517_v3  ;;  %v2146_v28 = vsel %vm2117_vm8, %v2113_v63, %v12518_v9  ;;  %v1983_v31 = vsel %vm326_vm0, %v6709_v44, %v12536_v50  ;;  %v12537_v10 = vld [vmem:[#allocation72_spill] sm:$0xff]  ;;  %v12538_v63 = vld [vmem:[#allocation93_spill] sm:$0xff]  ;;  %v12560_v50 = vld [vmem:[#allocation138_spill] sm:$0xff] }
 0x3a5   : > { %v2163_v46 = vsel %vm2150_vm7, %v2130_v19, %v12519_v61  ;;  %v2179_v20 = vsel %vm2150_vm7, %v2146_v28, %v12520_v45  ;;  %v2000_v52 = vsel %vm1985_vm3, %v1967_v1, %v12537_v10  ;;  %v12540_v19 = vld [vmem:[#allocation112_spill] sm:$0xff]  ;;  %v12541_v28 = vld [vmem:[#allocation123_spill] sm:$0xff]  ;;  %v1920_v1 = vpop.permute.xlu2 %1919  ;;  %v12561_v10 = vld [vmem:[#allocation153_spill] sm:$0xff] }
 0x3a6   : > { %v2196_v38 = vsel %vm2183_vm10, %v2163_v46, %v8372_v60  ;;  %v2212_v58 = vsel %vm2183_vm10, %v2179_v20, %v1914_v27  ;;  %v2015_v60 = vsel %vm1985_vm3, %v1982_v17, %v12524_v29  ;;  %v12539_v27 = vld [vmem:[#allocation95_spill] sm:$0xff]  ;;  %v12542_v46 = vld [vmem:[#allocation125_spill] sm:$0xff]  ;;  %v12543_v20 = vmov 0.0   ;;  %v12548_v29 = vld [vmem:[#allocation162_spill] sm:$0xff] }
 0x3a7   : > { %v2048_v25 = vsel %vm2018_vm5, %v2015_v60, %v12526_v23  ;;  %v2033_v3 = vsel %vm2018_vm5, %v2000_v52, %v12539_v27  ;;  %2541 = vst.msk [vmem:[#allocation3 + $0x28] sm:$0x3] %vm2537_vm11, %v12543_v20  ;;  %v12559_v30 = vld [vmem:[#allocation128_spill] sm:$0xff] }
 0x3a8   : > { %v2081_v37 = vsel %vm2051_vm4, %v2048_v25, %v12528_v0  ;;  %v2066_v61 = vsel %vm2051_vm4, %v2033_v3, %v12541_v28  ;;  %2538 = vst.msk [vmem:[#allocation3 + $0x10] sm:$0x3] %vm2537_vm11, %v12543_v20  ;;  %v12563_v27 = vld [vmem:[#allocation172_spill] sm:$0xff] }
 0x3a9   : > { %v2114_v2 = vsel %vm2084_vm6, %v2081_v37, %v12530_v11  ;;  %2544 = vst.msk [vmem:[#allocation3 + $0x40] sm:$0x3] %vm2537_vm11, %v12543_v20  ;;  %v6711_v37 = vld [vmem:[#allocation2 + $0x170] sm:$0xff]  ;;  %v6712_v28 = vld [vmem:[#allocation2 + $0xc0] sm:$0xff] }
 0x3aa   : > { %6552 = vmatmul.msk.f32.gmra.mxu0 %vm2225_vm9, %v2195_v34  ;;  %6568 = vmatmul.msk.f32.gmra.mxu3 %vm2225_vm9, %v2211_v12  ;;  %v12529_v34 = vld [vmem:[#allocation47_spill] sm:$0xff]  ;;  %v2147_v26 = vsel %vm2117_vm8, %v2114_v2, %v12532_v22  ;;  %2547 = vst.msk [vmem:[#allocation3 + $0x58] sm:$0x3] %vm2537_vm11, %v12543_v20  ;;  %v12553_v2 = vld [vmem:[#allocation90_spill] sm:$0xff] }
 0x3ab   : > { %v2098_v12 = vsel %vm2084_vm6, %v2065_v5, %v12529_v34  ;;  %v2180_v55 = vsel %vm2150_vm7, %v2147_v26, %v12534_v47  ;;  %2550 = vst.msk [vmem:[#allocation3 + $0x70] sm:$0x3] %vm2537_vm11, %v12543_v20  ;;  %v12550_v5 = vld [vmem:[#allocation16_spill] sm:$0xff]  ;;  %v12555_v22 = vld [vmem:[#allocation114_spill] sm:$0xff]  ;;  %v12557_v47 = vld [vmem:[#allocation53_spill] sm:$0xff] }
 0x3ac   : > { %v2131_v16 = vsel %vm2117_vm8, %v2098_v12, %v12531_v14  ;;  %v2213_v6 = vsel %vm2183_vm10, %v2180_v55, %v1916_v40  ;;  %v1968_v0 = vsel %vm326_vm0, %v6710_v33, %v12550_v5  ;;  %v12551_v34 = vld [vmem:[#allocation44_spill] sm:$0xff]  ;;  %2553 = vst.msk [vmem:[#allocation3 + $0x88] sm:$0x3] %vm2537_vm11, %v12543_v20  ;;  %v12554_v14 = vld [vmem:[#allocation99_spill] sm:$0xff]  ;;  %v12571_v33 = vld [vmem:[#allocation26_spill] sm:$0xff] }
 0x3ad   : > { %v2164_v7 = vsel %vm2150_vm7, %v2131_v16, %v12533_v39  ;;  %v1984_v12 = vsel %vm326_vm0, %v6711_v37, %v12551_v34  ;;  %2556 = vst.msk [vmem:[#allocation3 + $0xa0] sm:$0x3] %vm2537_vm11, %v12543_v20  ;;  %v12556_v39 = vld [vmem:[#allocation118_spill] sm:$0xff] }
 0x3ae   : > { %v2197_v57 = vsel %vm2183_vm10, %v2164_v7, %v8366_v43  ;;  %v2016_v43 = vsel %vm1985_vm3, %v1983_v31, %v12538_v63  ;;  %v2017_v40 = vsel %vm1985_vm3, %v1984_v12, %v12553_v2  ;;  %2559 = vst.msk [vmem:[#allocation3 + $0xb8] sm:$0x3] %vm2537_vm11, %v12543_v20  ;;  %v12562_v63 = vld [vmem:[#allocation157_spill] sm:$0xff]  ;;  %v12573_v34 = vld [vmem:[#allocation98_spill] sm:$0xff] }
 0x3af   : > { %v2049_v9 = vsel %vm2018_vm5, %v2016_v43, %v12540_v19  ;;  %v2050_v26 = vsel %vm2018_vm5, %v2017_v40, %v12555_v22  ;;  %2562 = vst.msk [vmem:[#allocation3 + $0xd0] sm:$0x3] %vm2537_vm11, %v12543_v20  ;;  %v2656_v44 = vld [vmem:[#allocation3 + $0x9] sm:$0xff] }
 0x3b0   : > { %v2082_v45 = vsel %vm2051_vm4, %v2049_v9, %v12542_v46  ;;  %v2083_v55 = vsel %vm2051_vm4, %v2050_v26, %v12557_v47  ;;  %2565 = vst.msk [vmem:[#allocation3 + $0xe8] sm:$0x3] %vm2537_vm11, %v12543_v20  ;;  %2946 = vrot.lane.b32.xlu1 %v2656_v44, %s6771_s11  ;;  %v12575_v40 = vld [vmem:[#allocation64_spill] sm:$0xff]  ;;  %v12577_v26 = vld [vmem:[#allocation165_spill] sm:$0xff]  ;;  %v12580_v44 = vld [vmem:[#allocation102_spill] sm:$0xff] }
 0x3b1   : > { %v2115_v59 = vsel %vm2084_vm6, %v2082_v45, %v12545_v13  ;;  %v2116_v48 = vsel %vm2084_vm6, %v2083_v55, %v12559_v30  ;;  %2568 = vst.msk [vmem:[#allocation3 + $0x100] sm:$0x3] %vm2537_vm11, %v12543_v20  ;;  %v12565_v45 = vld [vmem:[#allocation68_spill] sm:$0xff]  ;;  %v6714_v55 = vld [vmem:[#allocation2 + $0xd8] sm:$0xff] }
 0x3b2   : > { %6553 = vmatmul.msk.f32.gmra.mxu0 %vm2225_vm9, %v2196_v38  ;;  %6569 = vmatmul.msk.f32.gmra.mxu3 %vm2225_vm9, %v2212_v58  ;;  %v12544_v38 = vld [vmem:[#allocation57_spill] sm:$0xff]  ;;  %v2148_v41 = vsel %vm2117_vm8, %v2115_v59, %v12547_v24  ;;  %v2149_v52 = vsel %vm2117_vm8, %v2116_v48, %v12561_v10  ;;  %2571 = vst.msk [vmem:[#allocation3 + $0x118] sm:$0x3] %vm2537_vm11, %v12543_v20  ;;  %v8750_v13 = vld [vmem:[%s12162_s5] ss:$0 sm:$0xff]  ;;  %v12567_v59 = vld [vmem:[#allocation122_spill] sm:$0xff] }
 0x3b3   : > { %v2099_v58 = vsel %vm2084_vm6, %v2066_v61, %v12544_v38  ;;  %v2181_v56 = vsel %vm2150_vm7, %v2148_v41, %v12549_v35  ;;  %v2182_v3 = vsel %vm2150_vm7, %v2149_v52, %v12563_v27  ;;  %2574 = vst.msk [vmem:[#allocation3 + $0x130] sm:$0x3] %vm2537_vm11, %v12543_v20  ;;  %v12564_v61 = vld [vmem:[#allocation20_spill] sm:$0xff]  ;;  %v12569_v24 = vld [vmem:[#allocation142_spill] sm:$0xff]  ;;  %v12579_v48 = vld [vmem:[#allocation83_spill] sm:$0xff] }
 0x3b4   : > { %v2132_v17 = vsel %vm2117_vm8, %v2099_v58, %v12546_v53  ;;  %v2214_v25 = vsel %vm2183_vm10, %v2181_v56, %v1918_v4  ;;  %v2215_v9 = vsel %vm2183_vm10, %v2182_v3, %v1920_v1  ;;  %v1969_v46 = vsel %vm326_vm0, %v6712_v28, %v12564_v61  ;;  %2577 = vst.msk [vmem:[#allocation3 + $0x148] sm:$0x3] %vm2537_vm11, %v12543_v20  ;;  %v12581_v10 = vld [vmem:[#allocation121_spill] sm:$0xff] }
 0x3b5   : > { %v2165_v60 = vsel %vm2150_vm7, %v2132_v17, %v12548_v29  ;;  %v2002_v38 = vsel %vm1985_vm3, %v1969_v46, %v12565_v45  ;;  %2580 = vst.msk [vmem:[#allocation3 + $0x160] sm:$0x3] %vm2537_vm11, %v12543_v20  ;;  %v8763_v17 = vld [vmem:[%s12162_s5 + $0x1] ss:$0 sm:$0xff]  ;;  %v12583_v27 = vld [vmem:[#allocation141_spill] sm:$0xff] }
 0x3b6   : > { %v2198_v23 = vsel %vm2183_vm10, %v2165_v60, %v8386_v62  ;;  %v12552_v62 = vld [vmem:[#allocation78_spill] sm:$0xff]  ;;  %2583 = vst.msk [vmem:[#allocation3 + $0x178] sm:$0x3] %vm2537_vm11, %v12543_v20  ;;  %v12570_v60 = vld [vmem:[#allocation161_spill] sm:$0xff]  ;;  %v6715_v45 = vld [vmem:[#allocation2 + $0xe0] sm:$0xff] }
 0x3b7   : > { %v2001_v11 = vsel %vm1985_vm3, %v1968_v0, %v12552_v62  ;;  %2586 = vst.msk [vmem:[#allocation3 + $0x190] sm:$0x3] %vm2537_vm11, %v12543_v20 }
 0x3b8   : > { %v2034_v16 = vsel %vm2018_vm5, %v2001_v11, %v12554_v14  ;;  %2589 = vst.msk [vmem:[#allocation3 + $0x1a8] sm:$0x3] %vm2537_vm11, %v12543_v20  ;;  %v12572_v20 = vld [vmem:[#allocation77_spill] sm:$0xff]  ;;  %v12574_v11 = vld [vmem:[#allocation23_spill] sm:$0xff] }
 0x3b9   : > { %v2067_v7 = vsel %vm2051_vm4, %v2034_v16, %v12556_v39  ;;  %v12576_v14 = vld [vmem:[#allocation137_spill] sm:$0xff] }
 0x3ba   : > { %6554 = vmatmul.msk.f32.gmra.mxu0 %vm2225_vm9, %v2197_v57  ;;  %6570 = vmatmul.msk.f32.gmra.mxu3 %vm2225_vm9, %v2213_v6  ;;  %v12558_v57 = vld [vmem:[#allocation69_spill] sm:$0xff] }
 0x3bb   : > { %v2100_v6 = vsel %vm2084_vm6, %v2067_v7, %v12558_v57  ;;  %v12578_v57 = vld [vmem:[#allocation19_spill] sm:$0xff] }
 0x3bc   : > { %v2133_v31 = vsel %vm2117_vm8, %v2100_v6, %v12560_v50  ;;  %v1971_v6 = vsel %vm326_vm0, %v6714_v55, %v12578_v57  ;;  %v12598_v57 = vld [vmem:[#allocation167_spill] sm:$0xff] }
 0x3bd   : > { %v2166_v43 = vsel %vm2150_vm7, %v2133_v31, %v12562_v63  ;;  %v2004_v1 = vsel %vm1985_vm3, %v1971_v6, %v12579_v48 }
 0x3be   : > { %v2199_v19 = vsel %vm2183_vm10, %v2166_v43, %v8394_v21  ;;  %v12566_v21 = vld [vmem:[#allocation103_spill] sm:$0xff]  ;;  %v2037_v50 = vsel %vm2018_vm5, %v2004_v1, %v12580_v44  ;;  %v12599_v44 = vld [vmem:[#allocation22_spill] sm:$0xff] }
 0x3bf   : > { %v2035_v58 = vsel %vm2018_vm5, %v2002_v38, %v12566_v21  ;;  %v2070_v52 = vsel %vm2051_vm4, %v2037_v50, %v12581_v10  ;;  %v12585_v38 = vld [vmem:[#allocation25_spill] sm:$0xff]  ;;  %v6717_v1 = vld [vmem:[#allocation2 + $0xf8] sm:$0xff] }
 0x3c0   : > { %v2068_v4 = vsel %vm2051_vm4, %v2035_v58, %v12567_v59  ;;  %v1972_v21 = vsel %vm326_vm0, %v6715_v45, %v12585_v38  ;;  %v12586_v59 = vld [vmem:[#allocation74_spill] sm:$0xff]  ;;  %v1974_v50 = vsel %vm326_vm0, %v6717_v1, %v12599_v44  ;;  %v12600_v10 = vld [vmem:[#allocation87_spill] sm:$0xff]  ;;  %v12619_v44 = vld [vmem:[#allocation169_spill] sm:$0xff] }
 0x3c1   : > { %v2101_v53 = vsel %vm2084_vm6, %v2068_v4, %v12568_v32  ;;  %v2005_v4 = vsel %vm1985_vm3, %v1972_v21, %v12586_v59  ;;  %v12587_v32 = vld [vmem:[#allocation106_spill] sm:$0xff]  ;;  %v12605_v38 = vld [vmem:[#allocation163_spill] sm:$0xff] }
 0x3c2   : > { %6555 = vmatmul.msk.f32.gmra.mxu0 %vm2225_vm9, %v2198_v23  ;;  %6571 = vmatmul.msk.f32.gmra.mxu3 %vm2225_vm9, %v2214_v25  ;;  %v2134_v41 = vsel %vm2117_vm8, %v2101_v53, %v12569_v24  ;;  %v6713_v25 = vld [vmem:[#allocation2 + $0xc8] sm:$0xff]  ;;  %v2038_v53 = vsel %vm2018_vm5, %v2005_v4, %v12587_v32 }
 0x3c3   : > { %v2167_v35 = vsel %vm2150_vm7, %v2134_v41, %v12570_v60  ;;  %v1970_v5 = vsel %vm326_vm0, %v6713_v25, %v12571_v33  ;;  %v12588_v41 = vld [vmem:[#allocation33_spill] sm:$0xff]  ;;  %v12591_v33 = vld [vmem:[#allocation164_spill] sm:$0xff] }
 0x3c4   : > { %v2200_v23 = vsel %vm2183_vm10, %v2167_v35, %v8392_v8  ;;  %v2003_v37 = vsel %vm1985_vm3, %v1970_v5, %v12572_v20  ;;  %v6718_v4 = vld [vmem:[#allocation2 + $0x108] sm:$0xff] }
 0x3c5   : > { %v2036_v12 = vsel %vm2018_vm5, %v2003_v37, %v12573_v34  ;;  %v6716_v37 = vld [vmem:[#allocation2 + $0xf0] sm:$0xff]  ;;  %v12606_v32 = vld [vmem:[#allocation29_spill] sm:$0xff] }
 0x3c6   : > { %v2069_v2 = vsel %vm2051_vm4, %v2036_v12, %v12574_v11  ;;  %v12592_v34 = vld [vmem:[#allocation30_spill] sm:$0xff] }
 0x3c7   : > { %v2102_v8 = vsel %vm2084_vm6, %v2069_v2, %v12575_v40  ;;  %v1973_v12 = vsel %vm326_vm0, %v6716_v37, %v12592_v34  ;;  %v12593_v11 = vld [vmem:[#allocation82_spill] sm:$0xff]  ;;  %v12594_v40 = vld [vmem:[#allocation101_spill] sm:$0xff] }
 0x3c8   : > { %v2135_v16 = vsel %vm2117_vm8, %v2102_v8, %v12576_v14  ;;  %v2006_v2 = vsel %vm1985_vm3, %v1973_v12, %v12593_v11  ;;  %v12612_v34 = vld [vmem:[#allocation166_spill] sm:$0xff] }
 0x3c9   : > { %v2168_v39 = vsel %vm2150_vm7, %v2135_v16, %v12577_v26  ;;  %v2039_v8 = vsel %vm2018_vm5, %v2006_v2, %v12594_v40  ;;  %v12595_v16 = vld [vmem:[#allocation38_spill] sm:$0xff]  ;;  %v12613_v40 = vld [vmem:[#allocation35_spill] sm:$0xff] }
 0x3ca   : > { %6556 = vmatmul.msk.f32.gmra.mxu0 %vm2225_vm9, %v2199_v19  ;;  %6572 = vmatmul.msk.f32.gmra.mxu3 %vm2225_vm9, %v2215_v9  ;;  %v2201_v47 = vsel %vm2183_vm10, %v2168_v39, %v8412_v49  ;;  %v12582_v49 = vld [vmem:[#allocation76_spill] sm:$0xff]  ;;  %v6719_v2 = vld [vmem:[#allocation2 + $0x110] sm:$0xff] }
 0x3cb   : > { %v2103_v43 = vsel %vm2084_vm6, %v2070_v52, %v12582_v49  ;;  %v12584_v9 = vld [vmem:[#allocation160_spill] sm:$0xff]  ;;  %v2007_v52 = vsel %vm1985_vm3, %v1974_v50, %v12600_v10  ;;  %v12601_v49 = vld [vmem:[#allocation105_spill] sm:$0xff] }
 0x3cc   : > { %v2136_v3 = vsel %vm2117_vm8, %v2103_v43, %v12583_v27  ;;  %v2040_v43 = vsel %vm2018_vm5, %v2007_v52, %v12601_v49 }
 0x3cd   : > { %v2169_v28 = vsel %vm2150_vm7, %v2136_v3, %v12584_v9  ;;  %v12602_v3 = vld [vmem:[#allocation124_spill] sm:$0xff] }
 0x3ce   : > { %v2202_v46 = vsel %vm2183_vm10, %v2169_v28, %v8414_v15  ;;  %v12589_v15 = vld [vmem:[#allocation63_spill] sm:$0xff] }
 0x3cf   : > { %v2339_v29 = vpop.f32.mrf.mxu0 }
 0x3d0   : > { %v2437_v56 = vmul.f32 %v8750_v13, %v2339_v29  ;;  %v2071_v29 = vsel %vm2051_vm4, %v2038_v53, %v12588_v41  ;;  %v1975_v53 = vsel %vm326_vm0, %v6718_v4, %v12606_v32  ;;  %v12607_v41 = vld [vmem:[#allocation79_spill] sm:$0xff] }
 0x3d1   : > { %v2104_v35 = vsel %vm2084_vm6, %v2071_v29, %v12589_v15  ;;  %v2008_v29 = vsel %vm1985_vm3, %v1975_v53, %v12607_v41  ;;  %v12608_v15 = vld [vmem:[#allocation108_spill] sm:$0xff] }
 0x3d2   : > { %v2471_v0 = vadd.f32 %v8763_v17, %v2437_v56  ;;  %6557 = vmatmul.msk.f32.gmra.mxu0 %vm2225_vm9, %v2200_v23  ;;  %v12590_v56 = vld [vmem:[#allocation145_spill] sm:$0xff] }
 0x3d3   : > { %v2137_v23 = vsel %vm2117_vm8, %v2104_v35, %v12590_v56  ;;  %v2041_v35 = vsel %vm2018_vm5, %v2008_v29, %v12608_v15 }
 0x3d4   : > { %v2503_v62 = vmax.f32 %v2471_v0, 0.0  ;;  %v2170_v5 = vsel %vm2150_vm7, %v2137_v23, %v12591_v33  ;;  %v12609_v23 = vld [vmem:[#allocation24_spill] sm:$0xff] }
 0x3d5   : > { %v2203_v20 = vsel %vm2183_vm10, %v2170_v5, %v8419_v54  ;;  %v12596_v54 = vld [vmem:[#allocation75_spill] sm:$0xff] }
 0x3d6   : > { %2591 = vst.msk [vmem:[#allocation3 + $0x19] sm:$0xff] %vm574_vm1, %v2503_v62 }
 0x3d7   : > { %v2342_v22 = vpop.f32.mrf.mxu0 }
 0x3d8   : > { %v2438_v7 = vmul.f32 %v8750_v13, %v2342_v22  ;;  %v2072_v22 = vsel %vm2051_vm4, %v2039_v8, %v12595_v16  ;;  %v1976_v8 = vsel %vm326_vm0, %v6719_v2, %v12613_v40  ;;  %v12614_v16 = vld [vmem:[#allocation86_spill] sm:$0xff] }
 0x3d9   : > { %v2105_v39 = vsel %vm2084_vm6, %v2072_v22, %v12596_v54  ;;  %v2009_v22 = vsel %vm1985_vm3, %v1976_v8, %v12614_v16  ;;  %v12615_v54 = vld [vmem:[#allocation104_spill] sm:$0xff] }
 0x3da   : > { %v2472_v30 = vadd.f32 %v8763_v17, %v2438_v7  ;;  %6558 = vmatmul.msk.f32.gmra.mxu0 %vm2225_vm9, %v2201_v47  ;;  %v12597_v7 = vld [vmem:[#allocation140_spill] sm:$0xff] }
 0x3db   : > { %v2138_v47 = vsel %vm2117_vm8, %v2105_v39, %v12597_v7  ;;  %v2042_v39 = vsel %vm2018_vm5, %v2009_v22, %v12615_v54 }
 0x3dc   : > { %v2504_v31 = vmax.f32 %v2472_v30, 0.0  ;;  %v2171_v6 = vsel %vm2150_vm7, %v2138_v47, %v12598_v57  ;;  %v12616_v47 = vld [vmem:[#allocation32_spill] sm:$0xff] }
 0x3dd   : > { %v8804_v63 = vld [vmem:[#allocation3 + $0x19] sm:$0xff]  ;;  %v2204_v48 = vsel %vm2183_vm10, %v2171_v6, %v8442_v18 }
 0x3de   : > { %2592 = vst.msk [vmem:[#allocation3 + $0x21] sm:$0xff] %vm574_vm1, %v2504_v31  ;;  %2948 = vrot.lane.b32.xlu2 %v8804_v63, %s6771_s11  ;;  %v12603_v18 = vld [vmem:[#allocation85_spill] sm:$0xff] }
 0x3df   : > { %v2345_v19 = vpop.f32.mrf.mxu0 }
 0x3e0   : > { %v2439_v61 = vmul.f32 %v8750_v13, %v2345_v19  ;;  %v2073_v19 = vsel %vm2051_vm4, %v2040_v43, %v12602_v3 }
 0x3e1   : > { %v2106_v28 = vsel %vm2084_vm6, %v2073_v19, %v12603_v18 }
 0x3e2   : > { %v2473_v58 = vadd.f32 %v8763_v17, %v2439_v61  ;;  %6559 = vmatmul.msk.f32.gmra.mxu0 %vm2225_vm9, %v2202_v46  ;;  %v12604_v61 = vld [vmem:[#allocation144_spill] sm:$0xff] }
 0x3e3   : > { %v2139_v46 = vsel %vm2117_vm8, %v2106_v28, %v12604_v61 }
 0x3e4   : > { %v2505_v24 = vmax.f32 %v2473_v58, 0.0  ;;  %v2172_v21 = vsel %vm2150_vm7, %v2139_v46, %v12605_v38 }
 0x3e5   : > { %v8828_v60 = vld [vmem:[#allocation3 + $0x21] sm:$0xff]  ;;  %v2205_v59 = vsel %vm2183_vm10, %v2172_v21, %v8434_v51 }
 0x3e6   : > { %2593 = vst.msk [vmem:[#allocation3 + $0x31] sm:$0xff] %vm574_vm1, %v2505_v24  ;;  %2950 = vrot.lane.b32.xlu0 %v8828_v60, %s6771_s11  ;;  %v12610_v51 = vld [vmem:[#allocation70_spill] sm:$0xff] }
 0x3e7   : > { %v2348_v25 = vpop.f32.mrf.mxu0 }
 0x3e8   : > { %v2440_v0 = vmul.f32 %v8750_v13, %v2348_v25  ;;  %v2074_v25 = vsel %vm2051_vm4, %v2041_v35, %v12609_v23 }
 0x3e9   : > { %v2107_v5 = vsel %vm2084_vm6, %v2074_v25, %v12610_v51 }
 0x3ea   : > { %v2474_v62 = vadd.f32 %v8763_v17, %v2440_v0  ;;  %6560 = vmatmul.msk.f32.gmra.mxu0 %vm2225_vm9, %v2203_v20  ;;  %v12611_v0 = vld [vmem:[#allocation147_spill] sm:$0xff] }
 0x3eb   : > { %v2140_v20 = vsel %vm2117_vm8, %v2107_v5, %v12611_v0 }
 0x3ec   : > { %v2506_v14 = vmax.f32 %v2474_v62, 0.0  ;;  %v2173_v12 = vsel %vm2150_vm7, %v2140_v20, %v12612_v34 }
 0x3ed   : > { %v8852_v26 = vld [vmem:[#allocation3 + $0x31] sm:$0xff]  ;;  %v2206_v11 = vsel %vm2183_vm10, %v2173_v12, %v8453_v36 }
 0x3ee   : > { %2594 = vst.msk [vmem:[#allocation3 + $0x39] sm:$0xff] %vm574_vm1, %v2506_v14  ;;  %2952 = vrot.lane.b32.xlu1 %v8852_v26, %s6771_s11  ;;  %v12617_v36 = vld [vmem:[#allocation81_spill] sm:$0xff] }
 0x3ef   : > { %v2351_v55 = vpop.f32.mrf.mxu0 }
 0x3f0   : > { %v2441_v30 = vmul.f32 %v8750_v13, %v2351_v55  ;;  %v2075_v55 = vsel %vm2051_vm4, %v2042_v39, %v12616_v47 }
 0x3f1   : > { %v2108_v6 = vsel %vm2084_vm6, %v2075_v55, %v12617_v36 }
 0x3f2   : > { %v2475_v31 = vadd.f32 %v8763_v17, %v2441_v30  ;;  %6561 = vmatmul.msk.f32.gmra.mxu0 %vm2225_vm9, %v2204_v48  ;;  %v12618_v30 = vld [vmem:[#allocation143_spill] sm:$0xff] }
 0x3f3   : > { %v2141_v48 = vsel %vm2117_vm8, %v2108_v6, %v12618_v30 }
 0x3f4   : > { %v2507_v27 = vmax.f32 %v2475_v31, 0.0  ;;  %v2174_v50 = vsel %vm2150_vm7, %v2141_v48, %v12619_v44 }
 0x3f5   : > { %v8876_v9 = vld [vmem:[#allocation3 + $0x39] sm:$0xff]  ;;  %v2207_v10 = vsel %vm2183_vm10, %v2174_v50, %v8488_v42 }
 0x3f6   : > { %2595 = vst.msk [vmem:[#allocation3 + $0x49] sm:$0xff] %vm574_vm1, %v2507_v27  ;;  %2954 = vrot.lane.b32.xlu2 %v8876_v9, %s6771_s11 }
 0x3f7   : > { %v2354_v45 = vpop.f32.mrf.mxu0 }
 0x3f8   : > { %v2442_v58 = vmul.f32 %v8750_v13, %v2354_v45 }
 0x3fa   : > { %v2476_v24 = vadd.f32 %v8763_v17, %v2442_v58  ;;  %6562 = vmatmul.msk.f32.gmra.mxu0 %vm2225_vm9, %v2205_v59 }
 0x3fc   : > { %v2508_v56 = vmax.f32 %v2476_v24, 0.0 }
 0x3fd   : > { %v8900_v33 = vld [vmem:[#allocation3 + $0x49] sm:$0xff] }
 0x3fe   : > { %2596 = vst.msk [vmem:[#allocation3 + $0x51] sm:$0xff] %vm574_vm1, %v2508_v56  ;;  %2956 = vrot.lane.b32.xlu0 %v8900_v33, %s6771_s11 }
 0x3ff   : > { %v2357_v37 = vpop.f32.mrf.mxu0 }
 0x400   : > { %v2443_v62 = vmul.f32 %v8750_v13, %v2357_v37 }
 0x402   : > { %v2477_v14 = vadd.f32 %v8763_v17, %v2443_v62  ;;  %6563 = vmatmul.msk.f32.gmra.mxu0 %vm2225_vm9, %v2206_v11 }
 0x404   : > { %v2509_v7 = vmax.f32 %v2477_v14, 0.0 }
 0x405   : > { %v8924_v57 = vld [vmem:[#allocation3 + $0x51] sm:$0xff] }
 0x406   : > { %2597 = vst.msk [vmem:[#allocation3 + $0x61] sm:$0xff] %vm574_vm1, %v2509_v7  ;;  %2958 = vrot.lane.b32.xlu1 %v8924_v57, %s6771_s11 }
 0x407   : > { %v2360_v1 = vpop.f32.mrf.mxu0 }
 0x408   : > { %v2444_v31 = vmul.f32 %v8750_v13, %v2360_v1 }
 0x40a   : > { %v2478_v52 = vadd.f32 %v8763_v17, %v2444_v31  ;;  %6564 = vmatmul.msk.f32.gmra.mxu0 %vm2225_vm9, %v2207_v10 }
 0x40c   : > { %v2510_v49 = vmax.f32 %v2478_v52, 0.0 }
 0x40d   : > { %v8940_v43 = vld [vmem:[#allocation3 + $0x61] sm:$0xff] }
 0x40e   : > { %2598 = vst.msk [vmem:[#allocation3 + $0x69] sm:$0xff] %vm574_vm1, %v2510_v49  ;;  %2960 = vrot.lane.b32.xlu2 %v8940_v43, %s6771_s11 }
 0x40f   : > { %v2363_v27 = vpop.f32.mrf.mxu0 }
 0x410   : > { %v2445_v3 = vmul.f32 %v8750_v13, %v2363_v27 }
 0x412   : > { %v2479_v19 = vadd.f32 %v8763_v17, %v2445_v3 }
 0x414   : > { %v2511_v18 = vmax.f32 %v2479_v19, 0.0 }
 0x415   : > { %v2411_v28 = vpop.f32.mrf.mxu3  ;;  %v8947_v42 = vld [vmem:[#allocation3 + $0x69] sm:$0xff] }
 0x416   : > { %2599 = vst.msk [vmem:[#allocation3 + $0x79] sm:$0xff] %vm574_vm1, %v2511_v18  ;;  %v2461_v61 = vmul.f32 %v8750_v13, %v2411_v28  ;;  %2962 = vrot.lane.b32.xlu0 %v8947_v42, %s6771_s11 }
 0x417   : > { %v2366_v46 = vpop.f32.mrf.mxu0 }
 0x418   : > { %v2495_v45 = vadd.f32 %v8763_v17, %v2461_v61  ;;  %v2446_v38 = vmul.f32 %v8750_v13, %v2366_v46 }
 0x41a   : > { %v2527_v21 = vmax.f32 %v2495_v45, 0.0  ;;  %v2480_v58 = vadd.f32 %v8763_v17, %v2446_v38 }
 0x41c   : > { %2615 = vst.msk [vmem:[#allocation3 + $0x139] sm:$0xff] %vm574_vm1, %v2527_v21  ;;  %v2512_v59 = vmax.f32 %v2480_v58, 0.0 }
 0x41d   : > { %v2414_v4 = vpop.f32.mrf.mxu3  ;;  %v8957_v32 = vld [vmem:[#allocation3 + $0x79] sm:$0xff] }
 0x41e   : > { %2600 = vst.msk [vmem:[#allocation3 + $0x81] sm:$0xff] %vm574_vm1, %v2512_v59  ;;  %v2462_v53 = vmul.f32 %v8750_v13, %v2414_v4  ;;  %2964 = vrot.lane.b32.xlu1 %v8957_v32, %s6771_s11 }
 0x41f   : > { %v2369_v24 = vpop.f32.mrf.mxu0 }
 0x420   : > { %v2496_v41 = vadd.f32 %v8763_v17, %v2462_v53  ;;  %v2447_v29 = vmul.f32 %v8750_v13, %v2369_v24 }
 0x422   : > { %v2528_v15 = vmax.f32 %v2496_v41, 0.0  ;;  %v2481_v35 = vadd.f32 %v8763_v17, %v2447_v29 }
 0x424   : > { %2616 = vst.msk [vmem:[#allocation3 + $0x141] sm:$0xff] %vm574_vm1, %v2528_v15  ;;  %v2513_v56 = vmax.f32 %v2481_v35, 0.0 }
 0x425   : > { %v2417_v23 = vpop.f32.mrf.mxu3  ;;  %v8967_v25 = vld [vmem:[#allocation3 + $0x81] sm:$0xff] }
 0x426   : > { %2601 = vst.msk [vmem:[#allocation3 + $0x91] sm:$0xff] %vm574_vm1, %v2513_v56  ;;  %v2463_v51 = vmul.f32 %v8750_v13, %v2417_v23  ;;  %2966 = vrot.lane.b32.xlu2 %v8967_v25, %s6771_s11 }
 0x427   : > { %v2372_v5 = vpop.f32.mrf.mxu0 }
 0x428   : > { %v2497_v0 = vadd.f32 %v8763_v17, %v2463_v51  ;;  %v2448_v20 = vmul.f32 %v8750_v13, %v2372_v5 }
 0x42a   : > { %v2529_v37 = vmax.f32 %v2497_v0, 0.0  ;;  %v2482_v34 = vadd.f32 %v8763_v17, %v2448_v20 }
 0x42c   : > { %2617 = vst.msk [vmem:[#allocation3 + $0x151] sm:$0xff] %vm574_vm1, %v2529_v37  ;;  %v2514_v12 = vmax.f32 %v2482_v34, 0.0 }
 0x42d   : > { %v2420_v62 = vpop.f32.mrf.mxu3  ;;  %v8977_v11 = vld [vmem:[#allocation3 + $0x91] sm:$0xff] }
 0x42e   : > { %2602 = vst.msk [vmem:[#allocation3 + $0x99] sm:$0xff] %vm574_vm1, %v2514_v12  ;;  %v2464_v2 = vmul.f32 %v8750_v13, %v2420_v62  ;;  %2968 = vrot.lane.b32.xlu0 %v8977_v11, %s6771_s11 }
 0x42f   : > { %v2375_v40 = vpop.f32.mrf.mxu0 }
 0x430   : > { %v2498_v8 = vadd.f32 %v8763_v17, %v2464_v2  ;;  %v2449_v14 = vmul.f32 %v8750_v13, %v2375_v40 }
 0x432   : > { %v2530_v16 = vmax.f32 %v2498_v8, 0.0  ;;  %v2483_v22 = vadd.f32 %v8763_v17, %v2449_v14 }
 0x434   : > { %2618 = vst.msk [vmem:[#allocation3 + $0x159] sm:$0xff] %vm574_vm1, %v2530_v16  ;;  %v2515_v54 = vmax.f32 %v2483_v22, 0.0 }
 0x435   : > { %v2423_v39 = vpop.f32.mrf.mxu3  ;;  %v8987_v7 = vld [vmem:[#allocation3 + $0x99] sm:$0xff] }
 0x436   : > { %2603 = vst.msk [vmem:[#allocation3 + $0xa9] sm:$0xff] %vm574_vm1, %v2515_v54  ;;  %v2465_v47 = vmul.f32 %v8750_v13, %v2423_v39  ;;  %2970 = vrot.lane.b32.xlu1 %v8987_v7, %s6771_s11 }
 0x437   : > { %v2378_v55 = vpop.f32.mrf.mxu0 }
 0x438   : > { %v2499_v36 = vadd.f32 %v8763_v17, %v2465_v47  ;;  %v2450_v6 = vmul.f32 %v8750_v13, %v2378_v55 }
 0x43a   : > { %v2531_v30 = vmax.f32 %v2499_v36, 0.0  ;;  %v2484_v48 = vadd.f32 %v8763_v17, %v2450_v6 }
 0x43c   : > { %2619 = vst.msk [vmem:[#allocation3 + $0x169] sm:$0xff] %vm574_vm1, %v2531_v30  ;;  %v2516_v1 = vmax.f32 %v2484_v48, 0.0 }
 0x43d   : > { %v2426_v44 = vpop.f32.mrf.mxu3  ;;  %v8997_v50 = vld [vmem:[#allocation3 + $0xa9] sm:$0xff] }
 0x43e   : > { %2604 = vst.msk [vmem:[#allocation3 + $0xb1] sm:$0xff] %vm574_vm1, %v2516_v1  ;;  %v2466_v31 = vmul.f32 %v8750_v13, %v2426_v44  ;;  %2972 = vrot.lane.b32.xlu2 %v8997_v50, %s6771_s11 }
 0x43f   : > { %v2381_v10 = vpop.f32.mrf.mxu0 }
 0x440   : > { %v2500_v52 = vadd.f32 %v8763_v17, %v2466_v31  ;;  %v2451_v49 = vmul.f32 %v8750_v13, %v2381_v10 }
 0x442   : > { %v2532_v27 = vmax.f32 %v2500_v52, 0.0  ;;  %v2485_v3 = vadd.f32 %v8763_v17, %v2451_v49 }
 0x444   : > { %2620 = vst.msk [vmem:[#allocation3 + $0x171] sm:$0xff] %vm574_vm1, %v2532_v27  ;;  %v2517_v19 = vmax.f32 %v2485_v3, 0.0 }
 0x445   : > { %v2429_v18 = vpop.f32.mrf.mxu3  ;;  %v9007_v28 = vld [vmem:[#allocation3 + $0xb1] sm:$0xff] }
 0x446   : > { %2605 = vst.msk [vmem:[#allocation3 + $0xc1] sm:$0xff] %vm574_vm1, %v2517_v19  ;;  %v2467_v61 = vmul.f32 %v8750_v13, %v2429_v18  ;;  %2974 = vrot.lane.b32.xlu0 %v9007_v28, %s6771_s11 }
 0x447   : > { %v2384_v46 = vpop.f32.mrf.mxu0 }
 0x448   : > { %v2501_v45 = vadd.f32 %v8763_v17, %v2467_v61  ;;  %v2452_v38 = vmul.f32 %v8750_v13, %v2384_v46 }
 0x44a   : > { %v2533_v21 = vmax.f32 %v2501_v45, 0.0  ;;  %v2486_v58 = vadd.f32 %v8763_v17, %v2452_v38  ;;  %v9076_v38 = vld [vmem:[#allocation3 + $0x139] sm:$0xff] }
 0x44c   : > { %2621 = vst.msk [vmem:[#allocation3 + $0x181] sm:$0xff] %vm574_vm1, %v2533_v21  ;;  %v2518_v59 = vmax.f32 %v2486_v58, 0.0  ;;  %v9085_v58 = vld [vmem:[#allocation3 + $0x159] sm:$0xff] }
 0x44d   : > { %v2432_v4 = vpop.f32.mrf.mxu3  ;;  %v9017_v53 = vld [vmem:[#allocation3 + $0xc1] sm:$0xff] }
 0x44e   : > { %2606 = vst.msk [vmem:[#allocation3 + $0xc9] sm:$0xff] %vm574_vm1, %v2518_v59  ;;  %v2468_v24 = vmul.f32 %v8750_v13, %v2432_v4  ;;  %2976 = vrot.lane.b32.xlu1 %v9017_v53, %s6771_s11  ;;  %v9087_v59 = vld [vmem:[#allocation3 + $0x141] sm:$0xff]  ;;  %v9097_v4 = vld [vmem:[#allocation3 + $0x169] sm:$0xff] }
 0x44f   : > { %v2387_v41 = vpop.f32.mrf.mxu0 }
 0x450   : > { %v2502_v29 = vadd.f32 %v8763_v17, %v2468_v24  ;;  %v2453_v15 = vmul.f32 %v8750_v13, %v2387_v41  ;;  %v9102_v24 = vld [vmem:[#allocation3 + $0x151] sm:$0xff] }
 0x451   : > { %v2688_v41 = vld [vmem:[#allocation3 + $0xa] sm:$0xff] }
 0x452   : > { %v2534_v35 = vmax.f32 %v2502_v29, 0.0  ;;  %v2487_v56 = vadd.f32 %v8763_v17, %v2453_v15  ;;  %v9106_v29 = vld [vmem:[#allocation3 + $0x22] sm:$0xff]  ;;  %v9111_v15 = vld [vmem:[#allocation3 + $0x171] sm:$0xff] }
 0x454   : > { %2622 = vst.msk [vmem:[#allocation3 + $0x189] sm:$0xff] %vm574_vm1, %v2534_v35  ;;  %v2519_v23 = vmax.f32 %v2487_v56, 0.0  ;;  %v9115_v35 = vpop.permute.xlu2 %2948  ;;  %v9117_v56 = vld [vmem:[#allocation3 + $0x4a] sm:$0xff] }
 0x455   : > { %v9027_v51 = vld [vmem:[#allocation3 + $0xc9] sm:$0xff]  ;;  %12620 = vst [vmem:[#allocation4_spill] sm:$0xff] %v9115_v35  ;;  %v2626_v35 = vld [vmem:[#allocation3 + $0x20] sm:$0xff] }
 0x456   : > { %2607 = vst.msk [vmem:[#allocation3 + $0xd9] sm:$0xff] %vm574_vm1, %v2519_v23  ;;  %2978 = vrot.lane.b32.xlu2 %v9027_v51, %s6771_s11  ;;  %v9119_v23 = vld [vmem:[#allocation3 + $0x32] sm:$0xff] }
 0x457   : > { %v2390_v5 = vpop.f32.mrf.mxu0 }
 0x458   : > { %v2454_v0 = vmul.f32 %v8750_v13, %v2390_v5  ;;  %v9125_v5 = vld [vmem:[#allocation3 + $0x1a] sm:$0xff] }
 0x45a   : > { %v2488_v20 = vadd.f32 %v8763_v17, %v2454_v0 }
 0x45c   : > { %v2520_v37 = vmax.f32 %v2488_v20, 0.0  ;;  %v9129_v0 = vpop.permute.xlu2 %2954  ;;  %v9131_v20 = vld [vmem:[#allocation3 + $0x6a] sm:$0xff] }
 0x45d   : > { %v9034_v34 = vld [vmem:[#allocation3 + $0xd9] sm:$0xff]  ;;  %12621 = vst [vmem:[#allocation50_spill] sm:$0xff] %v9129_v0 }
 0x45e   : > { %2608 = vst.msk [vmem:[#allocation3 + $0xe1] sm:$0xff] %vm574_vm1, %v2520_v37  ;;  %2980 = vrot.lane.b32.xlu0 %v9034_v34, %s6771_s11  ;;  %v9133_v37 = vld [vmem:[#allocation3 + $0x52] sm:$0xff] }
 0x45f   : > { %v2393_v12 = vpop.f32.mrf.mxu0  ;;  %v9251_v0 = vld [vmem:[#allocation3 + $0x152] sm:$0xff] }
 0x460   : > { %v2455_v62 = vmul.f32 %v8750_v13, %v2393_v12  ;;  %v9139_v12 = vld [vmem:[#allocation3 + $0x3a] sm:$0xff]  ;;  %12642 = vst [vmem:[#allocation84_spill] sm:$0xff] %v9251_v0 }
 0x462   : > { %v2489_v2 = vadd.f32 %v8763_v17, %v2455_v62 }
 0x464   : > { %v2521_v40 = vmax.f32 %v2489_v2, 0.0  ;;  %v9145_v2 = vld [vmem:[#allocation3 + $0x92] sm:$0xff] }
 0x465   : > { %v9041_v8 = vld [vmem:[#allocation3 + $0xe1] sm:$0xff] }
 0x466   : > { %2609 = vst.msk [vmem:[#allocation3 + $0xf1] sm:$0xff] %vm574_vm1, %v2521_v40  ;;  %2982 = vrot.lane.b32.xlu1 %v9041_v8, %s6771_s11  ;;  %v9147_v40 = vld [vmem:[#allocation3 + $0x7a] sm:$0xff] }
 0x467   : > { %v2396_v14 = vpop.f32.mrf.mxu0 }
 0x468   : > { %v2456_v16 = vmul.f32 %v8750_v13, %v2396_v14  ;;  %v9143_v62 = vpop.permute.xlu2 %2960  ;;  %v9149_v14 = vpop.permute.xlu0 %2944 }
 0x469   : > { %12622 = vst [vmem:[#allocation6_spill] sm:$0xff] %v9143_v62 }
 0x46a   : > { %v2490_v22 = vadd.f32 %v8763_v17, %v2456_v16  ;;  %12623 = vst [vmem:[#allocation41_spill] sm:$0xff] %v9149_v14  ;;  %v9155_v16 = vld [vmem:[#allocation3 + $0x62] sm:$0xff]  ;;  %v9274_v14 = vld [vmem:[#allocation3 + $0x15a] sm:$0xff] }
 0x46b   : > { %12648 = vst [vmem:[#allocation133_spill] sm:$0xff] %v9274_v14 }
 0x46c   : > { %v2522_v54 = vmax.f32 %v2490_v22, 0.0 }
 0x46d   : > { %v9048_v39 = vld [vmem:[#allocation3 + $0xf1] sm:$0xff] }
 0x46e   : > { %2610 = vst.msk [vmem:[#allocation3 + $0xf9] sm:$0xff] %vm574_vm1, %v2522_v54  ;;  %2984 = vrot.lane.b32.xlu2 %v9048_v39, %s6771_s11  ;;  %v9161_v54 = vld [vmem:[#allocation3 + $0xb2] sm:$0xff] }
 0x46f   : > { %v2399_v47 = vpop.f32.mrf.mxu0 }
 0x470   : > { %v2457_v55 = vmul.f32 %v8750_v13, %v2399_v47  ;;  %v9163_v47 = vld [vmem:[#allocation3 + $0x9a] sm:$0xff] }
 0x472   : > { %v2491_v36 = vadd.f32 %v8763_v17, %v2457_v55  ;;  %v9169_v55 = vld [vmem:[#allocation3 + $0x82] sm:$0xff] }
 0x474   : > { %v2523_v6 = vmax.f32 %v2491_v36, 0.0  ;;  %v9171_v36 = vpop.permute.xlu1 %2946 }
 0x475   : > { %v9055_v30 = vld [vmem:[#allocation3 + $0xf9] sm:$0xff]  ;;  %12625 = vst [vmem:[#allocation49_spill] sm:$0xff] %v9171_v36 }
 0x476   : > { %2611 = vst.msk [vmem:[#allocation3 + $0x109] sm:$0xff] %vm574_vm1, %v2523_v6  ;;  %2986 = vrot.lane.b32.xlu0 %v9055_v30, %s6771_s11  ;;  %v9175_v6 = vpop.permute.xlu0 %2950  ;;  %v9269_v36 = vld [vmem:[#allocation3 + $0x172] sm:$0xff] }
 0x477   : > { %v2402_v48 = vpop.f32.mrf.mxu0  ;;  %12626 = vst [vmem:[#allocation5_spill] sm:$0xff] %v9175_v6  ;;  %v9259_v6 = vld [vmem:[#allocation3 + $0x13a] sm:$0xff] }
 0x478   : > { %v2458_v1 = vmul.f32 %v8750_v13, %v2402_v48  ;;  %12647 = vst [vmem:[#allocation80_spill] sm:$0xff] %v9269_v36 }
 0x47a   : > { %v2492_v44 = vadd.f32 %v8763_v17, %v2458_v1  ;;  %v9179_v1 = vld [vmem:[#allocation3 + $0xda] sm:$0xff] }
 0x47c   : > { %v2524_v31 = vmax.f32 %v2492_v44, 0.0  ;;  %v9181_v44 = vld [vmem:[#allocation3 + $0xc2] sm:$0xff] }
 0x47d   : > { %v9062_v10 = vld [vmem:[#allocation3 + $0x109] sm:$0xff] }
 0x47e   : > { %2612 = vst.msk [vmem:[#allocation3 + $0x111] sm:$0xff] %vm574_vm1, %v2524_v31  ;;  %2988 = vrot.lane.b32.xlu1 %v9062_v10, %s6771_s11  ;;  %v9187_v31 = vld [vmem:[#allocation3 + $0xaa] sm:$0xff] }
 0x47f   : > { %v2405_v52 = vpop.f32.mrf.mxu0 }
 0x480   : > { %v2459_v49 = vmul.f32 %v8750_v13, %v2405_v52  ;;  %v9159_v22 = vpop.permute.xlu2 %2966  ;;  %v9191_v52 = vpop.permute.xlu0 %2956 }
 0x481   : > { %12624 = vst [vmem:[#allocation9_spill] sm:$0xff] %v9159_v22 }
 0x482   : > { %v2493_v27 = vadd.f32 %v8763_v17, %v2459_v49  ;;  %12628 = vst [vmem:[#allocation8_spill] sm:$0xff] %v9191_v52 }
 0x484   : > { %v2525_v3 = vmax.f32 %v2493_v27, 0.0  ;;  %v9195_v27 = vpop.permute.xlu1 %2952 }
 0x485   : > { %v9069_v19 = vld [vmem:[#allocation3 + $0x111] sm:$0xff]  ;;  %12630 = vst [vmem:[#allocation12_spill] sm:$0xff] %v9195_v27 }
 0x486   : > { %2613 = vst.msk [vmem:[#allocation3 + $0x121] sm:$0xff] %vm574_vm1, %v2525_v3  ;;  %2990 = vrot.lane.b32.xlu2 %v9069_v19, %s6771_s11  ;;  %v9197_v3 = vld [vmem:[#allocation3 + $0xfa] sm:$0xff]  ;;  %v9241_v52 = vld [vmem:[#allocation3 + $0x112] sm:$0xff]  ;;  %v9253_v27 = vld [vmem:[#allocation3 + $0x16a] sm:$0xff] }
 0x487   : > { %v2408_v18 = vpop.f32.mrf.mxu0  ;;  %12643 = vst [vmem:[#allocation111_spill] sm:$0xff] %v9253_v27 }
 0x488   : > { %v2460_v61 = vmul.f32 %v8750_v13, %v2408_v18  ;;  %v9199_v18 = vld [vmem:[#allocation3 + $0xe2] sm:$0xff] }
 0x48a   : > { %v2494_v46 = vadd.f32 %v8763_v17, %v2460_v61  ;;  %v2687_v17 = vld [vmem:[#allocation3 + $0x2] sm:$0xff]  ;;  %v9205_v61 = vld [vmem:[#allocation3 + $0xca] sm:$0xff] }
 0x48c   : > { %v2526_v45 = vmax.f32 %v2494_v46, 0.0  ;;  %v9209_v46 = vpop.permute.xlu0 %2962 }
 0x48d   : > { %v9078_v21 = vld [vmem:[#allocation3 + $0x121] sm:$0xff]  ;;  %12631 = vst [vmem:[#allocation54_spill] sm:$0xff] %v9209_v46 }
 0x48e   : > { %2614 = vst.msk [vmem:[#allocation3 + $0x129] sm:$0xff] %vm574_vm1, %v2526_v45  ;;  %2996 = vrot.lane.b32.xlu2 %v9076_v38, %s6771_s11  ;;  %2992 = vrot.lane.b32.xlu0 %v9078_v21, %s6771_s11 }
 0x495   : > { %v9089_v13 = vld [vmem:[#allocation3 + $0x129] sm:$0xff] }
 0x496   : > { %3002 = vrot.lane.b32.xlu2 %v9085_v58, %s6771_s11  ;;  %2998 = vrot.lane.b32.xlu0 %v9087_v59, %s6771_s11  ;;  %v9233_v62 = vld [vmem:[#allocation3 + $0x12a] sm:$0xff] }
 0x497   : > { %2994 = vrot.lane.b32.xlu1 %v9089_v13, %s6771_s11  ;;  %12637 = vst [vmem:[#allocation27_spill] sm:$0xff] %v9233_v62 }
 0x498   : > { %v9177_v48 = vpop.permute.xlu2 %2972 }
 0x499   : > { %12627 = vst [vmem:[#allocation55_spill] sm:$0xff] %v9177_v48  ;;  %v9223_v48 = vld [vmem:[#allocation3 + $0xf2] sm:$0xff] }
 0x49e   : > { %3072 = vrot.lane.b32.xlu2 %v2687_v17, %s6773_s15  ;;  %3004 = vrot.lane.b32.xlu0 %v9097_v4, %s6771_s11  ;;  %v9213_v17 = vpop.permute.xlu1 %2958 }
 0x49f   : > { %3000 = vrot.lane.b32.xlu1 %v9102_v24, %s6771_s11  ;;  %12633 = vst [vmem:[#allocation61_spill] sm:$0xff] %v9213_v17  ;;  %v9235_v17 = vld [vmem:[#allocation3 + $0x142] sm:$0xff] }
 0x4a0   : > { %v9227_v22 = vpop.permute.xlu0 %2968  ;;  %12638 = vst [vmem:[#allocation60_spill] sm:$0xff] %v9235_v17 }
 0x4a1   : > { %12634 = vst [vmem:[#allocation11_spill] sm:$0xff] %v9227_v22 }
 0x4a6   : > { %3078 = vrot.lane.b32.xlu2 %v9106_v29, %s6773_s15  ;;  %3074 = vrot.lane.b32.xlu0 %v2688_v41, %s6773_s15  ;;  %v9215_v41 = vld [vmem:[#allocation3 + $0x10a] sm:$0xff]  ;;  %v9231_v46 = vpop.permute.xlu1 %2964 }
 0x4a7   : > { %3006 = vrot.lane.b32.xlu1 %v9111_v15, %s6771_s11  ;;  %12636 = vst [vmem:[#allocation15_spill] sm:$0xff] %v9231_v46 }
 0x4ae   : > { %3084 = vrot.lane.b32.xlu2 %v9117_v56, %s6773_s15  ;;  %3080 = vrot.lane.b32.xlu0 %v9119_v23, %s6773_s15  ;;  %v9249_v46 = vpop.permute.xlu1 %2970 }
 0x4af   : > { %3076 = vrot.lane.b32.xlu1 %v9125_v5, %s6773_s15  ;;  %12641 = vst [vmem:[#allocation67_spill] sm:$0xff] %v9249_v46 }
 0x4b0   : > { %v9193_v49 = vpop.permute.xlu2 %2978 }
 0x4b1   : > { %12629 = vst [vmem:[#allocation46_spill] sm:$0xff] %v9193_v49  ;;  %v9217_v49 = vld [vmem:[#allocation3 + $0x122] sm:$0xff] }
 0x4b6   : > { %3090 = vrot.lane.b32.xlu2 %v9131_v20, %s6773_s15  ;;  %3086 = vrot.lane.b32.xlu0 %v9133_v37, %s6773_s15 }
 0x4b7   : > { %3082 = vrot.lane.b32.xlu1 %v9139_v12, %s6773_s15 }
 0x4b8   : > { %v9245_v22 = vpop.permute.xlu0 %2974 }
 0x4b9   : > { %12639 = vst [vmem:[#allocation10_spill] sm:$0xff] %v9245_v22 }
 0x4be   : > { %3096 = vrot.lane.b32.xlu2 %v9145_v2, %s6773_s15  ;;  %3092 = vrot.lane.b32.xlu0 %v9147_v40, %s6773_s15 }
 0x4bf   : > { %3088 = vrot.lane.b32.xlu1 %v9155_v16, %s6773_s15 }
 0x4c0   : > { %v9267_v46 = vpop.permute.xlu1 %2976 }
 0x4c1   : > { %12646 = vst [vmem:[#allocation52_spill] sm:$0xff] %v9267_v46  ;;  %v2627_v46 = vld [vmem:[#allocation3 + $0x30] sm:$0xff] }
 0x4c6   : > { %3102 = vrot.lane.b32.xlu2 %v9161_v54, %s6773_s15  ;;  %3098 = vrot.lane.b32.xlu0 %v9163_v47, %s6773_s15 }
 0x4c7   : > { %3094 = vrot.lane.b32.xlu1 %v9169_v55, %s6773_s15 }
 0x4c8   : > { %v9211_v45 = vpop.permute.xlu2 %2984 }
 0x4c9   : > { %12632 = vst [vmem:[#allocation7_spill] sm:$0xff] %v9211_v45 }
 0x4ce   : > { %3108 = vrot.lane.b32.xlu2 %v9179_v1, %s6773_s15  ;;  %3104 = vrot.lane.b32.xlu0 %v9181_v44, %s6773_s15 }
 0x4cf   : > { %3100 = vrot.lane.b32.xlu1 %v9187_v31, %s6773_s15 }
 0x4d0   : > { %v9263_v22 = vpop.permute.xlu0 %2980 }
 0x4d1   : > { %12644 = vst [vmem:[#allocation115_spill] sm:$0xff] %v9263_v22 }
 0x4d6   : > { %3114 = vrot.lane.b32.xlu2 %v9197_v3, %s6773_s15  ;;  %3110 = vrot.lane.b32.xlu0 %v9199_v18, %s6773_s15 }
 0x4d7   : > { %3106 = vrot.lane.b32.xlu1 %v9205_v61, %s6773_s15 }
 0x4de   : > { %3116 = vrot.lane.b32.xlu0 %v9215_v41, %s6773_s15  ;;  %3120 = vrot.lane.b32.xlu2 %v9217_v49, %s6773_s15 }
 0x4df   : > { %3112 = vrot.lane.b32.xlu1 %v9223_v48, %s6773_s15 }
 0x4e0   : > { %v9229_v45 = vpop.permute.xlu2 %2990 }
 0x4e1   : > { %12635 = vst [vmem:[#allocation51_spill] sm:$0xff] %v9229_v45 }
 0x4e6   : > { %3122 = vrot.lane.b32.xlu0 %v9233_v62, %s6773_s15  ;;  %3126 = vrot.lane.b32.xlu2 %v9235_v17, %s6773_s15  ;;  %v2625_v62 = vld [vmem:[#allocation3 + $0x18] sm:$0xff]  ;;  %v2632_v17 = vld [vmem:[#allocation3 + $0x68] sm:$0xff] }
 0x4e7   : > { %3118 = vrot.lane.b32.xlu1 %v9241_v52, %s6773_s15 }
 0x4e8   : > { %v9247_v45 = vpop.permute.xlu2 %2996 }
 0x4e9   : > { %12640 = vst [vmem:[#allocation34_spill] sm:$0xff] %v9247_v45 }
 0x4ee   : > { %3128 = vrot.lane.b32.xlu0 %v9251_v0, %s6773_s15  ;;  %3132 = vrot.lane.b32.xlu2 %v9253_v27, %s6773_s15  ;;  %v9278_v0 = vpop.permute.xlu0 %2986  ;;  %v2629_v27 = vld [vmem:[#allocation3 + $0x48] sm:$0xff] }
 0x4ef   : > { %3124 = vrot.lane.b32.xlu1 %v9259_v6, %s6773_s15  ;;  %12649 = vst [vmem:[#allocation150_spill] sm:$0xff] %v9278_v0  ;;  %v2630_v0 = vld [vmem:[#allocation3 + $0x50] sm:$0xff] }
 0x4f0   : > { %v9265_v45 = vpop.permute.xlu2 %3002 }
 0x4f1   : > { %12645 = vst [vmem:[#allocation43_spill] sm:$0xff] %v9265_v45  ;;  %v9282_v45 = vpop.permute.xlu1 %2982 }
 0x4f2   : > { %12651 = vst [vmem:[#allocation14_spill] sm:$0xff] %v9282_v45  ;;  %v2633_v45 = vld [vmem:[#allocation3 + $0x78] sm:$0xff] }
 0x4f6   : > { %3134 = vrot.lane.b32.xlu0 %v9269_v36, %s6773_s15  ;;  %3202 = vrot.lane.b32.xlu2 %v2626_v35, %s6781_s10 }
 0x4f7   : > { %3130 = vrot.lane.b32.xlu1 %v9274_v14, %s6773_s15 }
 0x4f8   : > { %v9280_v22 = vpop.permute.xlu2 %3072 }
 0x4f9   : > { %12650 = vst [vmem:[#allocation154_spill] sm:$0xff] %v9280_v22  ;;  %v9291_v14 = vpop.permute.xlu1 %2988  ;;  %v2628_v22 = vld [vmem:[#allocation3 + $0x38] sm:$0xff] }
 0x4fa   : > { %12654 = vst [vmem:[#allocation89_spill] sm:$0xff] %v9291_v14  ;;  %v2636_v14 = vld [vmem:[#allocation3 + $0x98] sm:$0xff] }
 0x4fe   : > { %3204 = vrot.lane.b32.xlu0 %v2627_v46, %s6781_s10  ;;  %3208 = vrot.lane.b32.xlu2 %v2629_v27, %s6781_s10 }
 0x4ff   : > { %3200 = vrot.lane.b32.xlu1 %v2625_v62, %s6781_s10 }
 0x500   : > { %v9287_v35 = vpop.permute.xlu2 %3078  ;;  %v9289_v36 = vpop.permute.xlu0 %2992 }
 0x501   : > { %12652 = vst [vmem:[#allocation40_spill] sm:$0xff] %v9287_v35  ;;  %v2635_v35 = vld [vmem:[#allocation3 + $0x90] sm:$0xff] }
 0x502   : > { %12653 = vst [vmem:[#allocation56_spill] sm:$0xff] %v9289_v36  ;;  %v2631_v36 = vld [vmem:[#allocation3 + $0x60] sm:$0xff] }
 0x506   : > { %3210 = vrot.lane.b32.xlu0 %v2630_v0, %s6781_s10  ;;  %3214 = vrot.lane.b32.xlu2 %v2632_v17, %s6781_s10 }
 0x507   : > { %3206 = vrot.lane.b32.xlu1 %v2628_v22, %s6781_s10 }
 0x508   : > { %v9296_v46 = vpop.permute.xlu2 %3084  ;;  %v9298_v27 = vpop.permute.xlu0 %2998 }
 0x509   : > { %12655 = vst [vmem:[#allocation97_spill] sm:$0xff] %v9296_v46  ;;  %v9300_v62 = vpop.permute.xlu1 %2994  ;;  %v9311_v46 = vld [vmem:[#allocation3 + $0xb0] sm:$0xff] }
 0x50a   : > { %12656 = vst [vmem:[#allocation107_spill] sm:$0xff] %v9298_v27  ;;  %v2634_v27 = vld [vmem:[#allocation3 + $0x80] sm:$0xff] }
 0x50b   : > { %12657 = vst [vmem:[#allocation117_spill] sm:$0xff] %v9300_v62  ;;  %v9335_v62 = vld [vmem:[#allocation3 + $0xe0] sm:$0xff] }
 0x50c   : > { %12668 = vst [vmem:[#allocation94_spill] sm:$0xff] %v9335_v62 }
 0x50e   : > { %3216 = vrot.lane.b32.xlu0 %v2633_v45, %s6781_s10  ;;  %3220 = vrot.lane.b32.xlu2 %v2635_v35, %s6781_s10 }
 0x50f   : > { %3212 = vrot.lane.b32.xlu1 %v2631_v36, %s6781_s10 }
 0x510   : > { %v9305_v0 = vpop.permute.xlu2 %3090  ;;  %v9307_v17 = vpop.permute.xlu0 %3004 }
 0x511   : > { %12658 = vst [vmem:[#allocation37_spill] sm:$0xff] %v9305_v0  ;;  %v9309_v22 = vpop.permute.xlu1 %3000  ;;  %v9323_v0 = vld [vmem:[#allocation3 + $0xd8] sm:$0xff] }
 0x512   : > { %12659 = vst [vmem:[#allocation59_spill] sm:$0xff] %v9307_v17  ;;  %v2639_v17 = vld [vmem:[#allocation3 + $0xc0] sm:$0xff] }
 0x513   : > { %12660 = vst [vmem:[#allocation127_spill] sm:$0xff] %v9309_v22  ;;  %v2637_v22 = vld [vmem:[#allocation3 + $0xa8] sm:$0xff] }
 0x514   : > { %12664 = vst [vmem:[#allocation18_spill] sm:$0xff] %v9323_v0 }
 0x516   : > { %3222 = vrot.lane.b32.xlu0 %v2636_v14, %s6781_s10  ;;  %3226 = vrot.lane.b32.xlu2 %v9311_v46, %s6781_s10 }
 0x517   : > { %3218 = vrot.lane.b32.xlu1 %v2634_v27, %s6781_s10 }
 0x518   : > { %v9317_v45 = vpop.permute.xlu2 %3096  ;;  %v9319_v36 = vpop.permute.xlu0 %3074 }
 0x519   : > { %12661 = vst [vmem:[#allocation136_spill] sm:$0xff] %v9317_v45  ;;  %v9321_v35 = vpop.permute.xlu1 %3006 }
 0x51a   : > { %12662 = vst [vmem:[#allocation146_spill] sm:$0xff] %v9319_v36  ;;  %v2640_v36 = vld [vmem:[#allocation3 + $0xc8] sm:$0xff] }
 0x51b   : > { %12663 = vst [vmem:[#allocation156_spill] sm:$0xff] %v9321_v35  ;;  %v9337_v35 = vld [vmem:[#allocation3 + $0xf8] sm:$0xff] }
 0x51c   : > { %12669 = vst [vmem:[#allocation110_spill] sm:$0xff] %v9337_v35 }
 0x51e   : > { %3228 = vrot.lane.b32.xlu0 %v2639_v17, %s6781_s10  ;;  %3232 = vrot.lane.b32.xlu2 %v9323_v0, %s6781_s10  ;;  %v9354_v0 = vld [vmem:[#allocation3 + $0xf0] sm:$0xff] }
 0x51f   : > { %3224 = vrot.lane.b32.xlu1 %v2637_v22, %s6781_s10  ;;  %12675 = vst [vmem:[#allocation149_spill] sm:$0xff] %v9354_v0 }
 0x520   : > { %v9329_v14 = vpop.permute.xlu2 %3102  ;;  %v9331_v27 = vpop.permute.xlu0 %3080 }
 0x521   : > { %12665 = vst [vmem:[#allocation31_spill] sm:$0xff] %v9329_v14  ;;  %v9333_v45 = vpop.permute.xlu1 %3076 }
 0x522   : > { %12666 = vst [vmem:[#allocation66_spill] sm:$0xff] %v9331_v27  ;;  %v9350_v27 = vld [vmem:[#allocation3 + $0x108] sm:$0xff] }
 0x523   : > { %12667 = vst [vmem:[#allocation92_spill] sm:$0xff] %v9333_v45  ;;  %v9352_v45 = vld [vmem:[#allocation3 + $0x120] sm:$0xff] }
 0x524   : > { %12673 = vst [vmem:[#allocation130_spill] sm:$0xff] %v9350_v27 }
 0x525   : > { %12674 = vst [vmem:[#allocation132_spill] sm:$0xff] %v9352_v45 }
 0x526   : > { %3234 = vrot.lane.b32.xlu0 %v9335_v62, %s6781_s10  ;;  %3238 = vrot.lane.b32.xlu2 %v9337_v35, %s6781_s10  ;;  %v9370_v62 = vld [vmem:[#allocation3 + $0x128] sm:$0xff]  ;;  %v9372_v35 = vld [vmem:[#allocation3 + $0x110] sm:$0xff] }
 0x527   : > { %3230 = vrot.lane.b32.xlu1 %v2640_v36, %s6781_s10  ;;  %12680 = vst [vmem:[#allocation73_spill] sm:$0xff] %v9370_v62 }
 0x528   : > { %v9344_v17 = vpop.permute.xlu2 %3108  ;;  %v9346_v22 = vpop.permute.xlu0 %3086  ;;  %12681 = vst [vmem:[#allocation88_spill] sm:$0xff] %v9372_v35 }
 0x529   : > { %12670 = vst [vmem:[#allocation120_spill] sm:$0xff] %v9344_v17  ;;  %v9348_v14 = vpop.permute.xlu1 %3082 }
 0x52a   : > { %12671 = vst [vmem:[#allocation28_spill] sm:$0xff] %v9346_v22 }
 0x52b   : > { %12672 = vst [vmem:[#allocation65_spill] sm:$0xff] %v9348_v14  ;;  %v9368_v14 = vld [vmem:[#allocation3 + $0x140] sm:$0xff] }
 0x52c   : > { %12679 = vst [vmem:[#allocation39_spill] sm:$0xff] %v9368_v14 }
 0x52e   : > { %3240 = vrot.lane.b32.xlu0 %v9350_v27, %s6781_s10  ;;  %3244 = vrot.lane.b32.xlu2 %v9352_v45, %s6781_s10  ;;  %v9386_v27 = vld [vmem:[#allocation3 + $0x168] sm:$0xff]  ;;  %v9388_v45 = vld [vmem:[#allocation3 + $0x150] sm:$0xff] }
 0x52f   : > { %3236 = vrot.lane.b32.xlu1 %v9354_v0, %s6781_s10  ;;  %12685 = vst [vmem:[#allocation48_spill] sm:$0xff] %v9388_v45  ;;  %v9390_v0 = vld [vmem:[#allocation3 + $0x138] sm:$0xff] }
 0x530   : > { %v9362_v36 = vpop.permute.xlu2 %3114  ;;  %v9364_v17 = vpop.permute.xlu0 %3092 }
 0x531   : > { %12676 = vst [vmem:[#allocation159_spill] sm:$0xff] %v9362_v36  ;;  %v9366_v22 = vpop.permute.xlu1 %3088 }
 0x532   : > { %12677 = vst [vmem:[#allocation168_spill] sm:$0xff] %v9364_v17 }
 0x533   : > { %12678 = vst [vmem:[#allocation13_spill] sm:$0xff] %v9366_v22 }
 0x536   : > { %3246 = vrot.lane.b32.xlu0 %v9370_v62, %s6781_s10  ;;  %3250 = vrot.lane.b32.xlu2 %v9368_v14, %s6781_s10  ;;  %v9404_v62 = vld [vmem:[#allocation3 + $0x170] sm:$0xff]  ;;  %v9406_v14 = vld [vmem:[#allocation3 + $0x188] sm:$0xff] }
 0x537   : > { %3242 = vrot.lane.b32.xlu1 %v9372_v35, %s6781_s10  ;;  %12689 = vst [vmem:[#allocation152_spill] sm:$0xff] %v9404_v62  ;;  %v9408_v35 = vld [vmem:[#allocation3 + $0x158] sm:$0xff] }
 0x538   : > { %v9380_v36 = vpop.permute.xlu0 %3098  ;;  %v9382_v17 = vpop.permute.xlu2 %3120  ;;  %12690 = vst [vmem:[#allocation155_spill] sm:$0xff] %v9406_v14 }
 0x539   : > { %12682 = vst [vmem:[#allocation96_spill] sm:$0xff] %v9380_v36  ;;  %v9384_v22 = vpop.permute.xlu1 %3094 }
 0x53a   : > { %12683 = vst [vmem:[#allocation113_spill] sm:$0xff] %v9382_v17 }
 0x53b   : > { %12684 = vst [vmem:[#allocation116_spill] sm:$0xff] %v9384_v22 }
 0x53e   : > { %3252 = vrot.lane.b32.xlu0 %v9388_v45, %s6781_s10  ;;  %3256 = vrot.lane.b32.xlu2 %v9386_v27, %s6781_s10  ;;  %v9426_v45 = vld [vmem:[#allocation3 + $0x180] sm:$0xff] }
 0x53f   : > { %3248 = vrot.lane.b32.xlu1 %v9390_v0, %s6781_s10 }
 0x540   : > { %v9398_v36 = vpop.permute.xlu0 %3104  ;;  %v9400_v17 = vpop.permute.xlu2 %3126 }
 0x541   : > { %12686 = vst [vmem:[#allocation58_spill] sm:$0xff] %v9398_v36  ;;  %v9402_v22 = vpop.permute.xlu1 %3100 }
 0x542   : > { %12687 = vst [vmem:[#allocation126_spill] sm:$0xff] %v9400_v17 }
 0x543   : > { %12688 = vst [vmem:[#allocation135_spill] sm:$0xff] %v9402_v22 }
 0x546   : > { %3258 = vrot.lane.b32.xlu0 %v9404_v62, %s6781_s10  ;;  %3262 = vrot.lane.b32.xlu2 %v9406_v14, %s6781_s10 }
 0x547   : > { %3254 = vrot.lane.b32.xlu1 %v9408_v35, %s6781_s10 }
 0x548   : > { %v9416_v36 = vpop.permute.xlu0 %3110  ;;  %v9418_v17 = vpop.permute.xlu2 %3132 }
 0x549   : > { %12691 = vst [vmem:[#allocation171_spill] sm:$0xff] %v9416_v36  ;;  %v9420_v22 = vpop.permute.xlu1 %3106 }
 0x54a   : > { %12692 = vst [vmem:[#allocation17_spill] sm:$0xff] %v9418_v17  ;;  %v12753_v17 = vld [vmem:[#allocation110_spill] sm:$0xff] }
 0x54b   : > { %12693 = vst [vmem:[#allocation45_spill] sm:$0xff] %v9420_v22 }
 0x54e   : > { %3328 = vrot.lane.b32.xlu0 %v8804_v63, %s6774_s16  ;;  %3332 = vrot.lane.b32.xlu2 %v8852_v26, %s6774_s16 }
 0x54f   : > { %3260 = vrot.lane.b32.xlu1 %v9426_v45, %s6781_s10 }
 0x550   : > { %v9430_v62 = vpop.permute.xlu0 %3116  ;;  %v9432_v14 = vpop.permute.xlu2 %3202 }
 0x551   : > { %12694 = vst [vmem:[#allocation62_spill] sm:$0xff] %v9430_v62  ;;  %v9434_v36 = vpop.permute.xlu1 %3112 }
 0x552   : > { %12695 = vst [vmem:[#allocation91_spill] sm:$0xff] %v9434_v36 }
 0x556   : > { %3334 = vrot.lane.b32.xlu0 %v8876_v9, %s6774_s16  ;;  %3338 = vrot.lane.b32.xlu2 %v8924_v57, %s6774_s16 }
 0x557   : > { %3330 = vrot.lane.b32.xlu1 %v8828_v60, %s6774_s16 }
 0x558   : > { %v9442_v63 = vpop.permute.xlu0 %3122  ;;  %v9444_v26 = vpop.permute.xlu2 %3208 }
 0x559   : > { %v9446_v22 = vpop.permute.xlu1 %3118 }
 0x55a   : > { %12696 = vst [vmem:[#allocation100_spill] sm:$0xff] %v9446_v22  ;;  %v9544_v22 = vld [vmem:[#allocation3 + $0x181] sm:$0xff] }
 0x55e   : > { %3340 = vrot.lane.b32.xlu0 %v8940_v43, %s6774_s16  ;;  %3344 = vrot.lane.b32.xlu2 %v8957_v32, %s6774_s16 }
 0x55f   : > { %3336 = vrot.lane.b32.xlu1 %v8900_v33, %s6774_s16 }
 0x560   : > { %v9454_v9 = vpop.permute.xlu0 %3128  ;;  %v9456_v57 = vpop.permute.xlu2 %3214 }
 0x561   : > { %12697 = vst [vmem:[#allocation109_spill] sm:$0xff] %v9454_v9  ;;  %v9458_v60 = vpop.permute.xlu1 %3124  ;;  %v2865_v9 = vld [vmem:[#allocation3 + $0xf9] sm:$0xff] }
 0x562   : > { %12698 = vst [vmem:[#allocation119_spill] sm:$0xff] %v9458_v60 }
 0x566   : > { %3346 = vrot.lane.b32.xlu0 %v8967_v25, %s6774_s16  ;;  %3350 = vrot.lane.b32.xlu2 %v8987_v7, %s6774_s16 }
 0x567   : > { %3342 = vrot.lane.b32.xlu1 %v8947_v42, %s6774_s16 }
 0x568   : > { %v9466_v43 = vpop.permute.xlu0 %3134  ;;  %v9468_v32 = vpop.permute.xlu2 %3220 }
 0x569   : > { %12699 = vst [vmem:[#allocation42_spill] sm:$0xff] %v9466_v43  ;;  %v9470_v33 = vpop.permute.xlu1 %3130  ;;  %v2829_v43 = vld [vmem:[#allocation3 + $0xc8] sm:$0xff] }
 0x56a   : > { %12700 = vst [vmem:[#allocation47_spill] sm:$0xff] %v9468_v32 }
 0x56b   : > { %12701 = vst [vmem:[#allocation129_spill] sm:$0xff] %v9470_v33  ;;  %v2848_v33 = vld [vmem:[#allocation3 + $0x31] sm:$0xff] }
 0x56e   : > { %3352 = vrot.lane.b32.xlu0 %v8997_v50, %s6774_s16  ;;  %3356 = vrot.lane.b32.xlu2 %v9017_v53, %s6774_s16 }
 0x56f   : > { %3348 = vrot.lane.b32.xlu1 %v8977_v11, %s6774_s16 }
 0x570   : > { %v9478_v25 = vpop.permute.xlu0 %3204  ;;  %v9480_v7 = vpop.permute.xlu2 %3226 }
 0x571   : > { %12702 = vst [vmem:[#allocation139_spill] sm:$0xff] %v9480_v7  ;;  %v9482_v42 = vpop.permute.xlu1 %3200 }
 0x576   : > { %3358 = vrot.lane.b32.xlu0 %v9027_v51, %s6774_s16  ;;  %3362 = vrot.lane.b32.xlu2 %v9041_v8, %s6774_s16 }
 0x577   : > { %3354 = vrot.lane.b32.xlu1 %v9007_v28, %s6774_s16 }
 0x578   : > { %v9490_v50 = vpop.permute.xlu0 %3210  ;;  %v9492_v53 = vpop.permute.xlu2 %3232 }
 0x579   : > { %12703 = vst [vmem:[#allocation148_spill] sm:$0xff] %v9492_v53  ;;  %v9494_v11 = vpop.permute.xlu1 %3206  ;;  %v2820_v53 = vld [vmem:[#allocation3 + $0x60] sm:$0xff] }
 0x57e   : > { %3364 = vrot.lane.b32.xlu0 %v9048_v39, %s6774_s16  ;;  %3368 = vrot.lane.b32.xlu2 %v9062_v10, %s6774_s16 }
 0x57f   : > { %3360 = vrot.lane.b32.xlu1 %v9034_v34, %s6774_s16 }
 0x580   : > { %v9502_v51 = vpop.permute.xlu0 %3216  ;;  %v9504_v8 = vpop.permute.xlu2 %3238 }
 0x581   : > { %12704 = vst [vmem:[#allocation158_spill] sm:$0xff] %v9504_v8  ;;  %v9506_v28 = vpop.permute.xlu1 %3212  ;;  %v9682_v8 = vld [vmem:[#allocation3 + $0x18a] sm:$0xff] }
 0x586   : > { %3370 = vrot.lane.b32.xlu0 %v9069_v19, %s6774_s16  ;;  %3374 = vrot.lane.b32.xlu2 %v9089_v13, %s6774_s16 }
 0x587   : > { %3366 = vrot.lane.b32.xlu1 %v9055_v30, %s6774_s16 }
 0x588   : > { %v9514_v39 = vpop.permute.xlu0 %3222  ;;  %v9516_v10 = vpop.permute.xlu2 %3244 }
 0x589   : > { %12705 = vst [vmem:[#allocation173_spill] sm:$0xff] %v9514_v39  ;;  %v9518_v34 = vpop.permute.xlu1 %3218  ;;  %v2874_v39 = vld [vmem:[#allocation3 + $0x169] sm:$0xff] }
 0x58a   : > { %12706 = vst [vmem:[#allocation21_spill] sm:$0xff] %v9516_v10  ;;  %v9562_v10 = vld [vmem:[#allocation3 + $0x189] sm:$0xff] }
 0x58e   : > { %3376 = vrot.lane.b32.xlu0 %v9076_v38, %s6774_s16  ;;  %3380 = vrot.lane.b32.xlu2 %v9102_v24, %s6774_s16 }
 0x58f   : > { %3372 = vrot.lane.b32.xlu1 %v9078_v21, %s6774_s16 }
 0x590   : > { %v9526_v19 = vpop.permute.xlu0 %3228  ;;  %v9528_v13 = vpop.permute.xlu2 %3250 }
 0x591   : > { %12707 = vst [vmem:[#allocation36_spill] sm:$0xff] %v9526_v19  ;;  %v9530_v30 = vpop.permute.xlu1 %3224  ;;  %v2828_v19 = vld [vmem:[#allocation3 + $0xc0] sm:$0xff] }
 0x592   : > { %12708 = vst [vmem:[#allocation72_spill] sm:$0xff] %v9530_v30  ;;  %v2858_v30 = vld [vmem:[#allocation3 + $0xa9] sm:$0xff] }
 0x596   : > { %3382 = vrot.lane.b32.xlu0 %v9085_v58, %s6774_s16  ;;  %3386 = vrot.lane.b32.xlu2 %v9111_v15, %s6774_s16 }
 0x597   : > { %3378 = vrot.lane.b32.xlu1 %v9087_v59, %s6774_s16 }
 0x598   : > { %v9538_v38 = vpop.permute.xlu0 %3234  ;;  %v9540_v24 = vpop.permute.xlu2 %3256 }
 0x599   : > { %12709 = vst [vmem:[#allocation93_spill] sm:$0xff] %v9538_v38  ;;  %v9542_v21 = vpop.permute.xlu1 %3230  ;;  %v2818_v38 = vld [vmem:[#allocation3 + $0x48] sm:$0xff] }
 0x59a   : > { %12710 = vst [vmem:[#allocation95_spill] sm:$0xff] %v9540_v24  ;;  %v2862_v24 = vld [vmem:[#allocation3 + $0xd9] sm:$0xff] }
 0x59b   : > { %12711 = vst [vmem:[#allocation112_spill] sm:$0xff] %v9542_v21  ;;  %v2826_v21 = vld [vmem:[#allocation3 + $0xa8] sm:$0xff] }
 0x59e   : > { %3388 = vrot.lane.b32.xlu0 %v9544_v22, %s6774_s16  ;;  %3456 = vrot.lane.b32.xlu2 %v9125_v5, %s6782_s12 }
 0x59f   : > { %3384 = vrot.lane.b32.xlu1 %v9097_v4, %s6774_s16 }
 0x5a0   : > { %v9552_v58 = vpop.permute.xlu0 %3240  ;;  %v9554_v59 = vpop.permute.xlu2 %3262 }
 0x5a1   : > { %12712 = vst [vmem:[#allocation123_spill] sm:$0xff] %v9552_v58  ;;  %v9556_v15 = vpop.permute.xlu1 %3236 }
 0x5a2   : > { %12713 = vst [vmem:[#allocation125_spill] sm:$0xff] %v9554_v59  ;;  %v2823_v59 = vld [vmem:[#allocation3 + $0x80] sm:$0xff] }
 0x5a3   : > { %12714 = vst [vmem:[#allocation57_spill] sm:$0xff] %v9556_v15  ;;  %v2817_v15 = vld [vmem:[#allocation3 + $0x38] sm:$0xff] }
 0x5a6   : > { %3458 = vrot.lane.b32.xlu0 %v9106_v29, %s6782_s12  ;;  %3462 = vrot.lane.b32.xlu2 %v9139_v12, %s6782_s12 }
 0x5a7   : > { %3390 = vrot.lane.b32.xlu1 %v9562_v10, %s6774_s16 }
 0x5a8   : > { %v9566_v5 = vpop.permute.xlu0 %3246  ;;  %v9568_v4 = vpop.permute.xlu2 %3332 }
 0x5a9   : > { %12715 = vst [vmem:[#allocation131_spill] sm:$0xff] %v9566_v5  ;;  %v9570_v62 = vpop.permute.xlu1 %3242  ;;  %v12730_v5 = vld [vmem:[#allocation133_spill] sm:$0xff] }
 0x5aa   : > { %12716 = vst [vmem:[#allocation134_spill] sm:$0xff] %v9570_v62 }
 0x5ae   : > { %3464 = vrot.lane.b32.xlu0 %v9117_v56, %s6782_s12  ;;  %3468 = vrot.lane.b32.xlu2 %v9155_v16, %s6782_s12 }
 0x5af   : > { %3460 = vrot.lane.b32.xlu1 %v9119_v23, %s6782_s12 }
 0x5b0   : > { %v9578_v29 = vpop.permute.xlu0 %3252  ;;  %v9580_v12 = vpop.permute.xlu2 %3338 }
 0x5b1   : > { %12717 = vst [vmem:[#allocation151_spill] sm:$0xff] %v9578_v29  ;;  %v9582_v58 = vpop.permute.xlu1 %3248 }
 0x5b2   : > { %12718 = vst [vmem:[#allocation162_spill] sm:$0xff] %v9582_v58  ;;  %v12729_v58 = vld [vmem:[#allocation60_spill] sm:$0xff] }
 0x5b6   : > { %3470 = vrot.lane.b32.xlu0 %v9131_v20, %s6782_s12  ;;  %3474 = vrot.lane.b32.xlu2 %v9169_v55, %s6782_s12 }
 0x5b7   : > { %3466 = vrot.lane.b32.xlu1 %v9133_v37, %s6782_s12 }
 0x5b8   : > { %v9590_v56 = vpop.permute.xlu0 %3258  ;;  %v9592_v16 = vpop.permute.xlu2 %3344 }
 0x5b9   : > { %12719 = vst [vmem:[#allocation170_spill] sm:$0xff] %v9590_v56  ;;  %v9594_v23 = vpop.permute.xlu1 %3254  ;;  %v12761_v56 = vld [vmem:[#allocation39_spill] sm:$0xff] }
 0x5ba   : > { %12720 = vst [vmem:[#allocation16_spill] sm:$0xff] %v9594_v23  ;;  %v2872_v23 = vld [vmem:[#allocation3 + $0x151] sm:$0xff] }
 0x5be   : > { %3476 = vrot.lane.b32.xlu0 %v9145_v2, %s6782_s12  ;;  %3480 = vrot.lane.b32.xlu2 %v9187_v31, %s6782_s12 }
 0x5bf   : > { %3472 = vrot.lane.b32.xlu1 %v9147_v40, %s6782_s12 }
 0x5c0   : > { %v9602_v20 = vpop.permute.xlu0 %3328  ;;  %v9604_v55 = vpop.permute.xlu2 %3350 }
 0x5c1   : > { %12721 = vst [vmem:[#allocation44_spill] sm:$0xff] %v9604_v55  ;;  %v9606_v37 = vpop.permute.xlu1 %3260  ;;  %v2871_v55 = vld [vmem:[#allocation3 + $0x141] sm:$0xff] }
 0x5c2   : > { %12722 = vst [vmem:[#allocation78_spill] sm:$0xff] %v9606_v37  ;;  %v12751_v37 = vld [vmem:[#allocation149_spill] sm:$0xff] }
 0x5c6   : > { %3482 = vrot.lane.b32.xlu0 %v9161_v54, %s6782_s12  ;;  %3486 = vrot.lane.b32.xlu2 %v9205_v61, %s6782_s12 }
 0x5c7   : > { %3478 = vrot.lane.b32.xlu1 %v9163_v47, %s6782_s12 }
 0x5c8   : > { %v9614_v2 = vpop.permute.xlu0 %3334  ;;  %v9616_v31 = vpop.permute.xlu2 %3356 }
 0x5c9   : > { %12723 = vst [vmem:[#allocation90_spill] sm:$0xff] %v9616_v31  ;;  %v9618_v40 = vpop.permute.xlu1 %3330  ;;  %v2825_v31 = vld [vmem:[#allocation3 + $0x98] sm:$0xff] }
 0x5ce   : > { %3488 = vrot.lane.b32.xlu0 %v9179_v1, %s6782_s12  ;;  %3492 = vrot.lane.b32.xlu2 %v9223_v48, %s6782_s12 }
 0x5cf   : > { %3484 = vrot.lane.b32.xlu1 %v9181_v44, %s6782_s12 }
 0x5d0   : > { %v9626_v54 = vpop.permute.xlu0 %3340  ;;  %v9628_v61 = vpop.permute.xlu2 %3362 }
 0x5d1   : > { %12724 = vst [vmem:[#allocation99_spill] sm:$0xff] %v9628_v61  ;;  %v9630_v47 = vpop.permute.xlu1 %3336 }
 0x5d6   : > { %3494 = vrot.lane.b32.xlu0 %v9197_v3, %s6782_s12  ;;  %3498 = vrot.lane.b32.xlu2 %v9241_v52, %s6782_s12 }
 0x5d7   : > { %3490 = vrot.lane.b32.xlu1 %v9199_v18, %s6782_s12 }
 0x5d8   : > { %v9638_v1 = vpop.permute.xlu0 %3346  ;;  %v9640_v48 = vpop.permute.xlu2 %3368 }
 0x5d9   : > { %12725 = vst [vmem:[#allocation114_spill] sm:$0xff] %v9640_v48  ;;  %v9642_v44 = vpop.permute.xlu1 %3342  ;;  %v9668_v48 = vld [vmem:[#allocation3 + $0x182] sm:$0xff] }
 0x5de   : > { %3500 = vrot.lane.b32.xlu0 %v9217_v49, %s6782_s12  ;;  %3504 = vrot.lane.b32.xlu2 %v9259_v6, %s6782_s12  ;;  %v12731_v49 = vld [vmem:[#allocation27_spill] sm:$0xff] }
 0x5df   : > { %3496 = vrot.lane.b32.xlu1 %v9215_v41, %s6782_s12 }
 0x5e0   : > { %v9650_v3 = vpop.permute.xlu0 %3352  ;;  %v9652_v52 = vpop.permute.xlu2 %3374 }
 0x5e1   : > { %12726 = vst [vmem:[#allocation118_spill] sm:$0xff] %v9650_v3  ;;  %v9654_v18 = vpop.permute.xlu1 %3348  ;;  %v2859_v3 = vld [vmem:[#allocation3 + $0xb1] sm:$0xff] }
 0x5e2   : > { %12727 = vst [vmem:[#allocation53_spill] sm:$0xff] %v9652_v52  ;;  %v12735_v52 = vld [vmem:[#allocation111_spill] sm:$0xff] }
 0x5e3   : > { %12728 = vst [vmem:[#allocation69_spill] sm:$0xff] %v9654_v18  ;;  %v2898_v18 = vld [vmem:[#allocation3 + $0x10a] sm:$0xff] }
 0x5e6   : > { %3506 = vrot.lane.b32.xlu0 %v12729_v58, %s6782_s12  ;;  %3510 = vrot.lane.b32.xlu2 %v12730_v5, %s6782_s12  ;;  %v12736_v58 = vld [vmem:[#allocation84_spill] sm:$0xff] }
 0x5e7   : > { %3502 = vrot.lane.b32.xlu1 %v12731_v49, %s6782_s12 }
 0x5e8   : > { %v9662_v62 = vpop.permute.xlu0 %3358  ;;  %v9664_v6 = vpop.permute.xlu2 %3380 }
 0x5e9   : > { %12732 = vst [vmem:[#allocation128_spill] sm:$0xff] %v9662_v62  ;;  %v9666_v41 = vpop.permute.xlu1 %3354 }
 0x5ea   : > { %12733 = vst [vmem:[#allocation138_spill] sm:$0xff] %v9664_v6  ;;  %v2896_v6 = vld [vmem:[#allocation3 + $0xf2] sm:$0xff] }
 0x5eb   : > { %12734 = vst [vmem:[#allocation153_spill] sm:$0xff] %v9666_v41  ;;  %v12757_v41 = vld [vmem:[#allocation132_spill] sm:$0xff] }
 0x5ee   : > { %3512 = vrot.lane.b32.xlu0 %v12735_v52, %s6782_s12  ;;  %3516 = vrot.lane.b32.xlu2 %v9668_v48, %s6782_s12  ;;  %v12740_v52 = vld [vmem:[#allocation80_spill] sm:$0xff] }
 0x5ef   : > { %3508 = vrot.lane.b32.xlu1 %v12736_v58, %s6782_s12 }
 0x5f0   : > { %v9676_v5 = vpop.permute.xlu0 %3364  ;;  %v9678_v49 = vpop.permute.xlu2 %3386 }
 0x5f1   : > { %12737 = vst [vmem:[#allocation157_spill] sm:$0xff] %v9676_v5  ;;  %v9680_v36 = vpop.permute.xlu1 %3360 }
 0x5f2   : > { %12738 = vst [vmem:[#allocation172_spill] sm:$0xff] %v9678_v49 }
 0x5f3   : > { %12739 = vst [vmem:[#allocation20_spill] sm:$0xff] %v9680_v36  ;;  %v2816_v36 = vld [vmem:[#allocation3 + $0x30] sm:$0xff] }
 0x5f6   : > { %3518 = vrot.lane.b32.xlu0 %v9682_v8, %s6782_s12  ;;  %3586 = vrot.lane.b32.xlu2 %v2817_v15, %s6775_s17 }
 0x5f7   : > { %3514 = vrot.lane.b32.xlu1 %v12740_v52, %s6782_s12 }
 0x5f8   : > { %v9689_v61 = vpop.permute.xlu0 %3370  ;;  %v9691_v58 = vpop.permute.xlu2 %3456 }
 0x5f9   : > { %12741 = vst [vmem:[#allocation68_spill] sm:$0xff] %v9689_v61  ;;  %v9693_v5 = vpop.permute.xlu1 %3366  ;;  %v2821_v61 = vld [vmem:[#allocation3 + $0x68] sm:$0xff] }
 0x5fa   : > { %12742 = vst [vmem:[#allocation103_spill] sm:$0xff] %v9693_v5  ;;  %v2819_v5 = vld [vmem:[#allocation3 + $0x50] sm:$0xff] }
 0x5fe   : > { %3588 = vrot.lane.b32.xlu0 %v2818_v38, %s6775_s17  ;;  %3592 = vrot.lane.b32.xlu2 %v2820_v53, %s6775_s17 }
 0x5ff   : > { %3584 = vrot.lane.b32.xlu1 %v2816_v36, %s6775_s17 }
 0x600   : > { %v9698_v62 = vpop.permute.xlu0 %3376  ;;  %v9700_v15 = vpop.permute.xlu2 %3462 }
 0x601   : > { %12743 = vst [vmem:[#allocation122_spill] sm:$0xff] %v9698_v62  ;;  %v9702_v52 = vpop.permute.xlu1 %3372  ;;  %v2824_v62 = vld [vmem:[#allocation3 + $0x90] sm:$0xff] }
 0x602   : > { %12744 = vst [vmem:[#allocation71_spill] sm:$0xff] %v9702_v52  ;;  %v2822_v52 = vld [vmem:[#allocation3 + $0x78] sm:$0xff] }
 0x606   : > { %3594 = vrot.lane.b32.xlu0 %v2821_v61, %s6775_s17  ;;  %3598 = vrot.lane.b32.xlu2 %v2823_v59, %s6775_s17 }
 0x607   : > { %3590 = vrot.lane.b32.xlu1 %v2819_v5, %s6775_s17 }
 0x608   : > { %v9707_v38 = vpop.permute.xlu0 %3382  ;;  %v9709_v53 = vpop.permute.xlu2 %3468 }
 0x609   : > { %12745 = vst [vmem:[#allocation142_spill] sm:$0xff] %v9707_v38  ;;  %v9711_v36 = vpop.permute.xlu1 %3378  ;;  %v2869_v38 = vld [vmem:[#allocation3 + $0x129] sm:$0xff] }
 0x60e   : > { %3600 = vrot.lane.b32.xlu0 %v2824_v62, %s6775_s17  ;;  %3604 = vrot.lane.b32.xlu2 %v2826_v21, %s6775_s17 }
 0x60f   : > { %3596 = vrot.lane.b32.xlu1 %v2822_v52, %s6775_s17 }
 0x610   : > { %v9716_v61 = vpop.permute.xlu0 %3388  ;;  %v9718_v59 = vpop.permute.xlu2 %3474 }
 0x611   : > { %12746 = vst [vmem:[#allocation161_spill] sm:$0xff] %v9716_v61  ;;  %v9720_v5 = vpop.permute.xlu1 %3384  ;;  %v12750_v61 = vld [vmem:[#allocation18_spill] sm:$0xff] }
 0x612   : > { %12747 = vst [vmem:[#allocation26_spill] sm:$0xff] %v9720_v5  ;;  %v2857_v5 = vld [vmem:[#allocation3 + $0x99] sm:$0xff] }
 0x616   : > { %3606 = vrot.lane.b32.xlu0 %v9311_v46, %s6775_s17  ;;  %3610 = vrot.lane.b32.xlu2 %v2829_v43, %s6775_s17 }
 0x617   : > { %3602 = vrot.lane.b32.xlu1 %v2825_v31, %s6775_s17 }
 0x618   : > { %v9726_v62 = vpop.permute.xlu0 %3458  ;;  %v9728_v21 = vpop.permute.xlu2 %3480 }
 0x619   : > { %12748 = vst [vmem:[#allocation77_spill] sm:$0xff] %v9728_v21  ;;  %v9730_v52 = vpop.permute.xlu1 %3390  ;;  %v2850_v21 = vld [vmem:[#allocation3 + $0x49] sm:$0xff] }
 0x61a   : > { %12749 = vst [vmem:[#allocation98_spill] sm:$0xff] %v9730_v52  ;;  %v12754_v52 = vld [vmem:[#allocation88_spill] sm:$0xff] }
 0x61e   : > { %3612 = vrot.lane.b32.xlu0 %v12750_v61, %s6775_s17  ;;  %3616 = vrot.lane.b32.xlu2 %v12751_v37, %s6775_s17  ;;  %v12755_v61 = vld [vmem:[#allocation94_spill] sm:$0xff] }
 0x61f   : > { %3608 = vrot.lane.b32.xlu1 %v2828_v19, %s6775_s17 }
 0x620   : > { %v9737_v46 = vpop.permute.xlu0 %3464  ;;  %v9739_v43 = vpop.permute.xlu2 %3486 }
 0x621   : > { %12752 = vst [vmem:[#allocation23_spill] sm:$0xff] %v9739_v43  ;;  %v9741_v31 = vpop.permute.xlu1 %3460 }
 0x626   : > { %3618 = vrot.lane.b32.xlu0 %v12753_v17, %s6775_s17  ;;  %3622 = vrot.lane.b32.xlu2 %v12754_v52, %s6775_s17  ;;  %v12758_v17 = vld [vmem:[#allocation130_spill] sm:$0xff] }
 0x627   : > { %3614 = vrot.lane.b32.xlu1 %v12755_v61, %s6775_s17 }
 0x628   : > { %v9749_v49 = vpop.permute.xlu0 %3470  ;;  %v9751_v37 = vpop.permute.xlu2 %3492 }
 0x629   : > { %12756 = vst [vmem:[#allocation64_spill] sm:$0xff] %v9751_v37  ;;  %v9753_v19 = vpop.permute.xlu1 %3466 }
 0x62e   : > { %3624 = vrot.lane.b32.xlu0 %v12757_v41, %s6775_s17  ;;  %3628 = vrot.lane.b32.xlu2 %v9390_v0, %s6775_s17  ;;  %v12762_v41 = vld [vmem:[#allocation73_spill] sm:$0xff] }
 0x62f   : > { %3620 = vrot.lane.b32.xlu1 %v12758_v17, %s6775_s17 }
 0x630   : > { %v9761_v43 = vpop.permute.xlu0 %3476  ;;  %v9763_v52 = vpop.permute.xlu2 %3498 }
 0x631   : > { %12759 = vst [vmem:[#allocation137_spill] sm:$0xff] %v9761_v43  ;;  %v9765_v61 = vpop.permute.xlu1 %3472  ;;  %v2895_v43 = vld [vmem:[#allocation3 + $0xe2] sm:$0xff] }
 0x632   : > { %12760 = vst [vmem:[#allocation165_spill] sm:$0xff] %v9763_v52 }
 0x636   : > { %3630 = vrot.lane.b32.xlu0 %v12761_v56, %s6775_s17  ;;  %3634 = vrot.lane.b32.xlu2 %v9408_v35, %s6775_s17  ;;  %v12766_v56 = vld [vmem:[#allocation48_spill] sm:$0xff] }
 0x637   : > { %3626 = vrot.lane.b32.xlu1 %v12762_v41, %s6775_s17 }
 0x638   : > { %v9773_v37 = vpop.permute.xlu0 %3482  ;;  %v9775_v0 = vpop.permute.xlu2 %3504 }
 0x639   : > { %12763 = vst [vmem:[#allocation19_spill] sm:$0xff] %v9773_v37  ;;  %v9777_v17 = vpop.permute.xlu1 %3478  ;;  %v2847_v37 = vld [vmem:[#allocation3 + $0x1a0] sm:$0xff] }
 0x63a   : > { %12764 = vst [vmem:[#allocation83_spill] sm:$0xff] %v9775_v0  ;;  %v12770_v0 = vld [vmem:[#allocation155_spill] sm:$0xff] }
 0x63b   : > { %12765 = vst [vmem:[#allocation102_spill] sm:$0xff] %v9777_v17  ;;  %v2868_v17 = vld [vmem:[#allocation3 + $0x121] sm:$0xff] }
 0x63e   : > { %3636 = vrot.lane.b32.xlu0 %v9386_v27, %s6775_s17  ;;  %3640 = vrot.lane.b32.xlu2 %v9426_v45, %s6775_s17  ;;  %v12771_v27 = vld [vmem:[#allocation152_spill] sm:$0xff] }
 0x63f   : > { %3632 = vrot.lane.b32.xlu1 %v12766_v56, %s6775_s17 }
 0x640   : > { %v9785_v52 = vpop.permute.xlu0 %3488  ;;  %v9787_v35 = vpop.permute.xlu2 %3510 }
 0x641   : > { %12767 = vst [vmem:[#allocation121_spill] sm:$0xff] %v9785_v52  ;;  %v9789_v41 = vpop.permute.xlu1 %3484  ;;  %v2846_v52 = vld [vmem:[#allocation3 + $0x198] sm:$0xff] }
 0x642   : > { %12768 = vst [vmem:[#allocation76_spill] sm:$0xff] %v9787_v35  ;;  %v2866_v35 = vld [vmem:[#allocation3 + $0x109] sm:$0xff] }
 0x643   : > { %12769 = vst [vmem:[#allocation141_spill] sm:$0xff] %v9789_v41  ;;  %v2856_v41 = vld [vmem:[#allocation3 + $0x91] sm:$0xff] }
 0x646   : > { %3642 = vrot.lane.b32.xlu0 %v12770_v0, %s6775_s17  ;;  %3646 = vrot.lane.b32.xlu2 %v2847_v37, %s6775_s17 }
 0x647   : > { %3638 = vrot.lane.b32.xlu1 %v12771_v27, %s6775_s17 }
 0x648   : > { %v9796_v7 = vpop.permute.xlu0 %3494  ;;  %v9798_v45 = vpop.permute.xlu2 %3516 }
 0x649   : > { %12772 = vst [vmem:[#allocation160_spill] sm:$0xff] %v9796_v7  ;;  %v9800_v56 = vpop.permute.xlu1 %3490  ;;  %v2851_v7 = vld [vmem:[#allocation3 + $0x51] sm:$0xff] }
 0x64a   : > { %12773 = vst [vmem:[#allocation25_spill] sm:$0xff] %v9798_v45  ;;  %v2853_v45 = vld [vmem:[#allocation3 + $0x69] sm:$0xff] }
 0x64b   : > { %12774 = vst [vmem:[#allocation74_spill] sm:$0xff] %v9800_v56  ;;  %v2849_v56 = vld [vmem:[#allocation3 + $0x39] sm:$0xff] }
 0x64e   : > { %3712 = vrot.lane.b32.xlu0 %v2848_v33, %s6783_s13  ;;  %3716 = vrot.lane.b32.xlu2 %v2850_v21, %s6783_s13 }
 0x64f   : > { %3644 = vrot.lane.b32.xlu1 %v2846_v52, %s6775_s17 }
 0x650   : > { %v9805_v37 = vpop.permute.xlu0 %3500  ;;  %v9807_v0 = vpop.permute.xlu2 %3586 }
 0x651   : > { %12775 = vst [vmem:[#allocation106_spill] sm:$0xff] %v9805_v37  ;;  %v9809_v27 = vpop.permute.xlu1 %3496  ;;  %v2854_v37 = vld [vmem:[#allocation3 + $0x79] sm:$0xff] }
 0x652   : > { %12776 = vst [vmem:[#allocation33_spill] sm:$0xff] %v9809_v27  ;;  %v2852_v27 = vld [vmem:[#allocation3 + $0x61] sm:$0xff] }
 0x656   : > { %3718 = vrot.lane.b32.xlu0 %v2851_v7, %s6783_s13  ;;  %3722 = vrot.lane.b32.xlu2 %v2853_v45, %s6783_s13 }
 0x657   : > { %3714 = vrot.lane.b32.xlu1 %v2849_v56, %s6783_s13 }
 0x658   : > { %v9814_v33 = vpop.permute.xlu0 %3506  ;;  %v9816_v21 = vpop.permute.xlu2 %3592 }
 0x659   : > { %v9818_v52 = vpop.permute.xlu1 %3502 }
 0x65a   : > { %12777 = vst [vmem:[#allocation63_spill] sm:$0xff] %v9818_v52  ;;  %v2855_v52 = vld [vmem:[#allocation3 + $0x81] sm:$0xff] }
 0x65e   : > { %3724 = vrot.lane.b32.xlu0 %v2854_v37, %s6783_s13  ;;  %3728 = vrot.lane.b32.xlu2 %v2856_v41, %s6783_s13 }
 0x65f   : > { %3720 = vrot.lane.b32.xlu1 %v2852_v27, %s6783_s13 }
 0x660   : > { %v9823_v7 = vpop.permute.xlu0 %3512  ;;  %v9825_v45 = vpop.permute.xlu2 %3598 }
 0x661   : > { %12778 = vst [vmem:[#allocation145_spill] sm:$0xff] %v9823_v7  ;;  %v9827_v56 = vpop.permute.xlu1 %3508  ;;  %v2860_v7 = vld [vmem:[#allocation3 + $0xc1] sm:$0xff] }
 0x662   : > { %12779 = vst [vmem:[#allocation164_spill] sm:$0xff] %v9827_v56  ;;  %v2892_v56 = vld [vmem:[#allocation3 + $0xc2] sm:$0xff] }
 0x666   : > { %3730 = vrot.lane.b32.xlu0 %v2857_v5, %s6783_s13  ;;  %3734 = vrot.lane.b32.xlu2 %v2859_v3, %s6783_s13 }
 0x667   : > { %3726 = vrot.lane.b32.xlu1 %v2855_v52, %s6783_s13 }
 0x668   : > { %v9832_v37 = vpop.permute.xlu0 %3518  ;;  %v9834_v41 = vpop.permute.xlu2 %3604 }
 0x669   : > { %12780 = vst [vmem:[#allocation30_spill] sm:$0xff] %v9832_v37  ;;  %v9836_v27 = vpop.permute.xlu1 %3514  ;;  %v2863_v37 = vld [vmem:[#allocation3 + $0xe1] sm:$0xff] }
 0x66a   : > { %12781 = vst [vmem:[#allocation82_spill] sm:$0xff] %v9834_v41  ;;  %v2880_v41 = vld [vmem:[#allocation3 + $0x32] sm:$0xff] }
 0x66b   : > { %12782 = vst [vmem:[#allocation101_spill] sm:$0xff] %v9836_v27  ;;  %v2861_v27 = vld [vmem:[#allocation3 + $0xc9] sm:$0xff] }
 0x66e   : > { %3736 = vrot.lane.b32.xlu0 %v2860_v7, %s6783_s13  ;;  %3740 = vrot.lane.b32.xlu2 %v2862_v24, %s6783_s13 }
 0x66f   : > { %3732 = vrot.lane.b32.xlu1 %v2858_v30, %s6783_s13 }
 0x670   : > { %v9841_v5 = vpop.permute.xlu0 %3588  ;;  %v9843_v3 = vpop.permute.xlu2 %3610 }
 0x671   : > { %12783 = vst [vmem:[#allocation38_spill] sm:$0xff] %v9843_v3  ;;  %v9845_v52 = vpop.permute.xlu1 %3584  ;;  %v2864_v3 = vld [vmem:[#allocation3 + $0xf1] sm:$0xff] }
 0x676   : > { %3742 = vrot.lane.b32.xlu0 %v2863_v37, %s6783_s13  ;;  %3746 = vrot.lane.b32.xlu2 %v2865_v9, %s6783_s13 }
 0x677   : > { %3738 = vrot.lane.b32.xlu1 %v2861_v27, %s6783_s13 }
 0x678   : > { %v9850_v7 = vpop.permute.xlu0 %3594  ;;  %v9852_v24 = vpop.permute.xlu2 %3616 }
 0x679   : > { %12784 = vst [vmem:[#allocation75_spill] sm:$0xff] %v9852_v24  ;;  %v9854_v30 = vpop.permute.xlu1 %3590  ;;  %v2867_v24 = vld [vmem:[#allocation3 + $0x111] sm:$0xff] }
 0x67e   : > { %3748 = vrot.lane.b32.xlu0 %v2866_v35, %s6783_s13  ;;  %3752 = vrot.lane.b32.xlu2 %v2868_v17, %s6783_s13 }
 0x67f   : > { %3744 = vrot.lane.b32.xlu1 %v2864_v3, %s6783_s13 }
 0x680   : > { %v9859_v37 = vpop.permute.xlu0 %3600  ;;  %v9861_v9 = vpop.permute.xlu2 %3622 }
 0x681   : > { %12785 = vst [vmem:[#allocation140_spill] sm:$0xff] %v9861_v9  ;;  %v9863_v27 = vpop.permute.xlu1 %3596  ;;  %v2870_v9 = vld [vmem:[#allocation3 + $0x139] sm:$0xff] }
 0x686   : > { %3754 = vrot.lane.b32.xlu0 %v2869_v38, %s6783_s13  ;;  %3758 = vrot.lane.b32.xlu2 %v2871_v55, %s6783_s13 }
 0x687   : > { %3750 = vrot.lane.b32.xlu1 %v2867_v24, %s6783_s13 }
 0x688   : > { %v9868_v35 = vpop.permute.xlu0 %3606  ;;  %v9870_v17 = vpop.permute.xlu2 %3628 }
 0x689   : > { %12786 = vst [vmem:[#allocation167_spill] sm:$0xff] %v9868_v35  ;;  %v9872_v3 = vpop.permute.xlu1 %3602  ;;  %v2875_v35 = vld [vmem:[#allocation3 + $0x171] sm:$0xff] }
 0x68a   : > { %12787 = vst [vmem:[#allocation22_spill] sm:$0xff] %v9870_v17  ;;  %v2873_v17 = vld [vmem:[#allocation3 + $0x159] sm:$0xff] }
 0x68b   : > { %12788 = vst [vmem:[#allocation87_spill] sm:$0xff] %v9872_v3  ;;  %v2905_v3 = vld [vmem:[#allocation3 + $0x15a] sm:$0xff] }
 0x68e   : > { %3760 = vrot.lane.b32.xlu0 %v2872_v23, %s6783_s13  ;;  %3764 = vrot.lane.b32.xlu2 %v2874_v39, %s6783_s13 }
 0x68f   : > { %3756 = vrot.lane.b32.xlu1 %v2870_v9, %s6783_s13 }
 0x690   : > { %v9877_v38 = vpop.permute.xlu0 %3612  ;;  %v9879_v55 = vpop.permute.xlu2 %3634 }
 0x691   : > { %12789 = vst [vmem:[#allocation105_spill] sm:$0xff] %v9877_v38  ;;  %v9881_v24 = vpop.permute.xlu1 %3608  ;;  %v2878_v38 = vld [vmem:[#allocation3 + $0x199] sm:$0xff] }
 0x692   : > { %12790 = vst [vmem:[#allocation124_spill] sm:$0xff] %v9879_v55  ;;  %v2907_v55 = vld [vmem:[#allocation3 + $0x172] sm:$0xff] }
 0x693   : > { %12791 = vst [vmem:[#allocation85_spill] sm:$0xff] %v9881_v24  ;;  %v2881_v24 = vld [vmem:[#allocation3 + $0x3a] sm:$0xff] }
 0x696   : > { %3766 = vrot.lane.b32.xlu0 %v2875_v35, %s6783_s13  ;;  %3770 = vrot.lane.b32.xlu2 %v9562_v10, %s6783_s13 }
 0x697   : > { %3762 = vrot.lane.b32.xlu1 %v2873_v17, %s6783_s13 }
 0x698   : > { %v9887_v23 = vpop.permute.xlu0 %3618  ;;  %v9889_v39 = vpop.permute.xlu2 %3640 }
 0x699   : > { %12792 = vst [vmem:[#allocation144_spill] sm:$0xff] %v9887_v23  ;;  %v9891_v9 = vpop.permute.xlu1 %3614  ;;  %v2879_v23 = vld [vmem:[#allocation3 + $0x1a1] sm:$0xff] }
 0x69a   : > { %12793 = vst [vmem:[#allocation163_spill] sm:$0xff] %v9889_v39  ;;  %v2883_v39 = vld [vmem:[#allocation3 + $0x52] sm:$0xff] }
 0x69b   : > { %12794 = vst [vmem:[#allocation29_spill] sm:$0xff] %v9891_v9  ;;  %v2886_v9 = vld [vmem:[#allocation3 + $0x7a] sm:$0xff] }
 0x69e   : > { %3772 = vrot.lane.b32.xlu0 %v2878_v38, %s6783_s13  ;;  %3840 = vrot.lane.b32.xlu2 %v2880_v41, %s6776_s18 }
 0x69f   : > { %3768 = vrot.lane.b32.xlu1 %v9544_v22, %s6783_s13 }
 0x6a0   : > { %v9897_v35 = vpop.permute.xlu0 %3624  ;;  %v9899_v10 = vpop.permute.xlu2 %3646 }
 0x6a1   : > { %12795 = vst [vmem:[#allocation79_spill] sm:$0xff] %v9897_v35  ;;  %v9901_v17 = vpop.permute.xlu1 %3620  ;;  %v2884_v35 = vld [vmem:[#allocation3 + $0x62] sm:$0xff] }
 0x6a2   : > { %12796 = vst [vmem:[#allocation108_spill] sm:$0xff] %v9899_v10  ;;  %v2889_v10 = vld [vmem:[#allocation3 + $0x9a] sm:$0xff] }
 0x6a3   : > { %12797 = vst [vmem:[#allocation24_spill] sm:$0xff] %v9901_v17  ;;  %v2882_v17 = vld [vmem:[#allocation3 + $0x4a] sm:$0xff] }
 0x6a6   : > { %3842 = vrot.lane.b32.xlu0 %v2881_v24, %s6776_s18  ;;  %3846 = vrot.lane.b32.xlu2 %v2883_v39, %s6776_s18 }
 0x6a7   : > { %3774 = vrot.lane.b32.xlu1 %v2879_v23, %s6783_s13 }
 0x6a8   : > { %v9906_v38 = vpop.permute.xlu0 %3630  ;;  %v9908_v41 = vpop.permute.xlu2 %3716 }
 0x6a9   : > { %12798 = vst [vmem:[#allocation70_spill] sm:$0xff] %v9906_v38  ;;  %v9910_v22 = vpop.permute.xlu1 %3626  ;;  %v2887_v38 = vld [vmem:[#allocation3 + $0x82] sm:$0xff] }
 0x6aa   : > { %12799 = vst [vmem:[#allocation147_spill] sm:$0xff] %v9910_v22  ;;  %v2885_v22 = vld [vmem:[#allocation3 + $0x6a] sm:$0xff] }
 0x6ae   : > { %3848 = vrot.lane.b32.xlu0 %v2884_v35, %s6776_s18  ;;  %3852 = vrot.lane.b32.xlu2 %v2886_v9, %s6776_s18 }
 0x6af   : > { %3844 = vrot.lane.b32.xlu1 %v2882_v17, %s6776_s18 }
 0x6b0   : > { %v9915_v24 = vpop.permute.xlu0 %3636  ;;  %v9917_v39 = vpop.permute.xlu2 %3722 }
 0x6b1   : > { %12800 = vst [vmem:[#allocation166_spill] sm:$0xff] %v9915_v24  ;;  %v9919_v23 = vpop.permute.xlu1 %3632  ;;  %v2890_v24 = vld [vmem:[#allocation3 + $0xaa] sm:$0xff] }
 0x6b2   : > { %12801 = vst [vmem:[#allocation35_spill] sm:$0xff] %v9919_v23  ;;  %v2888_v23 = vld [vmem:[#allocation3 + $0x92] sm:$0xff] }
 0x6b6   : > { %3854 = vrot.lane.b32.xlu0 %v2887_v38, %s6776_s18  ;;  %3858 = vrot.lane.b32.xlu2 %v2889_v10, %s6776_s18 }
 0x6b7   : > { %3850 = vrot.lane.b32.xlu1 %v2885_v22, %s6776_s18 }
 0x6b8   : > { %v9924_v35 = vpop.permute.xlu0 %3642  ;;  %v9926_v9 = vpop.permute.xlu2 %3728 }
 0x6b9   : > { %12802 = vst [vmem:[#allocation86_spill] sm:$0xff] %v9924_v35  ;;  %v9928_v17 = vpop.permute.xlu1 %3638  ;;  %v2893_v35 = vld [vmem:[#allocation3 + $0xca] sm:$0xff] }
 0x6ba   : > { %12803 = vst [vmem:[#allocation104_spill] sm:$0xff] %v9928_v17  ;;  %v2891_v17 = vld [vmem:[#allocation3 + $0xb2] sm:$0xff] }
 0x6be   : > { %3860 = vrot.lane.b32.xlu0 %v2890_v24, %s6776_s18  ;;  %3864 = vrot.lane.b32.xlu2 %v2892_v56, %s6776_s18 }
 0x6bf   : > { %3856 = vrot.lane.b32.xlu1 %v2888_v23, %s6776_s18 }
 0x6c0   : > { %v9933_v38 = vpop.permute.xlu0 %3712  ;;  %v9935_v10 = vpop.permute.xlu2 %3734 }
 0x6c1   : > { %12804 = vst [vmem:[#allocation32_spill] sm:$0xff] %v9935_v10  ;;  %v9937_v22 = vpop.permute.xlu1 %3644  ;;  %v2897_v10 = vld [vmem:[#allocation3 + $0xfa] sm:$0xff] }
 0x6c2   : > { %12805 = vst [vmem:[#allocation81_spill] sm:$0xff] %v9937_v22  ;;  %v2894_v22 = vld [vmem:[#allocation3 + $0xda] sm:$0xff] }
 0x6c6   : > { %3866 = vrot.lane.b32.xlu0 %v2893_v35, %s6776_s18  ;;  %3870 = vrot.lane.b32.xlu2 %v2895_v43, %s6776_s18 }
 0x6c7   : > { %3862 = vrot.lane.b32.xlu1 %v2891_v17, %s6776_s18 }
 0x6c8   : > { %v9942_v24 = vpop.permute.xlu0 %3718  ;;  %v9944_v56 = vpop.permute.xlu2 %3740 }
 0x6c9   : > { %12806 = vst [vmem:[#allocation143_spill] sm:$0xff] %v9944_v56  ;;  %v9946_v23 = vpop.permute.xlu1 %3714  ;;  %v4199_v56 = vld [vmem:[%s12160_s3 + $0x20] sm:$0xf] }
 0x6ca   : > { %6573 = vmatpush.msk.msra.mxu1 %vm4297_vm12, %v4199_v56  ;;  %6653 = vmatpush.msk.msrb.mxu3 %vm4297_vm12, %v4199_v56  ;;  %v4196_v56 = vld [vmem:[%s12160_s3 + $0x8] sm:$0xff] }
 0x6ce   : > { %3872 = vrot.lane.b32.xlu0 %v2896_v6, %s6776_s18  ;;  %3876 = vrot.lane.b32.xlu2 %v2898_v18, %s6776_s18  ;;  %v4198_v6 = vld [vmem:[%s12160_s3 + $0x18] sm:$0xff]  ;;  %v4197_v18 = vld [vmem:[%s12160_s3 + $0x10] sm:$0xff] }
 0x6cf   : > { %3868 = vrot.lane.b32.xlu1 %v2894_v22, %s6776_s18  ;;  %v2899_v22 = vld [vmem:[#allocation3 + $0x112] sm:$0xff]  ;;  %4313 = vmatpush.msra.mxu1 %v4198_v6 }
 0x6d0   : > { %v9951_v35 = vpop.permute.xlu0 %3724  ;;  %v9953_v43 = vpop.permute.xlu2 %3746  ;;  %6654 = vmatpush.msrb.mxu3 %v4198_v6  ;;  %v2904_v6 = vld [vmem:[#allocation3 + $0x152] sm:$0xff] }
 0x6d1   : > { %12807 = vst [vmem:[#allocation169_spill] sm:$0xff] %v9953_v43  ;;  %v9955_v17 = vpop.permute.xlu1 %3720  ;;  %v2901_v43 = vld [vmem:[#allocation3 + $0x12a] sm:$0xff]  ;;  %4314 = vmatpush.msra.mxu1 %v4197_v18 }
 0x6d2   : > { %6655 = vmatpush.msrb.mxu3 %v4197_v18 }
 0x6d3   : > { %4315 = vmatpush.msra.mxu1 %v4196_v56 }
 0x6d4   : > { %6656 = vmatpush.msrb.mxu3 %v4196_v56  ;;  %v2903_v56 = vld [vmem:[#allocation3 + $0x142] sm:$0xff] }
 0x6d6   : > { %3878 = vrot.lane.b32.xlu0 %v2899_v22, %s6776_s18  ;;  %3882 = vrot.lane.b32.xlu2 %v2901_v43, %s6776_s18  ;;  %v4195_v43 = vld [vmem:[%s12160_s3] sm:$0xff]  ;;  %v2900_v22 = vld [vmem:[#allocation3 + $0x122] sm:$0xff] }
 0x6d7   : > { %3874 = vrot.lane.b32.xlu1 %v2897_v10, %s6776_s18  ;;  %4316 = vmatpush.msra.mxu1 %v4195_v43  ;;  %v2902_v10 = vld [vmem:[#allocation3 + $0x13a] sm:$0xff] }
 0x6d8   : > { %v9974_v29 = vpop.permute.xlu0 %3730  ;;  %v9976_v32 = vpop.permute.xlu2 %3752  ;;  %6657 = vmatpush.msrb.mxu3 %v4195_v43 }
 0x6d9   : > { %12808 = vst [vmem:[#allocation60_spill] sm:$0xff] %v9974_v29  ;;  %v9978_v60 = vpop.permute.xlu1 %3726 }
 0x6da   : > { %12809 = vst [vmem:[#allocation133_spill] sm:$0xff] %v9976_v32 }
 0x6de   : > { %3884 = vrot.lane.b32.xlu0 %v2902_v10, %s6776_s18  ;;  %3888 = vrot.lane.b32.xlu2 %v2904_v6, %s6776_s18 }
 0x6df   : > { %3880 = vrot.lane.b32.xlu1 %v2900_v22, %s6776_s18  ;;  %v2910_v22 = vld [vmem:[#allocation3 + $0x19a] sm:$0xff] }
 0x6e0   : > { %v9986_v18 = vpop.permute.xlu0 %3736  ;;  %v9988_v32 = vpop.permute.xlu2 %3758 }
 0x6e1   : > { %12810 = vst [vmem:[#allocation27_spill] sm:$0xff] %v9986_v18  ;;  %v9990_v29 = vpop.permute.xlu1 %3732  ;;  %v2623_v18 = vld [vmem:[#allocation3] sm:$0xff] }
 0x6e2   : > { %12811 = vst [vmem:[#allocation111_spill] sm:$0xff] %v9988_v32  ;;  %v2906_v32 = vld [vmem:[#allocation3 + $0x16a] sm:$0xff] }
 0x6e3   : > { %12812 = vst [vmem:[#allocation84_spill] sm:$0xff] %v9990_v29 }
 0x6e6   : > { %3890 = vrot.lane.b32.xlu0 %v2905_v3, %s6776_s18  ;;  %3894 = vrot.lane.b32.xlu2 %v2907_v55, %s6776_s18 }
 0x6e7   : > { %3886 = vrot.lane.b32.xlu1 %v2903_v56, %s6776_s18 }
 0x6e8   : > { %v9995_v43 = vpop.permute.xlu0 %3742  ;;  %v9997_v10 = vpop.permute.xlu2 %3764 }
 0x6e9   : > { %12813 = vst [vmem:[#allocation80_spill] sm:$0xff] %v9995_v43  ;;  %v9999_v6 = vpop.permute.xlu1 %3738  ;;  %v12817_v43 = vld [vmem:[#allocation41_spill] sm:$0xff] }
 0x6ea   : > { %12814 = vst [vmem:[#allocation18_spill] sm:$0xff] %v9997_v10  ;;  %v3936_v10 = vsel %vm574_vm1, %v2623_v18, %v12817_v43 }
 0x6eb   : > { %12815 = vst [vmem:[#allocation149_spill] sm:$0xff] %v9999_v6  ;;  %v12818_v6 = vld [vmem:[#allocation154_spill] sm:$0xff] }
 0x6ec   : > { %v3968_v29 = vsel %vm326_vm0, %v3936_v10, %v12818_v6 }
 0x6ee   : > { %3896 = vrot.lane.b32.xlu0 %v9668_v48, %s6776_s18  ;;  %3900 = vrot.lane.b32.xlu2 %v2910_v22, %s6776_s18  ;;  %v2911_v48 = vld [vmem:[#allocation3 + $0x1a2] sm:$0xff]  ;;  %v4001_v22 = vsel %vm4000_vm13, %v3968_v29, %v9482_v42 }
 0x6ef   : > { %3892 = vrot.lane.b32.xlu1 %v2906_v32, %s6776_s18  ;;  %v4033_v32 = vsel %vm1985_vm3, %v4001_v22, %v9602_v20  ;;  %v12823_v22 = vld [vmem:[#allocation49_spill] sm:$0xff] }
 0x6f0   : > { %v10005_v3 = vpop.permute.xlu0 %3748  ;;  %v10007_v55 = vpop.permute.xlu2 %3770 }
 0x6f1   : > { %12816 = vst [vmem:[#allocation110_spill] sm:$0xff] %v10005_v3  ;;  %v10009_v56 = vpop.permute.xlu1 %3744  ;;  %v4066_v3 = vsel %vm4065_vm14, %v4033_v32, %v9691_v58 }
 0x6f2   : > { %v4098_v18 = vsel %vm2018_vm5, %v4066_v3, %v9845_v52  ;;  %v2624_v3 = vld [vmem:[#allocation3 + $0x8] sm:$0xff] }
 0x6f3   : > { %v4131_v43 = vsel %vm4130_vm15, %v4098_v18, %v9933_v38  ;;  %v3937_v32 = vsel %vm574_vm1, %v2624_v3, %v12823_v22  ;;  %v12824_v18 = vld [vmem:[#allocation146_spill] sm:$0xff] }
 0x6f6   : > { %3902 = vrot.lane.b32.xlu0 %v2911_v48, %s6776_s18 }
 0x6f7   : > { %3898 = vrot.lane.b32.xlu1 %v9682_v8, %s6776_s18 }
 0x6f8   : > { %v10028_v42 = vpop.permute.xlu0 %3754  ;;  %v3841_v29 = vpop.permute.xlu2 %3840 }
 0x6f9   : > { %12819 = vst [vmem:[#allocation88_spill] sm:$0xff] %v10028_v42  ;;  %v10030_v20 = vpop.permute.xlu1 %3750  ;;  %v4163_v58 = vsel %vm2051_vm4, %v4131_v43, %v3841_v29  ;;  %v3969_v43 = vsel %vm326_vm0, %v3937_v32, %v12824_v18  ;;  %v12825_v18 = vld [vmem:[#allocation4_spill] sm:$0xff] }
 0x6fa   : > { %12820 = vst [vmem:[#allocation94_spill] sm:$0xff] %v10030_v20  ;;  %6574 = vmatmul.msk.f32.vlgmr.msra.gmra.mxu1 %vm4200_vm2, %v4163_v58  ;;  %v4002_v29 = vsel %vm4000_vm13, %v3969_v43, %v9432_v14  ;;  %v6720_v14 = vld [vmem:[#allocation3 + $0x18] sm:$0xff]  ;;  %v12826_v43 = vld [vmem:[#allocation92_spill] sm:$0xff] }
 0x6fb   : > { %v4034_v58 = vsel %vm1985_vm3, %v4002_v29, %v9618_v40  ;;  %v3938_v40 = vsel %vm574_vm1, %v6720_v14, %v12825_v18  ;;  %v6721_v14 = vld [vmem:[#allocation3 + $0x20] sm:$0xff]  ;;  %v12827_v18 = vld [vmem:[#allocation5_spill] sm:$0xff] }
 0x700   : > { %v10034_v10 = vpop.permute.xlu0 %3760  ;;  %v3847_v42 = vpop.permute.xlu2 %3846 }
 0x701   : > { %12821 = vst [vmem:[#allocation132_spill] sm:$0xff] %v10034_v10  ;;  %v10036_v52 = vpop.permute.xlu1 %3756  ;;  %v4067_v10 = vsel %vm4065_vm14, %v4034_v58, %v9726_v62  ;;  %v3970_v62 = vsel %vm326_vm0, %v3938_v40, %v12826_v43 }
 0x702   : > { %12822 = vst [vmem:[#allocation130_spill] sm:$0xff] %v10036_v52  ;;  %v4099_v52 = vsel %vm2018_vm5, %v4067_v10, %v9807_v0  ;;  %v4003_v0 = vsel %vm4000_vm13, %v3970_v62, %v9478_v25  ;;  %v3939_v25 = vsel %vm574_vm1, %v6721_v14, %v12827_v18 }
 0x703   : > { %v4132_v20 = vsel %vm4130_vm15, %v4099_v52, %v9946_v23  ;;  %v4035_v23 = vsel %vm1985_vm3, %v4003_v0, %v9568_v4  ;;  %v12828_v4 = vld [vmem:[#allocation40_spill] sm:$0xff] }
 0x704   : > { %v4068_v10 = vsel %vm4065_vm14, %v4035_v23, %v9741_v31  ;;  %v3971_v31 = vsel %vm326_vm0, %v3939_v25, %v12828_v4 }
 0x708   : > { %v10038_v6 = vpop.permute.xlu0 %3766  ;;  %v3853_v58 = vpop.permute.xlu2 %3852 }
 0x709   : > { %v10040_v8 = vpop.permute.xlu1 %3762 }
 0x710   : > { %v10042_v48 = vpop.permute.xlu0 %3772 }
 0x711   : > { %v10044_v38 = vpop.permute.xlu1 %3768 }
 0x718   : > { %v3843_v3 = vpop.permute.xlu0 %3842 }
 0x719   : > { %v10060_v22 = vpop.permute.xlu1 %3774  ;;  %v4164_v32 = vsel %vm2051_vm4, %v4132_v20, %v3843_v3  ;;  %v4100_v20 = vsel %vm2018_vm5, %v4068_v10, %v9841_v5  ;;  %v4004_v5 = vsel %vm4000_vm13, %v3971_v31, %v9494_v11  ;;  %v6723_v31 = vld [vmem:[#allocation3 + $0x38] sm:$0xff] }
 0x71a   : > { %6575 = vmatmul.msk.f32.gmra.mxu1 %vm4200_vm2, %v4164_v32  ;;  %v4133_v29 = vsel %vm4130_vm15, %v4100_v20, %v9908_v41  ;;  %v4036_v40 = vsel %vm1985_vm3, %v4004_v5, %v9614_v2  ;;  %v6722_v20 = vld [vmem:[#allocation3 + $0x30] sm:$0xff]  ;;  %v12830_v2 = vld [vmem:[#allocation66_spill] sm:$0xff] }
 0x71b   : > { %v4069_v41 = vsel %vm4065_vm14, %v4036_v40, %v9700_v15  ;;  %v12831_v5 = vld [vmem:[#allocation50_spill] sm:$0xff] }
 0x71c   : > { %v4101_v43 = vsel %vm2018_vm5, %v4069_v41, %v9854_v30 }
 0x71d   : > { %v4134_v0 = vsel %vm4130_vm15, %v4101_v43, %v9942_v24 }
 0x71e   : > { %v4166_v10 = vsel %vm2051_vm4, %v4134_v0, %v3847_v42 }
 0x720   : > { %v3849_v52 = vpop.permute.xlu0 %3848 }
 0x721   : > { %v3845_v3 = vpop.permute.xlu1 %3844 }
 0x722   : > { %v4165_v32 = vsel %vm2051_vm4, %v4133_v29, %v3845_v3  ;;  %v12829_v29 = vld [vmem:[#allocation12_spill] sm:$0xff]  ;;  %v10097_v3 = vpop.permute.xlu2 %3858 }
 0x723   : > { %6576 = vmatmul.msk.f32.gmra.mxu1 %vm4200_vm2, %v4165_v32  ;;  %v3940_v11 = vsel %vm574_vm1, %v6722_v20, %v12829_v29  ;;  %v6724_v20 = vld [vmem:[#allocation3 + $0x48] sm:$0xff]  ;;  %v12833_v29 = vld [vmem:[#allocation8_spill] sm:$0xff] }
 0x724   : > { %v3972_v15 = vsel %vm326_vm0, %v3940_v11, %v12830_v2  ;;  %v3942_v11 = vsel %vm574_vm1, %v6724_v20, %v12833_v29  ;;  %v6727_v29 = vld [vmem:[#allocation3 + $0x128] sm:$0xff] }
 0x725   : > { %v4005_v30 = vsel %vm4000_vm13, %v3972_v15, %v9444_v26  ;;  %v3941_v26 = vsel %vm574_vm1, %v6723_v31, %v12831_v5 }
 0x726   : > { %v4037_v24 = vsel %vm1985_vm3, %v4005_v30, %v9630_v47  ;;  %v12832_v47 = vld [vmem:[#allocation65_spill] sm:$0xff] }
 0x727   : > { %v4070_v42 = vsel %vm4065_vm14, %v4037_v24, %v9737_v46  ;;  %v3973_v46 = vsel %vm326_vm0, %v3941_v26, %v12832_v47 }
 0x728   : > { %v3855_v62 = vpop.permute.xlu0 %3854  ;;  %v4102_v32 = vsel %vm2018_vm5, %v4070_v42, %v9816_v21  ;;  %v4006_v21 = vsel %vm4000_vm13, %v3973_v46, %v9490_v50 }
 0x729   : > { %v3851_v23 = vpop.permute.xlu1 %3850  ;;  %v4135_v18 = vsel %vm4130_vm15, %v4102_v32, %v9955_v17  ;;  %v4038_v17 = vsel %vm1985_vm3, %v4006_v21, %v9580_v12  ;;  %v12834_v12 = vld [vmem:[#allocation97_spill] sm:$0xff]  ;;  %v6725_v32 = vld [vmem:[#allocation3 + $0x50] sm:$0xff]  ;;  %v6726_v21 = vld [vmem:[#allocation3 + $0x60] sm:$0xff] }
 0x72a   : > { %v4167_v4 = vsel %vm2051_vm4, %v4135_v18, %v3849_v52  ;;  %v10122_v40 = vpop.permute.xlu2 %3864  ;;  %v4071_v52 = vsel %vm4065_vm14, %v4038_v17, %v9753_v19  ;;  %v3974_v19 = vsel %vm326_vm0, %v3942_v11, %v12834_v12  ;;  %v12835_v18 = vld [vmem:[#allocation61_spill] sm:$0xff]  ;;  %v12837_v17 = vld [vmem:[#allocation6_spill] sm:$0xff] }
 0x72b   : > { %6577 = vmatmul.msk.f32.gmra.mxu1 %vm4200_vm2, %v4166_v10  ;;  %v4103_v41 = vsel %vm2018_vm5, %v4071_v52, %v9850_v7  ;;  %v4007_v7 = vsel %vm4000_vm13, %v3974_v19, %v9506_v28  ;;  %v12839_v11 = vld [vmem:[#allocation117_spill] sm:$0xff]  ;;  %v12840_v19 = vld [vmem:[#allocation54_spill] sm:$0xff] }
 0x72c   : > { %v4136_v0 = vsel %vm4130_vm15, %v4103_v41, %v9917_v39  ;;  %v4039_v2 = vsel %vm1985_vm3, %v4007_v7, %v9626_v54  ;;  %v3943_v54 = vsel %vm574_vm1, %v6725_v32, %v12835_v18  ;;  %v12842_v32 = vld [vmem:[#allocation124_spill] sm:$0xff] }
 0x72d   : > { %v4168_v50 = vsel %vm2051_vm4, %v4136_v0, %v3851_v23  ;;  %v4072_v39 = vsel %vm4065_vm14, %v4039_v2, %v9709_v53  ;;  %v12836_v53 = vld [vmem:[#allocation28_spill] sm:$0xff] }
 0x72e   : > { %v4104_v23 = vsel %vm2018_vm5, %v4072_v39, %v9863_v27 }
 0x72f   : > { %v4137_v24 = vsel %vm4130_vm15, %v4104_v23, %v9951_v35 }
 0x730   : > { %v10110_v14 = vpop.permute.xlu0 %3860  ;;  %v4169_v28 = vsel %vm2051_vm4, %v4137_v24, %v3853_v58 }
 0x731   : > { %v3857_v25 = vpop.permute.xlu1 %3856 }
 0x732   : > { %v10148_v15 = vpop.permute.xlu2 %3870 }
 0x733   : > { %6578 = vmatmul.msk.f32.gmra.mxu1 %vm4200_vm2, %v4167_v4  ;;  %v3975_v4 = vsel %vm326_vm0, %v3943_v54, %v12836_v53  ;;  %v12843_v54 = vld [vmem:[#allocation87_spill] sm:$0xff] }
 0x734   : > { %v4008_v27 = vsel %vm4000_vm13, %v3975_v4, %v9456_v57 }
 0x735   : > { %v4040_v31 = vsel %vm1985_vm3, %v4008_v27, %v9642_v44  ;;  %v3944_v44 = vsel %vm574_vm1, %v6726_v21, %v12837_v17  ;;  %v12848_v17 = vld [vmem:[#allocation119_spill] sm:$0xff] }
 0x736   : > { %v4073_v35 = vsel %vm4065_vm14, %v4040_v31, %v9749_v49  ;;  %v12838_v49 = vld [vmem:[#allocation13_spill] sm:$0xff]  ;;  %v12845_v31 = vld [vmem:[#allocation15_spill] sm:$0xff] }
 0x737   : > { %v4105_v58 = vsel %vm2018_vm5, %v4073_v35, %v9825_v45  ;;  %v3976_v45 = vsel %vm326_vm0, %v3944_v44, %v12838_v49  ;;  %v12849_v49 = vld [vmem:[#allocation47_spill] sm:$0xff] }
 0x738   : > { %v10130_v43 = vpop.permute.xlu0 %3866  ;;  %v4138_v26 = vsel %vm4130_vm15, %v4105_v58, %v9978_v60  ;;  %v4009_v52 = vsel %vm4000_vm13, %v3976_v45, %v9502_v51  ;;  %v3961_v51 = vsel %vm574_vm1, %v6727_v29, %v12839_v11  ;;  %v6730_v58 = vld [vmem:[#allocation3 + $0x138] sm:$0xff]  ;;  %v12850_v45 = vld [vmem:[#allocation151_spill] sm:$0xff] }
 0x739   : > { %v10134_v10 = vpop.permute.xlu1 %3862  ;;  %v4170_v57 = vsel %vm2051_vm4, %v4138_v26, %v3855_v62  ;;  %v4041_v60 = vsel %vm1985_vm3, %v4009_v52, %v9592_v16  ;;  %v6728_v16 = vld [vmem:[#allocation3 + $0x68] sm:$0xff]  ;;  %v12846_v26 = vld [vmem:[#allocation34_spill] sm:$0xff]  ;;  %v12853_v11 = vld [vmem:[#allocation137_spill] sm:$0xff] }
 0x73a   : > { %v10176_v47 = vpop.permute.xlu2 %3876  ;;  %v4074_v41 = vsel %vm4065_vm14, %v4041_v60, %v9765_v61  ;;  %v3945_v61 = vsel %vm574_vm1, %v6728_v16, %v12840_v19  ;;  %v12855_v19 = vld [vmem:[#allocation82_spill] sm:$0xff] }
 0x73b   : > { %6579 = vmatmul.msk.f32.gmra.mxu1 %vm4200_vm2, %v4168_v50  ;;  %v4106_v62 = vsel %vm2018_vm5, %v4074_v41, %v9859_v37  ;;  %v3993_v37 = vsel %vm326_vm0, %v3961_v51, %v9442_v63  ;;  %v12851_v41 = vld [vmem:[#allocation69_spill] sm:$0xff] }
 0x73c   : > { %v4139_v50 = vsel %vm4130_vm15, %v4106_v62, %v9926_v9  ;;  %v12841_v9 = vld [vmem:[#allocation37_spill] sm:$0xff]  ;;  %v4026_v39 = vsel %vm4000_vm13, %v3993_v37, %v9528_v13  ;;  %v12856_v37 = vld [vmem:[#allocation166_spill] sm:$0xff] }
 0x73d   : > { %v4171_v12 = vsel %vm2051_vm4, %v4139_v50, %v3857_v25  ;;  %v3977_v2 = vsel %vm326_vm0, %v3945_v61, %v12841_v9  ;;  %v4058_v23 = vsel %vm1985_vm3, %v4026_v39, %v9711_v36  ;;  %v12844_v36 = vld [vmem:[#allocation60_spill] sm:$0xff]  ;;  %v12852_v50 = vld [vmem:[#allocation138_spill] sm:$0xff] }
 0x73e   : > { %v4010_v25 = vsel %vm4000_vm13, %v3977_v2, %v9518_v34  ;;  %v4091_v63 = vsel %vm4065_vm14, %v4058_v23, %v9814_v33  ;;  %v6729_v33 = vld [vmem:[#allocation3 + $0x78] sm:$0xff]  ;;  %v12857_v2 = vld [vmem:[#allocation84_spill] sm:$0xff] }
 0x73f   : > { %v4042_v24 = vsel %vm1985_vm3, %v4010_v25, %v9638_v1  ;;  %v4123_v18 = vsel %vm2018_vm5, %v4091_v63, %v12842_v32  ;;  %v3946_v35 = vsel %vm574_vm1, %v6729_v33, %v12845_v31  ;;  %v12858_v25 = vld [vmem:[#allocation18_spill] sm:$0xff]  ;;  %v12864_v31 = vld [vmem:[#allocation16_spill] sm:$0xff] }
 0x740   : > { %v10152_v30 = vpop.permute.xlu0 %3872  ;;  %v4156_v34 = vsel %vm4130_vm15, %v4123_v18, %v10040_v8  ;;  %v3962_v8 = vsel %vm574_vm1, %v6730_v58, %v12846_v26  ;;  %v6731_v32 = vld [vmem:[#allocation3 + $0x80] sm:$0xff]  ;;  %v12859_v18 = vld [vmem:[#allocation9_spill] sm:$0xff]  ;;  %v12865_v58 = vld [vmem:[#allocation44_spill] sm:$0xff] }
 0x741   : > { %v10156_v42 = vpop.permute.xlu1 %3868  ;;  %v3994_v44 = vsel %vm326_vm0, %v3962_v8, %v12848_v17  ;;  %v12866_v8 = vld [vmem:[#allocation142_spill] sm:$0xff] }
 0x742   : > { %v10207_v7 = vpop.permute.xlu2 %3882  ;;  %v4027_v52 = vsel %vm4000_vm13, %v3994_v44, %v12850_v45  ;;  %v12868_v44 = vld [vmem:[#allocation76_spill] sm:$0xff]  ;;  %v12869_v45 = vld [vmem:[#allocation167_spill] sm:$0xff] }
 0x743   : > { %6580 = vmatmul.msk.f32.gmra.mxu1 %vm4200_vm2, %v4169_v28  ;;  %v4075_v28 = vsel %vm4065_vm14, %v4042_v24, %v9718_v59  ;;  %v4059_v29 = vsel %vm1985_vm3, %v4027_v52, %v12852_v50  ;;  %v12871_v50 = vld [vmem:[#allocation32_spill] sm:$0xff] }
 0x744   : > { %v4107_v13 = vsel %vm2018_vm5, %v4075_v28, %v12843_v54  ;;  %v3947_v54 = vsel %vm574_vm1, %v6731_v32, %v12859_v18  ;;  %v12878_v32 = vld [vmem:[#allocation118_spill] sm:$0xff] }
 0x745   : > { %v4140_v4 = vsel %vm4130_vm15, %v4107_v13, %v12844_v36  ;;  %v6732_v13 = vld [vmem:[#allocation3 + $0x140] sm:$0xff]  ;;  %v12861_v36 = vld [vmem:[#allocation116_spill] sm:$0xff] }
 0x746   : > { %v4172_v59 = vsel %vm2051_vm4, %v4140_v4, %v10097_v3  ;;  %v3979_v4 = vsel %vm326_vm0, %v3947_v54, %v12861_v36  ;;  %v12879_v54 = vld [vmem:[#allocation26_spill] sm:$0xff]  ;;  %v12881_v36 = vld [vmem:[#allocation145_spill] sm:$0xff] }
 0x748   : > { %v10172_v5 = vpop.permute.xlu0 %3878 }
 0x749   : > { %v10178_v46 = vpop.permute.xlu1 %3874 }
 0x74a   : > { %v10251_v60 = vpop.permute.xlu2 %3888 }
 0x74b   : > { %6581 = vmatmul.msk.f32.gmra.mxu1 %vm4200_vm2, %v4170_v57  ;;  %v12847_v57 = vld [vmem:[#allocation168_spill] sm:$0xff] }
 0x74c   : > { %v3978_v21 = vsel %vm326_vm0, %v3946_v35, %v12847_v57 }
 0x74d   : > { %v4011_v3 = vsel %vm4000_vm13, %v3978_v21, %v12849_v49  ;;  %v12867_v21 = vld [vmem:[#allocation102_spill] sm:$0xff] }
 0x74e   : > { %v4043_v62 = vsel %vm1985_vm3, %v4011_v3, %v12851_v41  ;;  %v12870_v41 = vld [vmem:[#allocation104_spill] sm:$0xff] }
 0x74f   : > { %v4076_v51 = vsel %vm4065_vm14, %v4043_v62, %v12853_v11 }
 0x750   : > { %v10194_v0 = vpop.permute.xlu0 %3884  ;;  %v4108_v61 = vsel %vm2018_vm5, %v4076_v51, %v12855_v19  ;;  %v12872_v19 = vld [vmem:[#allocation11_spill] sm:$0xff] }
 0x751   : > { %v10198_v20 = vpop.permute.xlu1 %3880  ;;  %v4141_v39 = vsel %vm4130_vm15, %v4108_v61, %v12857_v2 }
 0x752   : > { %v4173_v63 = vsel %vm2051_vm4, %v4141_v39, %v10110_v14  ;;  %v3895_v3 = vpop.permute.xlu2 %3894  ;;  %v12874_v39 = vld [vmem:[#allocation136_spill] sm:$0xff] }
 0x753   : > { %6582 = vmatmul.msk.f32.gmra.mxu1 %vm4200_vm2, %v4171_v12  ;;  %v12854_v12 = vld [vmem:[#allocation164_spill] sm:$0xff] }
 0x754   : > { %v4092_v16 = vsel %vm4065_vm14, %v4059_v29, %v12854_v12 }
 0x755   : > { %v4124_v9 = vsel %vm2018_vm5, %v4092_v16, %v12856_v37  ;;  %v6733_v16 = vld [vmem:[#allocation3 + $0x90] sm:$0xff] }
 0x756   : > { %v4157_v23 = vsel %vm4130_vm15, %v4124_v9, %v12858_v25  ;;  %v3948_v61 = vsel %vm574_vm1, %v6733_v16, %v12872_v19  ;;  %v6734_v37 = vld [vmem:[#allocation3 + $0x150] sm:$0xff]  ;;  %v12873_v9 = vld [vmem:[#allocation127_spill] sm:$0xff]  ;;  %v12875_v25 = vld [vmem:[#allocation109_spill] sm:$0xff] }
 0x757   : > { %v3964_v2 = vsel %vm574_vm1, %v6734_v37, %v12873_v9  ;;  %v12892_v19 = vld [vmem:[#allocation172_spill] sm:$0xff]  ;;  %v12893_v9 = vld [vmem:[#allocation19_spill] sm:$0xff] }
 0x758   : > { %v3891_v53 = vpop.permute.xlu0 %3890  ;;  %v10364_v37 = vld [vmem:[%s12163_s6 + $0x1] ss:$0 sm:$0xff] }
 0x759   : > { %v4188_v1 = vsel %vm2051_vm4, %v4156_v34, %v3891_v53  ;;  %v10233_v27 = vpop.permute.xlu1 %3886  ;;  %v12860_v34 = vld [vmem:[#allocation107_spill] sm:$0xff] }
 0x75a   : > { %6599 = vmatmul.msk.f32.vlgmr.msrb.gmra.mxu3 %vm4200_vm2, %v4188_v1  ;;  %v3963_v53 = vsel %vm574_vm1, %v6732_v13, %v12860_v34  ;;  %v12862_v1 = vld [vmem:[#allocation126_spill] sm:$0xff]  ;;  %v12880_v34 = vld [vmem:[#allocation77_spill] sm:$0xff] }
 0x75b   : > { %6583 = vmatmul.msk.f32.gmra.mxu1 %vm4200_vm2, %v4172_v59  ;;  %v3995_v14 = vsel %vm326_vm0, %v3963_v53, %v12862_v1  ;;  %v12863_v59 = vld [vmem:[#allocation173_spill] sm:$0xff] }
 0x75c   : > { %v4012_v33 = vsel %vm4000_vm13, %v3979_v4, %v12863_v59  ;;  %v4028_v35 = vsel %vm4000_vm13, %v3995_v14, %v12864_v31  ;;  %v12882_v14 = vld [vmem:[#allocation85_spill] sm:$0xff] }
 0x75d   : > { %v4044_v26 = vsel %vm1985_vm3, %v4012_v33, %v12865_v58  ;;  %v4060_v57 = vsel %vm1985_vm3, %v4028_v35, %v12866_v8  ;;  %v12883_v33 = vld [vmem:[#allocation163_spill] sm:$0xff] }
 0x75e   : > { %v4077_v17 = vsel %vm4065_vm14, %v4044_v26, %v12867_v21  ;;  %v4093_v49 = vsel %vm4065_vm14, %v4060_v57, %v12868_v44  ;;  %v12884_v35 = vld [vmem:[#allocation27_spill] sm:$0xff]  ;;  %v6735_v21 = vld [vmem:[#allocation3 + $0x98] sm:$0xff] }
 0x75f   : > { %v4109_v52 = vsel %vm2018_vm5, %v4077_v17, %v12869_v45  ;;  %v4125_v62 = vsel %vm2018_vm5, %v4093_v49, %v12870_v41  ;;  %v12885_v17 = vld [vmem:[#allocation67_spill] sm:$0xff]  ;;  %v6736_v49 = vld [vmem:[#allocation3 + $0x158] sm:$0xff] }
 0x760   : > { %v4142_v29 = vsel %vm4130_vm15, %v4109_v52, %v12871_v50  ;;  %v4158_v11 = vsel %vm4130_vm15, %v4125_v62, %v10038_v6  ;;  %v3980_v6 = vsel %vm326_vm0, %v3948_v61, %v12874_v39  ;;  %v3897_v1 = vpop.permute.xlu0 %3896  ;;  %v3949_v44 = vsel %vm574_vm1, %v6735_v21, %v12885_v17  ;;  %v12887_v52 = vld [vmem:[#allocation96_spill] sm:$0xff]  ;;  %v12888_v41 = vld [vmem:[#allocation129_spill] sm:$0xff]  ;;  %v12889_v50 = vld [vmem:[#allocation139_spill] sm:$0xff] }
 0x761   : > { %v3893_v24 = vpop.permute.xlu1 %3892  ;;  %v4174_v51 = vsel %vm2051_vm4, %v4142_v29, %v10134_v10  ;;  %v4190_v12 = vsel %vm2051_vm4, %v4158_v11, %v3895_v3  ;;  %v3996_v10 = vsel %vm326_vm0, %v3964_v2, %v12875_v25  ;;  %v12886_v3 = vld [vmem:[#allocation43_spill] sm:$0xff]  ;;  %v10351_v62 = vld [vmem:[%s12163_s6] ss:$0 sm:$0xff]  ;;  %v12890_v11 = vld [vmem:[#allocation170_spill] sm:$0xff] }
 0x762   : > { %v4189_v28 = vsel %vm2051_vm4, %v4157_v23, %v3893_v24  ;;  %v12876_v23 = vld [vmem:[#allocation72_spill] sm:$0xff]  ;;  %v3965_v45 = vsel %vm574_vm1, %v6736_v49, %v12886_v3  ;;  %v12894_v39 = vld [vmem:[#allocation101_spill] sm:$0xff]  ;;  %v12903_v21 = vld [vmem:[#allocation78_spill] sm:$0xff] }
 0x763   : > { %6584 = vmatmul.msk.f32.gmra.mxu1 %vm4200_vm2, %v4173_v63  ;;  %6600 = vmatmul.msk.f32.gmra.mxu3 %vm4200_vm2, %v4189_v28  ;;  %v4013_v24 = vsel %vm4000_vm13, %v3980_v6, %v12876_v23  ;;  %v12877_v63 = vld [vmem:[#allocation95_spill] sm:$0xff]  ;;  %v12895_v23 = vld [vmem:[#allocation38_spill] sm:$0xff]  ;;  %v12905_v3 = vld [vmem:[#allocation161_spill] sm:$0xff] }
 0x764   : > { %v4029_v28 = vsel %vm4000_vm13, %v3996_v10, %v12877_v63  ;;  %v4045_v18 = vsel %vm1985_vm3, %v4013_v24, %v12878_v32  ;;  %v12896_v63 = vld [vmem:[#allocation86_spill] sm:$0xff] }
 0x765   : > { %v4061_v13 = vsel %vm1985_vm3, %v4029_v28, %v12879_v54  ;;  %v4078_v53 = vsel %vm4065_vm14, %v4045_v18, %v12880_v34  ;;  %v12897_v18 = vld [vmem:[#allocation149_spill] sm:$0xff] }
 0x766   : > { %v4094_v4 = vsel %vm4065_vm14, %v4061_v13, %v12881_v36  ;;  %v4110_v59 = vsel %vm2018_vm5, %v4078_v53, %v12882_v14 }
 0x767   : > { %v4126_v31 = vsel %vm2018_vm5, %v4094_v4, %v12883_v33  ;;  %v4143_v58 = vsel %vm4130_vm15, %v4110_v59, %v12884_v35  ;;  %v6737_v4 = vld [vmem:[#allocation3 + $0xa8] sm:$0xff] }
 0x768   : > { %v4159_v26 = vsel %vm4130_vm15, %v4126_v31, %v10044_v38  ;;  %v4175_v8 = vsel %vm2051_vm4, %v4143_v58, %v10122_v40  ;;  %v3981_v38 = vsel %vm326_vm0, %v3949_v44, %v12887_v52  ;;  %v3997_v40 = vsel %vm326_vm0, %v3965_v45, %v12888_v41  ;;  %v6738_v59 = vld [vmem:[#allocation3 + $0x168] sm:$0xff]  ;;  %v12901_v58 = vld [vmem:[#allocation17_spill] sm:$0xff]  ;;  %v12904_v44 = vld [vmem:[#allocation90_spill] sm:$0xff] }
 0x769   : > { %v4191_v57 = vsel %vm2051_vm4, %v4159_v26, %v3897_v1  ;;  %v4014_v29 = vsel %vm4000_vm13, %v3981_v38, %v12889_v50  ;;  %v3899_v25 = vpop.permute.xlu1 %3898  ;;  %v12898_v1 = vld [vmem:[#allocation55_spill] sm:$0xff]  ;;  %v12906_v38 = vld [vmem:[#allocation141_spill] sm:$0xff] }
 0x76a   : > { %v3950_v14 = vsel %vm574_vm1, %v6737_v4, %v12898_v1  ;;  %v12899_v33 = vld [vmem:[#allocation59_spill] sm:$0xff]  ;;  %v12918_v1 = vld [vmem:[#allocation98_spill] sm:$0xff] }
 0x76b   : > { %6585 = vmatmul.msk.f32.gmra.mxu1 %vm4200_vm2, %v4174_v51  ;;  %6601 = vmatmul.msk.f32.gmra.mxu3 %vm4200_vm2, %v4190_v12  ;;  %v4030_v51 = vsel %vm4000_vm13, %v3997_v40, %v12890_v11  ;;  %v12891_v12 = vld [vmem:[#allocation153_spill] sm:$0xff]  ;;  %v3966_v31 = vsel %vm574_vm1, %v6738_v59, %v12899_v33  ;;  %v4578_v52 = vld [vmem:[#allocation3 + $0x1] sm:$0xff] }
 0x76c   : > { %v4046_v16 = vsel %vm1985_vm3, %v4014_v29, %v12891_v12  ;;  %v4062_v61 = vsel %vm1985_vm3, %v4030_v51, %v12892_v19  ;;  %v12907_v40 = vld [vmem:[#allocation25_spill] sm:$0xff]  ;;  %v3901_v29 = vpop.permute.xlu2 %3900  ;;  %4866 = vrot.lane.b32.xlu1 %v4578_v52, %s6771_s11  ;;  %v12910_v19 = vld [vmem:[#allocation143_spill] sm:$0xff]  ;;  %v12924_v52 = vld [vmem:[#allocation52_spill] sm:$0xff] }
 0x76d   : > { %v4079_v2 = vsel %vm4065_vm14, %v4046_v16, %v12893_v9  ;;  %v4095_v6 = vsel %vm4065_vm14, %v4062_v61, %v12894_v39  ;;  %v12908_v11 = vld [vmem:[#allocation105_spill] sm:$0xff]  ;;  %v12919_v59 = vld [vmem:[#allocation23_spill] sm:$0xff] }
 0x76e   : > { %v4111_v24 = vsel %vm2018_vm5, %v4079_v2, %v12895_v23  ;;  %v4127_v28 = vsel %vm2018_vm5, %v4095_v6, %v12896_v63  ;;  %v12909_v12 = vld [vmem:[#allocation81_spill] sm:$0xff]  ;;  %v6739_v6 = vld [vmem:[#allocation3 + $0xb0] sm:$0xff] }
 0x76f   : > { %v4144_v54 = vsel %vm4130_vm15, %v4111_v24, %v12897_v18  ;;  %v4160_v13 = vsel %vm4130_vm15, %v4127_v28, %v10007_v55  ;;  %v12900_v55 = vld [vmem:[#allocation135_spill] sm:$0xff]  ;;  %v6740_v23 = vld [vmem:[#allocation3 + $0x170] sm:$0xff] }
 0x770   : > { %v4176_v53 = vsel %vm2051_vm4, %v4144_v54, %v10130_v43  ;;  %v4192_v36 = vsel %vm2051_vm4, %v4160_v13, %v3899_v25  ;;  %v3982_v35 = vsel %vm326_vm0, %v3950_v14, %v12900_v55  ;;  %v3998_v43 = vsel %vm326_vm0, %v3966_v31, %v12901_v58  ;;  %v12911_v25 = vld [vmem:[#allocation10_spill] sm:$0xff]  ;;  %v12912_v24 = vld [vmem:[#allocation156_spill] sm:$0xff]  ;;  %v12913_v28 = vld [vmem:[#allocation31_spill] sm:$0xff] }
 0x771   : > { %v4031_v17 = vsel %vm4000_vm13, %v3998_v43, %v12903_v21  ;;  %v3967_v63 = vsel %vm574_vm1, %v6740_v23, %v12912_v24  ;;  %v12915_v18 = vld [vmem:[#allocation112_spill] sm:$0xff]  ;;  %v12916_v13 = vld [vmem:[#allocation125_spill] sm:$0xff]  ;;  %v12920_v31 = vld [vmem:[#allocation30_spill] sm:$0xff] }
 0x772   : > { %v4063_v45 = vsel %vm1985_vm3, %v4031_v17, %v12905_v3  ;;  %v4579_v58 = vld [vmem:[#allocation3 + $0x9] sm:$0xff]  ;;  %v12921_v43 = vld [vmem:[#allocation29_spill] sm:$0xff] }
 0x773   : > { %6586 = vmatmul.msk.f32.gmra.mxu1 %vm4200_vm2, %v4175_v8  ;;  %6602 = vmatmul.msk.f32.gmra.mxu3 %vm4200_vm2, %v4191_v57  ;;  %v12902_v8 = vld [vmem:[#allocation36_spill] sm:$0xff]  ;;  %v4096_v50 = vsel %vm4065_vm14, %v4063_v45, %v12907_v40  ;;  %v6741_v45 = vld [vmem:[#allocation3 + $0xc0] sm:$0xff]  ;;  %v12933_v24 = vld [vmem:[#allocation99_spill] sm:$0xff] }
 0x774   : > { %v4015_v57 = vsel %vm4000_vm13, %v3982_v35, %v12902_v8  ;;  %v4128_v16 = vsel %vm2018_vm5, %v4096_v50, %v12909_v12  ;;  %v3903_v35 = vpop.permute.xlu0 %3902  ;;  %v12922_v8 = vld [vmem:[#allocation108_spill] sm:$0xff]  ;;  %4868 = vrot.lane.b32.xlu2 %v4579_v58, %s6771_s11  ;;  %v12929_v12 = vld [vmem:[#allocation75_spill] sm:$0xff] }
 0x775   : > { %v4047_v49 = vsel %vm1985_vm3, %v4015_v57, %v12904_v44  ;;  %v4161_v9 = vsel %vm4130_vm15, %v4128_v16, %v10042_v48  ;;  %v12923_v21 = vld [vmem:[#allocation80_spill] sm:$0xff] }
 0x776   : > { %v4080_v41 = vsel %vm4065_vm14, %v4047_v49, %v12906_v38  ;;  %v4193_v39 = vsel %vm2051_vm4, %v4161_v9, %v3901_v29  ;;  %v3952_v38 = vsel %vm574_vm1, %v6741_v45, %v12924_v52  ;;  %v12926_v50 = vld [vmem:[#allocation148_spill] sm:$0xff]  ;;  %v6742_v9 = vld [vmem:[#allocation3 + $0xc8] sm:$0xff]  ;;  %v12944_v45 = vld [vmem:[#allocation14_spill] sm:$0xff] }
 0x777   : > { %v4318_v10 = vpop.f32.mrf.mxu1  ;;  %v4112_v51 = vsel %vm2018_vm5, %v4080_v41, %v12908_v11  ;;  %v12925_v41 = vld [vmem:[#allocation58_spill] sm:$0xff] }
 0x778   : > { %v4416_v32 = vmul.f32 %v10351_v62, %v4318_v10  ;;  %v4145_v61 = vsel %vm4130_vm15, %v4112_v51, %v12910_v19  ;;  %v3951_v10 = vsel %vm574_vm1, %v6739_v6, %v12911_v25  ;;  %v3984_v40 = vsel %vm326_vm0, %v3952_v38, %v12925_v41  ;;  %v12931_v6 = vld [vmem:[#allocation45_spill] sm:$0xff]  ;;  %v12945_v41 = vld [vmem:[#allocation171_spill] sm:$0xff] }
 0x779   : > { %v4177_v2 = vsel %vm2051_vm4, %v4145_v61, %v10156_v42  ;;  %v3983_v48 = vsel %vm326_vm0, %v3951_v10, %v12913_v28  ;;  %v4017_v29 = vsel %vm4000_vm13, %v3984_v40, %v12926_v50  ;;  %v12932_v10 = vld [vmem:[#allocation93_spill] sm:$0xff]  ;;  %v12934_v28 = vld [vmem:[#allocation74_spill] sm:$0xff] }
 0x77a   : > { %v4450_v34 = vadd.f32 %v10364_v37, %v4416_v32  ;;  %v12914_v32 = vld [vmem:[#allocation42_spill] sm:$0xff]  ;;  %v4016_v54 = vsel %vm4000_vm13, %v3983_v48, %v12915_v18  ;;  %v12936_v18 = vld [vmem:[#allocation169_spill] sm:$0xff] }
 0x77b   : > { %6587 = vmatmul.msk.f32.gmra.mxu1 %vm4200_vm2, %v4176_v53  ;;  %6603 = vmatmul.msk.f32.gmra.mxu3 %vm4200_vm2, %v4192_v36  ;;  %v3999_v42 = vsel %vm326_vm0, %v3967_v63, %v12914_v32  ;;  %v12917_v36 = vld [vmem:[#allocation128_spill] sm:$0xff]  ;;  %v12946_v50 = vld [vmem:[#allocation158_spill] sm:$0xff] }
 0x77c   : > { %v4482_v26 = vmax.f32 %v4450_v34, 0.0  ;;  %v4032_v34 = vsel %vm4000_vm13, %v3999_v42, %v12916_v13  ;;  %v4048_v4 = vsel %vm1985_vm3, %v4016_v54, %v12917_v36  ;;  %v6743_v36 = vld [vmem:[#allocation3 + $0xd8] sm:$0xff] }
 0x77d   : > { %v4064_v14 = vsel %vm1985_vm3, %v4032_v34, %v12918_v1  ;;  %v4081_v33 = vsel %vm4065_vm14, %v4048_v4, %v12919_v59  ;;  %v12937_v4 = vld [vmem:[#allocation115_spill] sm:$0xff] }
 0x77e   : > { %4514 = vst.msk [vmem:[#allocation3 + $0x19] sm:$0xff] %vm574_vm1, %v4482_v26  ;;  %v4097_v55 = vsel %vm4065_vm14, %v4064_v14, %v12920_v31  ;;  %v4113_v26 = vsel %vm2018_vm5, %v4081_v33, %v12921_v43  ;;  %v3954_v1 = vsel %vm574_vm1, %v6743_v36, %v12937_v4  ;;  %v12938_v14 = vld [vmem:[#allocation120_spill] sm:$0xff]  ;;  %v12939_v31 = vld [vmem:[#allocation57_spill] sm:$0xff] }
 0x77f   : > { %v4129_v57 = vsel %vm2018_vm5, %v4097_v55, %v12922_v8  ;;  %v4146_v17 = vsel %vm4130_vm15, %v4113_v26, %v12923_v21  ;;  %v3986_v59 = vsel %vm326_vm0, %v3954_v1, %v12938_v14  ;;  %v12941_v43 = vld [vmem:[#allocation64_spill] sm:$0xff]  ;;  %v12943_v21 = vld [vmem:[#allocation110_spill] sm:$0xff]  ;;  %v12957_v4 = vld [vmem:[#allocation133_spill] sm:$0xff] }
 0x780   : > { %v4162_v44 = vsel %vm4130_vm15, %v4129_v57, %v10060_v22  ;;  %v4178_v49 = vsel %vm2051_vm4, %v4146_v17, %v10148_v15  ;;  %v12927_v22 = vld [vmem:[#allocation20_spill] sm:$0xff]  ;;  %v12928_v15 = vld [vmem:[#allocation121_spill] sm:$0xff]  ;;  %v4019_v55 = vsel %vm4000_vm13, %v3986_v59, %v12939_v31  ;;  %v12958_v31 = vld [vmem:[#allocation150_spill] sm:$0xff] }
 0x781   : > { %v4194_v3 = vsel %vm2051_vm4, %v4162_v44, %v3903_v35  ;;  %v4049_v11 = vsel %vm1985_vm3, %v4017_v29, %v12927_v22  ;;  %v12940_v35 = vld [vmem:[#allocation157_spill] sm:$0xff]  ;;  %v12942_v26 = vld [vmem:[#allocation24_spill] sm:$0xff] }
 0x782   : > { %v4082_v51 = vsel %vm4065_vm14, %v4049_v11, %v12928_v15  ;;  %v4051_v58 = vsel %vm1985_vm3, %v4019_v55, %v12940_v35  ;;  %v12947_v15 = vld [vmem:[#allocation103_spill] sm:$0xff] }
 0x783   : > { %6588 = vmatmul.msk.f32.gmra.mxu1 %vm4200_vm2, %v4177_v2  ;;  %6604 = vmatmul.msk.f32.gmra.mxu3 %vm4200_vm2, %v4193_v39  ;;  %v4114_v16 = vsel %vm2018_vm5, %v4082_v51, %v12929_v12  ;;  %v12930_v2 = vld [vmem:[#allocation46_spill] sm:$0xff]  ;;  %v12948_v51 = vld [vmem:[#allocation160_spill] sm:$0xff] }
 0x784   : > { %v4147_v19 = vsel %vm4130_vm15, %v4114_v16, %v10009_v56  ;;  %v3953_v39 = vsel %vm574_vm1, %v6742_v9, %v12930_v2  ;;  %v12949_v16 = vld [vmem:[#allocation140_spill] sm:$0xff]  ;;  %v12950_v9 = vld [vmem:[#allocation94_spill] sm:$0xff] }
 0x785   : > { %v10432_v53 = vld [vmem:[#allocation3 + $0x19] sm:$0xff]  ;;  %v4179_v61 = vsel %vm2051_vm4, %v4147_v19, %v10152_v30  ;;  %v3985_v25 = vsel %vm326_vm0, %v3953_v39, %v12931_v6  ;;  %v12935_v30 = vld [vmem:[#allocation144_spill] sm:$0xff] }
 0x786   : > { %4870 = vrot.lane.b32.xlu0 %v10432_v53, %s6771_s11  ;;  %v4018_v23 = vsel %vm4000_vm13, %v3985_v25, %v12932_v10  ;;  %v6745_v25 = vld [vmem:[#allocation3 + $0xf0] sm:$0xff]  ;;  %v12951_v10 = vld [vmem:[#allocation7_spill] sm:$0xff] }
 0x787   : > { %v4050_v63 = vsel %vm1985_vm3, %v4018_v23, %v12933_v24  ;;  %v3956_v23 = vsel %vm574_vm1, %v6745_v25, %v12951_v10 }
 0x788   : > { %v4083_v56 = vsel %vm4065_vm14, %v4050_v63, %v12934_v28  ;;  %v12952_v63 = vld [vmem:[#allocation91_spill] sm:$0xff] }
 0x789   : > { %v4115_v32 = vsel %vm2018_vm5, %v4083_v56, %v12935_v30  ;;  %v3988_v28 = vsel %vm326_vm0, %v3956_v23, %v12952_v63  ;;  %v12953_v56 = vld [vmem:[#allocation123_spill] sm:$0xff]  ;;  %v12971_v23 = vld [vmem:[#allocation130_spill] sm:$0xff] }
 0x78a   : > { %v4148_v54 = vsel %vm4130_vm15, %v4115_v32, %v12936_v18  ;;  %v12954_v32 = vld [vmem:[#allocation114_spill] sm:$0xff] }
 0x78b   : > { %6589 = vmatmul.msk.f32.gmra.mxu1 %vm4200_vm2, %v4178_v49  ;;  %6605 = vmatmul.msk.f32.gmra.mxu3 %vm4200_vm2, %v4194_v3  ;;  %v4180_v34 = vsel %vm2051_vm4, %v4148_v54, %v10178_v46  ;;  %v4084_v46 = vsel %vm4065_vm14, %v4051_v58, %v12941_v43  ;;  %v6744_v3 = vld [vmem:[#allocation3 + $0xe0] sm:$0xff]  ;;  %v12959_v58 = vld [vmem:[#allocation159_spill] sm:$0xff] }
 0x78c   : > { %v4116_v8 = vsel %vm2018_vm5, %v4084_v46, %v12942_v26  ;;  %v3955_v52 = vsel %vm574_vm1, %v6744_v3, %v12944_v45  ;;  %v12960_v46 = vld [vmem:[#allocation134_spill] sm:$0xff] }
 0x78d   : > { %v4149_v17 = vsel %vm4130_vm15, %v4116_v8, %v12943_v21  ;;  %v3987_v40 = vsel %vm326_vm0, %v3955_v52, %v12945_v41  ;;  %v12964_v52 = vld [vmem:[#allocation88_spill] sm:$0xff] }
 0x78e   : > { %v4181_v49 = vsel %vm2051_vm4, %v4149_v17, %v10176_v47  ;;  %v4020_v29 = vsel %vm4000_vm13, %v3987_v40, %v12946_v50  ;;  %v6747_v50 = vld [vmem:[#allocation3 + $0x108] sm:$0xff] }
 0x78f   : > { %v4052_v47 = vsel %vm1985_vm3, %v4020_v29, %v12947_v15  ;;  %v12965_v29 = vld [vmem:[#allocation89_spill] sm:$0xff] }
 0x790   : > { %v4085_v12 = vsel %vm4065_vm14, %v4052_v47, %v12948_v51  ;;  %v12966_v47 = vld [vmem:[#allocation62_spill] sm:$0xff] }
 0x791   : > { %v4117_v19 = vsel %vm2018_vm5, %v4085_v12, %v12949_v16  ;;  %v12967_v12 = vld [vmem:[#allocation21_spill] sm:$0xff] }
 0x792   : > { %v4150_v2 = vsel %vm4130_vm15, %v4117_v19, %v12950_v9 }
 0x793   : > { %6590 = vmatmul.msk.f32.gmra.mxu1 %vm4200_vm2, %v4179_v61  ;;  %v4182_v6 = vsel %vm2051_vm4, %v4150_v2, %v10172_v5  ;;  %v12955_v5 = vld [vmem:[#allocation33_spill] sm:$0xff] }
 0x797   : > { %v4321_v48 = vpop.f32.mrf.mxu1 }
 0x798   : > { %v4417_v42 = vmul.f32 %v10351_v62, %v4321_v48  ;;  %v4021_v48 = vsel %vm4000_vm13, %v3988_v28, %v12953_v56  ;;  %v6748_v56 = vld [vmem:[#allocation3 + $0x110] sm:$0xff] }
 0x79a   : > { %v4451_v13 = vadd.f32 %v10364_v37, %v4417_v42  ;;  %v4053_v42 = vsel %vm1985_vm3, %v4021_v48, %v12954_v32  ;;  %v12972_v48 = vld [vmem:[#allocation51_spill] sm:$0xff] }
 0x79b   : > { %6591 = vmatmul.msk.f32.gmra.mxu1 %vm4200_vm2, %v4180_v34  ;;  %v4086_v54 = vsel %vm4065_vm14, %v4053_v42, %v12955_v5  ;;  %v12973_v42 = vld [vmem:[#allocation100_spill] sm:$0xff] }
 0x79c   : > { %v4483_v33 = vmax.f32 %v4451_v13, 0.0  ;;  %v12956_v13 = vld [vmem:[#allocation79_spill] sm:$0xff] }
 0x79d   : > { %v4118_v34 = vsel %vm2018_vm5, %v4086_v54, %v12956_v13  ;;  %v12974_v54 = vld [vmem:[#allocation131_spill] sm:$0xff] }
 0x79e   : > { %4515 = vst.msk [vmem:[#allocation3 + $0x21] sm:$0xff] %vm574_vm1, %v4483_v33  ;;  %v4151_v1 = vsel %vm4130_vm15, %v4118_v34, %v12957_v4  ;;  %v6746_v33 = vld [vmem:[#allocation3 + $0xf8] sm:$0xff] }
 0x79f   : > { %v4183_v59 = vsel %vm2051_vm4, %v4151_v1, %v10198_v20  ;;  %v3957_v55 = vsel %vm574_vm1, %v6746_v33, %v12958_v31  ;;  %v12962_v20 = vld [vmem:[#allocation165_spill] sm:$0xff] }
 0x7a0   : > { %v4324_v57 = vpop.f32.mrf.mxu1  ;;  %v3989_v43 = vsel %vm326_vm0, %v3957_v55, %v12959_v58  ;;  %v12978_v55 = vld [vmem:[#allocation111_spill] sm:$0xff] }
 0x7a1   : > { %v4418_v44 = vmul.f32 %v10351_v62, %v4324_v57  ;;  %v4022_v26 = vsel %vm4000_vm13, %v3989_v43, %v12960_v46  ;;  %v12961_v57 = vld [vmem:[#allocation68_spill] sm:$0xff]  ;;  %v6749_v46 = vld [vmem:[#allocation3 + $0x120] sm:$0xff] }
 0x7a2   : > { %v4054_v21 = vsel %vm1985_vm3, %v4022_v26, %v12961_v57  ;;  %v12979_v26 = vld [vmem:[#allocation56_spill] sm:$0xff] }
 0x7a3   : > { %v4452_v38 = vadd.f32 %v10364_v37, %v4418_v44  ;;  %6592 = vmatmul.msk.f32.gmra.mxu1 %vm4200_vm2, %v4181_v49  ;;  %v4087_v44 = vsel %vm4065_vm14, %v4054_v21, %v12962_v20  ;;  %v12963_v49 = vld [vmem:[#allocation147_spill] sm:$0xff]  ;;  %v12980_v21 = vld [vmem:[#allocation113_spill] sm:$0xff] }
 0x7a4   : > { %v4119_v3 = vsel %vm2018_vm5, %v4087_v44, %v12963_v49  ;;  %v12981_v44 = vld [vmem:[#allocation162_spill] sm:$0xff] }
 0x7a5   : > { %v4484_v22 = vmax.f32 %v4452_v38, 0.0  ;;  %v10520_v11 = vld [vmem:[#allocation3 + $0x21] sm:$0xff]  ;;  %v4152_v38 = vsel %vm4130_vm15, %v4119_v3, %v12964_v52 }
 0x7a6   : > { %4872 = vrot.lane.b32.xlu1 %v10520_v11, %s6771_s11  ;;  %v4184_v40 = vsel %vm2051_vm4, %v4152_v38, %v10207_v7  ;;  %v12969_v7 = vld [vmem:[#allocation106_spill] sm:$0xff] }
 0x7a7   : > { %4516 = vst.msk [vmem:[#allocation3 + $0x31] sm:$0xff] %vm574_vm1, %v4484_v22  ;;  %v3958_v22 = vsel %vm574_vm1, %v6747_v50, %v12965_v29 }
 0x7a8   : > { %v4327_v61 = vpop.f32.mrf.mxu1  ;;  %v3990_v51 = vsel %vm326_vm0, %v3958_v22, %v12966_v47  ;;  %v12985_v22 = vld [vmem:[#allocation132_spill] sm:$0xff] }
 0x7a9   : > { %v4419_v39 = vmul.f32 %v10351_v62, %v4327_v61  ;;  %v4023_v16 = vsel %vm4000_vm13, %v3990_v51, %v12967_v12  ;;  %v12968_v61 = vld [vmem:[#allocation71_spill] sm:$0xff] }
 0x7aa   : > { %v4055_v9 = vsel %vm1985_vm3, %v4023_v16, %v12968_v61 }
 0x7ab   : > { %v4453_v24 = vadd.f32 %v10364_v37, %v4419_v39  ;;  %6593 = vmatmul.msk.f32.gmra.mxu1 %vm4200_vm2, %v4182_v6  ;;  %v4088_v39 = vsel %vm4065_vm14, %v4055_v9, %v12969_v7  ;;  %v12970_v6 = vld [vmem:[#allocation22_spill] sm:$0xff] }
 0x7ac   : > { %v4120_v25 = vsel %vm2018_vm5, %v4088_v39, %v12970_v6 }
 0x7ad   : > { %v4485_v30 = vmax.f32 %v4453_v24, 0.0  ;;  %v4153_v24 = vsel %vm4130_vm15, %v4120_v25, %v12971_v23 }
 0x7ae   : > { %v10546_v18 = vld [vmem:[#allocation3 + $0x31] sm:$0xff]  ;;  %v4185_v28 = vsel %vm2051_vm4, %v4153_v24, %v10194_v0  ;;  %v12976_v0 = vld [vmem:[#allocation63_spill] sm:$0xff] }
 0x7af   : > { %4517 = vst.msk [vmem:[#allocation3 + $0x39] sm:$0xff] %vm574_vm1, %v4485_v30  ;;  %4874 = vrot.lane.b32.xlu2 %v10546_v18, %s6771_s11  ;;  %v3959_v30 = vsel %vm574_vm1, %v6748_v56, %v12972_v48 }
 0x7b0   : > { %v4330_v36 = vpop.f32.mrf.mxu1  ;;  %v3991_v5 = vsel %vm326_vm0, %v3959_v30, %v12973_v42 }
 0x7b1   : > { %v4420_v14 = vmul.f32 %v10351_v62, %v4330_v36  ;;  %v4024_v13 = vsel %vm4000_vm13, %v3991_v5, %v12974_v54  ;;  %v12975_v36 = vld [vmem:[#allocation53_spill] sm:$0xff] }
 0x7b2   : > { %v4056_v4 = vsel %vm1985_vm3, %v4024_v13, %v12975_v36 }
 0x7b3   : > { %v4454_v35 = vadd.f32 %v10364_v37, %v4420_v14  ;;  %6594 = vmatmul.msk.f32.gmra.mxu1 %vm4200_vm2, %v4183_v59  ;;  %v4089_v14 = vsel %vm4065_vm14, %v4056_v4, %v12976_v0  ;;  %v12977_v59 = vld [vmem:[#allocation70_spill] sm:$0xff] }
 0x7b4   : > { %v4121_v33 = vsel %vm2018_vm5, %v4089_v14, %v12977_v59 }
 0x7b5   : > { %v4486_v8 = vmax.f32 %v4454_v35, 0.0  ;;  %v4154_v35 = vsel %vm4130_vm15, %v4121_v33, %v12978_v55 }
 0x7b6   : > { %v10570_v17 = vld [vmem:[#allocation3 + $0x39] sm:$0xff]  ;;  %v4186_v43 = vsel %vm2051_vm4, %v4154_v35, %v10233_v27  ;;  %v12983_v27 = vld [vmem:[#allocation83_spill] sm:$0xff] }
 0x7b7   : > { %4518 = vst.msk [vmem:[#allocation3 + $0x49] sm:$0xff] %vm574_vm1, %v4486_v8  ;;  %4876 = vrot.lane.b32.xlu0 %v10570_v17, %s6771_s11  ;;  %v3960_v8 = vsel %vm574_vm1, %v6749_v46, %v12979_v26 }
 0x7b8   : > { %v4333_v45 = vpop.f32.mrf.mxu1  ;;  %v3992_v20 = vsel %vm326_vm0, %v3960_v8, %v12980_v21 }
 0x7b9   : > { %v4421_v41 = vmul.f32 %v10351_v62, %v4333_v45  ;;  %v4025_v49 = vsel %vm4000_vm13, %v3992_v20, %v12981_v44  ;;  %v12982_v45 = vld [vmem:[#allocation122_spill] sm:$0xff] }
 0x7ba   : > { %v4057_v52 = vsel %vm1985_vm3, %v4025_v49, %v12982_v45 }
 0x7bb   : > { %v4455_v15 = vadd.f32 %v10364_v37, %v4421_v41  ;;  %6595 = vmatmul.msk.f32.gmra.mxu1 %vm4200_vm2, %v4184_v40  ;;  %v4090_v41 = vsel %vm4065_vm14, %v4057_v52, %v12983_v27  ;;  %v12984_v40 = vld [vmem:[#allocation35_spill] sm:$0xff] }
 0x7bc   : > { %v4122_v50 = vsel %vm2018_vm5, %v4090_v41, %v12984_v40 }
 0x7bd   : > { %v4487_v19 = vmax.f32 %v4455_v15, 0.0  ;;  %v4155_v15 = vsel %vm4130_vm15, %v4122_v50, %v12985_v22 }
 0x7be   : > { %v10594_v2 = vld [vmem:[#allocation3 + $0x49] sm:$0xff]  ;;  %v4187_v51 = vsel %vm2051_vm4, %v4155_v15, %v10251_v60 }
 0x7bf   : > { %4519 = vst.msk [vmem:[#allocation3 + $0x51] sm:$0xff] %vm574_vm1, %v4487_v19  ;;  %4878 = vrot.lane.b32.xlu1 %v10594_v2, %s6771_s11 }
 0x7c0   : > { %v4336_v10 = vpop.f32.mrf.mxu1 }
 0x7c1   : > { %v4422_v63 = vmul.f32 %v10351_v62, %v4336_v10 }
 0x7c3   : > { %v4456_v32 = vadd.f32 %v10364_v37, %v4422_v63  ;;  %6596 = vmatmul.msk.f32.gmra.mxu1 %vm4200_vm2, %v4185_v28 }
 0x7c5   : > { %v4488_v34 = vmax.f32 %v4456_v32, 0.0 }
 0x7c6   : > { %v10618_v1 = vld [vmem:[#allocation3 + $0x51] sm:$0xff] }
 0x7c7   : > { %4520 = vst.msk [vmem:[#allocation3 + $0x61] sm:$0xff] %vm574_vm1, %v4488_v34  ;;  %4880 = vrot.lane.b32.xlu2 %v10618_v1, %s6771_s11 }
 0x7c8   : > { %v4339_v31 = vpop.f32.mrf.mxu1 }
 0x7c9   : > { %v4423_v58 = vmul.f32 %v10351_v62, %v4339_v31 }
 0x7cb   : > { %v4457_v57 = vadd.f32 %v10364_v37, %v4423_v58  ;;  %6597 = vmatmul.msk.f32.gmra.mxu1 %vm4200_vm2, %v4186_v43 }
 0x7cd   : > { %v4489_v3 = vmax.f32 %v4457_v57, 0.0 }
 0x7ce   : > { %v10642_v38 = vld [vmem:[#allocation3 + $0x61] sm:$0xff] }
 0x7cf   : > { %4521 = vst.msk [vmem:[#allocation3 + $0x69] sm:$0xff] %vm574_vm1, %v4489_v3  ;;  %4882 = vrot.lane.b32.xlu0 %v10642_v38, %s6771_s11 }
 0x7d0   : > { %v4342_v29 = vpop.f32.mrf.mxu1 }
 0x7d1   : > { %v4424_v47 = vmul.f32 %v10351_v62, %v4342_v29 }
 0x7d3   : > { %v4458_v12 = vadd.f32 %v10364_v37, %v4424_v47  ;;  %6598 = vmatmul.msk.f32.gmra.mxu1 %vm4200_vm2, %v4187_v51 }
 0x7d5   : > { %v4490_v16 = vmax.f32 %v4458_v12, 0.0 }
 0x7d6   : > { %v10658_v19 = vld [vmem:[#allocation3 + $0x69] sm:$0xff] }
 0x7d7   : > { %4522 = vst.msk [vmem:[#allocation3 + $0x79] sm:$0xff] %vm574_vm1, %v4490_v16  ;;  %4884 = vrot.lane.b32.xlu1 %v10658_v19, %s6771_s11 }
 0x7d8   : > { %v4345_v61 = vpop.f32.mrf.mxu1 }
 0x7d9   : > { %v4425_v9 = vmul.f32 %v10351_v62, %v4345_v61 }
 0x7db   : > { %v4459_v7 = vadd.f32 %v10364_v37, %v4425_v9 }
 0x7dd   : > { %v4491_v39 = vmax.f32 %v4459_v7, 0.0  ;;  %v4393_v6 = vpop.f32.mrf.mxu3 }
 0x7de   : > { %v4441_v60 = vmul.f32 %v10351_v62, %v4393_v6  ;;  %v10666_v25 = vld [vmem:[#allocation3 + $0x79] sm:$0xff] }
 0x7df   : > { %4523 = vst.msk [vmem:[#allocation3 + $0x81] sm:$0xff] %vm574_vm1, %v4491_v39  ;;  %4886 = vrot.lane.b32.xlu2 %v10666_v25, %s6771_s11 }
 0x7e0   : > { %v4475_v10 = vadd.f32 %v10364_v37, %v4441_v60  ;;  %v4348_v23 = vpop.f32.mrf.mxu1 }
 0x7e1   : > { %v4426_v24 = vmul.f32 %v10351_v62, %v4348_v23 }
 0x7e2   : > { %v4507_v63 = vmax.f32 %v4475_v10, 0.0 }
 0x7e3   : > { %v4460_v28 = vadd.f32 %v10364_v37, %v4426_v24 }
 0x7e4   : > { %4539 = vst.msk [vmem:[#allocation3 + $0x141] sm:$0xff] %vm574_vm1, %v4507_v63 }
 0x7e5   : > { %v4492_v56 = vmax.f32 %v4460_v28, 0.0 }
 0x7e6   : > { %v4396_v48 = vpop.f32.mrf.mxu3  ;;  %v10675_v30 = vld [vmem:[#allocation3 + $0x81] sm:$0xff] }
 0x7e7   : > { %4524 = vst.msk [vmem:[#allocation3 + $0x91] sm:$0xff] %vm574_vm1, %v4492_v56  ;;  %v4442_v32 = vmul.f32 %v10351_v62, %v4396_v48  ;;  %4888 = vrot.lane.b32.xlu0 %v10675_v30, %s6771_s11 }
 0x7e8   : > { %v4351_v42 = vpop.f32.mrf.mxu1 }
 0x7e9   : > { %v4476_v5 = vadd.f32 %v10364_v37, %v4442_v32  ;;  %v4427_v54 = vmul.f32 %v10351_v62, %v4351_v42 }
 0x7eb   : > { %v4508_v13 = vmax.f32 %v4476_v5, 0.0  ;;  %v4461_v34 = vadd.f32 %v10364_v37, %v4427_v54 }
 0x7ed   : > { %4540 = vst.msk [vmem:[#allocation3 + $0x151] sm:$0xff] %vm574_vm1, %v4508_v13  ;;  %v4493_v36 = vmax.f32 %v4461_v34, 0.0 }
 0x7ee   : > { %v4399_v4 = vpop.f32.mrf.mxu3  ;;  %v10685_v0 = vld [vmem:[#allocation3 + $0x91] sm:$0xff] }
 0x7ef   : > { %4525 = vst.msk [vmem:[#allocation3 + $0x99] sm:$0xff] %vm574_vm1, %v4493_v36  ;;  %v4443_v14 = vmul.f32 %v10351_v62, %v4399_v4  ;;  %4890 = vrot.lane.b32.xlu1 %v10685_v0, %s6771_s11 }
 0x7f0   : > { %v4354_v59 = vpop.f32.mrf.mxu1 }
 0x7f1   : > { %v4477_v33 = vadd.f32 %v10364_v37, %v4443_v14  ;;  %v4428_v31 = vmul.f32 %v10351_v62, %v4354_v59 }
 0x7f3   : > { %v4509_v55 = vmax.f32 %v4477_v33, 0.0  ;;  %v4462_v35 = vadd.f32 %v10364_v37, %v4428_v31 }
 0x7f5   : > { %4541 = vst.msk [vmem:[#allocation3 + $0x159] sm:$0xff] %vm574_vm1, %v4509_v55  ;;  %v4494_v58 = vmax.f32 %v4462_v35, 0.0 }
 0x7f6   : > { %v4402_v43 = vpop.f32.mrf.mxu3  ;;  %v10695_v46 = vld [vmem:[#allocation3 + $0x99] sm:$0xff] }
 0x7f7   : > { %4526 = vst.msk [vmem:[#allocation3 + $0xa9] sm:$0xff] %vm574_vm1, %v4494_v58  ;;  %v4444_v26 = vmul.f32 %v10351_v62, %v4402_v43  ;;  %4892 = vrot.lane.b32.xlu2 %v10695_v46, %s6771_s11 }
 0x7f8   : > { %v4357_v8 = vpop.f32.mrf.mxu1 }
 0x7f9   : > { %v4478_v57 = vadd.f32 %v10364_v37, %v4444_v26  ;;  %v4429_v21 = vmul.f32 %v10351_v62, %v4357_v8 }
 0x7fb   : > { %v4510_v20 = vmax.f32 %v4478_v57, 0.0  ;;  %v4463_v44 = vadd.f32 %v10364_v37, %v4429_v21 }
 0x7fd   : > { %4542 = vst.msk [vmem:[#allocation3 + $0x169] sm:$0xff] %vm574_vm1, %v4510_v20  ;;  %v4495_v49 = vmax.f32 %v4463_v44, 0.0 }
 0x7fe   : > { %v4405_v3 = vpop.f32.mrf.mxu3  ;;  %v10705_v45 = vld [vmem:[#allocation3 + $0xa9] sm:$0xff] }
 0x7ff   : > { %4527 = vst.msk [vmem:[#allocation3 + $0xb1] sm:$0xff] %vm574_vm1, %v4495_v49  ;;  %v4445_v52 = vmul.f32 %v10351_v62, %v4405_v3  ;;  %4894 = vrot.lane.b32.xlu0 %v10705_v45, %s6771_s11 }
 0x800   : > { %v4360_v27 = vpop.f32.mrf.mxu1 }
 0x801   : > { %v4479_v41 = vadd.f32 %v10364_v37, %v4445_v52  ;;  %v4430_v40 = vmul.f32 %v10351_v62, %v4360_v27 }
 0x803   : > { %v4511_v50 = vmax.f32 %v4479_v41, 0.0  ;;  %v4464_v29 = vadd.f32 %v10364_v37, %v4430_v40 }
 0x805   : > { %4543 = vst.msk [vmem:[#allocation3 + $0x171] sm:$0xff] %vm574_vm1, %v4511_v50  ;;  %v4496_v22 = vmax.f32 %v4464_v29, 0.0 }
 0x806   : > { %v4408_v15 = vpop.f32.mrf.mxu3  ;;  %v10715_v47 = vld [vmem:[#allocation3 + $0xb1] sm:$0xff] }
 0x807   : > { %4528 = vst.msk [vmem:[#allocation3 + $0xc1] sm:$0xff] %vm574_vm1, %v4496_v22  ;;  %v4446_v51 = vmul.f32 %v10351_v62, %v4408_v15  ;;  %4896 = vrot.lane.b32.xlu1 %v10715_v47, %s6771_s11 }
 0x808   : > { %v4363_v12 = vpop.f32.mrf.mxu1 }
 0x809   : > { %v4480_v16 = vadd.f32 %v10364_v37, %v4446_v51  ;;  %v4431_v61 = vmul.f32 %v10351_v62, %v4363_v12 }
 0x80b   : > { %v4512_v9 = vmax.f32 %v4480_v16, 0.0  ;;  %v4465_v7 = vadd.f32 %v10364_v37, %v4431_v61 }
 0x80d   : > { %4544 = vst.msk [vmem:[#allocation3 + $0x181] sm:$0xff] %vm574_vm1, %v4512_v9  ;;  %v4497_v39 = vmax.f32 %v4465_v7, 0.0 }
 0x80e   : > { %v4411_v6 = vpop.f32.mrf.mxu3  ;;  %v10725_v60 = vld [vmem:[#allocation3 + $0xc1] sm:$0xff] }
 0x80f   : > { %4529 = vst.msk [vmem:[#allocation3 + $0xc9] sm:$0xff] %vm574_vm1, %v4497_v39  ;;  %v4447_v10 = vmul.f32 %v10351_v62, %v4411_v6  ;;  %4898 = vrot.lane.b32.xlu2 %v10725_v60, %s6771_s11 }
 0x810   : > { %v4366_v23 = vpop.f32.mrf.mxu1 }
 0x811   : > { %v4481_v24 = vadd.f32 %v10364_v37, %v4447_v10  ;;  %v4432_v63 = vmul.f32 %v10351_v62, %v4366_v23  ;;  %v10793_v23 = vld [vmem:[#allocation3 + $0x141] sm:$0xff] }
 0x813   : > { %v4513_v28 = vmax.f32 %v4481_v24, 0.0  ;;  %v4466_v56 = vadd.f32 %v10364_v37, %v4432_v63  ;;  %v10802_v63 = vld [vmem:[#allocation3 + $0x151] sm:$0xff] }
 0x815   : > { %4545 = vst.msk [vmem:[#allocation3 + $0x189] sm:$0xff] %vm574_vm1, %v4513_v28  ;;  %v4498_v48 = vmax.f32 %v4466_v56, 0.0  ;;  %v10812_v28 = vld [vmem:[#allocation3 + $0x159] sm:$0xff]  ;;  %v10814_v56 = vld [vmem:[#allocation3 + $0x171] sm:$0xff] }
 0x816   : > { %v10735_v32 = vld [vmem:[#allocation3 + $0xc9] sm:$0xff] }
 0x817   : > { %4530 = vst.msk [vmem:[#allocation3 + $0xd9] sm:$0xff] %vm574_vm1, %v4498_v48  ;;  %4900 = vrot.lane.b32.xlu0 %v10735_v32, %s6771_s11  ;;  %v4610_v48 = vld [vmem:[#allocation3 + $0x2] sm:$0xff] }
 0x818   : > { %v4369_v42 = vpop.f32.mrf.mxu1 }
 0x819   : > { %v4433_v5 = vmul.f32 %v10351_v62, %v4369_v42  ;;  %v10821_v42 = vld [vmem:[#allocation3 + $0x1a] sm:$0xff] }
 0x81b   : > { %v4467_v54 = vadd.f32 %v10364_v37, %v4433_v5  ;;  %v10823_v5 = vpop.permute.xlu2 %4868 }
 0x81c   : > { %12986 = vst [vmem:[#allocation39_spill] sm:$0xff] %v10823_v5  ;;  %v11009_v5 = vld [vmem:[#allocation3 + $0xa8] sm:$0xff] }
 0x81d   : > { %v4499_v13 = vmax.f32 %v4467_v54, 0.0  ;;  %v10826_v54 = vld [vmem:[#allocation3 + $0x32] sm:$0xff]  ;;  %13024 = vst [vmem:[#allocation164_spill] sm:$0xff] %v11009_v5 }
 0x81e   : > { %v10742_v34 = vld [vmem:[#allocation3 + $0xd9] sm:$0xff] }
 0x81f   : > { %4531 = vst.msk [vmem:[#allocation3 + $0xe1] sm:$0xff] %vm574_vm1, %v4499_v13  ;;  %4902 = vrot.lane.b32.xlu1 %v10742_v34, %s6771_s11  ;;  %v10832_v13 = vld [vmem:[#allocation3 + $0x22] sm:$0xff] }
 0x820   : > { %v4372_v36 = vpop.f32.mrf.mxu1 }
 0x821   : > { %v4434_v4 = vmul.f32 %v10351_v62, %v4372_v36  ;;  %v10834_v36 = vld [vmem:[#allocation3 + $0x3a] sm:$0xff] }
 0x823   : > { %v4468_v14 = vadd.f32 %v10364_v37, %v4434_v4  ;;  %v10838_v4 = vld [vmem:[#allocation3 + $0x52] sm:$0xff] }
 0x825   : > { %v4500_v59 = vmax.f32 %v4468_v14, 0.0  ;;  %v10844_v14 = vpop.permute.xlu2 %4874 }
 0x826   : > { %v10749_v33 = vld [vmem:[#allocation3 + $0xe1] sm:$0xff]  ;;  %12987 = vst [vmem:[#allocation73_spill] sm:$0xff] %v10844_v14 }
 0x827   : > { %4532 = vst.msk [vmem:[#allocation3 + $0xf1] sm:$0xff] %vm574_vm1, %v4500_v59  ;;  %4904 = vrot.lane.b32.xlu2 %v10749_v33, %s6771_s11  ;;  %v10846_v59 = vld [vmem:[#allocation3 + $0x4a] sm:$0xff] }
 0x828   : > { %v4375_v31 = vpop.f32.mrf.mxu1  ;;  %v10992_v14 = vld [vmem:[#allocation3 + $0x68] sm:$0xff] }
 0x829   : > { %v4435_v55 = vmul.f32 %v10351_v62, %v4375_v31  ;;  %v10848_v31 = vld [vmem:[#allocation3 + $0x62] sm:$0xff] }
 0x82b   : > { %v4469_v35 = vadd.f32 %v10364_v37, %v4435_v55  ;;  %v10850_v55 = vpop.permute.xlu1 %4866 }
 0x82c   : > { %12988 = vst [vmem:[#allocation48_spill] sm:$0xff] %v10850_v55 }
 0x82d   : > { %v4501_v58 = vmax.f32 %v4469_v35, 0.0  ;;  %v10854_v35 = vld [vmem:[#allocation3 + $0x7a] sm:$0xff] }
 0x82e   : > { %v10756_v43 = vld [vmem:[#allocation3 + $0xf1] sm:$0xff] }
 0x82f   : > { %4533 = vst.msk [vmem:[#allocation3 + $0xf9] sm:$0xff] %vm574_vm1, %v4501_v58  ;;  %4906 = vrot.lane.b32.xlu0 %v10756_v43, %s6771_s11  ;;  %v10860_v58 = vpop.permute.xlu2 %4880 }
 0x830   : > { %v4378_v26 = vpop.f32.mrf.mxu1  ;;  %12989 = vst [vmem:[#allocation155_spill] sm:$0xff] %v10860_v58 }
 0x831   : > { %v4436_v8 = vmul.f32 %v10351_v62, %v4378_v26  ;;  %v10862_v26 = vld [vmem:[#allocation3 + $0x6a] sm:$0xff] }
 0x833   : > { %v4470_v57 = vadd.f32 %v10364_v37, %v4436_v8  ;;  %v10864_v8 = vld [vmem:[#allocation3 + $0x82] sm:$0xff] }
 0x835   : > { %v4502_v21 = vmax.f32 %v4470_v57, 0.0  ;;  %v10868_v57 = vld [vmem:[#allocation3 + $0x9a] sm:$0xff] }
 0x836   : > { %v10763_v20 = vld [vmem:[#allocation3 + $0xf9] sm:$0xff]  ;;  %12990 = vst [vmem:[#allocation152_spill] sm:$0xff] %v10868_v57 }
 0x837   : > { %4534 = vst.msk [vmem:[#allocation3 + $0x109] sm:$0xff] %vm574_vm1, %v4502_v21  ;;  %4908 = vrot.lane.b32.xlu1 %v10763_v20, %s6771_s11  ;;  %v10874_v21 = vpop.permute.xlu1 %4872 }
 0x838   : > { %v4381_v44 = vpop.f32.mrf.mxu1  ;;  %12991 = vst [vmem:[#allocation41_spill] sm:$0xff] %v10874_v21  ;;  %v4559_v21 = vld [vmem:[#allocation3 + $0x98] sm:$0xff] }
 0x839   : > { %v4437_v49 = vmul.f32 %v10351_v62, %v4381_v44  ;;  %v10876_v44 = vpop.permute.xlu2 %4886 }
 0x83a   : > { %12992 = vst [vmem:[#allocation154_spill] sm:$0xff] %v10876_v44 }
 0x83b   : > { %v4471_v3 = vadd.f32 %v10364_v37, %v4437_v49  ;;  %v10878_v49 = vld [vmem:[#allocation3 + $0x92] sm:$0xff] }
 0x83d   : > { %v4503_v52 = vmax.f32 %v4471_v3, 0.0  ;;  %v10880_v3 = vld [vmem:[#allocation3 + $0xaa] sm:$0xff] }
 0x83e   : > { %v10770_v27 = vld [vmem:[#allocation3 + $0x109] sm:$0xff]  ;;  %12993 = vst [vmem:[#allocation49_spill] sm:$0xff] %v10880_v3 }
 0x83f   : > { %4535 = vst.msk [vmem:[#allocation3 + $0x111] sm:$0xff] %vm574_vm1, %v4503_v52  ;;  %4910 = vrot.lane.b32.xlu2 %v10770_v27, %s6771_s11  ;;  %v4626_v52 = vld [vmem:[#allocation3 + $0xc2] sm:$0xff] }
 0x840   : > { %v4384_v41 = vpop.f32.mrf.mxu1 }
 0x841   : > { %v4438_v40 = vmul.f32 %v10351_v62, %v4384_v41  ;;  %v10886_v41 = vpop.permute.xlu0 %4870 }
 0x842   : > { %12994 = vst [vmem:[#allocation146_spill] sm:$0xff] %v10886_v41  ;;  %v11007_v41 = vld [vmem:[#allocation3 + $0x90] sm:$0xff] }
 0x843   : > { %v4472_v50 = vadd.f32 %v10364_v37, %v4438_v40  ;;  %v10889_v40 = vpop.permute.xlu1 %4878 }
 0x844   : > { %12995 = vst [vmem:[#allocation4_spill] sm:$0xff] %v10889_v40 }
 0x845   : > { %v4504_v29 = vmax.f32 %v4472_v50, 0.0 }
 0x846   : > { %v10777_v22 = vld [vmem:[#allocation3 + $0x111] sm:$0xff] }
 0x847   : > { %4536 = vst.msk [vmem:[#allocation3 + $0x121] sm:$0xff] %vm574_vm1, %v4504_v29  ;;  %4912 = vrot.lane.b32.xlu0 %v10777_v22, %s6771_s11  ;;  %v10893_v29 = vld [vmem:[#allocation3 + $0xb2] sm:$0xff] }
 0x848   : > { %v4387_v15 = vpop.f32.mrf.mxu1  ;;  %12997 = vst [vmem:[#allocation5_spill] sm:$0xff] %v10893_v29 }
 0x849   : > { %v4439_v51 = vmul.f32 %v10351_v62, %v4387_v15  ;;  %v4627_v15 = vld [vmem:[#allocation3 + $0xca] sm:$0xff] }
 0x84b   : > { %v4473_v12 = vadd.f32 %v10364_v37, %v4439_v51  ;;  %v4629_v51 = vld [vmem:[#allocation3 + $0xe2] sm:$0xff] }
 0x84d   : > { %v4505_v16 = vmax.f32 %v4473_v12, 0.0  ;;  %v10898_v12 = vpop.permute.xlu0 %4876 }
 0x84e   : > { %v10784_v61 = vld [vmem:[#allocation3 + $0x121] sm:$0xff]  ;;  %12998 = vst [vmem:[#allocation40_spill] sm:$0xff] %v10898_v12 }
 0x84f   : > { %4537 = vst.msk [vmem:[#allocation3 + $0x129] sm:$0xff] %vm574_vm1, %v4505_v16  ;;  %4914 = vrot.lane.b32.xlu1 %v10784_v61, %s6771_s11  ;;  %v10901_v16 = vpop.permute.xlu1 %4884 }
 0x850   : > { %v4390_v9 = vpop.f32.mrf.mxu1  ;;  %12999 = vst [vmem:[#allocation12_spill] sm:$0xff] %v10901_v16  ;;  %v10976_v16 = vld [vmem:[#allocation3 + $0x60] sm:$0xff] }
 0x851   : > { %v4440_v7 = vmul.f32 %v10351_v62, %v4390_v9  ;;  %v10808_v62 = vld [vmem:[#allocation3 + $0x169] sm:$0xff]  ;;  %v10891_v50 = vpop.permute.xlu2 %4892 }
 0x852   : > { %12996 = vst [vmem:[#allocation92_spill] sm:$0xff] %v10891_v50 }
 0x853   : > { %v4474_v39 = vadd.f32 %v10364_v37, %v4440_v7  ;;  %v4611_v37 = vld [vmem:[#allocation3 + $0xa] sm:$0xff]  ;;  %v4628_v7 = vld [vmem:[#allocation3 + $0xda] sm:$0xff] }
 0x855   : > { %v4506_v6 = vmax.f32 %v4474_v39, 0.0  ;;  %v4630_v39 = vld [vmem:[#allocation3 + $0xf2] sm:$0xff] }
 0x856   : > { %v10791_v10 = vld [vmem:[#allocation3 + $0x129] sm:$0xff] }
 0x857   : > { %4538 = vst.msk [vmem:[#allocation3 + $0x139] sm:$0xff] %vm574_vm1, %v4506_v6  ;;  %4916 = vrot.lane.b32.xlu2 %v10791_v10, %s6771_s11  ;;  %4920 = vrot.lane.b32.xlu1 %v10793_v23, %s6771_s11  ;;  %v4632_v6 = vld [vmem:[#allocation3 + $0x10a] sm:$0xff] }
 0x85e   : > { %v10800_v24 = vld [vmem:[#allocation3 + $0x139] sm:$0xff] }
 0x85f   : > { %4918 = vrot.lane.b32.xlu0 %v10800_v24, %s6771_s11  ;;  %4922 = vrot.lane.b32.xlu2 %v10802_v63, %s6771_s11  ;;  %v4636_v44 = vld [vmem:[#allocation3 + $0x13a] sm:$0xff] }
 0x860   : > { %4926 = vrot.lane.b32.xlu1 %v10808_v62, %s6771_s11 }
 0x867   : > { %4924 = vrot.lane.b32.xlu0 %v10812_v28, %s6771_s11  ;;  %4928 = vrot.lane.b32.xlu2 %v10814_v56, %s6771_s11  ;;  %s11787_s11 = scalar_lea.vmem %s12165_s8, %s6837_s29 }
 0x868   : > { %4996 = vrot.lane.b32.xlu1 %v4611_v37, %s6773_s15  ;;  %v10907_v37 = vpop.permute.xlu0 %4882 }
 0x869   : > { %v10903_v9 = vpop.permute.xlu2 %4898  ;;  %13001 = vst [vmem:[#allocation50_spill] sm:$0xff] %v10907_v37  ;;  %v10978_v37 = vld [vmem:[#allocation3 + $0x78] sm:$0xff] }
 0x86a   : > { %13000 = vst [vmem:[#allocation66_spill] sm:$0xff] %v10903_v9  ;;  %v4635_v9 = vld [vmem:[#allocation3 + $0x12a] sm:$0xff] }
 0x86f   : > { %4994 = vrot.lane.b32.xlu0 %v4610_v48, %s6773_s15  ;;  %4998 = vrot.lane.b32.xlu2 %v10821_v42, %s6773_s15  ;;  %v10910_v48 = vpop.permute.xlu1 %4890 }
 0x870   : > { %5002 = vrot.lane.b32.xlu1 %v10826_v54, %s6773_s15  ;;  %13002 = vst [vmem:[#allocation65_spill] sm:$0xff] %v10910_v48  ;;  %v10916_v50 = vpop.permute.xlu0 %4888 }
 0x871   : > { %13004 = vst [vmem:[#allocation97_spill] sm:$0xff] %v10916_v50  ;;  %v4639_v50 = vld [vmem:[#allocation3 + $0x15a] sm:$0xff] }
 0x877   : > { %5000 = vrot.lane.b32.xlu0 %v10832_v13, %s6773_s15  ;;  %5004 = vrot.lane.b32.xlu2 %v10834_v36, %s6773_s15 }
 0x878   : > { %5008 = vrot.lane.b32.xlu1 %v10838_v4, %s6773_s15  ;;  %v10925_v48 = vpop.permute.xlu0 %4894 }
 0x879   : > { %13007 = vst [vmem:[#allocation6_spill] sm:$0xff] %v10925_v48  ;;  %v10943_v48 = vld [vmem:[#allocation3 + $0x30] sm:$0xff] }
 0x87f   : > { %5006 = vrot.lane.b32.xlu0 %v10846_v59, %s6773_s15  ;;  %5010 = vrot.lane.b32.xlu2 %v10848_v31, %s6773_s15 }
 0x880   : > { %5014 = vrot.lane.b32.xlu1 %v10854_v35, %s6773_s15 }
 0x887   : > { %5012 = vrot.lane.b32.xlu0 %v10862_v26, %s6773_s15  ;;  %5016 = vrot.lane.b32.xlu2 %v10864_v8, %s6773_s15 }
 0x888   : > { %5020 = vrot.lane.b32.xlu1 %v10868_v57, %s6773_s15  ;;  %v4565_v57 = vld [vmem:[#allocation3 + $0xe0] sm:$0xff] }
 0x88f   : > { %5018 = vrot.lane.b32.xlu0 %v10878_v49, %s6773_s15  ;;  %5022 = vrot.lane.b32.xlu2 %v10880_v3, %s6773_s15  ;;  %v4563_v3 = vld [vmem:[#allocation3 + $0xc8] sm:$0xff] }
 0x890   : > { %5026 = vrot.lane.b32.xlu1 %v4626_v52, %s6773_s15  ;;  %v10912_v52 = vpop.permute.xlu2 %4904 }
 0x891   : > { %13003 = vst [vmem:[#allocation8_spill] sm:$0xff] %v10912_v52  ;;  %v4638_v52 = vld [vmem:[#allocation3 + $0x152] sm:$0xff] }
 0x897   : > { %5024 = vrot.lane.b32.xlu0 %v10893_v29, %s6773_s15  ;;  %5028 = vrot.lane.b32.xlu2 %v4627_v15, %s6773_s15  ;;  %v4631_v15 = vld [vmem:[#allocation3 + $0xfa] sm:$0xff] }
 0x898   : > { %5032 = vrot.lane.b32.xlu1 %v4629_v51, %s6773_s15  ;;  %v4633_v51 = vld [vmem:[#allocation3 + $0x112] sm:$0xff]  ;;  %v4562_v29 = vld [vmem:[#allocation3 + $0xc0] sm:$0xff] }
 0x89f   : > { %5030 = vrot.lane.b32.xlu0 %v4628_v7, %s6773_s15  ;;  %5034 = vrot.lane.b32.xlu2 %v4630_v39, %s6773_s15  ;;  %v10919_v7 = vpop.permute.xlu1 %4896  ;;  %v10921_v39 = vpop.permute.xlu2 %4910 }
 0x8a0   : > { %5038 = vrot.lane.b32.xlu1 %v4632_v6, %s6773_s15  ;;  %13005 = vst [vmem:[#allocation61_spill] sm:$0xff] %v10919_v7  ;;  %v4634_v6 = vld [vmem:[#allocation3 + $0x122] sm:$0xff]  ;;  %v10934_v7 = vpop.permute.xlu0 %4900 }
 0x8a1   : > { %13006 = vst [vmem:[#allocation28_spill] sm:$0xff] %v10921_v39  ;;  %v4641_v39 = vld [vmem:[#allocation3 + $0x172] sm:$0xff] }
 0x8a2   : > { %13010 = vst [vmem:[#allocation54_spill] sm:$0xff] %v10934_v7  ;;  %v10974_v7 = vld [vmem:[#allocation3 + $0x48] sm:$0xff] }
 0x8a7   : > { %5036 = vrot.lane.b32.xlu0 %v4631_v15, %s6773_s15  ;;  %5040 = vrot.lane.b32.xlu2 %v4633_v51, %s6773_s15  ;;  %v10928_v15 = vpop.permute.xlu1 %4902 }
 0x8a8   : > { %5044 = vrot.lane.b32.xlu1 %v4635_v9, %s6773_s15  ;;  %13008 = vst [vmem:[#allocation13_spill] sm:$0xff] %v10928_v15  ;;  %v4637_v9 = vld [vmem:[#allocation3 + $0x142] sm:$0xff]  ;;  %v4640_v15 = vld [vmem:[#allocation3 + $0x16a] sm:$0xff] }
 0x8af   : > { %5042 = vrot.lane.b32.xlu0 %v4634_v6, %s6773_s15  ;;  %5046 = vrot.lane.b32.xlu2 %v4636_v44, %s6773_s15  ;;  %v10937_v44 = vpop.permute.xlu1 %4908 }
 0x8b0   : > { %5050 = vrot.lane.b32.xlu1 %v4638_v52, %s6773_s15  ;;  %13011 = vst [vmem:[#allocation37_spill] sm:$0xff] %v10937_v44  ;;  %v10941_v52 = vld [vmem:[#allocation3 + $0x18] sm:$0xff]  ;;  %v10956_v44 = vld [vmem:[#allocation3 + $0x20] sm:$0xff] }
 0x8b1   : > { %v10930_v51 = vpop.permute.xlu2 %4916  ;;  %13013 = vst [vmem:[#allocation87_spill] sm:$0xff] %v10941_v52 }
 0x8b2   : > { %13009 = vst [vmem:[#allocation117_spill] sm:$0xff] %v10930_v51  ;;  %v10960_v51 = vld [vmem:[#allocation3 + $0x50] sm:$0xff] }
 0x8b3   : > { %13016 = vst [vmem:[#allocation34_spill] sm:$0xff] %v10956_v44 }
 0x8b7   : > { %5048 = vrot.lane.b32.xlu0 %v4637_v9, %s6773_s15  ;;  %5052 = vrot.lane.b32.xlu2 %v4639_v50, %s6773_s15  ;;  %v10948_v9 = vpop.permute.xlu0 %4906 }
 0x8b8   : > { %5056 = vrot.lane.b32.xlu1 %v4641_v39, %s6773_s15  ;;  %13014 = vst [vmem:[#allocation60_spill] sm:$0xff] %v10948_v9 }
 0x8b9   : > { %v10939_v6 = vpop.permute.xlu2 %4922 }
 0x8ba   : > { %13012 = vst [vmem:[#allocation124_spill] sm:$0xff] %v10939_v6  ;;  %v10958_v6 = vld [vmem:[#allocation3 + $0x38] sm:$0xff] }
 0x8bf   : > { %5054 = vrot.lane.b32.xlu0 %v4640_v15, %s6773_s15  ;;  %5122 = vrot.lane.b32.xlu2 %v10941_v52, %s6781_s10  ;;  %v10966_v15 = vpop.permute.xlu0 %4912 }
 0x8c0   : > { %5126 = vrot.lane.b32.xlu1 %v10943_v48, %s6781_s10 }
 0x8c1   : > { %v10952_v50 = vpop.permute.xlu1 %4914  ;;  %v10954_v39 = vpop.permute.xlu2 %4928 }
 0x8c2   : > { %13015 = vst [vmem:[#allocation15_spill] sm:$0xff] %v10954_v39 }
 0x8c7   : > { %5124 = vrot.lane.b32.xlu0 %v10956_v44, %s6781_s10  ;;  %5128 = vrot.lane.b32.xlu2 %v10958_v6, %s6781_s10  ;;  %v10994_v44 = vld [vmem:[#allocation3 + $0x80] sm:$0xff] }
 0x8c8   : > { %5132 = vrot.lane.b32.xlu1 %v10960_v51, %s6781_s10 }
 0x8c9   : > { %v10970_v9 = vpop.permute.xlu1 %4920  ;;  %v10972_v39 = vpop.permute.xlu2 %4998 }
 0x8ca   : > { %13017 = vst [vmem:[#allocation168_spill] sm:$0xff] %v10972_v39 }
 0x8cf   : > { %5130 = vrot.lane.b32.xlu0 %v10974_v7, %s6781_s10  ;;  %5134 = vrot.lane.b32.xlu2 %v10976_v16, %s6781_s10 }
 0x8d0   : > { %5138 = vrot.lane.b32.xlu1 %v10978_v37, %s6781_s10 }
 0x8d1   : > { %v10986_v58 = vpop.permute.xlu0 %4918  ;;  %v10988_v40 = vpop.permute.xlu2 %5004 }
 0x8d2   : > { %13018 = vst [vmem:[#allocation119_spill] sm:$0xff] %v10986_v58  ;;  %v10990_v12 = vpop.permute.xlu1 %4926  ;;  %v4672_v58 = vld [vmem:[#allocation3 + $0x180] sm:$0xff] }
 0x8d3   : > { %13019 = vst [vmem:[#allocation47_spill] sm:$0xff] %v10988_v40 }
 0x8d4   : > { %13020 = vst [vmem:[#allocation151_spill] sm:$0xff] %v10990_v12  ;;  %v4566_v12 = vld [vmem:[#allocation3 + $0xf0] sm:$0xff] }
 0x8d7   : > { %5136 = vrot.lane.b32.xlu0 %v10992_v14, %s6781_s10  ;;  %5140 = vrot.lane.b32.xlu2 %v10994_v44, %s6781_s10 }
 0x8d8   : > { %5144 = vrot.lane.b32.xlu1 %v4559_v21, %s6781_s10 }
 0x8d9   : > { %v11001_v39 = vpop.permute.xlu0 %4924  ;;  %v11003_v52 = vpop.permute.xlu2 %5010 }
 0x8da   : > { %13021 = vst [vmem:[#allocation69_spill] sm:$0xff] %v11001_v39  ;;  %v11005_v40 = vpop.permute.xlu1 %4996 }
 0x8db   : > { %13022 = vst [vmem:[#allocation138_spill] sm:$0xff] %v11003_v52 }
 0x8dc   : > { %13023 = vst [vmem:[#allocation137_spill] sm:$0xff] %v11005_v40  ;;  %v4561_v40 = vld [vmem:[#allocation3 + $0xb0] sm:$0xff] }
 0x8df   : > { %5142 = vrot.lane.b32.xlu0 %v11007_v41, %s6781_s10  ;;  %5146 = vrot.lane.b32.xlu2 %v11009_v5, %s6781_s10 }
 0x8e0   : > { %5150 = vrot.lane.b32.xlu1 %v4562_v29, %s6781_s10 }
 0x8e1   : > { %v11016_v21 = vpop.permute.xlu0 %4994  ;;  %v11018_v55 = vpop.permute.xlu2 %5016 }
 0x8e2   : > { %13025 = vst [vmem:[#allocation82_spill] sm:$0xff] %v11016_v21  ;;  %v11020_v52 = vpop.permute.xlu1 %5002  ;;  %v4564_v21 = vld [vmem:[#allocation3 + $0xd8] sm:$0xff] }
 0x8e3   : > { %13026 = vst [vmem:[#allocation166_spill] sm:$0xff] %v11018_v55  ;;  %v4568_v55 = vld [vmem:[#allocation3 + $0x108] sm:$0xff] }
 0x8e4   : > { %13027 = vst [vmem:[#allocation84_spill] sm:$0xff] %v11020_v52  ;;  %v4567_v52 = vld [vmem:[#allocation3 + $0xf8] sm:$0xff] }
 0x8e7   : > { %5148 = vrot.lane.b32.xlu0 %v4561_v40, %s6781_s10  ;;  %5152 = vrot.lane.b32.xlu2 %v4563_v3, %s6781_s10 }
 0x8e8   : > { %5156 = vrot.lane.b32.xlu1 %v4565_v57, %s6781_s10 }
 0x8e9   : > { %v11025_v39 = vpop.permute.xlu0 %5000  ;;  %v11027_v5 = vpop.permute.xlu2 %5022 }
 0x8ea   : > { %13028 = vst [vmem:[#allocation18_spill] sm:$0xff] %v11025_v39  ;;  %v11029_v29 = vpop.permute.xlu1 %5008  ;;  %v11040_v39 = vld [vmem:[#allocation3 + $0x110] sm:$0xff] }
 0x8eb   : > { %13029 = vst [vmem:[#allocation9_spill] sm:$0xff] %v11027_v5  ;;  %v4571_v5 = vld [vmem:[#allocation3 + $0x128] sm:$0xff] }
 0x8ec   : > { %13030 = vst [vmem:[#allocation107_spill] sm:$0xff] %v11029_v29  ;;  %v4574_v29 = vld [vmem:[#allocation3 + $0x150] sm:$0xff] }
 0x8ef   : > { %5154 = vrot.lane.b32.xlu0 %v4564_v21, %s6781_s10  ;;  %5158 = vrot.lane.b32.xlu2 %v4566_v12, %s6781_s10 }
 0x8f0   : > { %5162 = vrot.lane.b32.xlu1 %v4568_v55, %s6781_s10 }
 0x8f1   : > { %v11034_v40 = vpop.permute.xlu0 %5006  ;;  %v11036_v3 = vpop.permute.xlu2 %5028 }
 0x8f2   : > { %13031 = vst [vmem:[#allocation116_spill] sm:$0xff] %v11034_v40  ;;  %v11038_v57 = vpop.permute.xlu1 %5014  ;;  %v4577_v40 = vld [vmem:[#allocation3 + $0x170] sm:$0xff] }
 0x8f3   : > { %13032 = vst [vmem:[#allocation126_spill] sm:$0xff] %v11036_v3  ;;  %v11052_v3 = vld [vmem:[#allocation3 + $0x120] sm:$0xff] }
 0x8f4   : > { %13033 = vst [vmem:[#allocation173_spill] sm:$0xff] %v11038_v57  ;;  %v11054_v57 = vld [vmem:[#allocation3 + $0x138] sm:$0xff] }
 0x8f5   : > { %13037 = vst [vmem:[#allocation102_spill] sm:$0xff] %v11054_v57 }
 0x8f7   : > { %5160 = vrot.lane.b32.xlu0 %v4567_v52, %s6781_s10  ;;  %5164 = vrot.lane.b32.xlu2 %v11040_v39, %s6781_s10 }
 0x8f8   : > { %5168 = vrot.lane.b32.xlu1 %v4571_v5, %s6781_s10 }
 0x8f9   : > { %v11046_v12 = vpop.permute.xlu0 %5012  ;;  %v11048_v55 = vpop.permute.xlu2 %5034 }
 0x8fa   : > { %13034 = vst [vmem:[#allocation16_spill] sm:$0xff] %v11046_v12  ;;  %v11050_v21 = vpop.permute.xlu1 %5020  ;;  %v11069_v12 = vld [vmem:[#allocation3 + $0x158] sm:$0xff] }
 0x8fb   : > { %13035 = vst [vmem:[#allocation44_spill] sm:$0xff] %v11048_v55 }
 0x8fc   : > { %13036 = vst [vmem:[#allocation142_spill] sm:$0xff] %v11050_v21  ;;  %v11067_v21 = vld [vmem:[#allocation3 + $0x140] sm:$0xff] }
 0x8fd   : > { %13040 = vst [vmem:[#allocation104_spill] sm:$0xff] %v11069_v12 }
 0x8ff   : > { %5166 = vrot.lane.b32.xlu0 %v11052_v3, %s6781_s10  ;;  %5170 = vrot.lane.b32.xlu2 %v11054_v57, %s6781_s10 }
 0x900   : > { %5174 = vrot.lane.b32.xlu1 %v4574_v29, %s6781_s10 }
 0x901   : > { %v11061_v5 = vpop.permute.xlu0 %5018  ;;  %v11063_v52 = vpop.permute.xlu2 %5040 }
 0x902   : > { %13038 = vst [vmem:[#allocation76_spill] sm:$0xff] %v11061_v5  ;;  %v11065_v55 = vpop.permute.xlu1 %5026 }
 0x903   : > { %13039 = vst [vmem:[#allocation167_spill] sm:$0xff] %v11065_v55  ;;  %v11082_v55 = vld [vmem:[#allocation3 + $0x168] sm:$0xff] }
 0x907   : > { %5172 = vrot.lane.b32.xlu0 %v11067_v21, %s6781_s10  ;;  %5176 = vrot.lane.b32.xlu2 %v11069_v12, %s6781_s10 }
 0x908   : > { %5180 = vrot.lane.b32.xlu1 %v4577_v40, %s6781_s10 }
 0x909   : > { %v11076_v29 = vpop.permute.xlu0 %5024  ;;  %v11078_v5 = vpop.permute.xlu2 %5046 }
 0x90a   : > { %13041 = vst [vmem:[#allocation32_spill] sm:$0xff] %v11076_v29  ;;  %v11080_v57 = vpop.permute.xlu1 %5032 }
 0x90b   : > { %13042 = vst [vmem:[#allocation11_spill] sm:$0xff] %v11078_v5  ;;  %v4673_v5 = vld [vmem:[#allocation3 + $0x188] sm:$0xff] }
 0x90c   : > { %13043 = vst [vmem:[#allocation127_spill] sm:$0xff] %v11080_v57 }
 0x90f   : > { %5178 = vrot.lane.b32.xlu0 %v11082_v55, %s6781_s10  ;;  %5182 = vrot.lane.b32.xlu2 %v4672_v58, %s6781_s10 }
 0x910   : > { %5250 = vrot.lane.b32.xlu1 %v10432_v53, %s6774_s16 }
 0x911   : > { %v11089_v12 = vpop.permute.xlu0 %5030  ;;  %v11091_v40 = vpop.permute.xlu2 %5052 }
 0x912   : > { %13044 = vst [vmem:[#allocation136_spill] sm:$0xff] %v11089_v12  ;;  %v11093_v29 = vpop.permute.xlu1 %5038 }
 0x913   : > { %13045 = vst [vmem:[#allocation109_spill] sm:$0xff] %v11093_v29  ;;  %v11216_v29 = vld [vmem:[#allocation3 + $0x189] sm:$0xff] }
 0x914   : > { %13059 = vst [vmem:[#allocation139_spill] sm:$0xff] %v11216_v29 }
 0x917   : > { %5252 = vrot.lane.b32.xlu2 %v10520_v11, %s6774_s16  ;;  %5184 = vrot.lane.b32.xlu0 %v4673_v5, %s6781_s10 }
 0x918   : > { %5256 = vrot.lane.b32.xlu1 %v10570_v17, %s6774_s16 }
 0x919   : > { %v11100_v57 = vpop.permute.xlu0 %5036  ;;  %v11102_v58 = vpop.permute.xlu2 %5122 }
 0x91a   : > { %13046 = vst [vmem:[#allocation72_spill] sm:$0xff] %v11100_v57  ;;  %v11104_v53 = vpop.permute.xlu1 %5044 }
 0x91b   : > { %13047 = vst [vmem:[#allocation95_spill] sm:$0xff] %v11104_v53 }
 0x91f   : > { %5258 = vrot.lane.b32.xlu2 %v10594_v2, %s6774_s16  ;;  %5254 = vrot.lane.b32.xlu0 %v10546_v18, %s6774_s16 }
 0x920   : > { %5262 = vrot.lane.b32.xlu1 %v10642_v38, %s6774_s16 }
 0x921   : > { %v11112_v11 = vpop.permute.xlu0 %5042  ;;  %v11114_v5 = vpop.permute.xlu2 %5128 }
 0x922   : > { %v11116_v17 = vpop.permute.xlu1 %5050 }
 0x923   : > { %13048 = vst [vmem:[#allocation118_spill] sm:$0xff] %v11116_v17  ;;  %v4770_v17 = vld [vmem:[#allocation3 + $0x31] sm:$0xff] }
 0x927   : > { %5264 = vrot.lane.b32.xlu2 %v10658_v19, %s6774_s16  ;;  %5260 = vrot.lane.b32.xlu0 %v10618_v1, %s6774_s16 }
 0x928   : > { %5268 = vrot.lane.b32.xlu1 %v10675_v30, %s6774_s16 }
 0x929   : > { %v11124_v2 = vpop.permute.xlu0 %5048  ;;  %v11126_v18 = vpop.permute.xlu2 %5134 }
 0x92a   : > { %v11128_v38 = vpop.permute.xlu1 %5056 }
 0x92b   : > { %13049 = vst [vmem:[#allocation26_spill] sm:$0xff] %v11128_v38  ;;  %v11202_v38 = vld [vmem:[#allocation3 + $0x181] sm:$0xff] }
 0x92c   : > { %13056 = vst [vmem:[#allocation43_spill] sm:$0xff] %v11202_v38 }
 0x92f   : > { %5270 = vrot.lane.b32.xlu2 %v10685_v0, %s6774_s16  ;;  %5266 = vrot.lane.b32.xlu0 %v10666_v25, %s6774_s16 }
 0x930   : > { %5274 = vrot.lane.b32.xlu1 %v10705_v45, %s6774_s16 }
 0x931   : > { %v11136_v19 = vpop.permute.xlu0 %5054  ;;  %v11138_v1 = vpop.permute.xlu2 %5140 }
 0x932   : > { %v11140_v30 = vpop.permute.xlu1 %5126 }
 0x937   : > { %5276 = vrot.lane.b32.xlu2 %v10715_v47, %s6774_s16  ;;  %5272 = vrot.lane.b32.xlu0 %v10695_v46, %s6774_s16 }
 0x938   : > { %5280 = vrot.lane.b32.xlu1 %v10735_v32, %s6774_s16 }
 0x939   : > { %v11148_v0 = vpop.permute.xlu0 %5124  ;;  %v11150_v25 = vpop.permute.xlu2 %5146 }
 0x93a   : > { %v11152_v45 = vpop.permute.xlu1 %5132 }
 0x93f   : > { %5282 = vrot.lane.b32.xlu2 %v10742_v34, %s6774_s16  ;;  %5278 = vrot.lane.b32.xlu0 %v10725_v60, %s6774_s16 }
 0x940   : > { %5286 = vrot.lane.b32.xlu1 %v10756_v43, %s6774_s16 }
 0x941   : > { %v11160_v47 = vpop.permute.xlu0 %5130  ;;  %v11162_v46 = vpop.permute.xlu2 %5152 }
 0x942   : > { %13050 = vst [vmem:[#allocation77_spill] sm:$0xff] %v11162_v46  ;;  %v11164_v32 = vpop.permute.xlu1 %5138 }
 0x947   : > { %5288 = vrot.lane.b32.xlu2 %v10763_v20, %s6774_s16  ;;  %5284 = vrot.lane.b32.xlu0 %v10749_v33, %s6774_s16 }
 0x948   : > { %5292 = vrot.lane.b32.xlu1 %v10777_v22, %s6774_s16 }
 0x949   : > { %v11172_v34 = vpop.permute.xlu0 %5136  ;;  %v11174_v60 = vpop.permute.xlu2 %5158 }
 0x94a   : > { %13051 = vst [vmem:[#allocation145_spill] sm:$0xff] %v11174_v60  ;;  %v11176_v43 = vpop.permute.xlu1 %5144 }
 0x94f   : > { %5294 = vrot.lane.b32.xlu2 %v10784_v61, %s6774_s16  ;;  %5290 = vrot.lane.b32.xlu0 %v10770_v27, %s6774_s16 }
 0x950   : > { %5298 = vrot.lane.b32.xlu1 %v10800_v24, %s6774_s16 }
 0x951   : > { %v11184_v20 = vpop.permute.xlu0 %5142  ;;  %v11186_v33 = vpop.permute.xlu2 %5164 }
 0x952   : > { %13052 = vst [vmem:[#allocation85_spill] sm:$0xff] %v11186_v33  ;;  %v11188_v22 = vpop.permute.xlu1 %5150 }
 0x953   : > { %13053 = vst [vmem:[#allocation163_spill] sm:$0xff] %v11188_v22 }
 0x957   : > { %5300 = vrot.lane.b32.xlu2 %v10793_v23, %s6774_s16  ;;  %5296 = vrot.lane.b32.xlu0 %v10791_v10, %s6774_s16 }
 0x958   : > { %5304 = vrot.lane.b32.xlu1 %v10812_v28, %s6774_s16 }
 0x959   : > { %v11196_v61 = vpop.permute.xlu0 %5148  ;;  %v11198_v27 = vpop.permute.xlu2 %5170 }
 0x95a   : > { %13054 = vst [vmem:[#allocation27_spill] sm:$0xff] %v11196_v61  ;;  %v11200_v24 = vpop.permute.xlu1 %5156 }
 0x95b   : > { %13055 = vst [vmem:[#allocation67_spill] sm:$0xff] %v11200_v24 }
 0x95f   : > { %5306 = vrot.lane.b32.xlu2 %v10808_v62, %s6774_s16  ;;  %5302 = vrot.lane.b32.xlu0 %v10802_v63, %s6774_s16 }
 0x960   : > { %5310 = vrot.lane.b32.xlu1 %v11202_v38, %s6774_s16 }
 0x961   : > { %v11210_v10 = vpop.permute.xlu0 %5154  ;;  %v11212_v23 = vpop.permute.xlu2 %5176 }
 0x962   : > { %13057 = vst [vmem:[#allocation96_spill] sm:$0xff] %v11210_v10  ;;  %v11214_v28 = vpop.permute.xlu1 %5162  ;;  %v4774_v10 = vld [vmem:[#allocation3 + $0x61] sm:$0xff] }
 0x963   : > { %13058 = vst [vmem:[#allocation129_spill] sm:$0xff] %v11214_v28 }
 0x967   : > { %5312 = vrot.lane.b32.xlu2 %v11216_v29, %s6774_s16  ;;  %5308 = vrot.lane.b32.xlu0 %v10814_v56, %s6774_s16  ;;  %v4775_v29 = vld [vmem:[#allocation3 + $0x69] sm:$0xff] }
 0x968   : > { %5380 = vrot.lane.b32.xlu1 %v10832_v13, %s6782_s12 }
 0x969   : > { %v11224_v63 = vpop.permute.xlu0 %5160  ;;  %v11226_v62 = vpop.permute.xlu2 %5182 }
 0x96a   : > { %13060 = vst [vmem:[#allocation170_spill] sm:$0xff] %v11224_v63  ;;  %v11228_v33 = vpop.permute.xlu1 %5168 }
 0x96f   : > { %5382 = vrot.lane.b32.xlu2 %v10826_v54, %s6782_s12  ;;  %5378 = vrot.lane.b32.xlu0 %v10821_v42, %s6782_s12 }
 0x970   : > { %5506 = vrot.lane.b32.xlu1 %v10943_v48, %s6775_s17 }
 0x971   : > { %v11236_v57 = vpop.permute.xlu0 %5166  ;;  %v11238_v56 = vpop.permute.xlu2 %5252 }
 0x972   : > { %13061 = vst [vmem:[#allocation153_spill] sm:$0xff] %v11236_v57  ;;  %v11240_v13 = vpop.permute.xlu1 %5174  ;;  %v4771_v57 = vld [vmem:[#allocation3 + $0x39] sm:$0xff] }
 0x977   : > { %5634 = vrot.lane.b32.xlu2 %v4770_v17, %s6783_s13  ;;  %5384 = vrot.lane.b32.xlu0 %v10834_v36, %s6782_s12 }
 0x978   : > { %5508 = vrot.lane.b32.xlu1 %v10958_v6, %s6775_s17 }
 0x979   : > { %v11247_v28 = vpop.permute.xlu0 %5172  ;;  %v11249_v42 = vpop.permute.xlu2 %5258 }
 0x97a   : > { %13062 = vst [vmem:[#allocation172_spill] sm:$0xff] %v11247_v28  ;;  %v11251_v63 = vpop.permute.xlu1 %5180  ;;  %v4772_v28 = vld [vmem:[#allocation3 + $0x49] sm:$0xff] }
 0x97f   : > { %5636 = vrot.lane.b32.xlu2 %v4771_v57, %s6783_s13  ;;  %5762 = vrot.lane.b32.xlu0 %v10826_v54, %s6776_s18 }
 0x980   : > { %5510 = vrot.lane.b32.xlu1 %v10974_v7, %s6775_s17 }
 0x981   : > { %v11258_v17 = vpop.permute.xlu0 %5178  ;;  %v11260_v60 = vpop.permute.xlu2 %5264 }
 0x982   : > { %13063 = vst [vmem:[#allocation19_spill] sm:$0xff] %v11258_v17  ;;  %v11262_v12 = vpop.permute.xlu1 %5250  ;;  %v4773_v17 = vld [vmem:[#allocation3 + $0x51] sm:$0xff] }
 0x987   : > { %5638 = vrot.lane.b32.xlu2 %v4772_v28, %s6783_s13  ;;  %5764 = vrot.lane.b32.xlu0 %v10834_v36, %s6776_s18 }
 0x988   : > { %5512 = vrot.lane.b32.xlu1 %v10960_v51, %s6775_s17 }
 0x989   : > { %v11269_v57 = vpop.permute.xlu2 %5270  ;;  %v11271_v54 = vpop.permute.xlu0 %5184 }
 0x98a   : > { %13064 = vst [vmem:[#allocation101_spill] sm:$0xff] %v11271_v54  ;;  %v11273_v53 = vpop.permute.xlu1 %5256 }
 0x98f   : > { %5640 = vrot.lane.b32.xlu2 %v4773_v17, %s6783_s13  ;;  %5766 = vrot.lane.b32.xlu0 %v10846_v59, %s6776_s18 }
 0x990   : > { %5386 = vrot.lane.b32.xlu1 %v10846_v59, %s6782_s12 }
 0x991   : > { %v11280_v28 = vpop.permute.xlu2 %5276  ;;  %v11282_v36 = vpop.permute.xlu0 %5254 }
 0x992   : > { %13065 = vst [vmem:[#allocation38_spill] sm:$0xff] %v11280_v28  ;;  %v11284_v24 = vpop.permute.xlu1 %5262 }
 0x997   : > { %5514 = vrot.lane.b32.xlu2 %v10976_v16, %s6775_s17  ;;  %5768 = vrot.lane.b32.xlu0 %v10838_v4, %s6776_s18 }
 0x998   : > { %5770 = vrot.lane.b32.xlu1 %v10848_v31, %s6776_s18 }
 0x999   : > { %v11292_v17 = vpop.permute.xlu2 %5282  ;;  %v11294_v54 = vpop.permute.xlu0 %5260 }
 0x99a   : > { %13066 = vst [vmem:[#allocation86_spill] sm:$0xff] %v11292_v17  ;;  %v11296_v59 = vpop.permute.xlu1 %5268 }
 0x99f   : > { %5388 = vrot.lane.b32.xlu2 %v10838_v4, %s6782_s12  ;;  %5642 = vrot.lane.b32.xlu0 %v4774_v10, %s6783_s13 }
 0x9a0   : > { %5644 = vrot.lane.b32.xlu1 %v4775_v29, %s6783_s13 }
 0x9a1   : > { %v11302_v46 = vpop.permute.xlu2 %5288  ;;  %v11304_v38 = vpop.permute.xlu0 %5266 }
 0x9a2   : > { %13067 = vst [vmem:[#allocation149_spill] sm:$0xff] %v11302_v46  ;;  %v11306_v22 = vpop.permute.xlu1 %5274  ;;  %v4776_v46 = vld [vmem:[#allocation3 + $0x79] sm:$0xff] }
 0x9a7   : > { %5772 = vrot.lane.b32.xlu2 %v10862_v26, %s6776_s18  ;;  %5516 = vrot.lane.b32.xlu0 %v10992_v14, %s6775_s17 }
 0x9a8   : > { %5518 = vrot.lane.b32.xlu1 %v10978_v37, %s6775_s17 }
 0x9a9   : > { %v11314_v4 = vpop.permute.xlu2 %5294  ;;  %v11316_v10 = vpop.permute.xlu0 %5272 }
 0x9aa   : > { %13068 = vst [vmem:[#allocation55_spill] sm:$0xff] %v11314_v4  ;;  %v11318_v29 = vpop.permute.xlu1 %5280  ;;  %v4777_v4 = vld [vmem:[#allocation3 + $0x81] sm:$0xff] }
 0x9ab   : > { %13069 = vst [vmem:[#allocation59_spill] sm:$0xff] %v11318_v29 }
 0x9af   : > { %5646 = vrot.lane.b32.xlu2 %v4776_v46, %s6783_s13  ;;  %5390 = vrot.lane.b32.xlu0 %v10848_v31, %s6782_s12 }
 0x9b0   : > { %5392 = vrot.lane.b32.xlu1 %v10862_v26, %s6782_s12 }
 0x9b1   : > { %v11325_v17 = vpop.permute.xlu2 %5300  ;;  %v11327_v28 = vpop.permute.xlu0 %5278 }
 0x9b2   : > { %13070 = vst [vmem:[#allocation135_spill] sm:$0xff] %v11325_v17  ;;  %v11329_v61 = vpop.permute.xlu1 %5286  ;;  %v4778_v17 = vld [vmem:[#allocation3 + $0x91] sm:$0xff] }
 0x9b3   : > { %13071 = vst [vmem:[#allocation17_spill] sm:$0xff] %v11327_v28 }
 0x9b4   : > { %13072 = vst [vmem:[#allocation36_spill] sm:$0xff] %v11329_v61  ;;  %v5882_v61 = vsel %vm574_vm1, %v11052_v3, %v10952_v50  ;;  %v5881_v50 = vsel %vm574_vm1, %v11040_v39, %v10966_v15  ;;  %v4747_v3 = vld [vmem:[#allocation3 + $0x98] sm:$0xff] }
 0x9b7   : > { %5520 = vrot.lane.b32.xlu2 %v10994_v44, %s6775_s17  ;;  %5774 = vrot.lane.b32.xlu0 %v10854_v35, %s6776_s18 }
 0x9b8   : > { %5776 = vrot.lane.b32.xlu1 %v10864_v8, %s6776_s18 }
 0x9b9   : > { %v11337_v46 = vpop.permute.xlu2 %5306  ;;  %v11339_v31 = vpop.permute.xlu0 %5284 }
 0x9ba   : > { %13073 = vst [vmem:[#allocation78_spill] sm:$0xff] %v11337_v46  ;;  %v11341_v26 = vpop.permute.xlu1 %5292  ;;  %v5914_v46 = vsel %vm326_vm0, %v5882_v61, %v11112_v11  ;;  %v5885_v11 = vsel %vm574_vm1, %v11067_v21, %v10970_v9  ;;  %v5913_v61 = vsel %vm326_vm0, %v5881_v50, %v11063_v52  ;;  %v6118_v52 = vld [vmem:[%s12161_s4 + $0x20] sm:$0xf] }
 0x9bb   : > { %13074 = vst [vmem:[#allocation90_spill] sm:$0xff] %v11339_v31  ;;  %v5945_v39 = vsel %vm4000_vm13, %v5913_v61, %v11228_v33  ;;  %6606 = vmatpush.msk.msra.mxu2 %vm4297_vm12, %v6118_v52  ;;  %6658 = vmatpush.msk.msra.mxu3 %vm4297_vm12, %v6118_v52  ;;  %v6116_v33 = vld [vmem:[%s12161_s4 + $0x10] sm:$0xff]  ;;  %v13080_v61 = vld [vmem:[#allocation11_spill] sm:$0xff] }
 0x9bc   : > { %13075 = vst [vmem:[#allocation161_spill] sm:$0xff] %v11341_v26  ;;  %v5946_v26 = vsel %vm4000_vm13, %v5914_v46, %v11198_v27  ;;  %v5917_v27 = vsel %vm326_vm0, %v5885_v11, %v11124_v2  ;;  %v6117_v2 = vld [vmem:[%s12161_s4 + $0x18] sm:$0xff] }
 0x9bd   : > { %6230 = vmatpush.msra.mxu2 %v6117_v2  ;;  %6659 = vmatpush.msra.mxu3 %v6117_v2  ;;  %v13077_v46 = vld [vmem:[#allocation119_spill] sm:$0xff] }
 0x9bf   : > { %5394 = vrot.lane.b32.xlu2 %v10854_v35, %s6782_s12  ;;  %5648 = vrot.lane.b32.xlu0 %v4777_v4, %s6783_s13 }
 0x9c0   : > { %5650 = vrot.lane.b32.xlu1 %v4778_v17, %s6783_s13  ;;  %v5949_v17 = vsel %vm4000_vm13, %v5917_v27, %v11212_v23  ;;  %v4779_v23 = vld [vmem:[#allocation3 + $0x99] sm:$0xff]  ;;  %6231 = vmatpush.msra.mxu2 %v6116_v33 }
 0x9c1   : > { %v11352_v29 = vpop.permute.xlu2 %5312  ;;  %v11354_v31 = vpop.permute.xlu0 %5290  ;;  %6660 = vmatpush.msra.mxu3 %v6116_v33  ;;  %v13082_v33 = vld [vmem:[#allocation104_spill] sm:$0xff] }
 0x9c2   : > { %v5299_v28 = vpop.permute.xlu1 %5298 }
 0x9c3   : > { %v11359_v35 = vsel %vm1985_vm3, %v5946_v26, %v5299_v28  ;;  %v13078_v26 = vld [vmem:[#allocation102_spill] sm:$0xff] }
 0x9c4   : > { %13076 = vst [vmem:[#allocation141_spill] sm:$0xff] %v11359_v35  ;;  %v5884_v50 = vsel %vm574_vm1, %v13078_v26, %v13077_v46  ;;  %v13084_v46 = vld [vmem:[#allocation152_spill] sm:$0xff] }
 0x9c5   : > { %v5916_v27 = vsel %vm326_vm0, %v5884_v50, %v13080_v61  ;;  %v13085_v50 = vld [vmem:[#allocation49_spill] sm:$0xff]  ;;  %v4718_v35 = vld [vmem:[#allocation3 + $0xaa] sm:$0xff] }
 0x9c7   : > { %5778 = vrot.lane.b32.xlu2 %v10878_v49, %s6776_s18  ;;  %5522 = vrot.lane.b32.xlu0 %v11007_v41, %s6775_s17 }
 0x9c8   : > { %5524 = vrot.lane.b32.xlu1 %v4747_v3, %s6775_s17  ;;  %v13079_v3 = vld [vmem:[#allocation151_spill] sm:$0xff] }
 0x9c9   : > { %v11378_v15 = vpop.permute.xlu2 %5382  ;;  %v5297_v28 = vpop.permute.xlu0 %5296  ;;  %v5888_v11 = vsel %vm574_vm1, %v11082_v55, %v13079_v3 }
 0x9ca   : > { %v5305_v4 = vpop.permute.xlu1 %5304  ;;  %v11383_v9 = vsel %vm1985_vm3, %v5945_v39, %v5297_v28  ;;  %v6115_v39 = vld [vmem:[%s12161_s4 + $0x8] sm:$0xff]  ;;  %v5920_v28 = vsel %vm326_vm0, %v5888_v11, %v11136_v19  ;;  %v6114_v19 = vld [vmem:[%s12161_s4] sm:$0xff] }
 0x9cb   : > { %v11386_v21 = vsel %vm1985_vm3, %v5949_v17, %v5305_v4  ;;  %v5952_v55 = vsel %vm4000_vm13, %v5920_v28, %v11226_v62  ;;  %6232 = vmatpush.msra.mxu2 %v6115_v39  ;;  %6661 = vmatpush.msra.mxu3 %v6115_v39  ;;  %v13083_v62 = vld [vmem:[#allocation164_spill] sm:$0xff] }
 0x9cc   : > { %v4780_v28 = vld [vmem:[#allocation3 + $0xa9] sm:$0xff] }
 0x9cd   : > { %6233 = vmatpush.msra.mxu2 %v6114_v19  ;;  %6662 = vmatpush.msra.mxu3 %v6114_v19  ;;  %v13086_v19 = vld [vmem:[#allocation48_spill] sm:$0xff] }
 0x9cf   : > { %5652 = vrot.lane.b32.xlu2 %v4779_v23, %s6783_s13  ;;  %5396 = vrot.lane.b32.xlu0 %v10864_v8, %s6782_s12  ;;  %v5948_v8 = vsel %vm4000_vm13, %v5916_v27, %v11240_v13  ;;  %v13081_v13 = vld [vmem:[#allocation69_spill] sm:$0xff] }
 0x9d0   : > { %5398 = vrot.lane.b32.xlu1 %v10878_v49, %s6782_s12  ;;  %v5887_v23 = vsel %vm574_vm1, %v13082_v33, %v13081_v13  ;;  %v4750_v33 = vld [vmem:[#allocation3 + $0xc0] sm:$0xff] }
 0x9d1   : > { %v5635_v17 = vpop.permute.xlu2 %5634  ;;  %v5303_v4 = vpop.permute.xlu0 %5302  ;;  %v5919_v26 = vsel %vm326_vm0, %v5887_v23, %v11091_v40  ;;  %v13087_v23 = vld [vmem:[#allocation5_spill] sm:$0xff] }
 0x9d2   : > { %v5311_v52 = vpop.permute.xlu1 %5310  ;;  %v11422_v49 = vsel %vm1985_vm3, %v5948_v8, %v5303_v4  ;;  %v5951_v3 = vsel %vm4000_vm13, %v5919_v26, %v11251_v63  ;;  %v4781_v8 = vld [vmem:[#allocation3 + $0xb1] sm:$0xff]  ;;  %v4546_v63 = vld [vmem:[#allocation3] sm:$0xff] }
 0x9d3   : > { %v11425_v2 = vsel %vm1985_vm3, %v5952_v55, %v5311_v52  ;;  %v4749_v52 = vld [vmem:[#allocation3 + $0xb0] sm:$0xff]  ;;  %v5858_v13 = vsel %vm574_vm1, %v4546_v63, %v13086_v19  ;;  %v4547_v63 = vld [vmem:[#allocation3 + $0x8] sm:$0xff] }
 0x9d4   : > { %v4782_v19 = vld [vmem:[#allocation3 + $0xc1] sm:$0xff] }
 0x9d7   : > { %5526 = vrot.lane.b32.xlu2 %v13083_v62, %s6775_s17  ;;  %5780 = vrot.lane.b32.xlu0 %v13084_v46, %s6776_s18  ;;  %v13088_v62 = vld [vmem:[#allocation82_spill] sm:$0xff] }
 0x9d8   : > { %5782 = vrot.lane.b32.xlu1 %v13085_v50, %s6776_s18 }
 0x9d9   : > { %v5637_v11 = vpop.permute.xlu2 %5636  ;;  %v5309_v61 = vpop.permute.xlu0 %5308 }
 0x9da   : > { %v5381_v27 = vpop.permute.xlu1 %5380  ;;  %v11444_v39 = vsel %vm1985_vm3, %v5951_v3, %v5309_v61 }
 0x9df   : > { %5400 = vrot.lane.b32.xlu2 %v13084_v46, %s6782_s12  ;;  %5654 = vrot.lane.b32.xlu0 %v4780_v28, %s6783_s13  ;;  %v5890_v46 = vsel %vm326_vm0, %v5858_v13, %v13088_v62  ;;  %v13090_v62 = vld [vmem:[#allocation137_spill] sm:$0xff] }
 0x9e0   : > { %5656 = vrot.lane.b32.xlu1 %v4781_v8, %s6783_s13  ;;  %v5922_v26 = vsel %vm4000_vm13, %v5890_v46, %v11102_v58  ;;  %v13089_v58 = vld [vmem:[#allocation39_spill] sm:$0xff] }
 0x9e1   : > { %v11450_v40 = vpop.permute.xlu2 %5638  ;;  %v5379_v4 = vpop.permute.xlu0 %5378  ;;  %v5954_v61 = vsel %vm1985_vm3, %v5922_v26, %v11262_v12  ;;  %v5859_v13 = vsel %vm574_vm1, %v4547_v63, %v13089_v58  ;;  %v4751_v63 = vld [vmem:[#allocation3 + $0xc8] sm:$0xff] }
 0x9e2   : > { %v5507_v55 = vpop.permute.xlu1 %5506  ;;  %v5986_v8 = vsel %vm4065_vm14, %v5954_v61, %v5379_v4 }
 0x9e7   : > { %5784 = vrot.lane.b32.xlu2 %v13087_v23, %s6776_s18  ;;  %5528 = vrot.lane.b32.xlu0 %v4749_v52, %s6775_s17  ;;  %v6018_v52 = vsel %vm2018_vm5, %v5986_v8, %v5507_v55  ;;  %v5891_v55 = vsel %vm326_vm0, %v5859_v13, %v13090_v62 }
 0x9e8   : > { %5530 = vrot.lane.b32.xlu1 %v4750_v33, %s6775_s17  ;;  %v6050_v4 = vsel %vm4130_vm15, %v6018_v52, %v5635_v17  ;;  %v4814_v17 = vld [vmem:[#allocation3 + $0xc2] sm:$0xff]  ;;  %v4815_v52 = vld [vmem:[#allocation3 + $0xca] sm:$0xff] }
 0x9e9   : > { %v11462_v50 = vpop.permute.xlu2 %5640  ;;  %v5385_v3 = vpop.permute.xlu0 %5384 }
 0x9ea   : > { %v5509_v28 = vpop.permute.xlu1 %5508 }
 0x9ef   : > { %5658 = vrot.lane.b32.xlu2 %v4782_v19, %s6783_s13  ;;  %5402 = vrot.lane.b32.xlu0 %v4718_v35, %s6782_s12  ;;  %v5923_v35 = vsel %vm4000_vm13, %v5891_v55, %v11148_v0  ;;  %v13091_v19 = vld [vmem:[#allocation146_spill] sm:$0xff]  ;;  %v13092_v0 = vld [vmem:[#allocation87_spill] sm:$0xff] }
 0x9f0   : > { %5404 = vrot.lane.b32.xlu1 %v13087_v23, %s6782_s12  ;;  %v5955_v23 = vsel %vm1985_vm3, %v5923_v35, %v11238_v56  ;;  %v5860_v58 = vsel %vm574_vm1, %v13092_v0, %v13091_v19 }
 0x9f1   : > { %v11474_v33 = vpop.permute.xlu2 %5514  ;;  %v5763_v12 = vpop.permute.xlu0 %5762  ;;  %v5987_v61 = vsel %vm4065_vm14, %v5955_v23, %v5381_v27 }
 0x9f2   : > { %v5511_v46 = vpop.permute.xlu1 %5510  ;;  %v6082_v26 = vsel %vm2051_vm4, %v6050_v4, %v5763_v12  ;;  %v6019_v8 = vsel %vm2018_vm5, %v5987_v61, %v5509_v28  ;;  %v13093_v12 = vld [vmem:[#allocation168_spill] sm:$0xff]  ;;  %v4784_v61 = vld [vmem:[#allocation3 + $0xd9] sm:$0xff] }
 0x9f3   : > { %6607 = vmatmul.msk.f32.vlgmr.msra.gmra.mxu2 %vm4200_vm2, %v6082_v26  ;;  %v6051_v27 = vsel %vm4130_vm15, %v6019_v8, %v5637_v11  ;;  %v5892_v28 = vsel %vm326_vm0, %v5860_v58, %v13093_v12  ;;  %v4783_v11 = vld [vmem:[#allocation3 + $0xc9] sm:$0xff]  ;;  %v13094_v8 = vld [vmem:[#allocation41_spill] sm:$0xff] }
 0x9f4   : > { %v5924_v55 = vsel %vm4000_vm13, %v5892_v28, %v11140_v30  ;;  %v13095_v30 = vld [vmem:[#allocation34_spill] sm:$0xff] }
 0x9f5   : > { %v5956_v26 = vsel %vm1985_vm3, %v5924_v55, %v11282_v36  ;;  %v4753_v55 = vld [vmem:[#allocation3 + $0xe0] sm:$0xff] }
 0x9f6   : > { %v5988_v35 = vsel %vm4065_vm14, %v5956_v26, %v11378_v15  ;;  %v13096_v15 = vld [vmem:[#allocation18_spill] sm:$0xff] }
 0x9f7   : > { %5532 = vrot.lane.b32.xlu2 %v4751_v63, %s6775_s17  ;;  %5786 = vrot.lane.b32.xlu0 %v4814_v17, %s6776_s18  ;;  %v6020_v23 = vsel %vm2018_vm5, %v5988_v35, %v5511_v46  ;;  %v5861_v63 = vsel %vm574_vm1, %v13095_v30, %v13094_v8 }
 0x9f8   : > { %5788 = vrot.lane.b32.xlu1 %v4815_v52, %s6776_s18  ;;  %v6052_v36 = vsel %vm4130_vm15, %v6020_v23, %v11450_v40  ;;  %v5893_v46 = vsel %vm326_vm0, %v5861_v63, %v13096_v15  ;;  %v4752_v40 = vld [vmem:[#allocation3 + $0xd8] sm:$0xff]  ;;  %v4785_v63 = vld [vmem:[#allocation3 + $0xe1] sm:$0xff] }
 0x9f9   : > { %v11493_v13 = vpop.permute.xlu2 %5388  ;;  %v5765_v56 = vpop.permute.xlu0 %5764 }
 0x9fa   : > { %v5513_v4 = vpop.permute.xlu1 %5512  ;;  %v6083_v62 = vsel %vm2051_vm4, %v6051_v27, %v5765_v56 }
 0x9fb   : > { %6608 = vmatmul.msk.f32.gmra.mxu2 %vm4200_vm2, %v6083_v62  ;;  %v4816_v62 = vld [vmem:[#allocation3 + $0xda] sm:$0xff] }
 0x9ff   : > { %5406 = vrot.lane.b32.xlu2 %v4814_v17, %s6782_s12  ;;  %5660 = vrot.lane.b32.xlu0 %v4783_v11, %s6783_s13  ;;  %v5925_v17 = vsel %vm4000_vm13, %v5893_v46, %v11114_v5  ;;  %v13098_v11 = vld [vmem:[#allocation84_spill] sm:$0xff] }
 0xa00   : > { %5662 = vrot.lane.b32.xlu1 %v4784_v61, %s6783_s13  ;;  %v5957_v27 = vsel %vm1985_vm3, %v5925_v17, %v11273_v53  ;;  %v13097_v53 = vld [vmem:[#allocation73_spill] sm:$0xff]  ;;  %v13099_v46 = vld [vmem:[#allocation40_spill] sm:$0xff] }
 0xa01   : > { %v5773_v19 = vpop.permute.xlu2 %5772  ;;  %v5767_v0 = vpop.permute.xlu0 %5766  ;;  %v5989_v12 = vsel %vm4065_vm14, %v5957_v27, %v5385_v3  ;;  %v5862_v3 = vsel %vm574_vm1, %v10943_v48, %v13097_v53  ;;  %v4754_v17 = vld [vmem:[#allocation3 + $0xf0] sm:$0xff]  ;;  %v4817_v27 = vld [vmem:[#allocation3 + $0xe2] sm:$0xff] }
 0xa02   : > { %v5387_v58 = vpop.permute.xlu1 %5386  ;;  %v6084_v56 = vsel %vm2051_vm4, %v6052_v36, %v5767_v0  ;;  %v6021_v28 = vsel %vm2018_vm5, %v5989_v12, %v5513_v4  ;;  %v5894_v61 = vsel %vm326_vm0, %v5862_v3, %v13098_v11  ;;  %v4818_v12 = vld [vmem:[#allocation3 + $0xf2] sm:$0xff] }
 0xa03   : > { %6609 = vmatmul.msk.f32.gmra.mxu2 %vm4200_vm2, %v6084_v56  ;;  %v6053_v35 = vsel %vm4130_vm15, %v6021_v28, %v11462_v50  ;;  %v5926_v8 = vsel %vm4000_vm13, %v5894_v61, %v11160_v47  ;;  %v4786_v53 = vld [vmem:[#allocation3 + $0xf1] sm:$0xff] }
 0xa04   : > { %v5958_v30 = vsel %vm1985_vm3, %v5926_v8, %v11249_v42  ;;  %v13101_v3 = vld [vmem:[#allocation4_spill] sm:$0xff] }
 0xa05   : > { %v5990_v50 = vsel %vm4065_vm14, %v5958_v30, %v5387_v58  ;;  %v5863_v58 = vsel %vm574_vm1, %v10958_v6, %v13099_v46 }
 0xa06   : > { %v6022_v0 = vsel %vm2018_vm5, %v5990_v50, %v11474_v33 }
 0xa07   : > { %5790 = vrot.lane.b32.xlu2 %v4816_v62, %s6776_s18  ;;  %5534 = vrot.lane.b32.xlu0 %v4752_v40, %s6775_s17 }
 0xa08   : > { %5536 = vrot.lane.b32.xlu1 %v4753_v55, %s6775_s17 }
 0xa09   : > { %v11528_v26 = vpop.permute.xlu2 %5646  ;;  %v5769_v5 = vpop.permute.xlu0 %5768 }
 0xa0a   : > { %v5771_v4 = vpop.permute.xlu1 %5770  ;;  %v6085_v23 = vsel %vm2051_vm4, %v6053_v35, %v5769_v5 }
 0xa0b   : > { %6610 = vmatmul.msk.f32.gmra.mxu2 %vm4200_vm2, %v6085_v23 }
 0xa0f   : > { %5664 = vrot.lane.b32.xlu2 %v4785_v63, %s6783_s13  ;;  %5408 = vrot.lane.b32.xlu0 %v4815_v52, %s6782_s12  ;;  %v13100_v52 = vld [vmem:[#allocation47_spill] sm:$0xff]  ;;  %v4819_v63 = vld [vmem:[#allocation3 + $0xfa] sm:$0xff] }
 0xa10   : > { %5410 = vrot.lane.b32.xlu1 %v4816_v62, %s6782_s12  ;;  %v5895_v56 = vsel %vm326_vm0, %v5863_v58, %v13100_v52  ;;  %v13104_v52 = vld [vmem:[#allocation107_spill] sm:$0xff] }
 0xa11   : > { %v11547_v48 = vpop.permute.xlu2 %5520  ;;  %v5643_v36 = vpop.permute.xlu0 %5642  ;;  %v5927_v33 = vsel %vm4000_vm13, %v5895_v56, %v11152_v45 }
 0xa12   : > { %v5645_v15 = vpop.permute.xlu1 %5644  ;;  %v6054_v47 = vsel %vm4130_vm15, %v6022_v0, %v5643_v36  ;;  %v5959_v28 = vsel %vm1985_vm3, %v5927_v33, %v11294_v54  ;;  %v5864_v54 = vsel %vm574_vm1, %v10974_v7, %v13101_v3  ;;  %v4755_v0 = vld [vmem:[#allocation3 + $0xf8] sm:$0xff]  ;;  %v11586_v36 = vld [vmem:[#allocation3 + $0x142] sm:$0xff] }
 0xa13   : > { %v6086_v42 = vsel %vm2051_vm4, %v6054_v47, %v5771_v4  ;;  %v5991_v6 = vsel %vm4065_vm14, %v5959_v28, %v11493_v13  ;;  %v4787_v4 = vld [vmem:[#allocation3 + $0xf9] sm:$0xff]  ;;  %v13102_v13 = vld [vmem:[#allocation116_spill] sm:$0xff]  ;;  %v13103_v47 = vld [vmem:[#allocation155_spill] sm:$0xff] }
 0xa14   : > { %6611 = vmatmul.msk.f32.gmra.mxu2 %vm4200_vm2, %v6086_v42  ;;  %v5896_v23 = vsel %vm326_vm0, %v5864_v54, %v13102_v13  ;;  %v5865_v42 = vsel %vm574_vm1, %v10960_v51, %v13103_v47  ;;  %v4756_v33 = vld [vmem:[#allocation3 + $0x108] sm:$0xff]  ;;  %v4763_v3 = vld [vmem:[#allocation3 + $0x158] sm:$0xff] }
 0xa15   : > { %v5897_v56 = vsel %vm326_vm0, %v5865_v42, %v13104_v52  ;;  %v4788_v28 = vld [vmem:[#allocation3 + $0x109] sm:$0xff]  ;;  %v4827_v54 = vld [vmem:[#allocation3 + $0x15a] sm:$0xff] }
 0xa16   : > { %v4796_v52 = vld [vmem:[#allocation3 + $0x169] sm:$0xff] }
 0xa17   : > { %5538 = vrot.lane.b32.xlu2 %v4754_v17, %s6775_s17  ;;  %5792 = vrot.lane.b32.xlu0 %v4817_v27, %s6776_s18  ;;  %v5929_v17 = vsel %vm4000_vm13, %v5897_v56, %v11172_v34 }
 0xa18   : > { %5794 = vrot.lane.b32.xlu1 %v4818_v12, %s6776_s18 }
 0xa19   : > { %v5395_v62 = vpop.permute.xlu2 %5394  ;;  %v5517_v40 = vpop.permute.xlu0 %5516 }
 0xa1a   : > { %v5519_v55 = vpop.permute.xlu1 %5518  ;;  %v6023_v5 = vsel %vm2018_vm5, %v5991_v6, %v5517_v40 }
 0xa1b   : > { %v6055_v45 = vsel %vm4130_vm15, %v6023_v5, %v5645_v15  ;;  %v13105_v5 = vld [vmem:[#allocation50_spill] sm:$0xff] }
 0xa1c   : > { %v6087_v35 = vsel %vm2051_vm4, %v6055_v45, %v5773_v19  ;;  %v5928_v19 = vsel %vm4000_vm13, %v5896_v23, %v11126_v18  ;;  %v5866_v45 = vsel %vm574_vm1, %v10976_v16, %v13105_v5 }
 0xa1d   : > { %6612 = vmatmul.msk.f32.gmra.mxu2 %vm4200_vm2, %v6087_v35  ;;  %v5960_v8 = vsel %vm1985_vm3, %v5928_v19, %v11284_v24 }
 0xa1f   : > { %5412 = vrot.lane.b32.xlu2 %v4817_v27, %s6782_s12  ;;  %5666 = vrot.lane.b32.xlu0 %v4786_v53, %s6783_s13  ;;  %v5961_v27 = vsel %vm1985_vm3, %v5929_v17, %v11260_v60  ;;  %v4795_v53 = vld [vmem:[#allocation3 + $0x159] sm:$0xff] }
 0xa20   : > { %5668 = vrot.lane.b32.xlu1 %v4787_v4, %s6783_s13  ;;  %v13109_v17 = vld [vmem:[#allocation154_spill] sm:$0xff] }
 0xa21   : > { %v5779_v11 = vpop.permute.xlu2 %5778  ;;  %v5391_v61 = vpop.permute.xlu0 %5390 }
 0xa22   : > { %v5393_v30 = vpop.permute.xlu1 %5392  ;;  %v5992_v7 = vsel %vm4065_vm14, %v5960_v8, %v5391_v61 }
 0xa23   : > { %v6024_v50 = vsel %vm2018_vm5, %v5992_v7, %v5519_v55  ;;  %v13107_v7 = vld [vmem:[#allocation12_spill] sm:$0xff] }
 0xa24   : > { %v6056_v24 = vsel %vm4130_vm15, %v6024_v50, %v11528_v26  ;;  %v5993_v26 = vsel %vm4065_vm14, %v5961_v27, %v5393_v30  ;;  %v4820_v30 = vld [vmem:[#allocation3 + $0x10a] sm:$0xff]  ;;  %v5868_v27 = vsel %vm574_vm1, %v10978_v37, %v13109_v17 }
 0xa25   : > { %v6025_v6 = vsel %vm2018_vm5, %v5993_v26, %v11547_v48  ;;  %v4757_v50 = vld [vmem:[#allocation3 + $0x110] sm:$0xff] }
 0xa27   : > { %5796 = vrot.lane.b32.xlu2 %v4819_v63, %s6776_s18  ;;  %5540 = vrot.lane.b32.xlu0 %v4755_v0, %s6775_s17 }
 0xa28   : > { %5428 = vrot.lane.b32.xlu1 %v11586_v36, %s6782_s12 }
 0xa29   : > { %v11592_v18 = vpop.permute.xlu2 %5652  ;;  %v5775_v15 = vpop.permute.xlu0 %5774 }
 0xa2a   : > { %v5777_v46 = vpop.permute.xlu1 %5776  ;;  %v6088_v58 = vsel %vm2051_vm4, %v6056_v24, %v5775_v15 }
 0xa2b   : > { %6613 = vmatmul.msk.f32.gmra.mxu2 %vm4200_vm2, %v6088_v58  ;;  %v11649_v58 = vld [vmem:[#allocation3 + $0x152] sm:$0xff] }
 0xa2f   : > { %5542 = vrot.lane.b32.xlu2 %v4756_v33, %s6775_s17  ;;  %5414 = vrot.lane.b32.xlu0 %v4818_v12, %s6782_s12  ;;  %v13106_v12 = vld [vmem:[#allocation138_spill] sm:$0xff] }
 0xa30   : > { %5670 = vrot.lane.b32.xlu1 %v4788_v28, %s6783_s13  ;;  %v5898_v35 = vsel %vm326_vm0, %v5866_v45, %v13106_v12  ;;  %v13110_v28 = vld [vmem:[#allocation173_spill] sm:$0xff] }
 0xa31   : > { %v11611_v51 = vpop.permute.xlu2 %5526  ;;  %v5649_v40 = vpop.permute.xlu0 %5648  ;;  %v5930_v48 = vsel %vm4000_vm13, %v5898_v35, %v11164_v32  ;;  %v13111_v35 = vld [vmem:[#allocation97_spill] sm:$0xff] }
 0xa32   : > { %v5651_v34 = vpop.permute.xlu1 %5650  ;;  %v6057_v55 = vsel %vm4130_vm15, %v6025_v6, %v5649_v40  ;;  %v5962_v4 = vsel %vm1985_vm3, %v5930_v48, %v11304_v38  ;;  %v5867_v38 = vsel %vm574_vm1, %v10992_v14, %v13107_v7  ;;  %v5900_v6 = vsel %vm326_vm0, %v5868_v27, %v13110_v28  ;;  %v4758_v7 = vld [vmem:[#allocation3 + $0x120] sm:$0xff]  ;;  %v13117_v28 = vld [vmem:[#allocation27_spill] sm:$0xff] }
 0xa33   : > { %v6089_v60 = vsel %vm2051_vm4, %v6057_v55, %v5777_v46  ;;  %v5994_v16 = vsel %vm4065_vm14, %v5962_v4, %v5395_v62  ;;  %v13108_v62 = vld [vmem:[#allocation16_spill] sm:$0xff]  ;;  %v4764_v46 = vld [vmem:[#allocation3 + $0x168] sm:$0xff]  ;;  %v5932_v40 = vsel %vm4000_vm13, %v5900_v6, %v11184_v20 }
 0xa34   : > { %6614 = vmatmul.msk.f32.gmra.mxu2 %vm4200_vm2, %v6089_v60  ;;  %v5899_v0 = vsel %vm326_vm0, %v5867_v38, %v13108_v62  ;;  %v11671_v55 = vld [vmem:[#allocation3 + $0x112] sm:$0xff]  ;;  %v4828_v4 = vld [vmem:[#allocation3 + $0x16a] sm:$0xff] }
 0xa35   : > { %v4789_v60 = vld [vmem:[#allocation3 + $0x111] sm:$0xff] }
 0xa36   : > { %v13113_v38 = vld [vmem:[#allocation65_spill] sm:$0xff] }
 0xa37   : > { %5684 = vrot.lane.b32.xlu2 %v4795_v53, %s6783_s13  ;;  %5556 = vrot.lane.b32.xlu0 %v4763_v3, %s6775_s17  ;;  %v5869_v53 = vsel %vm574_vm1, %v10994_v44, %v13111_v35  ;;  %v13112_v3 = vld [vmem:[#allocation166_spill] sm:$0xff] }
 0xa38   : > { %5812 = vrot.lane.b32.xlu1 %v4827_v54, %s6776_s18  ;;  %v5901_v48 = vsel %vm326_vm0, %v5869_v53, %v13112_v3  ;;  %v11754_v53 = vld [vmem:[%s12164_s7] ss:$0 sm:$0xff]  ;;  %v13119_v3 = vld [vmem:[#allocation6_spill] sm:$0xff] }
 0xa39   : > { %v5401_v13 = vpop.permute.xlu2 %5400  ;;  %v5523_v23 = vpop.permute.xlu0 %5522 }
 0xa3a   : > { %v5525_v19 = vpop.permute.xlu1 %5524  ;;  %v6026_v61 = vsel %vm2018_vm5, %v5994_v16, %v5523_v23  ;;  %v5933_v16 = vsel %vm4000_vm13, %v5901_v48, %v11176_v43 }
 0xa3b   : > { %v6058_v8 = vsel %vm4130_vm15, %v6026_v61, %v5651_v34  ;;  %v5964_v34 = vsel %vm1985_vm3, %v5932_v40, %v11269_v57  ;;  %v5965_v23 = vsel %vm1985_vm3, %v5933_v16, %v11316_v10  ;;  %v5870_v10 = vsel %vm574_vm1, %v11007_v41, %v13113_v38  ;;  %v13118_v40 = vld [vmem:[#allocation38_spill] sm:$0xff] }
 0xa3c   : > { %v6090_v32 = vsel %vm2051_vm4, %v6058_v8, %v5779_v11  ;;  %v5931_v11 = vsel %vm4000_vm13, %v5899_v0, %v11138_v1 }
 0xa3d   : > { %6615 = vmatmul.msk.f32.gmra.mxu2 %vm4200_vm2, %v6090_v32  ;;  %v5963_v47 = vsel %vm1985_vm3, %v5931_v11, %v11296_v59 }
 0xa3f   : > { %5416 = vrot.lane.b32.xlu2 %v4819_v63, %s6782_s12  ;;  %5798 = vrot.lane.b32.xlu0 %v4820_v30, %s6776_s18 }
 0xa40   : > { %5544 = vrot.lane.b32.xlu1 %v4757_v50, %s6775_s17  ;;  %v11706_v50 = vld [vmem:[#allocation3 + $0x122] sm:$0xff] }
 0xa41   : > { %v5785_v15 = vpop.permute.xlu2 %5784  ;;  %v5397_v24 = vpop.permute.xlu0 %5396 }
 0xa42   : > { %v5399_v42 = vpop.permute.xlu1 %5398  ;;  %v5995_v14 = vsel %vm4065_vm14, %v5963_v47, %v5397_v24 }
 0xa43   : > { %v6027_v63 = vsel %vm2018_vm5, %v5995_v14, %v5525_v19  ;;  %v5997_v19 = vsel %vm4065_vm14, %v5965_v23, %v5401_v13  ;;  %v13114_v13 = vld [vmem:[#allocation76_spill] sm:$0xff]  ;;  %v4766_v23 = vld [vmem:[#allocation3 + $0x180] sm:$0xff] }
 0xa44   : > { %v6059_v59 = vsel %vm4130_vm15, %v6027_v63, %v11592_v18  ;;  %v5996_v18 = vsel %vm4065_vm14, %v5964_v34, %v5399_v42  ;;  %v5902_v62 = vsel %vm326_vm0, %v5870_v10, %v13114_v13  ;;  %v11720_v14 = vld [vmem:[#allocation3 + $0x172] sm:$0xff] }
 0xa45   : > { %v6028_v20 = vsel %vm2018_vm5, %v5996_v18, %v11611_v51  ;;  %v4765_v51 = vld [vmem:[#allocation3 + $0x170] sm:$0xff]  ;;  %v5934_v0 = vsel %vm4000_vm13, %v5902_v62, %v11150_v25  ;;  %v4759_v18 = vld [vmem:[#allocation3 + $0x128] sm:$0xff] }
 0xa46   : > { %v5966_v41 = vsel %vm1985_vm3, %v5934_v0, %v11306_v22  ;;  %v4797_v63 = vld [vmem:[#allocation3 + $0x171] sm:$0xff] }
 0xa47   : > { %5558 = vrot.lane.b32.xlu2 %v4764_v46, %s6775_s17  ;;  %5430 = vrot.lane.b32.xlu0 %v11649_v58, %s6782_s12 }
 0xa48   : > { %5686 = vrot.lane.b32.xlu1 %v4796_v52, %s6783_s13  ;;  %v6750_v52 = vld [vmem:[#allocation3 + $0x98] sm:$0xff] }
 0xa49   : > { %v11655_v1 = vpop.permute.xlu2 %5658  ;;  %v5781_v56 = vpop.permute.xlu0 %5780 }
 0xa4a   : > { %v5783_v26 = vpop.permute.xlu1 %5782  ;;  %v6091_v33 = vsel %vm2051_vm4, %v6059_v59, %v5781_v56  ;;  %v13115_v56 = vld [vmem:[#allocation92_spill] sm:$0xff] }
 0xa4b   : > { %6616 = vmatmul.msk.f32.gmra.mxu2 %vm4200_vm2, %v6091_v33  ;;  %v5871_v59 = vsel %vm574_vm1, %v6750_v52, %v13115_v56  ;;  %v4760_v52 = vld [vmem:[#allocation3 + $0x138] sm:$0xff] }
 0xa4f   : > { %5800 = vrot.lane.b32.xlu2 %v11671_v55, %s6776_s18  ;;  %5672 = vrot.lane.b32.xlu0 %v4789_v60, %s6783_s13  ;;  %v4791_v60 = vld [vmem:[#allocation3 + $0x129] sm:$0xff] }
 0xa50   : > { %5418 = vrot.lane.b32.xlu1 %v4820_v30, %s6782_s12 }
 0xa51   : > { %v11677_v37 = vpop.permute.xlu2 %5532  ;;  %v5655_v5 = vpop.permute.xlu0 %5654 }
 0xa52   : > { %v5657_v45 = vpop.permute.xlu1 %5656  ;;  %v6060_v57 = vsel %vm4130_vm15, %v6028_v20, %v5655_v5 }
 0xa53   : > { %v6092_v12 = vsel %vm2051_vm4, %v6060_v57, %v5783_v26  ;;  %v13116_v26 = vld [vmem:[#allocation142_spill] sm:$0xff] }
 0xa54   : > { %6617 = vmatmul.msk.f32.gmra.mxu2 %vm4200_vm2, %v6092_v12  ;;  %v5903_v33 = vsel %vm326_vm0, %v5871_v59, %v13116_v26  ;;  %v13126_v59 = vld [vmem:[#allocation77_spill] sm:$0xff] }
 0xa55   : > { %v5935_v6 = vsel %vm4000_vm13, %v5903_v33, %v13117_v28  ;;  %v13127_v28 = vld [vmem:[#allocation59_spill] sm:$0xff] }
 0xa56   : > { %v5967_v34 = vsel %vm1985_vm3, %v5935_v6, %v13118_v40 }
 0xa57   : > { %5432 = vrot.lane.b32.xlu2 %v4827_v54, %s6782_s12  ;;  %5814 = vrot.lane.b32.xlu0 %v4828_v4, %s6776_s18  ;;  %v4790_v54 = vld [vmem:[#allocation3 + $0x121] sm:$0xff] }
 0xa58   : > { %5560 = vrot.lane.b32.xlu1 %v4765_v51, %s6775_s17 }
 0xa59   : > { %v11697_v44 = vpop.permute.xlu2 %5406  ;;  %v5529_v61 = vpop.permute.xlu0 %5528 }
 0xa5a   : > { %v5531_v8 = vpop.permute.xlu1 %5530  ;;  %v6029_v32 = vsel %vm2018_vm5, %v5997_v19, %v5529_v61  ;;  %v13121_v19 = vld [vmem:[#allocation163_spill] sm:$0xff] }
 0xa5b   : > { %v6061_v43 = vsel %vm4130_vm15, %v6029_v32, %v5657_v45  ;;  %v11769_v32 = vld [vmem:[#allocation3 + $0x182] sm:$0xff] }
 0xa5c   : > { %v6093_v30 = vsel %vm2051_vm4, %v6061_v43, %v5785_v15  ;;  %v13122_v43 = vld [vmem:[#allocation43_spill] sm:$0xff] }
 0xa5d   : > { %6618 = vmatmul.msk.f32.gmra.mxu2 %vm4200_vm2, %v6093_v30  ;;  %v13123_v30 = vld [vmem:[#allocation17_spill] sm:$0xff] }
 0xa5f   : > { %5674 = vrot.lane.b32.xlu2 %v4790_v54, %s6783_s13  ;;  %5546 = vrot.lane.b32.xlu0 %v4758_v7, %s6775_s17 }
 0xa60   : > { %5802 = vrot.lane.b32.xlu1 %v11706_v50, %s6776_s18 }
 0xa61   : > { %v5791_v11 = vpop.permute.xlu2 %5790  ;;  %v5403_v15 = vpop.permute.xlu0 %5402 }
 0xa62   : > { %v5405_v24 = vpop.permute.xlu1 %5404  ;;  %v5998_v47 = vsel %vm4065_vm14, %v5966_v41, %v5403_v15 }
 0xa63   : > { %v6030_v42 = vsel %vm2018_vm5, %v5998_v47, %v5531_v8  ;;  %v4823_v47 = vld [vmem:[#allocation3 + $0x12a] sm:$0xff] }
 0xa64   : > { %v6062_v22 = vsel %vm4130_vm15, %v6030_v42, %v11655_v1  ;;  %v5999_v1 = vsel %vm4065_vm14, %v5967_v34, %v5405_v24  ;;  %v6752_v42 = vld [vmem:[#allocation3 + $0xb0] sm:$0xff] }
 0xa65   : > { %v6031_v5 = vsel %vm2018_vm5, %v5999_v1, %v11677_v37  ;;  %v11762_v37 = vld [vmem:[%s12164_s7 + $0x1] ss:$0 sm:$0xff] }
 0xa67   : > { %5816 = vrot.lane.b32.xlu2 %v11720_v14, %s6776_s18  ;;  %5688 = vrot.lane.b32.xlu0 %v4797_v63, %s6783_s13  ;;  %v13124_v63 = vld [vmem:[#allocation61_spill] sm:$0xff] }
 0xa68   : > { %5434 = vrot.lane.b32.xlu1 %v4828_v4, %s6782_s12  ;;  %v13120_v4 = vld [vmem:[#allocation9_spill] sm:$0xff] }
 0xa69   : > { %v11726_v25 = vpop.permute.xlu2 %5664  ;;  %v5787_v46 = vpop.permute.xlu0 %5786 }
 0xa6a   : > { %v5789_v17 = vpop.permute.xlu1 %5788  ;;  %v6094_v27 = vsel %vm2051_vm4, %v6062_v22, %v5787_v46  ;;  %v5873_v46 = vsel %vm574_vm1, %v6752_v42, %v13124_v63 }
 0xa6b   : > { %6619 = vmatmul.msk.f32.gmra.mxu2 %vm4200_vm2, %v6094_v27 }
 0xa6f   : > { %5548 = vrot.lane.b32.xlu2 %v4759_v18, %s6775_s17  ;;  %5420 = vrot.lane.b32.xlu0 %v11671_v55, %s6782_s12  ;;  %v6751_v55 = vld [vmem:[#allocation3 + $0xa8] sm:$0xff] }
 0xa70   : > { %5676 = vrot.lane.b32.xlu1 %v4791_v60, %s6783_s13  ;;  %v5872_v48 = vsel %vm574_vm1, %v6751_v55, %v13119_v3  ;;  %v4767_v60 = vld [vmem:[#allocation3 + $0x188] sm:$0xff]  ;;  %v6753_v3 = vld [vmem:[#allocation3 + $0xc0] sm:$0xff] }
 0xa71   : > { %v11745_v20 = vpop.permute.xlu2 %5538  ;;  %v5661_v45 = vpop.permute.xlu0 %5660  ;;  %v5904_v16 = vsel %vm326_vm0, %v5872_v48, %v13120_v4  ;;  %v13129_v48 = vld [vmem:[#allocation66_spill] sm:$0xff] }
 0xa72   : > { %v5663_v57 = vpop.permute.xlu1 %5662  ;;  %v6063_v12 = vsel %vm4130_vm15, %v6031_v5, %v5661_v45  ;;  %v5936_v61 = vsel %vm4000_vm13, %v5904_v16, %v13121_v19  ;;  %v13128_v45 = vld [vmem:[#allocation139_spill] sm:$0xff]  ;;  %v5874_v4 = vsel %vm574_vm1, %v6753_v3, %v13129_v48 }
 0xa73   : > { %v6095_v35 = vsel %vm2051_vm4, %v6063_v12, %v5789_v17  ;;  %v5968_v54 = vsel %vm1985_vm3, %v5936_v61, %v13123_v30  ;;  %v13131_v61 = vld [vmem:[#allocation96_spill] sm:$0xff] }
 0xa74   : > { %6620 = vmatmul.msk.f32.gmra.mxu2 %vm4200_vm2, %v6095_v35  ;;  %v6000_v7 = vsel %vm4065_vm14, %v5968_v54, %v11697_v44 }
 0xa76   : > { %v6235_v51 = vpop.f32.mrf.mxu2 }
 0xa77   : > { %v6333_v8 = vmul.f32 %v11754_v53, %v6235_v51  ;;  %5690 = vrot.lane.b32.xlu2 %v13122_v43, %s6783_s13  ;;  %5562 = vrot.lane.b32.xlu0 %v4766_v23, %s6775_s17  ;;  %v13130_v23 = vld [vmem:[#allocation167_spill] sm:$0xff]  ;;  %v13132_v43 = vld [vmem:[#allocation86_spill] sm:$0xff] }
 0xa78   : > { %5818 = vrot.lane.b32.xlu1 %v11769_v32, %s6776_s18 }
 0xa79   : > { %v6367_v38 = vadd.f32 %v11762_v37, %v6333_v8  ;;  %v11781_v10 = vpop.permute.xlu2 %5412  ;;  %v5535_v13 = vpop.permute.xlu0 %5534 }
 0xa7a   : > { %v5537_v62 = vpop.permute.xlu1 %5536  ;;  %v6032_v0 = vsel %vm2018_vm5, %v6000_v7, %v5535_v13  ;;  %v11839_v7 = vld [vmem:[#allocation3 + $0x13a] sm:$0xff] }
 0xa7b   : > { %v6399_v15 = vmax.f32 %v6367_v38, 0.0  ;;  %v6064_v41 = vsel %vm4130_vm15, %v6032_v0, %v5663_v57  ;;  %v4792_v38 = vld [vmem:[#allocation3 + $0x139] sm:$0xff] }
 0xa7c   : > { %v6096_v24 = vsel %vm2051_vm4, %v6064_v41, %v5791_v11  ;;  %v13125_v11 = vld [vmem:[#allocation32_spill] sm:$0xff] }
 0xa7d   : > { %6431 = vst.msk [vmem:[%s11787_s11] sm:$0xff] %vm574_vm1, %v6399_v15  ;;  %6621 = vmatmul.msk.f32.gmra.mxu2 %vm4200_vm2, %v6096_v24  ;;  %v5905_v56 = vsel %vm326_vm0, %v5873_v46, %v13125_v11  ;;  %v6754_v46 = vld [vmem:[#allocation3 + $0xc8] sm:$0xff]  ;;  %v13134_v11 = vld [vmem:[#allocation126_spill] sm:$0xff] }
 0xa7e   : > { %v6238_v44 = vpop.f32.mrf.mxu2  ;;  %v5937_v17 = vsel %vm4000_vm13, %v5905_v56, %v13126_v59  ;;  %v13135_v59 = vld [vmem:[#allocation67_spill] sm:$0xff] }
 0xa7f   : > { %v6334_v22 = vmul.f32 %v11754_v53, %v6238_v44  ;;  %5422 = vrot.lane.b32.xlu2 %v11706_v50, %s6782_s12  ;;  %5804 = vrot.lane.b32.xlu0 %v4823_v47, %s6776_s18  ;;  %v5969_v6 = vsel %vm1985_vm3, %v5937_v17, %v13127_v28 }
 0xa80   : > { %5550 = vrot.lane.b32.xlu1 %v4760_v52, %s6775_s17  ;;  %v4768_v52 = vld [vmem:[#allocation3 + $0x198] sm:$0xff] }
 0xa81   : > { %v6368_v27 = vadd.f32 %v11762_v37, %v6334_v22  ;;  %v11807_v26 = vpop.permute.xlu2 %5796  ;;  %v5409_v33 = vpop.permute.xlu0 %5408  ;;  %v13133_v22 = vld [vmem:[#allocation54_spill] sm:$0xff] }
 0xa82   : > { %v5411_v40 = vpop.permute.xlu1 %5410  ;;  %v6001_v34 = vsel %vm4065_vm14, %v5969_v6, %v5409_v33  ;;  %v13136_v33 = vld [vmem:[#allocation90_spill] sm:$0xff] }
 0xa83   : > { %v6400_v50 = vmax.f32 %v6368_v27, 0.0  ;;  %v6033_v1 = vsel %vm2018_vm5, %v6001_v34, %v5537_v62 }
 0xa84   : > { %v6065_v55 = vsel %vm4130_vm15, %v6033_v1, %v11726_v25 }
 0xa85   : > { %6432 = vst.msk [vmem:[%s11787_s11 + $0x8] sm:$0xff] %vm574_vm1, %v6400_v50 }
 0xa86   : > { %v6241_v18 = vpop.f32.mrf.mxu2 }
 0xa87   : > { %v6335_v5 = vmul.f32 %v11754_v53, %v6241_v18  ;;  %5564 = vrot.lane.b32.xlu2 %v4767_v60, %s6775_s17  ;;  %5436 = vrot.lane.b32.xlu0 %v11720_v14, %s6782_s12  ;;  %v5906_v14 = vsel %vm326_vm0, %v5874_v4, %v13130_v23  ;;  %v6755_v23 = vld [vmem:[#allocation3 + $0x128] sm:$0xff] }
 0xa88   : > { %5692 = vrot.lane.b32.xlu1 %v13128_v45, %s6783_s13  ;;  %v5938_v8 = vsel %vm4000_vm13, %v5906_v14, %v13131_v61  ;;  %v13137_v14 = vld [vmem:[#allocation117_spill] sm:$0xff] }
 0xa89   : > { %v6369_v57 = vadd.f32 %v11762_v37, %v6335_v5  ;;  %v11822_v12 = vpop.permute.xlu2 %5542  ;;  %v5793_v35 = vpop.permute.xlu0 %5792  ;;  %v5970_v30 = vsel %vm1985_vm3, %v5938_v8, %v13132_v43  ;;  %v13138_v8 = vld [vmem:[#allocation95_spill] sm:$0xff]  ;;  %v6756_v43 = vld [vmem:[#allocation3 + $0xd8] sm:$0xff] }
 0xa8a   : > { %v5795_v16 = vpop.permute.xlu1 %5794  ;;  %v6097_v51 = vsel %vm2051_vm4, %v6065_v55, %v5793_v35  ;;  %v6002_v25 = vsel %vm4065_vm14, %v5970_v30, %v5411_v40  ;;  %v13139_v30 = vld [vmem:[#allocation13_spill] sm:$0xff] }
 0xa8b   : > { %v6401_v19 = vmax.f32 %v6369_v57, 0.0  ;;  %6622 = vmatmul.msk.f32.gmra.mxu2 %vm4200_vm2, %v6097_v51  ;;  %v6034_v15 = vsel %vm2018_vm5, %v6002_v25, %v11745_v20  ;;  %v4831_v20 = vld [vmem:[#allocation3 + $0x18a] sm:$0xff]  ;;  %v4793_v57 = vld [vmem:[#allocation3 + $0x141] sm:$0xff]  ;;  %v4800_v51 = vld [vmem:[#allocation3 + $0x199] sm:$0xff]  ;;  %v5876_v25 = vsel %vm574_vm1, %v6756_v43, %v13139_v30 }
 0xa8d   : > { %6433 = vst.msk [vmem:[%s11787_s11 + $0x10] sm:$0xff] %vm574_vm1, %v6401_v19  ;;  %v5883_v19 = vsel %vm574_vm1, %v6755_v23, %v13137_v14  ;;  %v13146_v23 = vld [vmem:[#allocation127_spill] sm:$0xff] }
 0xa8e   : > { %v6244_v54 = vpop.f32.mrf.mxu2 }
 0xa8f   : > { %v6336_v13 = vmul.f32 %v11754_v53, %v6244_v54  ;;  %5806 = vrot.lane.b32.xlu2 %v11839_v7, %s6776_s18  ;;  %5678 = vrot.lane.b32.xlu0 %v4792_v38, %s6783_s13  ;;  %v13140_v54 = vld [vmem:[#allocation172_spill] sm:$0xff] }
 0xa90   : > { %5424 = vrot.lane.b32.xlu1 %v4823_v47, %s6782_s12  ;;  %v5875_v47 = vsel %vm574_vm1, %v6754_v46, %v13133_v22  ;;  %v13144_v22 = vld [vmem:[#allocation36_spill] sm:$0xff] }
 0xa91   : > { %v6370_v62 = vadd.f32 %v11762_v37, %v6336_v13  ;;  %v11847_v0 = vpop.permute.xlu2 %5684  ;;  %v5667_v41 = vpop.permute.xlu0 %5666  ;;  %v5907_v56 = vsel %vm326_vm0, %v5875_v47, %v13134_v11  ;;  %v13141_v13 = vld [vmem:[#allocation136_spill] sm:$0xff] }
 0xa92   : > { %v5669_v24 = vpop.permute.xlu1 %5668  ;;  %v6066_v44 = vsel %vm4130_vm15, %v6034_v15, %v5667_v41  ;;  %v5939_v17 = vsel %vm4000_vm13, %v5907_v56, %v13135_v59  ;;  %v13142_v15 = vld [vmem:[#allocation135_spill] sm:$0xff] }
 0xa93   : > { %v6402_v42 = vmax.f32 %v6370_v62, 0.0  ;;  %v6098_v63 = vsel %vm2051_vm4, %v6066_v44, %v5795_v16  ;;  %v5971_v28 = vsel %vm1985_vm3, %v5939_v17, %v13136_v33  ;;  %v4832_v16 = vld [vmem:[#allocation3 + $0x19a] sm:$0xff]  ;;  %v5908_v62 = vsel %vm326_vm0, %v5876_v25, %v13141_v13  ;;  %v4762_v33 = vld [vmem:[#allocation3 + $0x150] sm:$0xff] }
 0xa94   : > { %6623 = vmatmul.msk.f32.gmra.mxu2 %vm4200_vm2, %v6098_v63  ;;  %v6003_v40 = vsel %vm4065_vm14, %v5971_v28, %v11781_v10  ;;  %v4761_v10 = vld [vmem:[#allocation3 + $0x140] sm:$0xff] }
 0xa95   : > { %6434 = vst.msk [vmem:[%s11787_s11 + $0x18] sm:$0xff] %vm574_vm1, %v6402_v42 }
 0xa97   : > { %5438 = vrot.lane.b32.xlu2 %v11769_v32, %s6782_s12  ;;  %5820 = vrot.lane.b32.xlu0 %v4831_v20, %s6776_s18  ;;  %v6247_v27 = vpop.f32.mrf.mxu2 }
 0xa98   : > { %5566 = vrot.lane.b32.xlu1 %v4768_v52, %s6775_s17  ;;  %v6337_v6 = vmul.f32 %v11754_v53, %v6247_v27 }
 0xa99   : > { %v11871_v50 = vpop.permute.xlu2 %5416  ;;  %v5541_v34 = vpop.permute.xlu0 %5540 }
 0xa9a   : > { %v6371_v1 = vadd.f32 %v11762_v37, %v6337_v6  ;;  %v5429_v32 = vpop.permute.xlu1 %5428  ;;  %v6035_v18 = vsel %vm2018_vm5, %v6003_v40, %v5541_v34  ;;  %v4794_v6 = vld [vmem:[#allocation3 + $0x151] sm:$0xff] }
 0xa9b   : > { %v6067_v60 = vsel %vm4130_vm15, %v6035_v18, %v5669_v24  ;;  %v13143_v24 = vld [vmem:[#allocation145_spill] sm:$0xff] }
 0xa9c   : > { %v6403_v5 = vmax.f32 %v6371_v1, 0.0  ;;  %v6099_v45 = vsel %vm2051_vm4, %v6067_v60, %v11807_v26  ;;  %v5940_v44 = vsel %vm4000_vm13, %v5908_v62, %v13143_v24  ;;  %v4769_v60 = vld [vmem:[#allocation3 + $0x1a0] sm:$0xff] }
 0xa9d   : > { %6624 = vmatmul.msk.f32.gmra.mxu2 %vm4200_vm2, %v6099_v45  ;;  %v5972_v47 = vsel %vm1985_vm3, %v5940_v44, %v13144_v22 }
 0xa9e   : > { %6435 = vst.msk [vmem:[%s11787_s11 + $0x20] sm:$0xff] %vm574_vm1, %v6403_v5  ;;  %v4833_v5 = vld [vmem:[#allocation3 + $0x1a2] sm:$0xff] }
 0xa9f   : > { %5680 = vrot.lane.b32.xlu2 %v4793_v57, %s6783_s13  ;;  %5552 = vrot.lane.b32.xlu0 %v4761_v10, %s6775_s17 }
 0xaa0   : > { %5808 = vrot.lane.b32.xlu1 %v11586_v36, %s6776_s18  ;;  %v6250_v35 = vpop.f32.mrf.mxu2  ;;  %v5915_v36 = vsel %vm326_vm0, %v5883_v19, %v13138_v8  ;;  %v13147_v19 = vld [vmem:[#allocation170_spill] sm:$0xff]  ;;  %v13148_v8 = vld [vmem:[#allocation149_spill] sm:$0xff] }
 0xaa1   : > { %v6338_v55 = vmul.f32 %v11754_v53, %v6250_v35  ;;  %v11886_v3 = vpop.permute.xlu2 %5558  ;;  %v5415_v26 = vpop.permute.xlu0 %5414  ;;  %v5947_v38 = vsel %vm4000_vm13, %v5915_v36, %v13140_v54 }
 0xaa2   : > { %v5671_v48 = vpop.permute.xlu1 %5670  ;;  %v5979_v41 = vsel %vm1985_vm3, %v5947_v38, %v13142_v15  ;;  %v6004_v56 = vsel %vm4065_vm14, %v5972_v47, %v5415_v26  ;;  %v6757_v26 = vld [vmem:[#allocation3 + $0xe0] sm:$0xff] }
 0xaa3   : > { %v6372_v4 = vadd.f32 %v11762_v37, %v6338_v55  ;;  %v6011_v42 = vsel %vm4065_vm14, %v5979_v41, %v5429_v32  ;;  %v6036_v17 = vsel %vm2018_vm5, %v6004_v56, %v11822_v12 }
 0xaa4   : > { %v6068_v34 = vsel %vm4130_vm15, %v6036_v17, %v5671_v48  ;;  %v13145_v48 = vld [vmem:[#allocation8_spill] sm:$0xff] }
 0xaa5   : > { %v6404_v61 = vmax.f32 %v6372_v4, 0.0  ;;  %v5877_v4 = vsel %vm574_vm1, %v6757_v26, %v13145_v48 }
 0xaa6   : > { %v5909_v14 = vsel %vm326_vm0, %v5877_v4, %v13146_v23 }
 0xaa7   : > { %6436 = vst.msk [vmem:[%s11787_s11 + $0x28] sm:$0xff] %vm574_vm1, %v6404_v61  ;;  %5822 = vrot.lane.b32.xlu2 %v4832_v16, %s6776_s18  ;;  %5694 = vrot.lane.b32.xlu0 %v4800_v51, %s6783_s13  ;;  %v5941_v61 = vsel %vm4000_vm13, %v5909_v14, %v13147_v19  ;;  %v6759_v14 = vld [vmem:[#allocation3 + $0x150] sm:$0xff] }
 0xaa8   : > { %5440 = vrot.lane.b32.xlu1 %v4831_v20, %s6782_s12  ;;  %v5973_v36 = vsel %vm1985_vm3, %v5941_v61, %v13148_v8  ;;  %v13152_v19 = vld [vmem:[#allocation124_spill] sm:$0xff] }
 0xaa9   : > { %v5801_v63 = vpop.permute.xlu2 %5800  ;;  %v5557_v46 = vpop.permute.xlu0 %5556  ;;  %v6005_v43 = vsel %vm4065_vm14, %v5973_v36, %v11871_v50  ;;  %v5886_v61 = vsel %vm574_vm1, %v6759_v14, %v13152_v19  ;;  %v13153_v36 = vld [vmem:[#allocation118_spill] sm:$0xff] }
 0xaaa   : > { %v5813_v52 = vpop.permute.xlu1 %5812  ;;  %v6043_v11 = vsel %vm2018_vm5, %v6011_v42, %v5557_v46 }
 0xaab   : > { %v6075_v59 = vsel %vm4130_vm15, %v6043_v11, %v11847_v0  ;;  %v13150_v11 = vld [vmem:[#allocation44_spill] sm:$0xff] }
 0xaac   : > { %v6107_v20 = vsel %vm2051_vm4, %v6075_v59, %v5813_v52  ;;  %v13149_v52 = vld [vmem:[#allocation60_spill] sm:$0xff]  ;;  %v13151_v59 = vld [vmem:[#allocation129_spill] sm:$0xff] }
 0xaad   : > { %6632 = vmatmul.msk.f32.vlgmr.msra.gmra.mxu3 %vm4200_vm2, %v6107_v20 }
 0xaae   : > { %v6253_v27 = vpop.f32.mrf.mxu2 }
 0xaaf   : > { %v6339_v28 = vmul.f32 %v11754_v53, %v6253_v27  ;;  %5554 = vrot.lane.b32.xlu2 %v4762_v33, %s6775_s17  ;;  %5426 = vrot.lane.b32.xlu0 %v11839_v7, %s6782_s12  ;;  %v4801_v7 = vld [vmem:[#allocation3 + $0x1a1] sm:$0xff] }
 0xab0   : > { %5682 = vrot.lane.b32.xlu1 %v4794_v6, %s6783_s13 }
 0xab1   : > { %v6373_v0 = vadd.f32 %v11762_v37, %v6339_v28  ;;  %v5799_v40 = vpop.permute.xlu0 %5798  ;;  %v11926_v12 = vpop.permute.xlu2 %5432 }
 0xab2   : > { %v5545_v1 = vpop.permute.xlu1 %5544  ;;  %v6100_v32 = vsel %vm2051_vm4, %v6068_v34, %v5799_v40 }
 0xab3   : > { %v6405_v18 = vmax.f32 %v6373_v0, 0.0  ;;  %6625 = vmatmul.msk.f32.gmra.mxu2 %vm4200_vm2, %v6100_v32  ;;  %v6037_v25 = vsel %vm2018_vm5, %v6005_v43, %v5545_v1  ;;  %v5918_v43 = vsel %vm326_vm0, %v5886_v61, %v13153_v36 }
 0xab5   : > { %6437 = vst.msk [vmem:[%s11787_s11 + $0x30] sm:$0xff] %vm574_vm1, %v6405_v18 }
 0xab7   : > { %5568 = vrot.lane.b32.xlu0 %v4769_v60, %s6775_s17  ;;  %v6256_v45 = vpop.f32.mrf.mxu2  ;;  %5696 = vrot.lane.b32.xlu2 %v4801_v7, %s6783_s13  ;;  %v6013_v60 = vsel %vm4065_vm14, %v11386_v21, %v11926_v12 }
 0xab8   : > { %v6340_v57 = vmul.f32 %v11754_v53, %v6256_v45  ;;  %5824 = vrot.lane.b32.xlu1 %v4833_v5, %s6776_s18 }
 0xab9   : > { %v5431_v10 = vpop.permute.xlu0 %5430  ;;  %v5675_v51 = vpop.permute.xlu2 %5674 }
 0xaba   : > { %v6374_v35 = vadd.f32 %v11762_v37, %v6340_v57  ;;  %v5687_v55 = vpop.permute.xlu1 %5686  ;;  %v6012_v15 = vsel %vm4065_vm14, %v11422_v49, %v5431_v10  ;;  %v6758_v49 = vld [vmem:[#allocation3 + $0xf0] sm:$0xff] }
 0xabb   : > { %v6044_v50 = vsel %vm2018_vm5, %v6012_v15, %v11886_v3 }
 0xabc   : > { %v6406_v16 = vmax.f32 %v6374_v35, 0.0  ;;  %v6076_v46 = vsel %vm4130_vm15, %v6044_v50, %v5687_v55 }
 0xabe   : > { %6438 = vst.msk [vmem:[%s11787_s11 + $0x38] sm:$0xff] %vm574_vm1, %v6406_v16 }
 0xabf   : > { %5810 = vrot.lane.b32.xlu0 %v11649_v58, %s6776_s18 }
 0xac0   : > { %v6259_v30 = vpop.f32.mrf.mxu2 }
 0xac1   : > { %v6341_v54 = vmul.f32 %v11754_v53, %v6259_v30  ;;  %v5673_v38 = vpop.permute.xlu0 %5672  ;;  %v5817_v44 = vpop.permute.xlu2 %5816  ;;  %v6760_v30 = vld [vmem:[#allocation3 + $0xf8] sm:$0xff] }
 0xac2   : > { %v5419_v13 = vpop.permute.xlu1 %5418  ;;  %v6069_v62 = vsel %vm4130_vm15, %v6037_v25, %v5673_v38  ;;  %v13154_v25 = vld [vmem:[#allocation37_spill] sm:$0xff]  ;;  %v13155_v38 = vld [vmem:[#allocation19_spill] sm:$0xff] }
 0xac3   : > { %v6375_v41 = vadd.f32 %v11762_v37, %v6341_v54  ;;  %v6101_v24 = vsel %vm2051_vm4, %v6069_v62, %v5801_v63  ;;  %v5878_v63 = vsel %vm574_vm1, %v6758_v49, %v13149_v52  ;;  %v5879_v54 = vsel %vm574_vm1, %v6760_v30, %v13154_v25  ;;  %v13156_v62 = vld [vmem:[#allocation72_spill] sm:$0xff] }
 0xac4   : > { %6626 = vmatmul.msk.f32.gmra.mxu2 %vm4200_vm2, %v6101_v24  ;;  %v5910_v56 = vsel %vm326_vm0, %v5878_v63, %v13150_v11  ;;  %v5911_v15 = vsel %vm326_vm0, %v5879_v54, %v13156_v62 }
 0xac5   : > { %v6407_v58 = vmax.f32 %v6375_v41, 0.0  ;;  %v5942_v20 = vsel %vm4000_vm13, %v5910_v56, %v13151_v59  ;;  %v13157_v41 = vld [vmem:[#allocation78_spill] sm:$0xff] }
 0xac6   : > { %v5974_v27 = vsel %vm1985_vm3, %v5942_v20, %v11354_v31 }
 0xac7   : > { %6439 = vst.msk [vmem:[%s11787_s11 + $0x40] sm:$0xff] %vm574_vm1, %v6407_v58  ;;  %v6006_v28 = vsel %vm4065_vm14, %v5974_v27, %v5419_v13  ;;  %v5950_v13 = vsel %vm4000_vm13, %v5918_v43, %v13155_v38  ;;  %v13158_v58 = vld [vmem:[#allocation85_spill] sm:$0xff] }
 0xac8   : > { %v5982_v24 = vsel %vm1985_vm3, %v5950_v13, %v13157_v41  ;;  %v5943_v50 = vsel %vm4000_vm13, %v5911_v15, %v13158_v58 }
 0xac9   : > { %v5815_v42 = vpop.permute.xlu0 %5814  ;;  %v5549_v33 = vpop.permute.xlu2 %5548 }
 0xaca   : > { %v5561_v22 = vpop.permute.xlu1 %5560  ;;  %v6108_v47 = vsel %vm2051_vm4, %v6076_v46, %v5815_v42  ;;  %v13159_v46 = vld [vmem:[#allocation161_spill] sm:$0xff] }
 0xacb   : > { %6633 = vmatmul.msk.f32.gmra.mxu3 %vm4200_vm2, %v6108_v47  ;;  %v6045_v7 = vsel %vm2018_vm5, %v6013_v60, %v5561_v22  ;;  %v5975_v22 = vsel %vm1985_vm3, %v5943_v50, %v13159_v46  ;;  %v6761_v60 = vld [vmem:[#allocation3 + $0x108] sm:$0xff] }
 0xace   : > { %v6262_v3 = vpop.f32.mrf.mxu2 }
 0xacf   : > { %v6342_v17 = vmul.f32 %v11754_v53, %v6262_v3 }
 0xad1   : > { %v6376_v6 = vadd.f32 %v11762_v37, %v6342_v17  ;;  %v5547_v0 = vpop.permute.xlu0 %5546  ;;  %v5691_v57 = vpop.permute.xlu2 %5690 }
 0xad2   : > { %v5803_v40 = vpop.permute.xlu1 %5802  ;;  %v6038_v34 = vsel %vm2018_vm5, %v6006_v28, %v5547_v0 }
 0xad3   : > { %v6408_v1 = vmax.f32 %v6376_v6, 0.0  ;;  %v6070_v32 = vsel %vm4130_vm15, %v6038_v34, %v5675_v51 }
 0xad4   : > { %v6102_v18 = vsel %vm2051_vm4, %v6070_v32, %v5803_v40 }
 0xad5   : > { %6440 = vst.msk [vmem:[%s11787_s11 + $0x48] sm:$0xff] %vm574_vm1, %v6408_v1  ;;  %6627 = vmatmul.msk.f32.gmra.mxu2 %vm4200_vm2, %v6102_v18 }
 0xad7   : > { %v6265_v31 = vpop.f32.mrf.mxu2 }
 0xad8   : > { %v6343_v5 = vmul.f32 %v11754_v53, %v6265_v31 }
 0xad9   : > { %v5689_v45 = vpop.permute.xlu0 %5688  ;;  %v5423_v23 = vpop.permute.xlu2 %5422 }
 0xada   : > { %v6377_v10 = vadd.f32 %v11762_v37, %v6343_v5  ;;  %v5435_v35 = vpop.permute.xlu1 %5434  ;;  %v6077_v55 = vsel %vm4130_vm15, %v6045_v7, %v5689_v45  ;;  %v13160_v5 = vld [vmem:[#allocation28_spill] sm:$0xff] }
 0xadb   : > { %v6109_v26 = vsel %vm2051_vm4, %v6077_v55, %v5817_v44  ;;  %v6014_v44 = vsel %vm4065_vm14, %v5982_v24, %v5435_v35  ;;  %v5880_v7 = vsel %vm574_vm1, %v6761_v60, %v13160_v5  ;;  %v13162_v35 = vld [vmem:[#allocation153_spill] sm:$0xff] }
 0xadc   : > { %v6409_v48 = vmax.f32 %v6377_v10, 0.0  ;;  %6634 = vmatmul.msk.f32.gmra.mxu3 %vm4200_vm2, %v6109_v26  ;;  %v13163_v26 = vld [vmem:[#allocation55_spill] sm:$0xff]  ;;  %v13166_v60 = vld [vmem:[#allocation101_spill] sm:$0xff] }
 0xade   : > { %6441 = vst.msk [vmem:[%s11787_s11 + $0x50] sm:$0xff] %vm574_vm1, %v6409_v48 }
 0xae0   : > { %v6268_v21 = vpop.f32.mrf.mxu2 }
 0xae1   : > { %v6344_v12 = vmul.f32 %v11754_v53, %v6268_v21  ;;  %v5421_v4 = vpop.permute.xlu0 %5420  ;;  %v5565_v56 = vpop.permute.xlu2 %5564 }
 0xae2   : > { %v5677_v16 = vpop.permute.xlu1 %5676  ;;  %v6007_v52 = vsel %vm4065_vm14, %v5975_v22, %v5421_v4 }
 0xae3   : > { %v6378_v51 = vadd.f32 %v11762_v37, %v6344_v12  ;;  %v6039_v3 = vsel %vm2018_vm5, %v6007_v52, %v5549_v33 }
 0xae4   : > { %v6071_v28 = vsel %vm4130_vm15, %v6039_v3, %v5677_v16 }
 0xae5   : > { %v6410_v8 = vmax.f32 %v6378_v51, 0.0 }
 0xae7   : > { %6442 = vst.msk [vmem:[%s11787_s11 + $0x58] sm:$0xff] %vm574_vm1, %v6410_v8 }
 0xae9   : > { %v5563_v42 = vpop.permute.xlu0 %5562  ;;  %v5807_v1 = vpop.permute.xlu2 %5806 }
 0xaea   : > { %v5819_v47 = vpop.permute.xlu1 %5818  ;;  %v6046_v49 = vsel %vm2018_vm5, %v6014_v44, %v5563_v42 }
 0xaeb   : > { %v6078_v63 = vsel %vm4130_vm15, %v6046_v49, %v5691_v57  ;;  %v13161_v57 = vld [vmem:[#allocation109_spill] sm:$0xff] }
 0xaec   : > { %v6110_v11 = vsel %vm2051_vm4, %v6078_v63, %v5819_v47  ;;  %v5912_v10 = vsel %vm326_vm0, %v5880_v7, %v13161_v57 }
 0xaed   : > { %6635 = vmatmul.msk.f32.gmra.mxu3 %vm4200_vm2, %v6110_v11  ;;  %v5944_v55 = vsel %vm4000_vm13, %v5912_v10, %v13162_v35 }
 0xaee   : > { %v6271_v59 = vpop.f32.mrf.mxu2  ;;  %v5976_v48 = vsel %vm1985_vm3, %v5944_v55, %v13163_v26  ;;  %v13167_v26 = vld [vmem:[#allocation141_spill] sm:$0xff] }
 0xaef   : > { %v6345_v20 = vmul.f32 %v11754_v53, %v6271_v59  ;;  %v6008_v21 = vsel %vm4065_vm14, %v5976_v48, %v5423_v23 }
 0xaf1   : > { %v6379_v17 = vadd.f32 %v11762_v37, %v6345_v20  ;;  %v5805_v27 = vpop.permute.xlu0 %5804  ;;  %v5439_v14 = vpop.permute.xlu2 %5438 }
 0xaf2   : > { %v5551_v6 = vpop.permute.xlu1 %5550  ;;  %v6103_v0 = vsel %vm2051_vm4, %v6071_v28, %v5805_v27 }
 0xaf3   : > { %v6411_v40 = vmax.f32 %v6379_v17, 0.0  ;;  %6628 = vmatmul.msk.f32.gmra.mxu2 %vm4200_vm2, %v6103_v0  ;;  %v6040_v4 = vsel %vm2018_vm5, %v6008_v21, %v5551_v6 }
 0xaf5   : > { %6443 = vst.msk [vmem:[%s11787_s11 + $0x60] sm:$0xff] %vm574_vm1, %v6411_v40 }
 0xaf7   : > { %v6274_v34 = vpop.f32.mrf.mxu2 }
 0xaf8   : > { %v6346_v33 = vmul.f32 %v11754_v53, %v6274_v34  ;;  %v6762_v34 = vld [vmem:[#allocation3 + $0x170] sm:$0xff] }
 0xaf9   : > { %v5437_v32 = vpop.permute.xlu0 %5436 }
 0xafa   : > { %v6380_v18 = vadd.f32 %v11762_v37, %v6346_v33  ;;  %v5693_v31 = vpop.permute.xlu1 %5692  ;;  %v6015_v8 = vsel %vm4065_vm14, %v11444_v39, %v5437_v32  ;;  %v5681_v39 = vpop.permute.xlu2 %5680 }
 0xafb   : > { %v6047_v30 = vsel %vm2018_vm5, %v6015_v8, %v5565_v56 }
 0xafc   : > { %v6412_v45 = vmax.f32 %v6380_v18, 0.0  ;;  %v6079_v54 = vsel %vm4130_vm15, %v6047_v30, %v5693_v31  ;;  %v13165_v18 = vld [vmem:[#allocation26_spill] sm:$0xff] }
 0xafe   : > { %6444 = vst.msk [vmem:[%s11787_s11 + $0x68] sm:$0xff] %vm574_vm1, %v6412_v45 }
 0xb00   : > { %v6277_v12 = vpop.f32.mrf.mxu2 }
 0xb01   : > { %v6347_v16 = vmul.f32 %v11754_v53, %v6277_v12  ;;  %v5679_v51 = vpop.permute.xlu0 %5678 }
 0xb02   : > { %v5425_v19 = vpop.permute.xlu1 %5424  ;;  %v6072_v61 = vsel %vm4130_vm15, %v6040_v4, %v5679_v51  ;;  %v5823_v47 = vpop.permute.xlu2 %5822 }
 0xb03   : > { %v6381_v36 = vadd.f32 %v11762_v37, %v6347_v16  ;;  %v6104_v43 = vsel %vm2051_vm4, %v6072_v61, %v5807_v1  ;;  %v6009_v41 = vsel %vm4065_vm14, %v11383_v9, %v5425_v19  ;;  %v6016_v9 = vsel %vm4065_vm14, %v11425_v2, %v5439_v14  ;;  %v13164_v1 = vld [vmem:[#allocation15_spill] sm:$0xff] }
 0xb04   : > { %6629 = vmatmul.msk.f32.gmra.mxu2 %vm4200_vm2, %v6104_v43  ;;  %v5889_v33 = vsel %vm574_vm1, %v6762_v34, %v13164_v1 }
 0xb05   : > { %v6413_v23 = vmax.f32 %v6381_v36, 0.0  ;;  %v5921_v31 = vsel %vm326_vm0, %v5889_v33, %v13165_v18 }
 0xb06   : > { %v5953_v5 = vsel %vm4000_vm13, %v5921_v31, %v13166_v60 }
 0xb07   : > { %6445 = vst.msk [vmem:[%s11787_s11 + $0x70] sm:$0xff] %vm574_vm1, %v6413_v23  ;;  %v5985_v7 = vsel %vm1985_vm3, %v5953_v5, %v11352_v29 }
 0xb09   : > { %v5821_v25 = vpop.permute.xlu0 %5820 }
 0xb0a   : > { %v5567_v38 = vpop.permute.xlu1 %5566  ;;  %v6111_v13 = vsel %vm2051_vm4, %v6079_v54, %v5821_v25  ;;  %v5555_v27 = vpop.permute.xlu2 %5554 }
 0xb0b   : > { %6636 = vmatmul.msk.f32.gmra.mxu3 %vm4200_vm2, %v6111_v13  ;;  %v6048_v63 = vsel %vm2018_vm5, %v6016_v9, %v5567_v38 }
 0xb0e   : > { %v6280_v62 = vpop.f32.mrf.mxu2 }
 0xb0f   : > { %v6348_v15 = vmul.f32 %v11754_v53, %v6280_v62 }
 0xb11   : > { %v6382_v24 = vadd.f32 %v11762_v37, %v6348_v15  ;;  %v5553_v58 = vpop.permute.xlu0 %5552 }
 0xb12   : > { %v5809_v50 = vpop.permute.xlu1 %5808  ;;  %v6041_v44 = vsel %vm2018_vm5, %v6009_v41, %v5553_v58  ;;  %v5697_v45 = vpop.permute.xlu2 %5696 }
 0xb13   : > { %v6414_v42 = vmax.f32 %v6382_v24, 0.0  ;;  %v6073_v46 = vsel %vm4130_vm15, %v6041_v44, %v5681_v39 }
 0xb14   : > { %v6105_v22 = vsel %vm2051_vm4, %v6073_v46, %v5809_v50 }
 0xb15   : > { %6446 = vst.msk [vmem:[%s11787_s11 + $0x78] sm:$0xff] %vm574_vm1, %v6414_v42  ;;  %6630 = vmatmul.msk.f32.gmra.mxu2 %vm4200_vm2, %v6105_v22 }
 0xb17   : > { %v6283_v49 = vpop.f32.mrf.mxu2 }
 0xb18   : > { %v6349_v52 = vmul.f32 %v11754_v53, %v6283_v49 }
 0xb19   : > { %v5695_v11 = vpop.permute.xlu0 %5694 }
 0xb1a   : > { %v6383_v56 = vadd.f32 %v11762_v37, %v6349_v52  ;;  %v5441_v3 = vpop.permute.xlu1 %5440  ;;  %v6080_v59 = vsel %vm4130_vm15, %v6048_v63, %v5695_v11 }
 0xb1b   : > { %v6112_v20 = vsel %vm2051_vm4, %v6080_v59, %v5823_v47  ;;  %v6017_v57 = vsel %vm4065_vm14, %v5985_v7, %v5441_v3 }
 0xb1c   : > { %v6415_v17 = vmax.f32 %v6383_v56, 0.0  ;;  %6637 = vmatmul.msk.f32.gmra.mxu3 %vm4200_vm2, %v6112_v20 }
 0xb1e   : > { %6447 = vst.msk [vmem:[%s11787_s11 + $0x80] sm:$0xff] %vm574_vm1, %v6415_v17 }
 0xb20   : > { %v6286_v2 = vpop.f32.mrf.mxu2 }
 0xb21   : > { %v6350_v28 = vmul.f32 %v11754_v53, %v6286_v2  ;;  %v5427_v6 = vpop.permute.xlu0 %5426 }
 0xb22   : > { %v5683_v0 = vpop.permute.xlu1 %5682  ;;  %v6010_v48 = vsel %vm4065_vm14, %v13167_v26, %v5427_v6 }
 0xb23   : > { %v6384_v40 = vadd.f32 %v11762_v37, %v6350_v28  ;;  %v6042_v29 = vsel %vm2018_vm5, %v6010_v48, %v5555_v27 }
 0xb24   : > { %v6074_v51 = vsel %vm4130_vm15, %v6042_v29, %v5683_v0 }
 0xb25   : > { %v6416_v32 = vmax.f32 %v6384_v40, 0.0 }
 0xb27   : > { %6448 = vst.msk [vmem:[%s11787_s11 + $0x88] sm:$0xff] %vm574_vm1, %v6416_v32 }
 0xb29   : > { %v5569_v10 = vpop.permute.xlu0 %5568 }
 0xb2a   : > { %v6049_v35 = vsel %vm2018_vm5, %v6017_v57, %v5569_v10  ;;  %v5825_v55 = vpop.permute.xlu1 %5824 }
 0xb2b   : > { %v6081_v21 = vsel %vm4130_vm15, %v6049_v35, %v5697_v45 }
 0xb2c   : > { %v6113_v12 = vsel %vm2051_vm4, %v6081_v21, %v5825_v55 }
 0xb2d   : > { %6638 = vmatmul.msk.f32.gmra.mxu3 %vm4200_vm2, %v6113_v12 }
 0xb30   : > { %v6310_v4 = vpop.f32.mrf.mxu3 }
 0xb31   : > { %v6358_v16 = vmul.f32 %v11754_v53, %v6310_v4  ;;  %v5811_v14 = vpop.permute.xlu0 %5810 }
 0xb32   : > { %v6106_v19 = vsel %vm2051_vm4, %v6074_v51, %v5811_v14 }
 0xb33   : > { %v6392_v61 = vadd.f32 %v11762_v37, %v6358_v16  ;;  %6631 = vmatmul.msk.f32.gmra.mxu2 %vm4200_vm2, %v6106_v19 }
 0xb35   : > { %v6424_v8 = vmax.f32 %v6392_v61, 0.0 }
 0xb36   : > { %v6289_v36 = vpop.f32.mrf.mxu2 }
 0xb37   : > { %6456 = vst.msk [vmem:[%s11787_s11 + $0xc8] sm:$0xff] %vm574_vm1, %v6424_v8  ;;  %v6351_v43 = vmul.f32 %v11754_v53, %v6289_v36 }
 0xb39   : > { %v6385_v23 = vadd.f32 %v11762_v37, %v6351_v43 }
 0xb3b   : > { %v6417_v30 = vmax.f32 %v6385_v23, 0.0 }
 0xb3d   : > { %6449 = vst.msk [vmem:[%s11787_s11 + $0x90] sm:$0xff] %vm574_vm1, %v6417_v30 }
 0xb47   : > { %v6292_v25 = vpop.f32.mrf.mxu2 }
 0xb48   : > { %v6352_v54 = vmul.f32 %v11754_v53, %v6292_v25 }
 0xb4a   : > { %v6386_v38 = vadd.f32 %v11762_v37, %v6352_v54 }
 0xb4c   : > { %v6418_v13 = vmax.f32 %v6386_v38, 0.0 }
 0xb4e   : > { %6450 = vst.msk [vmem:[%s11787_s11 + $0x98] sm:$0xff] %vm574_vm1, %v6418_v13  ;;  %v6313_v39 = vpop.f32.mrf.mxu3 }
 0xb4f   : > { %v6359_v62 = vmul.f32 %v11754_v53, %v6313_v39 }
 0xb51   : > { %v6393_v15 = vadd.f32 %v11762_v37, %v6359_v62 }
 0xb53   : > { %v6425_v41 = vmax.f32 %v6393_v15, 0.0 }
 0xb55   : > { %6457 = vst.msk [vmem:[%s11787_s11 + $0xd0] sm:$0xff] %vm574_vm1, %v6425_v41 }
 0xb58   : > { %v6295_v24 = vpop.f32.mrf.mxu2 }
 0xb59   : > { %v6353_v58 = vmul.f32 %v11754_v53, %v6295_v24 }
 0xb5b   : > { %v6387_v50 = vadd.f32 %v11762_v37, %v6353_v58 }
 0xb5d   : > { %v6419_v44 = vmax.f32 %v6387_v50, 0.0 }
 0xb5f   : > { %6451 = vst.msk [vmem:[%s11787_s11 + $0xa0] sm:$0xff] %vm574_vm1, %v6419_v44  ;;  %v6316_v42 = vpop.f32.mrf.mxu3 }
 0xb60   : > { %v6360_v46 = vmul.f32 %v11754_v53, %v6316_v42 }
 0xb62   : > { %v6394_v22 = vadd.f32 %v11762_v37, %v6360_v46 }
 0xb64   : > { %v6426_v47 = vmax.f32 %v6394_v22, 0.0 }
 0xb66   : > { %6458 = vst.msk [vmem:[%s11787_s11 + $0xd8] sm:$0xff] %vm574_vm1, %v6426_v47 }
 0xb70   : > { %v6319_v49 = vpop.f32.mrf.mxu3 }
 0xb71   : > { %v6361_v9 = vmul.f32 %v11754_v53, %v6319_v49 }
 0xb73   : > { %v6395_v52 = vadd.f32 %v11762_v37, %v6361_v9 }
 0xb75   : > { %v6427_v63 = vmax.f32 %v6395_v52, 0.0 }
 0xb76   : > { %v6298_v11 = vpop.f32.mrf.mxu2 }
 0xb77   : > { %6459 = vst.msk [vmem:[%s11787_s11 + $0xe0] sm:$0xff] %vm574_vm1, %v6427_v63  ;;  %v6354_v56 = vmul.f32 %v11754_v53, %v6298_v11 }
 0xb79   : > { %v6388_v3 = vadd.f32 %v11762_v37, %v6354_v56 }
 0xb7b   : > { %v6420_v59 = vmax.f32 %v6388_v3, 0.0 }
 0xb7d   : > { %6452 = vst.msk [vmem:[%s11787_s11 + $0xa8] sm:$0xff] %vm574_vm1, %v6420_v59 }
 0xb87   : > { %v6301_v20 = vpop.f32.mrf.mxu2 }
 0xb88   : > { %v6355_v17 = vmul.f32 %v11754_v53, %v6301_v20 }
 0xb8a   : > { %v6389_v27 = vadd.f32 %v11762_v37, %v6355_v17 }
 0xb8c   : > { %v6421_v2 = vmax.f32 %v6389_v27, 0.0 }
 0xb8e   : > { %6453 = vst.msk [vmem:[%s11787_s11 + $0xb0] sm:$0xff] %vm574_vm1, %v6421_v2  ;;  %v6322_v28 = vpop.f32.mrf.mxu3 }
 0xb8f   : > { %v6362_v6 = vmul.f32 %v11754_v53, %v6322_v28 }
 0xb91   : > { %v6396_v0 = vadd.f32 %v11762_v37, %v6362_v6 }
 0xb93   : > { %v6428_v40 = vmax.f32 %v6396_v0, 0.0 }
 0xb95   : > { %6460 = vst.msk [vmem:[%s11787_s11 + $0xe8] sm:$0xff] %vm574_vm1, %v6428_v40 }
 0xb98   : > { %v6304_v34 = vpop.f32.mrf.mxu2 }
 0xb99   : > { %v6356_v1 = vmul.f32 %v11754_v53, %v6304_v34 }
 0xb9b   : > { %v6390_v33 = vadd.f32 %v11762_v37, %v6356_v1 }
 0xb9d   : > { %v6422_v32 = vmax.f32 %v6390_v33, 0.0 }
 0xb9f   : > { %6454 = vst.msk [vmem:[%s11787_s11 + $0xb8] sm:$0xff] %vm574_vm1, %v6422_v32  ;;  %v6325_v18 = vpop.f32.mrf.mxu3 }
 0xba0   : > { %v6363_v31 = vmul.f32 %v11754_v53, %v6325_v18 }
 0xba2   : > { %v6397_v60 = vadd.f32 %v11762_v37, %v6363_v31 }
 0xba4   : > { %v6429_v5 = vmax.f32 %v6397_v60, 0.0 }
 0xba6   : > { %6461 = vst.msk [vmem:[%s11787_s11 + $0xf0] sm:$0xff] %vm574_vm1, %v6429_v5 }
 0xbb0   : > { %v6328_v7 = vpop.f32.mrf.mxu3 }
 0xbb1   : > { %v6364_v45 = vmul.f32 %v11754_v53, %v6328_v7 }
 0xbb3   : > { %v6398_v57 = vadd.f32 %v11762_v37, %v6364_v45 }
 0xbb5   : > { %v6430_v10 = vmax.f32 %v6398_v57, 0.0 }
 0xbb6   : > { %v6307_v35 = vpop.f32.mrf.mxu2 }
 0xbb7   : > { %6462 = vst.msk [vmem:[%s11787_s11 + $0xf8] sm:$0xff] %vm574_vm1, %v6430_v10  ;;  %v6357_v55 = vmul.f32 %v11754_v53, %v6307_v35 }
 0xbb9   : > { %v6391_v26 = vadd.f32 %v11762_v37, %v6357_v55 }
 0xbbb   : > { %v6423_v48 = vmax.f32 %v6391_v26, 0.0 }
 0xbbd   : > { %6455 = vst.msk [vmem:[%s11787_s11 + $0xc0] sm:$0xff] %vm574_vm1, %v6423_v48 }
 0xbbe PF: > { %s18_s27 = sadd.s32 1, %s6769_s27  }
 0xbbf   : > { %p15_p4 = scmp.ge.s32.totalorder %s18_s27, 4  }
 0xbc1   :  { %17 = sbr.rel (!%p15_p4) target bundleno = 1 (0x1), region = 89 }

</bundles_post_ra>
